<compile_context>
chip_gen: v7x
topology: tpu7x:2x2x1
jax: 0.10.0
libtpu: 0.0.40
codegen_flags: <defaults>
</compile_context>

<pallas_src>
import functools
import math

import jax
import jax.numpy as jnp
from jax import lax
from jax.experimental import pallas as pl
from jax.experimental.pallas import tpu as pltpu

LANE = 128
TILE_M = 256  # M-tile for the conv matmuls


def _round_up(x, m):
    return (x + m - 1) // m * m


# --------------------------------------------------------------------------
# Pallas kernels
# --------------------------------------------------------------------------
def matmul_bias_kernel(a_ref, w_ref, b_ref, o_ref, *, apply_relu):
    """One M-tile of A @ W + b. bf16 inputs, f32 accumulate + f32 epilogue."""
    acc = jnp.dot(a_ref[...], w_ref[...], preferred_element_type=jnp.float32)
    acc = acc + b_ref[...]
    if apply_relu:
        acc = jnp.maximum(acc, 0.0)
    o_ref[...] = acc


def fc_head_kernel(flat_ref, w1_ref, b1_ref, w2_ref, b2_ref, q_ref, *, n_actions):
    """Fused dueling head: flat -> hidden(relu) -> (value | advantage) -> q.

    w1 is [v1 | a1] concatenated on the output dim (cols 0..H-1 = value hidden,
    H..2H-1 = advantage hidden).  w2 is block-diagonal: value column 0 of the
    first 128-lane half, advantage columns 0..n_actions-1 of the second half.
    """
    h = jnp.dot(flat_ref[...], w1_ref[...], preferred_element_type=jnp.float32)
    h = jnp.maximum(h + b1_ref[...], 0.0)
    out = jnp.dot(h.astype(w2_ref.dtype), w2_ref[...],
                  preferred_element_type=jnp.float32)
    out = out + b2_ref[...]
    half = out.shape[-1] // 2
    value = out[:, 0:1]                                   # (Bt, 1)
    adv = out[:, half:]                                   # (Bt, 128), cols >= n_actions are 0
    col = lax.broadcasted_iota(jnp.int32, adv.shape, 1)
    adv_sum = jnp.sum(jnp.where(col < n_actions, adv, 0.0), axis=-1, keepdims=True)
    q_ref[...] = value + adv - adv_sum * (1.0 / float(n_actions))


# --------------------------------------------------------------------------
# Pallas wrappers
# --------------------------------------------------------------------------
def pallas_matmul_bias(a, w_p, b_p, apply_relu=True):
    """a: (M, K) float; w_p: (Kp, N) bf16 pre-padded/transposed; b_p: (1, N) f32."""
    M, K = a.shape
    Kp, N = w_p.shape
    tile_m = min(TILE_M, _round_up(M, 16))
    Mp = _round_up(M, tile_m)
    a_p = jnp.pad(a, ((0, Mp - M), (0, Kp - K))).astype(jnp.bfloat16)

    out = pl.pallas_call(
        functools.partial(matmul_bias_kernel, apply_relu=apply_relu),
        out_shape=jax.ShapeDtypeStruct((Mp, N), jnp.float32),
        grid=(Mp // tile_m,),
        in_specs=[
            pl.BlockSpec((tile_m, Kp), lambda i: (i, 0)),   # activation tile (pipelined)
            pl.BlockSpec((Kp, N), lambda i: (0, 0)),        # weight resident across M tiles
            pl.BlockSpec((1, N), lambda i: (0, 0)),
        ],
        out_specs=pl.BlockSpec((tile_m, N), lambda i: (i, 0)),
        compiler_params=pltpu.CompilerParams(dimension_semantics=("parallel",)),
    )(a_p, w_p, b_p)
    return out[:M]


def conv2d_relu_pallas(x, w_p, b_p, kh, kw, stride):
    """VALID conv, NCHW in/out. XLA patch extraction + Pallas MXU matmul+bias+ReLU."""
    B, Cin, H, W = x.shape
    OH = (H - kh) // stride + 1
    OW = (W - kw) // stride + 1
    K = Cin * kh * kw
    Cout = w_p.shape[1]
    # Feature order of patches is (Cin, kh, kw) -> matches OIHW weight.reshape(Cout, -1).
    patches = lax.conv_general_dilated_patches(
        x, (kh, kw), (stride, stride), "VALID",
        dimension_numbers=("NCHW", "OIHW", "NCHW"))        # (B, Cin*kh*kw, OH, OW)
    patches = patches.reshape(B, K, OH * OW).transpose(0, 2, 1).reshape(B * OH * OW, K)
    out = pallas_matmul_bias(patches, w_p, b_p, apply_relu=True)   # (B*OH*OW, Cout)
    return out.reshape(B, OH, OW, Cout).transpose(0, 3, 1, 2)


def pallas_fc_head(flat, w1_p, b1_p, w2_p, b2_p, n_actions):
    """Single fused kernel for both dueling heads + combine."""
    B, K = flat.shape
    Kp, H2 = w1_p.shape
    two_ap = w2_p.shape[1]
    a_pad = two_ap // 2
    tile_b = min(TILE_M, _round_up(B, 16))
    Bp = _round_up(B, tile_b)
    flat_p = jnp.pad(flat, ((0, Bp - B), (0, Kp - K))).astype(jnp.bfloat16)

    q = pl.pallas_call(
        functools.partial(fc_head_kernel, n_actions=n_actions),
        out_shape=jax.ShapeDtypeStruct((Bp, a_pad), jnp.float32),
        grid=(Bp // tile_b,),
        in_specs=[
            pl.BlockSpec((tile_b, Kp), lambda i: (i, 0)),   # flat activations
            pl.BlockSpec((Kp, H2), lambda i: (0, 0)),       # fused hidden weights (resident)
            pl.BlockSpec((1, H2), lambda i: (0, 0)),
            pl.BlockSpec((H2, two_ap), lambda i: (0, 0)),   # fused output weights (resident)
            pl.BlockSpec((1, two_ap), lambda i: (0, 0)),
        ],
        out_specs=pl.BlockSpec((tile_b, a_pad), lambda i: (i, 0)),
        compiler_params=pltpu.CompilerParams(dimension_semantics=("parallel",)),
    )(flat_p, w1_p, b1_p, w2_p, b2_p)
    return q[:B, :n_actions]


# --------------------------------------------------------------------------
# Parameters (deterministic, PyTorch-default-style uniform init)
# --------------------------------------------------------------------------
def init_params(key, in_channels, n_actions, hidden=512, conv_out=3136):
    def uinit(k, shape, fan_in):
        bound = 1.0 / math.sqrt(fan_in)
        return jax.random.uniform(k, shape, jnp.float32, -bound, bound)

    ks = jax.random.split(key, 14)
    p = {}
    p["c1_w"] = uinit(ks[0], (32, in_channels, 8, 8), in_channels * 8 * 8)
    p["c1_b"] = uinit(ks[1], (32,), in_channels * 8 * 8)
    p["c2_w"] = uinit(ks[2], (64, 32, 4, 4), 32 * 4 * 4)
    p["c2_b"] = uinit(ks[3], (64,), 32 * 4 * 4)
    p["c3_w"] = uinit(ks[4], (64, 64, 3, 3), 64 * 3 * 3)
    p["c3_b"] = uinit(ks[5], (64,), 64 * 3 * 3)
    p["a1_w"] = uinit(ks[6], (hidden, conv_out), conv_out)
    p["a1_b"] = uinit(ks[7], (hidden,), conv_out)
    p["a2_w"] = uinit(ks[8], (n_actions, hidden), hidden)
    p["a2_b"] = uinit(ks[9], (n_actions,), hidden)
    p["v1_w"] = uinit(ks[10], (hidden, conv_out), conv_out)
    p["v1_b"] = uinit(ks[11], (hidden,), conv_out)
    p["v2_w"] = uinit(ks[12], (1, hidden), hidden)
    p["v2_b"] = uinit(ks[13], (1,), hidden)
    return p


def prepare_params(params, n_actions, hidden=512):
    """One-time weight layout prep: transpose, pad K to 128, fuse heads, cast bf16."""
    prep = {}

    def conv_pack(w, b):
        cout = w.shape[0]
        k = w.shape[1] * w.shape[2] * w.shape[3]
        kp = _round_up(k, LANE)
        w_mat = w.reshape(cout, k).T                       # (K, Cout), (Cin, kh, kw) order
        w_mat = jnp.pad(w_mat, ((0, kp - k), (0, 0)))
        return w_mat.astype(jnp.bfloat16), b.reshape(1, cout).astype(jnp.float32)

    prep["c1_w"], prep["c1_b"] = conv_pack(params["c1_w"], params["c1_b"])
    prep["c2_w"], prep["c2_b"] = conv_pack(params["c2_w"], params["c2_b"])
    prep["c3_w"], prep["c3_b"] = conv_pack(params["c3_w"], params["c3_b"])

    conv_out = params["v1_w"].shape[1]                     # 3136
    kp = _round_up(conv_out, LANE)                         # 3200
    w1 = jnp.concatenate([params["v1_w"].T, params["a1_w"].T], axis=1)   # (3136, 2*hidden)
    prep["fc1_w"] = jnp.pad(w1, ((0, kp - conv_out), (0, 0))).astype(jnp.bfloat16)
    prep["fc1_b"] = jnp.concatenate([params["v1_b"], params["a1_b"]]
                                    ).reshape(1, 2 * hidden).astype(jnp.float32)

    a_pad = _round_up(n_actions, LANE)                     # lane-dense output half-width
    w2 = jnp.zeros((2 * hidden, 2 * a_pad), jnp.float32)
    w2 = w2.at[:hidden, 0:1].set(params["v2_w"].T)                        # value column
    w2 = w2.at[hidden:, a_pad:a_pad + n_actions].set(params["a2_w"].T)    # advantage block
    prep["fc2_w"] = w2.astype(jnp.bfloat16)
    b2 = jnp.zeros((1, 2 * a_pad), jnp.float32)
    b2 = b2.at[0, 0].set(params["v2_b"][0])
    b2 = b2.at[0, a_pad:a_pad + n_actions].set(params["a2_b"])
    prep["fc2_b"] = b2
    return prep


# --------------------------------------------------------------------------
# Forward passes
# --------------------------------------------------------------------------
def dqn_forward_pallas(prep, x, n_actions):
    h = conv2d_relu_pallas(x, prep["c1_w"], prep["c1_b"], 8, 8, 4)
    h = conv2d_relu_pallas(h, prep["c2_w"], prep["c2_b"], 4, 4, 2)
    h = conv2d_relu_pallas(h, prep["c3_w"], prep["c3_b"], 3, 3, 1)
    flat = h.reshape(h.shape[0], -1)                       # channel-major, like torch .view
    return pallas_fc_head(flat, prep["fc1_w"], prep["fc1_b"],
                          prep["fc2_w"], prep["fc2_b"], n_actions)


def dqn_forward_reference(params, x):
    def conv(h, w, b, s):
        y = lax.conv_general_dilated(h, w, (s, s), "VALID",
                                     dimension_numbers=("NCHW", "OIHW", "NCHW"))
        return jax.nn.relu(y + b[None, :, None, None])

    h = conv(x, params["c1_w"], params["c1_b"], 4)
    h = conv(h, params["c2_w"], params["c2_b"], 2)
    h = conv(h, params["c3_w"], params["c3_b"], 1)
    flat = h.reshape(x.shape[0], -1)
    v = jax.nn.relu(flat @ params["v1_w"].T + params["v1_b"]) @ params["v2_w"].T + params["v2_b"]
    a = jax.nn.relu(flat @ params["a1_w"].T + params["a1_b"]) @ params["a2_w"].T + params["a2_b"]
    return v + a - a.mean(axis=-1, keepdims=True)


# --------------------------------------------------------------------------
if __name__ == "__main__":
    B, C, H, W = 2, 4, 84, 84      # conv_output_size=3136 in the module forces 84x84
    N_ACTIONS = 6

    key = jax.random.PRNGKey(0)
    k_param, k_x = jax.random.split(key)
    params = init_params(k_param, in_channels=C, n_actions=N_ACTIONS)
    prep = prepare_params(params, N_ACTIONS)
    x = jax.random.normal(k_x, (B, C, H, W), jnp.float32)

    fwd = jax.jit(functools.partial(dqn_forward_pallas, n_actions=N_ACTIONS))
    q = jax.block_until_ready(fwd(prep, x))

    q_ref = jax.block_until_ready(dqn_forward_reference(params, x))
    assert q.shape == (B, N_ACTIONS), q.shape
    assert bool(jnp.all(jnp.isfinite(q)))
    assert bool(jnp.allclose(q, q_ref, rtol=2e-2, atol=2e-2)), (
        "mismatch vs reference: max abs diff "
        f"{float(jnp.max(jnp.abs(q - q_ref)))}"
    )
    print("KERNEL_OK")
</pallas_src>

<mosaic_0001>
module attributes {stable_mosaic.version = 11 : i64} {
  func.func @matmul_bias_kernel(%arg0: i32, %arg1: memref<256x256xbf16, #tpu.memory_space<vmem>>, %arg2: memref<256x32xbf16, #tpu.memory_space<vmem>>, %arg3: memref<1x32xf32, #tpu.memory_space<vmem>>, %arg4: memref<256x32xf32, #tpu.memory_space<vmem>>) attributes {dimension_semantics = [#tpu.dimension_semantics<parallel>], iteration_bounds = array<i64: 4>, scalar_prefetch = 0 : i64, scratch_operands = 0 : i64, tpu.core_type = #tpu.core_type<tc>, window_params = [{transform_indices = @transform_0, window_bounds = array<i64: 256, 256>}, {pipeline_mode = #tpu.pipeline_mode<synchronous>, transform_indices = @transform_1, window_bounds = array<i64: 256, 32>}, {pipeline_mode = #tpu.pipeline_mode<synchronous>, transform_indices = @transform_2, window_bounds = array<i64: 1, 32>}, {transform_indices = @transform_3, window_bounds = array<i64: 256, 32>}]} {
    %c0 = arith.constant 0 : index
    %c0_0 = arith.constant 0 : index
    %0 = vector.load %arg1[%c0, %c0_0] : memref<256x256xbf16, #tpu.memory_space<vmem>>, vector<256x256xbf16>
    %c0_1 = arith.constant 0 : index
    %c0_2 = arith.constant 0 : index
    %1 = vector.load %arg2[%c0_1, %c0_2] : memref<256x32xbf16, #tpu.memory_space<vmem>>, vector<256x32xbf16>
    %cst = arith.constant dense<0.000000e+00> : vector<256x32xf32>
    %2 = tpu.matmul %0, %1, %cst {dimension_numbers = #tpu.dot_dimension_numbers<[1], [0], [0], [1], [0, 0, 1, 1], [], []>} : vector<256x256xbf16>, vector<256x32xbf16>, vector<256x32xf32> -> vector<256x32xf32>
    %c0_3 = arith.constant 0 : index
    %c0_4 = arith.constant 0 : index
    %3 = vector.load %arg3[%c0_3, %c0_4] : memref<1x32xf32, #tpu.memory_space<vmem>>, vector<1x32xf32>
    %4 = vector.broadcast %3 : vector<1x32xf32> to vector<256x32xf32>
    %5 = arith.addf %2, %4 : vector<256x32xf32>
    %cst_5 = arith.constant 0.000000e+00 : f32
    %6 = vector.broadcast %cst_5 : f32 to vector<256x32xf32>
    %7 = arith.maximumf %5, %6 : vector<256x32xf32>
    %c0_6 = arith.constant 0 : index
    %c0_7 = arith.constant 0 : index
    %8 = vector.load %arg4[%c0_6, %c0_7] : memref<256x32xf32, #tpu.memory_space<vmem>>, vector<256x32xf32>
    tpu.vector_store %arg4[%c0_6, %c0_7], %7 {strides = array<i32>} : memref<256x32xf32, #tpu.memory_space<vmem>>, vector<256x32xf32>,
    return
  }
  func.func @transform_0(%arg0: i32) -> (i32, i32) {
    %c0_i32 = arith.constant 0 : i32
    %c0_i32_0 = arith.constant 0 : i32
    return %arg0, %c0_i32 : i32, i32
  }
  func.func @transform_1(%arg0: i32) -> (i32, i32) {
    %c0_i32 = arith.constant 0 : i32
    %c0_i32_0 = arith.constant 0 : i32
    %c0_i32_1 = arith.constant 0 : i32
    return %c0_i32, %c0_i32_0 : i32, i32
  }
  func.func @transform_2(%arg0: i32) -> (i32, i32) {
    %c0_i32 = arith.constant 0 : i32
    %c0_i32_0 = arith.constant 0 : i32
    %c0_i32_1 = arith.constant 0 : i32
    return %c0_i32, %c0_i32_0 : i32, i32
  }
  func.func @transform_3(%arg0: i32) -> (i32, i32) {
    %c0_i32 = arith.constant 0 : i32
    %c0_i32_0 = arith.constant 0 : i32
    return %arg0, %c0_i32 : i32, i32
  }
}

module attributes {stable_mosaic.version = 11 : i64} {
  func.func @matmul_bias_kernel(%arg0: i32, %arg1: memref<176x512xbf16, #tpu.memory_space<vmem>>, %arg2: memref<512x64xbf16, #tpu.memory_space<vmem>>, %arg3: memref<1x64xf32, #tpu.memory_space<vmem>>, %arg4: memref<176x64xf32, #tpu.memory_space<vmem>>) attributes {dimension_semantics = [#tpu.dimension_semantics<parallel>], iteration_bounds = array<i64: 1>, scalar_prefetch = 0 : i64, scratch_operands = 0 : i64, tpu.core_type = #tpu.core_type<tc>, window_params = [{transform_indices = @transform_0, window_bounds = array<i64: 176, 512>}, {pipeline_mode = #tpu.pipeline_mode<synchronous>, transform_indices = @transform_1, window_bounds = array<i64: 512, 64>}, {pipeline_mode = #tpu.pipeline_mode<synchronous>, transform_indices = @transform_2, window_bounds = array<i64: 1, 64>}, {transform_indices = @transform_3, window_bounds = array<i64: 176, 64>}]} {
    %c0 = arith.constant 0 : index
    %c0_0 = arith.constant 0 : index
    %0 = vector.load %arg1[%c0, %c0_0] : memref<176x512xbf16, #tpu.memory_space<vmem>>, vector<176x512xbf16>
    %c0_1 = arith.constant 0 : index
    %c0_2 = arith.constant 0 : index
    %1 = vector.load %arg2[%c0_1, %c0_2] : memref<512x64xbf16, #tpu.memory_space<vmem>>, vector<512x64xbf16>
    %cst = arith.constant dense<0.000000e+00> : vector<176x64xf32>
    %2 = tpu.matmul %0, %1, %cst {dimension_numbers = #tpu.dot_dimension_numbers<[1], [0], [0], [1], [0, 0, 1, 1], [], []>} : vector<176x512xbf16>, vector<512x64xbf16>, vector<176x64xf32> -> vector<176x64xf32>
    %c0_3 = arith.constant 0 : index
    %c0_4 = arith.constant 0 : index
    %3 = vector.load %arg3[%c0_3, %c0_4] : memref<1x64xf32, #tpu.memory_space<vmem>>, vector<1x64xf32>
    %4 = vector.broadcast %3 : vector<1x64xf32> to vector<176x64xf32>
    %5 = arith.addf %2, %4 : vector<176x64xf32>
    %cst_5 = arith.constant 0.000000e+00 : f32
    %6 = vector.broadcast %cst_5 : f32 to vector<176x64xf32>
    %7 = arith.maximumf %5, %6 : vector<176x64xf32>
    %c0_6 = arith.constant 0 : index
    %c0_7 = arith.constant 0 : index
    %8 = vector.load %arg4[%c0_6, %c0_7] : memref<176x64xf32, #tpu.memory_space<vmem>>, vector<176x64xf32>
    tpu.vector_store %arg4[%c0_6, %c0_7], %7 {strides = array<i32>} : memref<176x64xf32, #tpu.memory_space<vmem>>, vector<176x64xf32>,
    return
  }
  func.func @transform_0(%arg0: i32) -> (i32, i32) {
    %c0_i32 = arith.constant 0 : i32
    %c0_i32_0 = arith.constant 0 : i32
    return %arg0, %c0_i32 : i32, i32
  }
  func.func @transform_1(%arg0: i32) -> (i32, i32) {
    %c0_i32 = arith.constant 0 : i32
    %c0_i32_0 = arith.constant 0 : i32
    %c0_i32_1 = arith.constant 0 : i32
    return %c0_i32, %c0_i32_0 : i32, i32
  }
  func.func @transform_2(%arg0: i32) -> (i32, i32) {
    %c0_i32 = arith.constant 0 : i32
    %c0_i32_0 = arith.constant 0 : i32
    %c0_i32_1 = arith.constant 0 : i32
    return %c0_i32, %c0_i32_0 : i32, i32
  }
  func.func @transform_3(%arg0: i32) -> (i32, i32) {
    %c0_i32 = arith.constant 0 : i32
    %c0_i32_0 = arith.constant 0 : i32
    return %arg0, %c0_i32 : i32, i32
  }
}

module attributes {stable_mosaic.version = 11 : i64} {
  func.func @matmul_bias_kernel(%arg0: i32, %arg1: memref<112x640xbf16, #tpu.memory_space<vmem>>, %arg2: memref<640x64xbf16, #tpu.memory_space<vmem>>, %arg3: memref<1x64xf32, #tpu.memory_space<vmem>>, %arg4: memref<112x64xf32, #tpu.memory_space<vmem>>) attributes {dimension_semantics = [#tpu.dimension_semantics<parallel>], iteration_bounds = array<i64: 1>, scalar_prefetch = 0 : i64, scratch_operands = 0 : i64, tpu.core_type = #tpu.core_type<tc>, window_params = [{transform_indices = @transform_0, window_bounds = array<i64: 112, 640>}, {pipeline_mode = #tpu.pipeline_mode<synchronous>, transform_indices = @transform_1, window_bounds = array<i64: 640, 64>}, {pipeline_mode = #tpu.pipeline_mode<synchronous>, transform_indices = @transform_2, window_bounds = array<i64: 1, 64>}, {transform_indices = @transform_3, window_bounds = array<i64: 112, 64>}]} {
    %c0 = arith.constant 0 : index
    %c0_0 = arith.constant 0 : index
    %0 = vector.load %arg1[%c0, %c0_0] : memref<112x640xbf16, #tpu.memory_space<vmem>>, vector<112x640xbf16>
    %c0_1 = arith.constant 0 : index
    %c0_2 = arith.constant 0 : index
    %1 = vector.load %arg2[%c0_1, %c0_2] : memref<640x64xbf16, #tpu.memory_space<vmem>>, vector<640x64xbf16>
    %cst = arith.constant dense<0.000000e+00> : vector<112x64xf32>
    %2 = tpu.matmul %0, %1, %cst {dimension_numbers = #tpu.dot_dimension_numbers<[1], [0], [0], [1], [0, 0, 1, 1], [], []>} : vector<112x640xbf16>, vector<640x64xbf16>, vector<112x64xf32> -> vector<112x64xf32>
    %c0_3 = arith.constant 0 : index
    %c0_4 = arith.constant 0 : index
    %3 = vector.load %arg3[%c0_3, %c0_4] : memref<1x64xf32, #tpu.memory_space<vmem>>, vector<1x64xf32>
    %4 = vector.broadcast %3 : vector<1x64xf32> to vector<112x64xf32>
    %5 = arith.addf %2, %4 : vector<112x64xf32>
    %cst_5 = arith.constant 0.000000e+00 : f32
    %6 = vector.broadcast %cst_5 : f32 to vector<112x64xf32>
    %7 = arith.maximumf %5, %6 : vector<112x64xf32>
    %c0_6 = arith.constant 0 : index
    %c0_7 = arith.constant 0 : index
    %8 = vector.load %arg4[%c0_6, %c0_7] : memref<112x64xf32, #tpu.memory_space<vmem>>, vector<112x64xf32>
    tpu.vector_store %arg4[%c0_6, %c0_7], %7 {strides = array<i32>} : memref<112x64xf32, #tpu.memory_space<vmem>>, vector<112x64xf32>,
    return
  }
  func.func @transform_0(%arg0: i32) -> (i32, i32) {
    %c0_i32 = arith.constant 0 : i32
    %c0_i32_0 = arith.constant 0 : i32
    return %arg0, %c0_i32 : i32, i32
  }
  func.func @transform_1(%arg0: i32) -> (i32, i32) {
    %c0_i32 = arith.constant 0 : i32
    %c0_i32_0 = arith.constant 0 : i32
    %c0_i32_1 = arith.constant 0 : i32
    return %c0_i32, %c0_i32_0 : i32, i32
  }
  func.func @transform_2(%arg0: i32) -> (i32, i32) {
    %c0_i32 = arith.constant 0 : i32
    %c0_i32_0 = arith.constant 0 : i32
    %c0_i32_1 = arith.constant 0 : i32
    return %c0_i32, %c0_i32_0 : i32, i32
  }
  func.func @transform_3(%arg0: i32) -> (i32, i32) {
    %c0_i32 = arith.constant 0 : i32
    %c0_i32_0 = arith.constant 0 : i32
    return %arg0, %c0_i32 : i32, i32
  }
}

module attributes {stable_mosaic.version = 11 : i64} {
  func.func @fc_head_kernel(%arg0: i32, %arg1: memref<16x3200xbf16, #tpu.memory_space<vmem>>, %arg2: memref<3200x1024xbf16, #tpu.memory_space<vmem>>, %arg3: memref<1x1024xf32, #tpu.memory_space<vmem>>, %arg4: memref<1024x256xbf16, #tpu.memory_space<vmem>>, %arg5: memref<1x256xf32, #tpu.memory_space<vmem>>, %arg6: memref<16x128xf32, #tpu.memory_space<vmem>>) attributes {dimension_semantics = [#tpu.dimension_semantics<parallel>], iteration_bounds = array<i64: 1>, scalar_prefetch = 0 : i64, scratch_operands = 0 : i64, tpu.core_type = #tpu.core_type<tc>, window_params = [{transform_indices = @transform_0, window_bounds = array<i64: 16, 3200>}, {pipeline_mode = #tpu.pipeline_mode<synchronous>, transform_indices = @transform_1, window_bounds = array<i64: 3200, 1024>}, {pipeline_mode = #tpu.pipeline_mode<synchronous>, transform_indices = @transform_2, window_bounds = array<i64: 1, 1024>}, {pipeline_mode = #tpu.pipeline_mode<synchronous>, transform_indices = @transform_3, window_bounds = array<i64: 1024, 256>}, {pipeline_mode = #tpu.pipeline_mode<synchronous>, transform_indices = @transform_4, window_bounds = array<i64: 1, 256>}, {transform_indices = @transform_5, window_bounds = array<i64: 16, 128>}]} {
    %c0 = arith.constant 0 : index
    %c0_0 = arith.constant 0 : index
    %0 = vector.load %arg1[%c0, %c0_0] : memref<16x3200xbf16, #tpu.memory_space<vmem>>, vector<16x3200xbf16>
    %c0_1 = arith.constant 0 : index
    %c0_2 = arith.constant 0 : index
    %1 = vector.load %arg2[%c0_1, %c0_2] : memref<3200x1024xbf16, #tpu.memory_space<vmem>>, vector<3200x1024xbf16>
    %cst = arith.constant dense<0.000000e+00> : vector<16x1024xf32>
    %2 = tpu.matmul %0, %1, %cst {dimension_numbers = #tpu.dot_dimension_numbers<[1], [0], [0], [1], [0, 0, 1, 1], [], []>} : vector<16x3200xbf16>, vector<3200x1024xbf16>, vector<16x1024xf32> -> vector<16x1024xf32>
    %c0_3 = arith.constant 0 : index
    %c0_4 = arith.constant 0 : index
    %3 = vector.load %arg3[%c0_3, %c0_4] : memref<1x1024xf32, #tpu.memory_space<vmem>>, vector<1x1024xf32>
    %4 = vector.broadcast %3 : vector<1x1024xf32> to vector<16x1024xf32>
    %5 = arith.addf %2, %4 : vector<16x1024xf32>
    %cst_5 = arith.constant 0.000000e+00 : f32
    %6 = vector.broadcast %cst_5 : f32 to vector<16x1024xf32>
    %7 = arith.maximumf %5, %6 : vector<16x1024xf32>
    %8 = arith.truncf %7 : vector<16x1024xf32> to vector<16x1024xbf16>
    %c0_6 = arith.constant 0 : index
    %c0_7 = arith.constant 0 : index
    %9 = vector.load %arg4[%c0_6, %c0_7] : memref<1024x256xbf16, #tpu.memory_space<vmem>>, vector<1024x256xbf16>
    %cst_8 = arith.constant dense<0.000000e+00> : vector<16x256xf32>
    %10 = tpu.matmul %8, %9, %cst_8 {dimension_numbers = #tpu.dot_dimension_numbers<[1], [0], [0], [1], [0, 0, 1, 1], [], []>} : vector<16x1024xbf16>, vector<1024x256xbf16>, vector<16x256xf32> -> vector<16x256xf32>
    %c0_9 = arith.constant 0 : index
    %c0_10 = arith.constant 0 : index
    %11 = vector.load %arg5[%c0_9, %c0_10] : memref<1x256xf32, #tpu.memory_space<vmem>>, vector<1x256xf32>
    %12 = vector.broadcast %11 : vector<1x256xf32> to vector<16x256xf32>
    %13 = arith.addf %10, %12 : vector<16x256xf32>
    %14 = vector.extract_strided_slice %13 {offsets = [0, 0], sizes = [16, 1], strides = [1, 1]} : vector<16x256xf32> to vector<16x1xf32>
    %15 = vector.extract_strided_slice %13 {offsets = [0, 128], sizes = [16, 128], strides = [1, 1]} : vector<16x256xf32> to vector<16x128xf32>
    %16 = tpu.iota {dimensions = array<i32: 1>} : vector<16x128xi32>
    %c6_i32 = arith.constant 6 : i32
    %17 = vector.broadcast %c6_i32 : i32 to vector<16x128xi32>
    %18 = arith.cmpi slt, %16, %17 : vector<16x128xi32>
    %cst_11 = arith.constant 0.000000e+00 : f32
    %19 = vector.broadcast %cst_11 : f32 to vector<16x128xf32>
    %20 = arith.select %18, %15, %19 : vector<16x128xi1>, vector<16x128xf32>
    %cst_12 = arith.constant dense<0.000000e+00> : vector<16xf32>
    %21 = vector.multi_reduction <add>, %20, %cst_12 [1] : vector<16x128xf32> to vector<16xf32>
    %22 = vector.shape_cast %21 : vector<16xf32> to vector<16x1xf32>
    %23 = vector.broadcast %14 : vector<16x1xf32> to vector<16x128xf32>
    %24 = arith.addf %23, %15 : vector<16x128xf32>
    %cst_13 = arith.constant 0.166666672 : f32
    %25 = vector.broadcast %cst_13 : f32 to vector<16x1xf32>
    %26 = arith.mulf %22, %25 : vector<16x1xf32>
    %27 = vector.broadcast %26 : vector<16x1xf32> to vector<16x128xf32>
    %28 = arith.subf %24, %27 : vector<16x128xf32>
    %c0_14 = arith.constant 0 : index
    %c0_15 = arith.constant 0 : index
    %29 = vector.load %arg6[%c0_14, %c0_15] : memref<16x128xf32, #tpu.memory_space<vmem>>, vector<16x128xf32>
    tpu.vector_store %arg6[%c0_14, %c0_15], %28 {strides = array<i32>} : memref<16x128xf32, #tpu.memory_space<vmem>>, vector<16x128xf32>,
    return
  }
  func.func @transform_0(%arg0: i32) -> (i32, i32) {
    %c0_i32 = arith.constant 0 : i32
    %c0_i32_0 = arith.constant 0 : i32
    return %arg0, %c0_i32 : i32, i32
  }
  func.func @transform_1(%arg0: i32) -> (i32, i32) {
    %c0_i32 = arith.constant 0 : i32
    %c0_i32_0 = arith.constant 0 : i32
    %c0_i32_1 = arith.constant 0 : i32
    return %c0_i32, %c0_i32_0 : i32, i32
  }
  func.func @transform_2(%arg0: i32) -> (i32, i32) {
    %c0_i32 = arith.constant 0 : i32
    %c0_i32_0 = arith.constant 0 : i32
    %c0_i32_1 = arith.constant 0 : i32
    return %c0_i32, %c0_i32_0 : i32, i32
  }
  func.func @transform_3(%arg0: i32) -> (i32, i32) {
    %c0_i32 = arith.constant 0 : i32
    %c0_i32_0 = arith.constant 0 : i32
    %c0_i32_1 = arith.constant 0 : i32
    return %c0_i32, %c0_i32_0 : i32, i32
  }
  func.func @transform_4(%arg0: i32) -> (i32, i32) {
    %c0_i32 = arith.constant 0 : i32
    %c0_i32_0 = arith.constant 0 : i32
    %c0_i32_1 = arith.constant 0 : i32
    return %c0_i32, %c0_i32_0 : i32, i32
  }
  func.func @transform_5(%arg0: i32) -> (i32, i32) {
    %c0_i32 = arith.constant 0 : i32
    %c0_i32_0 = arith.constant 0 : i32
    return %arg0, %c0_i32 : i32, i32
  }
}

</mosaic_0001>

<bundles_post_ra>
// kernel: dqn_forward_pallas.4
= control target key start
LH: loop header
LB: loop body
LE: loop exit
PB: predicated region body
PF: predicated region fallthrough
CT: control target
= control target key end

     0   :  { %s1077_s12 = smov 0   ;;  %s1286_s0 = inlined_call_operand.vmem [shape: bf16[1024,256], index: 0, kind: input, shape index: {}]   ;;  %s1287_s1 = inlined_call_operand.vmem [shape: bf16[256,32], index: 1, kind: input, shape index: {}]   ;;  %s1288_s2 = inlined_call_operand.vmem [shape: f32[1,32], index: 2, kind: input, shape index: {}]   ;;  %s1289_s3 = inlined_call_operand.vmem [shape: f32[1024,32], index: 3, kind: output, shape index: {}]  }
   0x1 LB: > { %s787_s13 = sadd.s32 4294967295, %s1055_s12   ;;  %p791_p0 = scmp.ge.s32.totalorder %s1055_s12, 1  ;;  %s1055_s12 = sphi %s1077_s12, %s13_s12  }
   0x2   : > { %p139_p1 = scmp.lt.s32.totalorder %s1055_s12, 5 }
   0x4   : > { %p140_p2 = pnand %p791_p0, %p139_p1 }
   0x5   : > { %v985_v0 = vld [vmem:[%s1287_s1 + $0x40] sm:$0xff] (!%p140_p2)   ;;  %s792_s16 = sshll.u32 (!%p140_p2), %s787_s13, 5  ;;  %v987_v2 = vld [vmem:[%s1287_s1 + $0x48] sm:$0xff] (!%p140_p2)   ;;  %v989_v4 = vld [vmem:[%s1287_s1 + $0x50] sm:$0xff] (!%p140_p2)   ;;  %vm698_vm0 = vcmask (!%p140_p2), 261120  }
   0x6   : > { %143 = sbr.rel (%p140_p2) target bundleno = 316 (0x13c), region = 32  ;;  %v986_v1 = vld [vmem:[%s1287_s1] sm:$0xff] (!%p140_p2)   ;;  %849 = vmatprep.subr.bf16.mxu0 (!%p140_p2), %v985_v0  ;;  %961 = vmatprep.subr.bf16.mxu1 (!%p140_p2), %v985_v0  ;;  %v988_v3 = vld [vmem:[%s1287_s1 + $0x8] sm:$0xff] (!%p140_p2)   ;;  %p165_p3 = scmp.lt.s32.totalorder (!%p140_p2), %s792_s16, 127  ;;  %v990_v5 = vld [vmem:[%s1287_s1 + $0x10] sm:$0xff] (!%p140_p2)  }
   0x7   : > { %850 = vmatpush3.bf16.msra.mxu0 (!%p140_p2), %v986_v1  ;;  %969 = vmatpush3.bf16.msra.mxu1 (!%p140_p2), %v986_v1  ;;  %v991_v6 = vld [vmem:[%s1287_s1 + $0x58] sm:$0xff] (!%p140_p2)   ;;  %v993_v8 = vld [vmem:[%s1287_s1 + $0x60] sm:$0xff] (!%p140_p2)   ;;  %v995_v10 = vld [vmem:[%s1287_s1 + $0x68] sm:$0xff] (!%p140_p2)  }
   0x8   : > { %851 = vmatprep.subr.bf16.mxu0 (!%p140_p2), %v987_v2  ;;  %962 = vmatprep.subr.bf16.mxu1 (!%p140_p2), %v987_v2  ;;  %v992_v7 = vld [vmem:[%s1287_s1 + $0x18] sm:$0xff] (!%p140_p2)   ;;  %v994_v9 = vld [vmem:[%s1287_s1 + $0x20] sm:$0xff] (!%p140_p2)   ;;  %v996_v13 = vld [vmem:[%s1287_s1 + $0x28] sm:$0xff] (!%p140_p2)  }
   0x9   : > { %v997_v14 = vld [vmem:[%s1287_s1 + $0x70] sm:$0xff] (!%p140_p2)   ;;  %v999_v16 = vld [vmem:[%s1287_s1 + $0x78] sm:$0xff] (!%p140_p2)   ;;  %v1178_v50 = vld [vmem:[%s1288_s2] ss:$0 sm:$0xff] (!%p140_p2) }
   0xa   : > { %v998_v15 = vld [vmem:[%s1287_s1 + $0x30] sm:$0xff] (!%p140_p2)   ;;  %v1000_v17 = vld [vmem:[%s1287_s1 + $0x38] sm:$0xff] (!%p140_p2)  }
   0xb   : > { %852 = vmatpush3.bf16.msra.mxu0 (!%p140_p2), %v988_v3  ;;  %970 = vmatpush3.bf16.msra.mxu1 (!%p140_p2), %v988_v3 }
   0xc   : > { %853 = vmatprep.subr.bf16.mxu0 (!%p140_p2), %v989_v4  ;;  %963 = vmatprep.subr.bf16.mxu1 (!%p140_p2), %v989_v4 }
   0xd   : > { %s1291_s16 = smov (!%p165_p3, %s792_s16), 127 }
   0xe   : > { %s848_s4 = sshll.u32 %s1291_s16, 3 }
   0xf   : > { %854 = vmatpush3.bf16.msra.mxu0 %v990_v5  ;;  %971 = vmatpush3.bf16.msra.mxu1 %v990_v5  ;;  %s1120_s9 = scalar_lea.vmem %s1286_s0, %s848_s4  ;;  %s1187_s30 = scalar_lea.vmem %s1289_s3, %s848_s4 }
  0x10   : > { %855 = vmatprep.subr.bf16.mxu0 %v991_v6  ;;  %964 = vmatprep.subr.bf16.mxu1 %v991_v6  ;;  %v1003_v11 = vld [vmem:[%s1120_s9 + $0x4] ss:$8 sps:$4 sm:$0xff]   ;;  %v1001_v18 = vld [vmem:[%s1120_s9] ss:$8 sps:$4 sm:$0xff]   ;;  %v1007_v20 = vld [vmem:[%s1120_s9 + $0x14] ss:$8 sps:$4 sm:$0xff]  }
  0x11   : > { %v1006_v12 = vld [vmem:[%s1120_s9 + $0x84] ss:$8 sps:$4 sm:$0xff]   ;;  %537 = vmatprep.mubr.bf16.mxu0 %v1003_v11  ;;  %v1004_v19 = vld [vmem:[%s1120_s9 + $0x80] ss:$8 sps:$4 sm:$0xff]   ;;  %v1009_v21 = vld [vmem:[%s1120_s9 + $0x94] ss:$8 sps:$4 sm:$0xff]  }
  0x12   : > { %601 = vmatprep.mubr.bf16.mxu1 %v1006_v12  ;;  %v1011_v22 = vld [vmem:[%s1120_s9 + $0x10] ss:$8 sps:$4 sm:$0xff]   ;;  %v1013_v24 = vld [vmem:[%s1120_s9 + $0x24] ss:$8 sps:$4 sm:$0xff]   ;;  %v1017_v26 = vld [vmem:[%s1120_s9 + $0x20] ss:$8 sps:$4 sm:$0xff]  }
  0x13   : > { %856 = vmatpush3.bf16.msra.mxu0 %v992_v7  ;;  %972 = vmatpush3.bf16.msra.mxu1 %v992_v7  ;;  %v1012_v23 = vld [vmem:[%s1120_s9 + $0x90] ss:$8 sps:$4 sm:$0xff]   ;;  %v1015_v25 = vld [vmem:[%s1120_s9 + $0xa4] ss:$8 sps:$4 sm:$0xff]   ;;  %v1018_v27 = vld [vmem:[%s1120_s9 + $0xa0] ss:$8 sps:$4 sm:$0xff]  }
  0x14   : > { %857 = vmatprep.subr.bf16.mxu0 %v993_v8  ;;  %965 = vmatprep.subr.bf16.mxu1 %v993_v8  ;;  %v1019_v28 = vld [vmem:[%s1120_s9 + $0x34] ss:$8 sps:$4 sm:$0xff]   ;;  %v1023_v30 = vld [vmem:[%s1120_s9 + $0x30] ss:$8 sps:$4 sm:$0xff]   ;;  %v1025_v32 = vld [vmem:[%s1120_s9 + $0x44] ss:$8 sps:$4 sm:$0xff]  }
  0x15   : > { %v1021_v29 = vld [vmem:[%s1120_s9 + $0xb4] ss:$8 sps:$4 sm:$0xff]   ;;  %v1024_v31 = vld [vmem:[%s1120_s9 + $0xb0] ss:$8 sps:$4 sm:$0xff]   ;;  %v1027_v33 = vld [vmem:[%s1120_s9 + $0xc4] ss:$8 sps:$4 sm:$0xff]  }
  0x16   : > { %v1029_v34 = vld [vmem:[%s1120_s9 + $0x40] ss:$8 sps:$4 sm:$0xff]   ;;  %v1031_v36 = vld [vmem:[%s1120_s9 + $0x54] ss:$8 sps:$4 sm:$0xff]   ;;  %v1035_v38 = vld [vmem:[%s1120_s9 + $0x50] ss:$8 sps:$4 sm:$0xff]  }
  0x17   : > { %858 = vmatpush3.bf16.msra.mxu0 %v994_v9  ;;  %973 = vmatpush3.bf16.msra.mxu1 %v994_v9  ;;  %v1030_v35 = vld [vmem:[%s1120_s9 + $0xc0] ss:$8 sps:$4 sm:$0xff]   ;;  %v1033_v37 = vld [vmem:[%s1120_s9 + $0xd4] ss:$8 sps:$4 sm:$0xff]   ;;  %v1036_v39 = vld [vmem:[%s1120_s9 + $0xd0] ss:$8 sps:$4 sm:$0xff]  }
  0x18   : > { %859 = vmatprep.subr.bf16.mxu0 %v995_v10  ;;  %966 = vmatprep.subr.bf16.mxu1 %v995_v10  ;;  %v1037_v40 = vld [vmem:[%s1120_s9 + $0x64] ss:$8 sps:$4 sm:$0xff]   ;;  %v1041_v42 = vld [vmem:[%s1120_s9 + $0x60] ss:$8 sps:$4 sm:$0xff]   ;;  %v1043_v44 = vld [vmem:[%s1120_s9 + $0x74] ss:$8 sps:$4 sm:$0xff]  }
  0x19   : > { %v1039_v41 = vld [vmem:[%s1120_s9 + $0xe4] ss:$8 sps:$4 sm:$0xff]   ;;  %v1042_v43 = vld [vmem:[%s1120_s9 + $0xe0] ss:$8 sps:$4 sm:$0xff]   ;;  %v1045_v45 = vld [vmem:[%s1120_s9 + $0xf4] ss:$8 sps:$4 sm:$0xff]  }
  0x1a   : > { %v1047_v46 = vld [vmem:[%s1120_s9 + $0x70] ss:$8 sps:$4 sm:$0xff]  }
  0x1b   : > { %860 = vmatpush3.bf16.msra.mxu0 %v996_v13  ;;  %974 = vmatpush3.bf16.msra.mxu1 %v996_v13  ;;  %v1048_v47 = vld [vmem:[%s1120_s9 + $0xf0] ss:$8 sps:$4 sm:$0xff]  }
  0x1c   : > { %861 = vmatprep.subr.bf16.mxu0 %v997_v14  ;;  %967 = vmatprep.subr.bf16.mxu1 %v997_v14 }
  0x1f   : > { %862 = vmatpush3.bf16.msra.mxu0 %v998_v15  ;;  %975 = vmatpush3.bf16.msra.mxu1 %v998_v15 }
  0x20   : > { %863 = vmatprep.subr.bf16.mxu0 %v999_v16  ;;  %968 = vmatprep.subr.bf16.mxu1 %v999_v16 }
  0x23   : > { %864 = vmatpush3.bf16.msra.mxu0 %v1000_v17  ;;  %976 = vmatpush3.bf16.msra.mxu1 %v1000_v17 }
  0x26   : > { %538 = vmatmul.mubr.bf16.vlgmr.msra.gmra.mrb[0].mxu0 %v1001_v18  ;;  %602 = vmatmul.mubr.bf16.vlgmr.msra.gmra.mrb[0].mxu1 %v1004_v19 }
  0x27   : > { %545 = vmatprep.mubr.bf16.mxu0 %v1007_v20  ;;  %609 = vmatprep.mubr.bf16.mxu1 %v1009_v21 }
  0x2e   : > { %546 = vmatmul.mubr.bf16.gmra.mrb[4].mxu0 %v1011_v22  ;;  %610 = vmatmul.mubr.bf16.gmra.mrb[4].mxu1 %v1012_v23 }
  0x2f   : > { %553 = vmatprep.mubr.bf16.mxu0 %v1013_v24  ;;  %617 = vmatprep.mubr.bf16.mxu1 %v1015_v25 }
  0x36   : > { %554 = vmatmul.mubr.bf16.gmra.mrb[8].mxu0 %v1017_v26  ;;  %618 = vmatmul.mubr.bf16.gmra.mrb[8].mxu1 %v1018_v27 }
  0x37   : > { %561 = vmatprep.mubr.bf16.mxu0 %v1019_v28  ;;  %625 = vmatprep.mubr.bf16.mxu1 %v1021_v29 }
  0x3e   : > { %562 = vmatmul.mubr.bf16.gmra.mrb[12].mxu0 %v1023_v30  ;;  %626 = vmatmul.mubr.bf16.gmra.mrb[12].mxu1 %v1024_v31 }
  0x3f   : > { %569 = vmatprep.mubr.bf16.mxu0 %v1025_v32  ;;  %633 = vmatprep.mubr.bf16.mxu1 %v1027_v33 }
  0x46   : > { %570 = vmatmul.mubr.bf16.gmra.mrb[16].mxu0 %v1029_v34  ;;  %634 = vmatmul.mubr.bf16.gmra.mrb[16].mxu1 %v1030_v35 }
  0x47   : > { %577 = vmatprep.mubr.bf16.mxu0 %v1031_v36  ;;  %641 = vmatprep.mubr.bf16.mxu1 %v1033_v37 }
  0x4e   : > { %578 = vmatmul.mubr.bf16.gmra.mrb[20].mxu0 %v1035_v38  ;;  %642 = vmatmul.mubr.bf16.gmra.mrb[20].mxu1 %v1036_v39 }
  0x4f   : > { %585 = vmatprep.mubr.bf16.mxu0 %v1037_v40  ;;  %649 = vmatprep.mubr.bf16.mxu1 %v1039_v41 }
  0x56   : > { %586 = vmatmul.mubr.bf16.gmra.mrb[24].mxu0 %v1041_v42  ;;  %650 = vmatmul.mubr.bf16.gmra.mrb[24].mxu1 %v1042_v43 }
  0x57   : > { %593 = vmatprep.mubr.bf16.mxu0 %v1043_v44  ;;  %657 = vmatprep.mubr.bf16.mxu1 %v1045_v45 }
  0x5e   : > { %594 = vmatmul.mubr.bf16.gmra.mrb[28].mxu0 %v1047_v46  ;;  %658 = vmatmul.mubr.bf16.gmra.mrb[28].mxu1 %v1048_v47 }
  0xf9   : > { %v865_v48 = vpop.f32.mrb[0].mxu0  ;;  %v913_v49 = vpop.f32.mrb[0].mxu1 }
  0xfa   : > { %v866_v51 = vpop.f32.mrb[1].mxu0  ;;  %v914_v52 = vpop.f32.mrb[1].mxu1 }
  0xfb   : > { %v867_v53 = vadd.f32 %v866_v51, %v865_v48  ;;  %v915_v54 = vadd.f32 %v914_v52, %v913_v49  ;;  %v868_v55 = vpop.f32.mrb[2].mxu0  ;;  %v916_v56 = vpop.f32.mrb[2].mxu1 }
  0xfc   : > { %v869_v57 = vpop.f32.mrb[3].mxu0  ;;  %v917_v58 = vpop.f32.mrb[3].mxu1 }
  0xfd   : > { %v540_v59 = vadd.f32 %v867_v53, %v1178_v50  ;;  %v604_v60 = vadd.f32 %v915_v54, %v1178_v50  ;;  %v870_v61 = vadd.f32 %v869_v57, %v868_v55  ;;  %v918_v62 = vadd.f32 %v917_v58, %v916_v56 }
  0xff   : > { %v666_v63 = vmax.f32 %v540_v59, 0.0  ;;  %v682_v0 = vmax.f32 %v604_v60, 0.0  ;;  %v543_v1 = vadd.f32 %v870_v61, %v1178_v50  ;;  %v607_v2 = vadd.f32 %v918_v62, %v1178_v50 }
 0x101   : > { %699 = vst.msk [vmem:[%s1187_s30] sm:$0xff] %vm698_vm0, %v666_v63  ;;  %715 = vst.msk [vmem:[%s1187_s30 + $0x80] sm:$0xff] %vm698_vm0, %v682_v0  ;;  %v667_v3 = vmax.f32 %v543_v1, 0.0  ;;  %v683_v4 = vmax.f32 %v607_v2, 0.0  ;;  %v871_v5 = vpop.f32.mrb[4].mxu0  ;;  %v919_v6 = vpop.f32.mrb[4].mxu1 }
 0x102   : > { %v872_v7 = vpop.f32.mrb[5].mxu0  ;;  %v920_v8 = vpop.f32.mrb[5].mxu1 }
 0x103   : > { %700 = vst.msk [vmem:[%s1187_s30 + $0x8] sm:$0xff] %vm698_vm0, %v667_v3  ;;  %716 = vst.msk [vmem:[%s1187_s30 + $0x88] sm:$0xff] %vm698_vm0, %v683_v4  ;;  %v873_v9 = vadd.f32 %v872_v7, %v871_v5  ;;  %v921_v10 = vadd.f32 %v920_v8, %v919_v6  ;;  %v874_v11 = vpop.f32.mrb[6].mxu0  ;;  %v922_v12 = vpop.f32.mrb[6].mxu1 }
 0x104   : > { %v875_v13 = vpop.f32.mrb[7].mxu0  ;;  %v923_v14 = vpop.f32.mrb[7].mxu1 }
 0x105   : > { %v548_v15 = vadd.f32 %v873_v9, %v1178_v50  ;;  %v612_v16 = vadd.f32 %v921_v10, %v1178_v50  ;;  %v876_v17 = vadd.f32 %v875_v13, %v874_v11  ;;  %v924_v18 = vadd.f32 %v923_v14, %v922_v12 }
 0x107   : > { %v668_v19 = vmax.f32 %v548_v15, 0.0  ;;  %v684_v20 = vmax.f32 %v612_v16, 0.0  ;;  %v551_v21 = vadd.f32 %v876_v17, %v1178_v50  ;;  %v615_v22 = vadd.f32 %v924_v18, %v1178_v50 }
 0x109   : > { %701 = vst.msk [vmem:[%s1187_s30 + $0x10] sm:$0xff] %vm698_vm0, %v668_v19  ;;  %717 = vst.msk [vmem:[%s1187_s30 + $0x90] sm:$0xff] %vm698_vm0, %v684_v20  ;;  %v669_v23 = vmax.f32 %v551_v21, 0.0  ;;  %v685_v24 = vmax.f32 %v615_v22, 0.0  ;;  %v877_v25 = vpop.f32.mrb[8].mxu0  ;;  %v925_v26 = vpop.f32.mrb[8].mxu1 }
 0x10a   : > { %v878_v27 = vpop.f32.mrb[9].mxu0  ;;  %v926_v28 = vpop.f32.mrb[9].mxu1 }
 0x10b   : > { %702 = vst.msk [vmem:[%s1187_s30 + $0x18] sm:$0xff] %vm698_vm0, %v669_v23  ;;  %718 = vst.msk [vmem:[%s1187_s30 + $0x98] sm:$0xff] %vm698_vm0, %v685_v24  ;;  %v879_v29 = vadd.f32 %v878_v27, %v877_v25  ;;  %v927_v30 = vadd.f32 %v926_v28, %v925_v26  ;;  %v880_v31 = vpop.f32.mrb[10].mxu0  ;;  %v928_v32 = vpop.f32.mrb[10].mxu1 }
 0x10c   : > { %v881_v33 = vpop.f32.mrb[11].mxu0  ;;  %v929_v34 = vpop.f32.mrb[11].mxu1 }
 0x10d   : > { %v556_v35 = vadd.f32 %v879_v29, %v1178_v50  ;;  %v620_v36 = vadd.f32 %v927_v30, %v1178_v50  ;;  %v882_v37 = vadd.f32 %v881_v33, %v880_v31  ;;  %v930_v38 = vadd.f32 %v929_v34, %v928_v32 }
 0x10f   : > { %v670_v39 = vmax.f32 %v556_v35, 0.0  ;;  %v686_v40 = vmax.f32 %v620_v36, 0.0  ;;  %v559_v41 = vadd.f32 %v882_v37, %v1178_v50  ;;  %v623_v42 = vadd.f32 %v930_v38, %v1178_v50 }
 0x111   : > { %703 = vst.msk [vmem:[%s1187_s30 + $0x20] sm:$0xff] %vm698_vm0, %v670_v39  ;;  %719 = vst.msk [vmem:[%s1187_s30 + $0xa0] sm:$0xff] %vm698_vm0, %v686_v40  ;;  %v671_v43 = vmax.f32 %v559_v41, 0.0  ;;  %v687_v44 = vmax.f32 %v623_v42, 0.0  ;;  %v883_v45 = vpop.f32.mrb[12].mxu0  ;;  %v931_v46 = vpop.f32.mrb[12].mxu1 }
 0x112   : > { %v884_v47 = vpop.f32.mrb[13].mxu0  ;;  %v932_v48 = vpop.f32.mrb[13].mxu1 }
 0x113   : > { %704 = vst.msk [vmem:[%s1187_s30 + $0x28] sm:$0xff] %vm698_vm0, %v671_v43  ;;  %720 = vst.msk [vmem:[%s1187_s30 + $0xa8] sm:$0xff] %vm698_vm0, %v687_v44  ;;  %v885_v49 = vadd.f32 %v884_v47, %v883_v45  ;;  %v933_v51 = vadd.f32 %v932_v48, %v931_v46  ;;  %v886_v52 = vpop.f32.mrb[14].mxu0  ;;  %v934_v53 = vpop.f32.mrb[14].mxu1 }
 0x114   : > { %v887_v54 = vpop.f32.mrb[15].mxu0  ;;  %v935_v55 = vpop.f32.mrb[15].mxu1 }
 0x115   : > { %v564_v56 = vadd.f32 %v885_v49, %v1178_v50  ;;  %v628_v57 = vadd.f32 %v933_v51, %v1178_v50  ;;  %v888_v58 = vadd.f32 %v887_v54, %v886_v52  ;;  %v936_v59 = vadd.f32 %v935_v55, %v934_v53 }
 0x117   : > { %v672_v60 = vmax.f32 %v564_v56, 0.0  ;;  %v688_v61 = vmax.f32 %v628_v57, 0.0  ;;  %v567_v62 = vadd.f32 %v888_v58, %v1178_v50  ;;  %v631_v63 = vadd.f32 %v936_v59, %v1178_v50 }
 0x119   : > { %705 = vst.msk [vmem:[%s1187_s30 + $0x30] sm:$0xff] %vm698_vm0, %v672_v60  ;;  %721 = vst.msk [vmem:[%s1187_s30 + $0xb0] sm:$0xff] %vm698_vm0, %v688_v61  ;;  %v673_v0 = vmax.f32 %v567_v62, 0.0  ;;  %v689_v1 = vmax.f32 %v631_v63, 0.0  ;;  %v889_v2 = vpop.f32.mrb[16].mxu0  ;;  %v937_v3 = vpop.f32.mrb[16].mxu1 }
 0x11a   : > { %v890_v4 = vpop.f32.mrb[17].mxu0  ;;  %v938_v5 = vpop.f32.mrb[17].mxu1 }
 0x11b   : > { %706 = vst.msk [vmem:[%s1187_s30 + $0x38] sm:$0xff] %vm698_vm0, %v673_v0  ;;  %722 = vst.msk [vmem:[%s1187_s30 + $0xb8] sm:$0xff] %vm698_vm0, %v689_v1  ;;  %v891_v6 = vadd.f32 %v890_v4, %v889_v2  ;;  %v939_v7 = vadd.f32 %v938_v5, %v937_v3  ;;  %v892_v8 = vpop.f32.mrb[18].mxu0  ;;  %v940_v9 = vpop.f32.mrb[18].mxu1 }
 0x11c   : > { %v893_v10 = vpop.f32.mrb[19].mxu0  ;;  %v941_v11 = vpop.f32.mrb[19].mxu1 }
 0x11d   : > { %v572_v12 = vadd.f32 %v891_v6, %v1178_v50  ;;  %v636_v13 = vadd.f32 %v939_v7, %v1178_v50  ;;  %v894_v14 = vadd.f32 %v893_v10, %v892_v8  ;;  %v942_v15 = vadd.f32 %v941_v11, %v940_v9 }
 0x11f   : > { %v674_v16 = vmax.f32 %v572_v12, 0.0  ;;  %v690_v17 = vmax.f32 %v636_v13, 0.0  ;;  %v575_v18 = vadd.f32 %v894_v14, %v1178_v50  ;;  %v639_v19 = vadd.f32 %v942_v15, %v1178_v50 }
 0x121   : > { %707 = vst.msk [vmem:[%s1187_s30 + $0x40] sm:$0xff] %vm698_vm0, %v674_v16  ;;  %723 = vst.msk [vmem:[%s1187_s30 + $0xc0] sm:$0xff] %vm698_vm0, %v690_v17  ;;  %v675_v20 = vmax.f32 %v575_v18, 0.0  ;;  %v691_v21 = vmax.f32 %v639_v19, 0.0  ;;  %v895_v22 = vpop.f32.mrb[20].mxu0  ;;  %v943_v23 = vpop.f32.mrb[20].mxu1 }
 0x122   : > { %v896_v24 = vpop.f32.mrb[21].mxu0  ;;  %v944_v25 = vpop.f32.mrb[21].mxu1 }
 0x123   : > { %708 = vst.msk [vmem:[%s1187_s30 + $0x48] sm:$0xff] %vm698_vm0, %v675_v20  ;;  %724 = vst.msk [vmem:[%s1187_s30 + $0xc8] sm:$0xff] %vm698_vm0, %v691_v21  ;;  %v897_v26 = vadd.f32 %v896_v24, %v895_v22  ;;  %v945_v27 = vadd.f32 %v944_v25, %v943_v23  ;;  %v898_v28 = vpop.f32.mrb[22].mxu0  ;;  %v946_v29 = vpop.f32.mrb[22].mxu1 }
 0x124   : > { %v899_v30 = vpop.f32.mrb[23].mxu0  ;;  %v947_v31 = vpop.f32.mrb[23].mxu1 }
 0x125   : > { %v580_v32 = vadd.f32 %v897_v26, %v1178_v50  ;;  %v644_v33 = vadd.f32 %v945_v27, %v1178_v50  ;;  %v900_v34 = vadd.f32 %v899_v30, %v898_v28  ;;  %v948_v35 = vadd.f32 %v947_v31, %v946_v29 }
 0x127   : > { %v676_v36 = vmax.f32 %v580_v32, 0.0  ;;  %v692_v37 = vmax.f32 %v644_v33, 0.0  ;;  %v583_v38 = vadd.f32 %v900_v34, %v1178_v50  ;;  %v647_v39 = vadd.f32 %v948_v35, %v1178_v50 }
 0x129   : > { %709 = vst.msk [vmem:[%s1187_s30 + $0x50] sm:$0xff] %vm698_vm0, %v676_v36  ;;  %725 = vst.msk [vmem:[%s1187_s30 + $0xd0] sm:$0xff] %vm698_vm0, %v692_v37  ;;  %v677_v40 = vmax.f32 %v583_v38, 0.0  ;;  %v693_v41 = vmax.f32 %v647_v39, 0.0  ;;  %v901_v42 = vpop.f32.mrb[24].mxu0  ;;  %v949_v43 = vpop.f32.mrb[24].mxu1 }
 0x12a   : > { %v902_v44 = vpop.f32.mrb[25].mxu0  ;;  %v950_v45 = vpop.f32.mrb[25].mxu1 }
 0x12b   : > { %710 = vst.msk [vmem:[%s1187_s30 + $0x58] sm:$0xff] %vm698_vm0, %v677_v40  ;;  %726 = vst.msk [vmem:[%s1187_s30 + $0xd8] sm:$0xff] %vm698_vm0, %v693_v41  ;;  %v903_v46 = vadd.f32 %v902_v44, %v901_v42  ;;  %v951_v47 = vadd.f32 %v950_v45, %v949_v43  ;;  %v904_v48 = vpop.f32.mrb[26].mxu0  ;;  %v952_v49 = vpop.f32.mrb[26].mxu1 }
 0x12c   : > { %v905_v51 = vpop.f32.mrb[27].mxu0  ;;  %v953_v52 = vpop.f32.mrb[27].mxu1 }
 0x12d   : > { %v588_v53 = vadd.f32 %v903_v46, %v1178_v50  ;;  %v652_v54 = vadd.f32 %v951_v47, %v1178_v50  ;;  %v906_v55 = vadd.f32 %v905_v51, %v904_v48  ;;  %v954_v56 = vadd.f32 %v953_v52, %v952_v49 }
 0x12f   : > { %v678_v57 = vmax.f32 %v588_v53, 0.0  ;;  %v694_v58 = vmax.f32 %v652_v54, 0.0  ;;  %v591_v59 = vadd.f32 %v906_v55, %v1178_v50  ;;  %v655_v60 = vadd.f32 %v954_v56, %v1178_v50 }
 0x131   : > { %711 = vst.msk [vmem:[%s1187_s30 + $0x60] sm:$0xff] %vm698_vm0, %v678_v57  ;;  %727 = vst.msk [vmem:[%s1187_s30 + $0xe0] sm:$0xff] %vm698_vm0, %v694_v58  ;;  %v679_v61 = vmax.f32 %v591_v59, 0.0  ;;  %v695_v62 = vmax.f32 %v655_v60, 0.0  ;;  %v907_v63 = vpop.f32.mrb[28].mxu0  ;;  %v955_v0 = vpop.f32.mrb[28].mxu1 }
 0x132   : > { %v908_v1 = vpop.f32.mrb[29].mxu0  ;;  %v956_v2 = vpop.f32.mrb[29].mxu1 }
 0x133   : > { %712 = vst.msk [vmem:[%s1187_s30 + $0x68] sm:$0xff] %vm698_vm0, %v679_v61  ;;  %728 = vst.msk [vmem:[%s1187_s30 + $0xe8] sm:$0xff] %vm698_vm0, %v695_v62  ;;  %v909_v3 = vadd.f32 %v908_v1, %v907_v63  ;;  %v957_v4 = vadd.f32 %v956_v2, %v955_v0  ;;  %v910_v5 = vpop.f32.mrb[30].mxu0  ;;  %v958_v6 = vpop.f32.mrb[30].mxu1 }
 0x134   : > { %v911_v7 = vpop.f32.mrb[31].mxu0  ;;  %v959_v8 = vpop.f32.mrb[31].mxu1 }
 0x135   : > { %v596_v9 = vadd.f32 %v909_v3, %v1178_v50  ;;  %v660_v10 = vadd.f32 %v957_v4, %v1178_v50  ;;  %v912_v11 = vadd.f32 %v911_v7, %v910_v5  ;;  %v960_v12 = vadd.f32 %v959_v8, %v958_v6 }
 0x137   : > { %v680_v13 = vmax.f32 %v596_v9, 0.0  ;;  %v696_v14 = vmax.f32 %v660_v10, 0.0  ;;  %v599_v15 = vadd.f32 %v912_v11, %v1178_v50  ;;  %v663_v16 = vadd.f32 %v960_v12, %v1178_v50 }
 0x139   : > { %713 = vst.msk [vmem:[%s1187_s30 + $0x70] sm:$0xff] %vm698_vm0, %v680_v13  ;;  %729 = vst.msk [vmem:[%s1187_s30 + $0xf0] sm:$0xff] %vm698_vm0, %v696_v14  ;;  %v681_v17 = vmax.f32 %v599_v15, 0.0  ;;  %v697_v18 = vmax.f32 %v663_v16, 0.0 }
 0x13b   : > { %714 = vst.msk [vmem:[%s1187_s30 + $0x78] sm:$0xff] %vm698_vm0, %v681_v17  ;;  %730 = vst.msk [vmem:[%s1187_s30 + $0xf8] sm:$0xff] %vm698_vm0, %v697_v18 }
 0x13c PF: > { %s13_s12 = sadd.s32 1, %s1055_s12  }
 0x13d   : > { %p10_p4 = scmp.ge.s32.totalorder %s13_s12, 6  }
 0x13f   :  { %12 = sbr.rel (!%p10_p4) target bundleno = 1 (0x1), region = 62 }

// kernel: dqn_forward_pallas.5
= control target key start
LH: loop header
LB: loop body
LE: loop exit
PB: predicated region body
PF: predicated region fallthrough
CT: control target
= control target key end

     0   :  { %vm806_vm0 = vcmask 523264   ;;  %s1535_s1 = inlined_call_operand.vmem [shape: bf16[512,64], index: 1, kind: input, shape index: {}]   ;;  %s1536_s0 = inlined_call_operand.vmem [shape: bf16[176,512], index: 0, kind: input, shape index: {}]   ;;  %s1537_s2 = inlined_call_operand.vmem [shape: f32[1,64], index: 2, kind: input, shape index: {}]   ;;  %s1538_s3 = inlined_call_operand.vmem [shape: f32[176,64], index: 3, kind: output, shape index: {}]  }
   0x1   :  { %v1074_v0 = vld [vmem:[%s1535_s1 + $0x40] sm:$0xff]   ;;  %v1078_v4 = vld [vmem:[%s1535_s1 + $0x48] sm:$0xff]   ;;  %v1082_v8 = vld [vmem:[%s1535_s1 + $0x50] sm:$0xff]  }
   0x2   :  { %v1075_v1 = vld [vmem:[%s1535_s1 + $0xc0] sm:$0xff]   ;;  %910 = vmatprep.subr.bf16.mxu0 %v1074_v0  ;;  %v1079_v5 = vld [vmem:[%s1535_s1 + $0xc8] sm:$0xff]   ;;  %v1083_v9 = vld [vmem:[%s1535_s1 + $0xd0] sm:$0xff]  }
   0x3   :  { %v1076_v2 = vld [vmem:[%s1535_s1] sm:$0xff]   ;;  %992 = vmatprep.subr.bf16.mxu1 %v1075_v1  ;;  %v1080_v6 = vld [vmem:[%s1535_s1 + $0x8] sm:$0xff]   ;;  %v1084_v10 = vld [vmem:[%s1535_s1 + $0x10] sm:$0xff]  }
   0x4   :  { %v1077_v3 = vld [vmem:[%s1535_s1 + $0x80] sm:$0xff]   ;;  %911 = vmatpush3.bf16.msra.mxu0 %v1076_v2  ;;  %v1081_v7 = vld [vmem:[%s1535_s1 + $0x88] sm:$0xff]   ;;  %v1085_v11 = vld [vmem:[%s1535_s1 + $0x90] sm:$0xff]  }
   0x5   :  { %993 = vmatpush3.bf16.msra.mxu1 %v1077_v3  ;;  %912 = vmatprep.subr.bf16.mxu0 %v1078_v4  ;;  %v1086_v12 = vld [vmem:[%s1535_s1 + $0x58] sm:$0xff]   ;;  %v1090_v16 = vld [vmem:[%s1535_s1 + $0x60] sm:$0xff]   ;;  %v1094_v20 = vld [vmem:[%s1535_s1 + $0x68] sm:$0xff]  }
   0x6   :  { %994 = vmatprep.subr.bf16.mxu1 %v1079_v5  ;;  %v1087_v13 = vld [vmem:[%s1535_s1 + $0xd8] sm:$0xff]   ;;  %v1091_v17 = vld [vmem:[%s1535_s1 + $0xe0] sm:$0xff]   ;;  %v1095_v21 = vld [vmem:[%s1535_s1 + $0xe8] sm:$0xff]  }
   0x7   :  { %v1088_v14 = vld [vmem:[%s1535_s1 + $0x18] sm:$0xff]   ;;  %v1092_v18 = vld [vmem:[%s1535_s1 + $0x20] sm:$0xff]   ;;  %v1096_v22 = vld [vmem:[%s1535_s1 + $0x28] sm:$0xff]  }
   0x8   :  { %913 = vmatpush3.bf16.msra.mxu0 %v1080_v6  ;;  %v1089_v15 = vld [vmem:[%s1535_s1 + $0x98] sm:$0xff]   ;;  %v1093_v19 = vld [vmem:[%s1535_s1 + $0xa0] sm:$0xff]   ;;  %v1097_v23 = vld [vmem:[%s1535_s1 + $0xa8] sm:$0xff]  }
   0x9   :  { %995 = vmatpush3.bf16.msra.mxu1 %v1081_v7  ;;  %914 = vmatprep.subr.bf16.mxu0 %v1082_v8  ;;  %v1098_v24 = vld [vmem:[%s1535_s1 + $0x70] sm:$0xff]   ;;  %v1102_v28 = vld [vmem:[%s1535_s1 + $0x78] sm:$0xff]  }
   0xa   :  { %996 = vmatprep.subr.bf16.mxu1 %v1083_v9  ;;  %v1099_v25 = vld [vmem:[%s1535_s1 + $0xf0] sm:$0xff]   ;;  %v1103_v29 = vld [vmem:[%s1535_s1 + $0xf8] sm:$0xff]  }
   0xb   :  { %v1100_v26 = vld [vmem:[%s1535_s1 + $0x30] sm:$0xff]   ;;  %v1104_v30 = vld [vmem:[%s1535_s1 + $0x38] sm:$0xff]  }
   0xc   :  { %915 = vmatpush3.bf16.msra.mxu0 %v1084_v10  ;;  %v1101_v27 = vld [vmem:[%s1535_s1 + $0xb0] sm:$0xff]   ;;  %v1105_v31 = vld [vmem:[%s1535_s1 + $0xb8] sm:$0xff]  }
   0xd   :  { %997 = vmatpush3.bf16.msra.mxu1 %v1085_v11  ;;  %916 = vmatprep.subr.bf16.mxu0 %v1086_v12  ;;  %v1106_v32 = vld [vmem:[%s1536_s0] ss:$16 sps:$4 sm:$0xff]   ;;  %v1108_v33 = vld [vmem:[%s1536_s0 + $0x4] ss:$16 sps:$4 sm:$0xff]   ;;  %v1109_v34 = vld [vmem:[%s1536_s0 + $0x8] ss:$16 sps:$4 sm:$0xff]  }
   0xe   :  { %998 = vmatprep.subr.bf16.mxu1 %v1087_v13  ;;  %v1111_v35 = vld [vmem:[%s1536_s0 + $0xc] ss:$16 sps:$4 sm:$0xff]   ;;  %574 = vmatprep.mubr.bf16.mxu0 %v1108_v33  ;;  %v1112_v36 = vld [vmem:[%s1536_s0 + $0x24] ss:$16 sps:$4 sm:$0xff]   ;;  %v1116_v38 = vld [vmem:[%s1536_s0 + $0x20] ss:$16 sps:$4 sm:$0xff]  }
   0xf   :  { %695 = vmatprep.mubr.bf16.mxu1 %v1111_v35  ;;  %v1114_v37 = vld [vmem:[%s1536_s0 + $0x2c] ss:$16 sps:$4 sm:$0xff]   ;;  %v1117_v39 = vld [vmem:[%s1536_s0 + $0x28] ss:$16 sps:$4 sm:$0xff]   ;;  %v1118_v40 = vld [vmem:[%s1536_s0 + $0x44] ss:$16 sps:$4 sm:$0xff]  }
  0x10   :  { %917 = vmatpush3.bf16.msra.mxu0 %v1088_v14  ;;  %v1120_v41 = vld [vmem:[%s1536_s0 + $0x4c] ss:$16 sps:$4 sm:$0xff]   ;;  %v1122_v42 = vld [vmem:[%s1536_s0 + $0x40] ss:$16 sps:$4 sm:$0xff]   ;;  %v1123_v43 = vld [vmem:[%s1536_s0 + $0x48] ss:$16 sps:$4 sm:$0xff]  }
  0x11   :  { %999 = vmatpush3.bf16.msra.mxu1 %v1089_v15  ;;  %918 = vmatprep.subr.bf16.mxu0 %v1090_v16  ;;  %v1124_v44 = vld [vmem:[%s1536_s0 + $0x64] ss:$16 sps:$4 sm:$0xff]   ;;  %v1126_v45 = vld [vmem:[%s1536_s0 + $0x6c] ss:$16 sps:$4 sm:$0xff]   ;;  %v1128_v46 = vld [vmem:[%s1536_s0 + $0x60] ss:$16 sps:$4 sm:$0xff]  }
  0x12   :  { %1000 = vmatprep.subr.bf16.mxu1 %v1091_v17  ;;  %v1129_v47 = vld [vmem:[%s1536_s0 + $0x68] ss:$16 sps:$4 sm:$0xff]   ;;  %v1130_v48 = vld [vmem:[%s1536_s0 + $0x84] ss:$16 sps:$4 sm:$0xff]   ;;  %v1132_v49 = vld [vmem:[%s1536_s0 + $0x8c] ss:$16 sps:$4 sm:$0xff]  }
  0x13   :  { %v1134_v50 = vld [vmem:[%s1536_s0 + $0x80] ss:$16 sps:$4 sm:$0xff]   ;;  %v1135_v51 = vld [vmem:[%s1536_s0 + $0x88] ss:$16 sps:$4 sm:$0xff]   ;;  %v1136_v52 = vld [vmem:[%s1536_s0 + $0xa4] ss:$16 sps:$4 sm:$0xff]  }
  0x14   :  { %919 = vmatpush3.bf16.msra.mxu0 %v1092_v18  ;;  %v1138_v53 = vld [vmem:[%s1536_s0 + $0xac] ss:$16 sps:$4 sm:$0xff]   ;;  %v1140_v54 = vld [vmem:[%s1536_s0 + $0xa0] ss:$16 sps:$4 sm:$0xff]   ;;  %v1141_v55 = vld [vmem:[%s1536_s0 + $0xa8] ss:$16 sps:$4 sm:$0xff]  }
  0x15   :  { %1001 = vmatpush3.bf16.msra.mxu1 %v1093_v19  ;;  %920 = vmatprep.subr.bf16.mxu0 %v1094_v20  ;;  %v1142_v56 = vld [vmem:[%s1536_s0 + $0xc4] ss:$16 sps:$4 sm:$0xff]   ;;  %v1144_v57 = vld [vmem:[%s1536_s0 + $0xcc] ss:$16 sps:$4 sm:$0xff]   ;;  %v1146_v58 = vld [vmem:[%s1536_s0 + $0xc0] ss:$16 sps:$4 sm:$0xff]  }
  0x16   :  { %1002 = vmatprep.subr.bf16.mxu1 %v1095_v21  ;;  %v1147_v59 = vld [vmem:[%s1536_s0 + $0xc8] ss:$16 sps:$4 sm:$0xff]   ;;  %v1148_v60 = vld [vmem:[%s1536_s0 + $0xe4] ss:$16 sps:$4 sm:$0xff]   ;;  %v1150_v61 = vld [vmem:[%s1536_s0 + $0xec] ss:$16 sps:$4 sm:$0xff]  }
  0x17   :  { %v1152_v62 = vld [vmem:[%s1536_s0 + $0xe0] ss:$16 sps:$4 sm:$0xff]   ;;  %v1153_v63 = vld [vmem:[%s1536_s0 + $0xe8] ss:$16 sps:$4 sm:$0xff]   ;;  %v1154_v0 = vld [vmem:[%s1536_s0 + $0x104] ss:$16 sps:$4 sm:$0xff]  }
  0x18   :  { %921 = vmatpush3.bf16.msra.mxu0 %v1096_v22  ;;  %v1156_v1 = vld [vmem:[%s1536_s0 + $0x10c] ss:$16 sps:$4 sm:$0xff]   ;;  %v1158_v2 = vld [vmem:[%s1536_s0 + $0x100] ss:$16 sps:$4 sm:$0xff]   ;;  %v1159_v3 = vld [vmem:[%s1536_s0 + $0x108] ss:$16 sps:$4 sm:$0xff]  }
  0x19   :  { %1003 = vmatpush3.bf16.msra.mxu1 %v1097_v23  ;;  %922 = vmatprep.subr.bf16.mxu0 %v1098_v24  ;;  %v1160_v4 = vld [vmem:[%s1536_s0 + $0x124] ss:$16 sps:$4 sm:$0xff]   ;;  %v1162_v5 = vld [vmem:[%s1536_s0 + $0x12c] ss:$16 sps:$4 sm:$0xff]   ;;  %v1164_v6 = vld [vmem:[%s1536_s0 + $0x120] ss:$16 sps:$4 sm:$0xff]  }
  0x1a   :  { %1004 = vmatprep.subr.bf16.mxu1 %v1099_v25  ;;  %v1165_v7 = vld [vmem:[%s1536_s0 + $0x128] ss:$16 sps:$4 sm:$0xff]   ;;  %v1166_v8 = vld [vmem:[%s1536_s0 + $0x144] ss:$16 sps:$4 sm:$0xff]   ;;  %v1168_v9 = vld [vmem:[%s1536_s0 + $0x14c] ss:$16 sps:$4 sm:$0xff]  }
  0x1b   :  { %v1170_v10 = vld [vmem:[%s1536_s0 + $0x140] ss:$16 sps:$4 sm:$0xff]   ;;  %v1171_v11 = vld [vmem:[%s1536_s0 + $0x148] ss:$16 sps:$4 sm:$0xff]  }
  0x1c   :  { %923 = vmatpush3.bf16.msra.mxu0 %v1100_v26  ;;  %v1423_v14 = vld [vmem:[%s1537_s2] ss:$0 sm:$0xff] }
  0x1d   :  { %1005 = vmatpush3.bf16.msra.mxu1 %v1101_v27  ;;  %924 = vmatprep.subr.bf16.mxu0 %v1102_v28 }
  0x1e   :  { %1006 = vmatprep.subr.bf16.mxu1 %v1103_v29 }
  0x20   :  { %925 = vmatpush3.bf16.msra.mxu0 %v1104_v30 }
  0x21   :  { %1007 = vmatpush3.bf16.msra.mxu1 %v1105_v31 }
  0x23   :  { %575 = vmatmul.mubr.bf16.vlgmr.msra.gmra.mrb[0].mxu0 %v1106_v32 }
  0x24   :  { %696 = vmatmul.mubr.bf16.vlgmr.msra.gmra.mrb[0].mxu1 %v1109_v34  ;;  %582 = vmatprep.mubr.bf16.mxu0 %v1112_v36 }
  0x25   :  { %703 = vmatprep.mubr.bf16.mxu1 %v1114_v37 }
  0x2b   :  { %583 = vmatmul.mubr.bf16.gmra.mrb[4].mxu0 %v1116_v38 }
  0x2c   :  { %704 = vmatmul.mubr.bf16.gmra.mrb[4].mxu1 %v1117_v39  ;;  %590 = vmatprep.mubr.bf16.mxu0 %v1118_v40 }
  0x2d   :  { %711 = vmatprep.mubr.bf16.mxu1 %v1120_v41 }
  0x33   :  { %591 = vmatmul.mubr.bf16.gmra.mrb[8].mxu0 %v1122_v42 }
  0x34   :  { %712 = vmatmul.mubr.bf16.gmra.mrb[8].mxu1 %v1123_v43  ;;  %598 = vmatprep.mubr.bf16.mxu0 %v1124_v44 }
  0x35   :  { %719 = vmatprep.mubr.bf16.mxu1 %v1126_v45 }
  0x3b   :  { %599 = vmatmul.mubr.bf16.gmra.mrb[12].mxu0 %v1128_v46 }
  0x3c   :  { %720 = vmatmul.mubr.bf16.gmra.mrb[12].mxu1 %v1129_v47  ;;  %606 = vmatprep.mubr.bf16.mxu0 %v1130_v48 }
  0x3d   :  { %727 = vmatprep.mubr.bf16.mxu1 %v1132_v49 }
  0x43   :  { %607 = vmatmul.mubr.bf16.gmra.mrb[16].mxu0 %v1134_v50 }
  0x44   :  { %728 = vmatmul.mubr.bf16.gmra.mrb[16].mxu1 %v1135_v51  ;;  %614 = vmatprep.mubr.bf16.mxu0 %v1136_v52 }
  0x45   :  { %735 = vmatprep.mubr.bf16.mxu1 %v1138_v53 }
  0x4b   :  { %615 = vmatmul.mubr.bf16.gmra.mrb[20].mxu0 %v1140_v54 }
  0x4c   :  { %736 = vmatmul.mubr.bf16.gmra.mrb[20].mxu1 %v1141_v55  ;;  %622 = vmatprep.mubr.bf16.mxu0 %v1142_v56 }
  0x4d   :  { %743 = vmatprep.mubr.bf16.mxu1 %v1144_v57 }
  0x53   :  { %623 = vmatmul.mubr.bf16.gmra.mrb[24].mxu0 %v1146_v58 }
  0x54   :  { %744 = vmatmul.mubr.bf16.gmra.mrb[24].mxu1 %v1147_v59  ;;  %630 = vmatprep.mubr.bf16.mxu0 %v1148_v60 }
  0x55   :  { %751 = vmatprep.mubr.bf16.mxu1 %v1150_v61 }
  0x5b   :  { %631 = vmatmul.mubr.bf16.gmra.mrb[28].mxu0 %v1152_v62 }
  0x5c   :  { %752 = vmatmul.mubr.bf16.gmra.mrb[28].mxu1 %v1153_v63  ;;  %638 = vmatprep.mubr.bf16.mxu0 %v1154_v0 }
  0x5d   :  { %759 = vmatprep.mubr.bf16.mxu1 %v1156_v1 }
  0x63   :  { %639 = vmatmul.mubr.bf16.gmra.mrb[32].mxu0 %v1158_v2 }
  0x64   :  { %760 = vmatmul.mubr.bf16.gmra.mrb[32].mxu1 %v1159_v3  ;;  %646 = vmatprep.mubr.bf16.mxu0 %v1160_v4 }
  0x65   :  { %767 = vmatprep.mubr.bf16.mxu1 %v1162_v5 }
  0x6b   :  { %647 = vmatmul.mubr.bf16.gmra.mrb[36].mxu0 %v1164_v6 }
  0x6c   :  { %768 = vmatmul.mubr.bf16.gmra.mrb[36].mxu1 %v1165_v7  ;;  %654 = vmatprep.mubr.bf16.mxu0 %v1166_v8 }
  0x6d   :  { %775 = vmatprep.mubr.bf16.mxu1 %v1168_v9 }
  0x73   :  { %655 = vmatmul.mubr.bf16.gmra.mrb[40].mxu0 %v1170_v10 }
  0x74   :  { %776 = vmatmul.mubr.bf16.gmra.mrb[40].mxu1 %v1171_v11 }
  0xf6   :  { %v926_v12 = vpop.f32.mrb[0].mxu0 }
  0xf7   :  { %v1008_v13 = vpop.f32.mrb[0].mxu1  ;;  %v927_v15 = vpop.f32.mrb[1].mxu0 }
  0xf8   :  { %v928_v16 = vadd.f32 %v927_v15, %v926_v12  ;;  %v1009_v17 = vpop.f32.mrb[1].mxu1  ;;  %v929_v18 = vpop.f32.mrb[2].mxu0 }
  0xf9   :  { %v1010_v19 = vadd.f32 %v1009_v17, %v1008_v13  ;;  %v1011_v20 = vpop.f32.mrb[2].mxu1  ;;  %v930_v21 = vpop.f32.mrb[3].mxu0 }
  0xfa   :  { %v577_v22 = vadd.f32 %v928_v16, %v1423_v14  ;;  %v931_v23 = vadd.f32 %v930_v21, %v929_v18  ;;  %v1012_v24 = vpop.f32.mrb[3].mxu1 }
  0xfb   :  { %v1013_v25 = vadd.f32 %v1012_v24, %v1011_v20 }
  0xfc   :  { %v698_v26 = vadd.f32 %v1010_v19, %v577_v22  ;;  %v580_v27 = vadd.f32 %v931_v23, %v1423_v14 }
  0xfe   :  { %v784_v28 = vmax.f32 %v698_v26, 0.0  ;;  %v701_v29 = vadd.f32 %v1013_v25, %v580_v27  ;;  %v932_v30 = vpop.f32.mrb[4].mxu0 }
  0xff   :  { %v1014_v31 = vpop.f32.mrb[4].mxu1  ;;  %v933_v32 = vpop.f32.mrb[5].mxu0 }
 0x100   :  { %807 = vst.msk [vmem:[%s1538_s3] sm:$0xff] %vm806_vm0, %v784_v28  ;;  %v785_v33 = vmax.f32 %v701_v29, 0.0  ;;  %v934_v34 = vadd.f32 %v933_v32, %v932_v30  ;;  %v1015_v35 = vpop.f32.mrb[5].mxu1  ;;  %v935_v36 = vpop.f32.mrb[6].mxu0 }
 0x101   :  { %v1016_v37 = vadd.f32 %v1015_v35, %v1014_v31  ;;  %v1017_v38 = vpop.f32.mrb[6].mxu1  ;;  %v936_v39 = vpop.f32.mrb[7].mxu0 }
 0x102   :  { %808 = vst.msk [vmem:[%s1538_s3 + $0x8] sm:$0xff] %vm806_vm0, %v785_v33  ;;  %v585_v40 = vadd.f32 %v934_v34, %v1423_v14  ;;  %v937_v41 = vadd.f32 %v936_v39, %v935_v36  ;;  %v1018_v42 = vpop.f32.mrb[7].mxu1 }
 0x103   :  { %v1019_v43 = vadd.f32 %v1018_v42, %v1017_v38 }
 0x104   :  { %v706_v44 = vadd.f32 %v1016_v37, %v585_v40  ;;  %v588_v45 = vadd.f32 %v937_v41, %v1423_v14 }
 0x106   :  { %v786_v46 = vmax.f32 %v706_v44, 0.0  ;;  %v709_v47 = vadd.f32 %v1019_v43, %v588_v45  ;;  %v938_v48 = vpop.f32.mrb[8].mxu0 }
 0x107   :  { %v1020_v49 = vpop.f32.mrb[8].mxu1  ;;  %v939_v50 = vpop.f32.mrb[9].mxu0 }
 0x108   :  { %809 = vst.msk [vmem:[%s1538_s3 + $0x10] sm:$0xff] %vm806_vm0, %v786_v46  ;;  %v787_v51 = vmax.f32 %v709_v47, 0.0  ;;  %v940_v52 = vadd.f32 %v939_v50, %v938_v48  ;;  %v1021_v53 = vpop.f32.mrb[9].mxu1  ;;  %v941_v54 = vpop.f32.mrb[10].mxu0 }
 0x109   :  { %v1022_v55 = vadd.f32 %v1021_v53, %v1020_v49  ;;  %v1023_v56 = vpop.f32.mrb[10].mxu1  ;;  %v942_v57 = vpop.f32.mrb[11].mxu0 }
 0x10a   :  { %810 = vst.msk [vmem:[%s1538_s3 + $0x18] sm:$0xff] %vm806_vm0, %v787_v51  ;;  %v593_v58 = vadd.f32 %v940_v52, %v1423_v14  ;;  %v943_v59 = vadd.f32 %v942_v57, %v941_v54  ;;  %v1024_v60 = vpop.f32.mrb[11].mxu1 }
 0x10b   :  { %v1025_v61 = vadd.f32 %v1024_v60, %v1023_v56 }
 0x10c   :  { %v714_v62 = vadd.f32 %v1022_v55, %v593_v58  ;;  %v596_v63 = vadd.f32 %v943_v59, %v1423_v14 }
 0x10e   :  { %v788_v0 = vmax.f32 %v714_v62, 0.0  ;;  %v717_v1 = vadd.f32 %v1025_v61, %v596_v63  ;;  %v944_v2 = vpop.f32.mrb[12].mxu0 }
 0x10f   :  { %v1026_v3 = vpop.f32.mrb[12].mxu1  ;;  %v945_v4 = vpop.f32.mrb[13].mxu0 }
 0x110   :  { %811 = vst.msk [vmem:[%s1538_s3 + $0x20] sm:$0xff] %vm806_vm0, %v788_v0  ;;  %v789_v5 = vmax.f32 %v717_v1, 0.0  ;;  %v946_v6 = vadd.f32 %v945_v4, %v944_v2  ;;  %v1027_v7 = vpop.f32.mrb[13].mxu1  ;;  %v947_v8 = vpop.f32.mrb[14].mxu0 }
 0x111   :  { %v1028_v9 = vadd.f32 %v1027_v7, %v1026_v3  ;;  %v1029_v10 = vpop.f32.mrb[14].mxu1  ;;  %v948_v11 = vpop.f32.mrb[15].mxu0 }
 0x112   :  { %812 = vst.msk [vmem:[%s1538_s3 + $0x28] sm:$0xff] %vm806_vm0, %v789_v5  ;;  %v601_v12 = vadd.f32 %v946_v6, %v1423_v14  ;;  %v949_v13 = vadd.f32 %v948_v11, %v947_v8  ;;  %v1030_v15 = vpop.f32.mrb[15].mxu1 }
 0x113   :  { %v1031_v16 = vadd.f32 %v1030_v15, %v1029_v10 }
 0x114   :  { %v722_v17 = vadd.f32 %v1028_v9, %v601_v12  ;;  %v604_v18 = vadd.f32 %v949_v13, %v1423_v14 }
 0x116   :  { %v790_v19 = vmax.f32 %v722_v17, 0.0  ;;  %v725_v20 = vadd.f32 %v1031_v16, %v604_v18  ;;  %v950_v21 = vpop.f32.mrb[16].mxu0 }
 0x117   :  { %v1032_v22 = vpop.f32.mrb[16].mxu1  ;;  %v951_v23 = vpop.f32.mrb[17].mxu0 }
 0x118   :  { %813 = vst.msk [vmem:[%s1538_s3 + $0x30] sm:$0xff] %vm806_vm0, %v790_v19  ;;  %v791_v24 = vmax.f32 %v725_v20, 0.0  ;;  %v952_v25 = vadd.f32 %v951_v23, %v950_v21  ;;  %v1033_v26 = vpop.f32.mrb[17].mxu1  ;;  %v953_v27 = vpop.f32.mrb[18].mxu0 }
 0x119   :  { %v1034_v28 = vadd.f32 %v1033_v26, %v1032_v22  ;;  %v1035_v29 = vpop.f32.mrb[18].mxu1  ;;  %v954_v30 = vpop.f32.mrb[19].mxu0 }
 0x11a   :  { %814 = vst.msk [vmem:[%s1538_s3 + $0x38] sm:$0xff] %vm806_vm0, %v791_v24  ;;  %v609_v31 = vadd.f32 %v952_v25, %v1423_v14  ;;  %v955_v32 = vadd.f32 %v954_v30, %v953_v27  ;;  %v1036_v33 = vpop.f32.mrb[19].mxu1 }
 0x11b   :  { %v1037_v34 = vadd.f32 %v1036_v33, %v1035_v29 }
 0x11c   :  { %v730_v35 = vadd.f32 %v1034_v28, %v609_v31  ;;  %v612_v36 = vadd.f32 %v955_v32, %v1423_v14 }
 0x11e   :  { %v792_v37 = vmax.f32 %v730_v35, 0.0  ;;  %v733_v38 = vadd.f32 %v1037_v34, %v612_v36  ;;  %v956_v39 = vpop.f32.mrb[20].mxu0 }
 0x11f   :  { %v1038_v40 = vpop.f32.mrb[20].mxu1  ;;  %v957_v41 = vpop.f32.mrb[21].mxu0 }
 0x120   :  { %815 = vst.msk [vmem:[%s1538_s3 + $0x40] sm:$0xff] %vm806_vm0, %v792_v37  ;;  %v793_v42 = vmax.f32 %v733_v38, 0.0  ;;  %v958_v43 = vadd.f32 %v957_v41, %v956_v39  ;;  %v1039_v44 = vpop.f32.mrb[21].mxu1  ;;  %v959_v45 = vpop.f32.mrb[22].mxu0 }
 0x121   :  { %v1040_v46 = vadd.f32 %v1039_v44, %v1038_v40  ;;  %v1041_v47 = vpop.f32.mrb[22].mxu1  ;;  %v960_v48 = vpop.f32.mrb[23].mxu0 }
 0x122   :  { %816 = vst.msk [vmem:[%s1538_s3 + $0x48] sm:$0xff] %vm806_vm0, %v793_v42  ;;  %v617_v49 = vadd.f32 %v958_v43, %v1423_v14  ;;  %v961_v50 = vadd.f32 %v960_v48, %v959_v45  ;;  %v1042_v51 = vpop.f32.mrb[23].mxu1 }
 0x123   :  { %v1043_v52 = vadd.f32 %v1042_v51, %v1041_v47 }
 0x124   :  { %v738_v53 = vadd.f32 %v1040_v46, %v617_v49  ;;  %v620_v54 = vadd.f32 %v961_v50, %v1423_v14 }
 0x126   :  { %v794_v55 = vmax.f32 %v738_v53, 0.0  ;;  %v741_v56 = vadd.f32 %v1043_v52, %v620_v54  ;;  %v962_v57 = vpop.f32.mrb[24].mxu0 }
 0x127   :  { %v1044_v58 = vpop.f32.mrb[24].mxu1  ;;  %v963_v59 = vpop.f32.mrb[25].mxu0 }
 0x128   :  { %817 = vst.msk [vmem:[%s1538_s3 + $0x50] sm:$0xff] %vm806_vm0, %v794_v55  ;;  %v795_v60 = vmax.f32 %v741_v56, 0.0  ;;  %v964_v61 = vadd.f32 %v963_v59, %v962_v57  ;;  %v1045_v62 = vpop.f32.mrb[25].mxu1  ;;  %v965_v63 = vpop.f32.mrb[26].mxu0 }
 0x129   :  { %v1046_v0 = vadd.f32 %v1045_v62, %v1044_v58  ;;  %v1047_v1 = vpop.f32.mrb[26].mxu1  ;;  %v966_v2 = vpop.f32.mrb[27].mxu0 }
 0x12a   :  { %818 = vst.msk [vmem:[%s1538_s3 + $0x58] sm:$0xff] %vm806_vm0, %v795_v60  ;;  %v625_v3 = vadd.f32 %v964_v61, %v1423_v14  ;;  %v967_v4 = vadd.f32 %v966_v2, %v965_v63  ;;  %v1048_v5 = vpop.f32.mrb[27].mxu1 }
 0x12b   :  { %v1049_v6 = vadd.f32 %v1048_v5, %v1047_v1 }
 0x12c   :  { %v746_v7 = vadd.f32 %v1046_v0, %v625_v3  ;;  %v628_v8 = vadd.f32 %v967_v4, %v1423_v14 }
 0x12e   :  { %v796_v9 = vmax.f32 %v746_v7, 0.0  ;;  %v749_v10 = vadd.f32 %v1049_v6, %v628_v8  ;;  %v968_v11 = vpop.f32.mrb[28].mxu0 }
 0x12f   :  { %v1050_v12 = vpop.f32.mrb[28].mxu1  ;;  %v969_v13 = vpop.f32.mrb[29].mxu0 }
 0x130   :  { %819 = vst.msk [vmem:[%s1538_s3 + $0x60] sm:$0xff] %vm806_vm0, %v796_v9  ;;  %v797_v15 = vmax.f32 %v749_v10, 0.0  ;;  %v970_v16 = vadd.f32 %v969_v13, %v968_v11  ;;  %v1051_v17 = vpop.f32.mrb[29].mxu1  ;;  %v971_v18 = vpop.f32.mrb[30].mxu0 }
 0x131   :  { %v1052_v19 = vadd.f32 %v1051_v17, %v1050_v12  ;;  %v1053_v20 = vpop.f32.mrb[30].mxu1  ;;  %v972_v21 = vpop.f32.mrb[31].mxu0 }
 0x132   :  { %820 = vst.msk [vmem:[%s1538_s3 + $0x68] sm:$0xff] %vm806_vm0, %v797_v15  ;;  %v633_v22 = vadd.f32 %v970_v16, %v1423_v14  ;;  %v973_v23 = vadd.f32 %v972_v21, %v971_v18  ;;  %v1054_v24 = vpop.f32.mrb[31].mxu1 }
 0x133   :  { %v1055_v25 = vadd.f32 %v1054_v24, %v1053_v20 }
 0x134   :  { %v754_v26 = vadd.f32 %v1052_v19, %v633_v22  ;;  %v636_v27 = vadd.f32 %v973_v23, %v1423_v14 }
 0x136   :  { %v798_v28 = vmax.f32 %v754_v26, 0.0  ;;  %v757_v29 = vadd.f32 %v1055_v25, %v636_v27  ;;  %v974_v30 = vpop.f32.mrb[32].mxu0 }
 0x137   :  { %v1056_v31 = vpop.f32.mrb[32].mxu1  ;;  %v975_v32 = vpop.f32.mrb[33].mxu0 }
 0x138   :  { %821 = vst.msk [vmem:[%s1538_s3 + $0x70] sm:$0xff] %vm806_vm0, %v798_v28  ;;  %v799_v33 = vmax.f32 %v757_v29, 0.0  ;;  %v976_v34 = vadd.f32 %v975_v32, %v974_v30  ;;  %v1057_v35 = vpop.f32.mrb[33].mxu1  ;;  %v977_v36 = vpop.f32.mrb[34].mxu0 }
 0x139   :  { %v1058_v37 = vadd.f32 %v1057_v35, %v1056_v31  ;;  %v1059_v38 = vpop.f32.mrb[34].mxu1  ;;  %v978_v39 = vpop.f32.mrb[35].mxu0 }
 0x13a   :  { %822 = vst.msk [vmem:[%s1538_s3 + $0x78] sm:$0xff] %vm806_vm0, %v799_v33  ;;  %v641_v40 = vadd.f32 %v976_v34, %v1423_v14  ;;  %v979_v41 = vadd.f32 %v978_v39, %v977_v36  ;;  %v1060_v42 = vpop.f32.mrb[35].mxu1 }
 0x13b   :  { %v1061_v43 = vadd.f32 %v1060_v42, %v1059_v38 }
 0x13c   :  { %v762_v44 = vadd.f32 %v1058_v37, %v641_v40  ;;  %v644_v45 = vadd.f32 %v979_v41, %v1423_v14 }
 0x13e   :  { %v800_v46 = vmax.f32 %v762_v44, 0.0  ;;  %v765_v47 = vadd.f32 %v1061_v43, %v644_v45  ;;  %v980_v48 = vpop.f32.mrb[36].mxu0 }
 0x13f   :  { %v1062_v49 = vpop.f32.mrb[36].mxu1  ;;  %v981_v50 = vpop.f32.mrb[37].mxu0 }
 0x140   :  { %823 = vst.msk [vmem:[%s1538_s3 + $0x80] sm:$0xff] %vm806_vm0, %v800_v46  ;;  %v801_v51 = vmax.f32 %v765_v47, 0.0  ;;  %v982_v52 = vadd.f32 %v981_v50, %v980_v48  ;;  %v1063_v53 = vpop.f32.mrb[37].mxu1  ;;  %v983_v54 = vpop.f32.mrb[38].mxu0 }
 0x141   :  { %v1064_v55 = vadd.f32 %v1063_v53, %v1062_v49  ;;  %v1065_v56 = vpop.f32.mrb[38].mxu1  ;;  %v984_v57 = vpop.f32.mrb[39].mxu0 }
 0x142   :  { %824 = vst.msk [vmem:[%s1538_s3 + $0x88] sm:$0xff] %vm806_vm0, %v801_v51  ;;  %v649_v58 = vadd.f32 %v982_v52, %v1423_v14  ;;  %v985_v59 = vadd.f32 %v984_v57, %v983_v54  ;;  %v1066_v60 = vpop.f32.mrb[39].mxu1 }
 0x143   :  { %v1067_v61 = vadd.f32 %v1066_v60, %v1065_v56 }
 0x144   :  { %v770_v62 = vadd.f32 %v1064_v55, %v649_v58  ;;  %v652_v63 = vadd.f32 %v985_v59, %v1423_v14 }
 0x146   :  { %v802_v0 = vmax.f32 %v770_v62, 0.0  ;;  %v773_v1 = vadd.f32 %v1067_v61, %v652_v63  ;;  %v986_v2 = vpop.f32.mrb[40].mxu0 }
 0x147   :  { %v1068_v3 = vpop.f32.mrb[40].mxu1  ;;  %v987_v4 = vpop.f32.mrb[41].mxu0 }
 0x148   :  { %825 = vst.msk [vmem:[%s1538_s3 + $0x90] sm:$0xff] %vm806_vm0, %v802_v0  ;;  %v803_v5 = vmax.f32 %v773_v1, 0.0  ;;  %v988_v6 = vadd.f32 %v987_v4, %v986_v2  ;;  %v1069_v7 = vpop.f32.mrb[41].mxu1  ;;  %v989_v8 = vpop.f32.mrb[42].mxu0 }
 0x149   :  { %v1070_v9 = vadd.f32 %v1069_v7, %v1068_v3  ;;  %v1071_v10 = vpop.f32.mrb[42].mxu1  ;;  %v990_v11 = vpop.f32.mrb[43].mxu0 }
 0x14a   :  { %826 = vst.msk [vmem:[%s1538_s3 + $0x98] sm:$0xff] %vm806_vm0, %v803_v5  ;;  %v657_v12 = vadd.f32 %v988_v6, %v1423_v14  ;;  %v991_v13 = vadd.f32 %v990_v11, %v989_v8  ;;  %v1072_v15 = vpop.f32.mrb[43].mxu1 }
 0x14b   :  { %v1073_v16 = vadd.f32 %v1072_v15, %v1071_v10 }
 0x14c   :  { %v778_v17 = vadd.f32 %v1070_v9, %v657_v12  ;;  %v660_v18 = vadd.f32 %v991_v13, %v1423_v14 }
 0x14e   :  { %v804_v19 = vmax.f32 %v778_v17, 0.0  ;;  %v781_v20 = vadd.f32 %v1073_v16, %v660_v18 }
 0x150   :  { %827 = vst.msk [vmem:[%s1538_s3 + $0xa0] sm:$0xff] %vm806_vm0, %v804_v19  ;;  %v805_v21 = vmax.f32 %v781_v20, 0.0 }
 0x152   :  { %828 = vst.msk [vmem:[%s1538_s3 + $0xa8] sm:$0xff] %vm806_vm0, %v805_v21 }

// kernel: dqn_forward_pallas.6
= control target key start
LH: loop header
LB: loop body
LE: loop exit
PB: predicated region body
PF: predicated region fallthrough
CT: control target
= control target key end

     0   :  { %v1224_v24 = vmov 0.0   ;;  %vm1225_vm0 = vmmov 0   ;;  %vm847_vm1 = vcmask 523264   ;;  %s1592_s1 = inlined_call_operand.vmem [shape: bf16[640,64], index: 1, kind: input, shape index: {}]   ;;  %s1593_s0 = inlined_call_operand.vmem [shape: bf16[112,640], index: 0, kind: input, shape index: {}]   ;;  %s1594_s2 = inlined_call_operand.vmem [shape: f32[1,64], index: 2, kind: input, shape index: {}]   ;;  %s1595_s3 = inlined_call_operand.vmem [shape: f32[112,64], index: 3, kind: output, shape index: {}]  }
   0x1   :  { %v1135_v0 = vld [vmem:[%s1592_s1 + $0x40] sm:$0xff]   ;;  %v1137_v2 = vld [vmem:[%s1592_s1 + $0x48] sm:$0xff]   ;;  %v1139_v4 = vld [vmem:[%s1592_s1 + $0x50] sm:$0xff]  }
   0x2   :  { %v1136_v1 = vld [vmem:[%s1592_s1] sm:$0xff]   ;;  %1117 = vmatprep.subr.bf16.mxu1 %v1135_v0  ;;  %942 = vmatprep.subr.bf16.mxu0 %v1135_v0  ;;  %v1138_v3 = vld [vmem:[%s1592_s1 + $0x8] sm:$0xff]   ;;  %v1140_v5 = vld [vmem:[%s1592_s1 + $0x10] sm:$0xff]  }
   0x3   :  { %1125 = vmatpush3.bf16.msra.mxu1 %v1136_v1  ;;  %943 = vmatpush3.bf16.msra.mxu0 %v1136_v1  ;;  %v1141_v6 = vld [vmem:[%s1592_s1 + $0x58] sm:$0xff]   ;;  %v1143_v8 = vld [vmem:[%s1592_s1 + $0x60] sm:$0xff]   ;;  %v1145_v10 = vld [vmem:[%s1592_s1 + $0x68] sm:$0xff]  }
   0x4   :  { %1118 = vmatprep.subr.bf16.mxu1 %v1137_v2  ;;  %944 = vmatprep.subr.bf16.mxu0 %v1137_v2  ;;  %v1142_v7 = vld [vmem:[%s1592_s1 + $0x18] sm:$0xff]   ;;  %v1144_v9 = vld [vmem:[%s1592_s1 + $0x20] sm:$0xff]   ;;  %v1146_v12 = vld [vmem:[%s1592_s1 + $0x28] sm:$0xff]  }
   0x5   :  { %v1153_v11 = vld [vmem:[%s1593_s0 + $0xa4] ss:$20 sps:$4 sm:$0xff]   ;;  %v1147_v14 = vld [vmem:[%s1592_s1 + $0x70] sm:$0xff]   ;;  %v1160_v23 = vld [vmem:[%s1592_s1 + $0xc8] sm:$0xff]  }
   0x6   :  { %v1157_v13 = vld [vmem:[%s1593_s0 + $0x4] ss:$20 sps:$4 sm:$0xff]   ;;  %630 = vmatprep.mubr.bf16.mxu1 %v1153_v11  ;;  %v1148_v15 = vld [vmem:[%s1592_s1 + $0x30] sm:$0xff]   ;;  %v1164_v25 = vld [vmem:[%s1593_s0 + $0x2c] ss:$20 sps:$4 sm:$0xff]  }
   0x7   :  { %1126 = vmatpush3.bf16.msra.mxu1 %v1138_v3  ;;  %945 = vmatpush3.bf16.msra.mxu0 %v1138_v3  ;;  %v1149_v16 = vld [vmem:[%s1592_s1 + $0x78] sm:$0xff]   ;;  %v1154_v18 = vld [vmem:[%s1592_s1 + $0xc0] sm:$0xff]   ;;  %v1161_v27 = vld [vmem:[%s1592_s1 + $0x88] sm:$0xff]  }
   0x8   :  { %1119 = vmatprep.subr.bf16.mxu1 %v1139_v4  ;;  %946 = vmatprep.subr.bf16.mxu0 %v1139_v4  ;;  %v1150_v17 = vld [vmem:[%s1592_s1 + $0x38] sm:$0xff]   ;;  %v1151_v19 = vld [vmem:[%s1593_s0 + $0xa0] ss:$20 sps:$4 sm:$0xff]   ;;  %v1162_v28 = vld [vmem:[%s1592_s1 + $0x108] sm:$0xff]  }
   0x9   :  { %598 = vmatprep.mubr.bf16.mxu0 %v1157_v13  ;;  %v1155_v20 = vld [vmem:[%s1593_s0] ss:$20 sps:$4 sm:$0xff]   ;;  %v1167_v31 = vld [vmem:[%s1593_s0 + $0x28] ss:$20 sps:$4 sm:$0xff]   ;;  %v1179_v41 = vld [vmem:[%s1593_s0 + $0x50] ss:$20 sps:$4 sm:$0xff]  }
   0xa   :  { %v1158_v21 = vld [vmem:[%s1592_s1 + $0x80] sm:$0xff]   ;;  %v1163_v29 = vld [vmem:[%s1592_s1 + $0xd0] sm:$0xff]   ;;  %v1172_v32 = vld [vmem:[%s1593_s0 + $0xc8] ss:$20 sps:$4 sm:$0xff]  }
   0xb   :  { %1127 = vmatpush3.bf16.msra.mxu1 %v1140_v5  ;;  %947 = vmatpush3.bf16.msra.mxu0 %v1140_v5  ;;  %v1159_v22 = vld [vmem:[%s1592_s1 + $0x100] sm:$0xff]   ;;  %v1166_v30 = vld [vmem:[%s1592_s1 + $0x90] sm:$0xff]   ;;  %v1171_v34 = vld [vmem:[%s1592_s1 + $0xd8] sm:$0xff]  }
   0xc   :  { %1120 = vmatprep.subr.bf16.mxu1 %v1141_v6  ;;  %948 = vmatprep.subr.bf16.mxu0 %v1141_v6  ;;  %v1169_v26 = vld [vmem:[%s1593_s0 + $0xcc] ss:$20 sps:$4 sm:$0xff]   ;;  %v1168_v33 = vld [vmem:[%s1592_s1 + $0x110] sm:$0xff]   ;;  %v1173_v37 = vld [vmem:[%s1592_s1 + $0x98] sm:$0xff]  }
   0xd   :  { %v1176_v35 = vld [vmem:[%s1593_s0 + $0x54] ss:$20 sps:$4 sm:$0xff]   ;;  %v1174_v38 = vld [vmem:[%s1592_s1 + $0x118] sm:$0xff]   ;;  %v1175_v39 = vld [vmem:[%s1592_s1 + $0xe0] sm:$0xff]  }
   0xe   :  { %v1181_v36 = vld [vmem:[%s1593_s0 + $0xf4] ss:$20 sps:$4 sm:$0xff]   ;;  %v1178_v40 = vld [vmem:[%s1592_s1 + $0xa0] sm:$0xff]   ;;  %v1188_v45 = vld [vmem:[%s1593_s0 + $0x7c] ss:$20 sps:$4 sm:$0xff]  }
   0xf   :  { %1128 = vmatpush3.bf16.msra.mxu1 %v1142_v7  ;;  %949 = vmatpush3.bf16.msra.mxu0 %v1142_v7  ;;  %v1184_v42 = vld [vmem:[%s1593_s0 + $0xf0] ss:$20 sps:$4 sm:$0xff]   ;;  %v1183_v44 = vld [vmem:[%s1592_s1 + $0xe8] sm:$0xff]   ;;  %v1193_v53 = vld [vmem:[%s1592_s1 + $0xf8] sm:$0xff]  }
  0x10   :  { %1121 = vmatprep.subr.bf16.mxu1 %v1143_v8  ;;  %950 = vmatprep.subr.bf16.mxu0 %v1143_v8  ;;  %v1180_v43 = vld [vmem:[%s1592_s1 + $0x120] sm:$0xff]   ;;  %v1185_v47 = vld [vmem:[%s1592_s1 + $0xa8] sm:$0xff]   ;;  %v1187_v49 = vld [vmem:[%s1592_s1 + $0xf0] sm:$0xff]  }
  0x11   :  { %v1197_v46 = vld [vmem:[%s1593_s0 + $0xc] ss:$20 sps:$4 sm:$0xff]   ;;  %v1190_v50 = vld [vmem:[%s1592_s1 + $0xb0] sm:$0xff]   ;;  %v1194_v54 = vld [vmem:[%s1592_s1 + $0xb8] sm:$0xff]  }
  0x12   :  { %v1186_v48 = vld [vmem:[%s1592_s1 + $0x128] sm:$0xff]   ;;  %v1192_v52 = vld [vmem:[%s1592_s1 + $0x130] sm:$0xff]   ;;  %v1198_v55 = vld [vmem:[%s1592_s1 + $0x138] sm:$0xff]  }
  0x13   :  { %1129 = vmatpush3.bf16.msra.mxu1 %v1144_v9  ;;  %951 = vmatpush3.bf16.msra.mxu0 %v1144_v9  ;;  %v1191_v51 = vld [vmem:[%s1593_s0 + $0x78] ss:$20 sps:$4 sm:$0xff]   ;;  %v1195_v56 = vld [vmem:[%s1593_s0 + $0x8] ss:$20 sps:$4 sm:$0xff]   ;;  %v1199_v57 = vld [vmem:[%s1593_s0 + $0x10] ss:$20 sps:$4 sm:$0xff]  }
  0x14   :  { %1122 = vmatprep.subr.bf16.mxu1 %v1145_v10  ;;  %952 = vmatprep.subr.bf16.mxu0 %v1145_v10  ;;  %v1200_v58 = vld [vmem:[%s1593_s0 + $0x34] ss:$20 sps:$4 sm:$0xff]   ;;  %v1202_v59 = vld [vmem:[%s1593_s0 + $0x30] ss:$20 sps:$4 sm:$0xff]   ;;  %v1203_v60 = vld [vmem:[%s1593_s0 + $0x38] ss:$20 sps:$4 sm:$0xff]  }
  0x15   :  { %v1204_v61 = vld [vmem:[%s1593_s0 + $0x5c] ss:$20 sps:$4 sm:$0xff]   ;;  %v1206_v62 = vld [vmem:[%s1593_s0 + $0x58] ss:$20 sps:$4 sm:$0xff]   ;;  %v1207_v63 = vld [vmem:[%s1593_s0 + $0x60] ss:$20 sps:$4 sm:$0xff]  }
  0x16   :  { %v1208_v0 = vld [vmem:[%s1593_s0 + $0x84] ss:$20 sps:$4 sm:$0xff]   ;;  %v1210_v1 = vld [vmem:[%s1593_s0 + $0x80] ss:$20 sps:$4 sm:$0xff]   ;;  %v1211_v2 = vld [vmem:[%s1593_s0 + $0x88] ss:$20 sps:$4 sm:$0xff]  }
  0x17   :  { %1130 = vmatpush3.bf16.msra.mxu1 %v1146_v12  ;;  %953 = vmatpush3.bf16.msra.mxu0 %v1146_v12  ;;  %v1212_v3 = vld [vmem:[%s1593_s0 + $0xac] ss:$20 sps:$4 sm:$0xff]   ;;  %v1214_v4 = vld [vmem:[%s1593_s0 + $0xa8] ss:$20 sps:$4 sm:$0xff]   ;;  %v1215_v5 = vld [vmem:[%s1593_s0 + $0xb0] ss:$20 sps:$4 sm:$0xff]  }
  0x18   :  { %1123 = vmatprep.subr.bf16.mxu1 %v1147_v14  ;;  %954 = vmatprep.subr.bf16.mxu0 %v1147_v14  ;;  %v1216_v6 = vld [vmem:[%s1593_s0 + $0xd4] ss:$20 sps:$4 sm:$0xff]   ;;  %v1218_v7 = vld [vmem:[%s1593_s0 + $0xd0] ss:$20 sps:$4 sm:$0xff]   ;;  %v1219_v8 = vld [vmem:[%s1593_s0 + $0xd8] ss:$20 sps:$4 sm:$0xff]  }
  0x19   :  { %v1220_v9 = vld [vmem:[%s1593_s0 + $0xfc] ss:$20 sps:$4 sm:$0xff]   ;;  %v1222_v10 = vld [vmem:[%s1593_s0 + $0xf8] ss:$20 sps:$4 sm:$0xff]   ;;  %v1223_v11 = vld [vmem:[%s1593_s0 + $0x100] ss:$20 sps:$4 sm:$0xff]  }
  0x1b   :  { %1131 = vmatpush3.bf16.msra.mxu1 %v1148_v15  ;;  %955 = vmatpush3.bf16.msra.mxu0 %v1148_v15 }
  0x1c   :  { %1124 = vmatprep.subr.bf16.mxu1 %v1149_v16  ;;  %956 = vmatprep.subr.bf16.mxu0 %v1149_v16 }
  0x1f   :  { %1132 = vmatpush3.bf16.msra.mxu1 %v1150_v17  ;;  %957 = vmatpush3.bf16.msra.mxu0 %v1150_v17 }
  0x20   :  { %1000 = vmatprep.subr.bf16.mxu1 %v1154_v18  ;;  %1073 = vmatprep.subr.bf16.mxu0 %v1224_v24 }
  0x22   :  { %631 = vmatmul.mubr.bf16.vlgmr.msra.gmra.mrb[0].mxu1 %v1151_v19  ;;  %599 = vmatmul.mubr.bf16.vlgmr.msra.gmra.mrb[0].mxu0 %v1155_v20 }
  0x23   :  { %1001 = vmatpush3.bf16.msra.mxu1 %v1158_v21  ;;  %1074 = vmatpush3.bf16.msra.mxu0 %v1159_v22 }
  0x24   :  { %1002 = vmatprep.subr.bf16.mxu1 %v1160_v23  ;;  %1075 = vmatprep.subr.bf16.mxu0 %v1224_v24 }
  0x25   :  { %606 = vmatprep.mubr.bf16.mxu0 %v1164_v25  ;;  %638 = vmatprep.mubr.bf16.mxu1 %v1169_v26 }
  0x27   :  { %1003 = vmatpush3.bf16.msra.mxu1 %v1161_v27  ;;  %1076 = vmatpush3.bf16.msra.mxu0 %v1162_v28 }
  0x28   :  { %1004 = vmatprep.subr.bf16.mxu1 %v1163_v29  ;;  %1077 = vmatprep.subr.bf16.mxu0 %v1224_v24 }
  0x2a   :  { %607 = vmatmul.mubr.bf16.gmra.mrb[4].mxu0 %v1167_v31  ;;  %639 = vmatmul.mubr.bf16.gmra.mrb[4].mxu1 %v1172_v32 }
  0x2b   :  { %1005 = vmatpush3.bf16.msra.mxu1 %v1166_v30  ;;  %1078 = vmatpush3.bf16.msra.mxu0 %v1168_v33 }
  0x2c   :  { %1006 = vmatprep.subr.bf16.mxu1 %v1171_v34  ;;  %1079 = vmatprep.subr.bf16.mxu0 %v1224_v24 }
  0x2d   :  { %614 = vmatprep.mubr.bf16.mxu0 %v1176_v35  ;;  %646 = vmatprep.mubr.bf16.mxu1 %v1181_v36 }
  0x2f   :  { %1007 = vmatpush3.bf16.msra.mxu1 %v1173_v37  ;;  %1080 = vmatpush3.bf16.msra.mxu0 %v1174_v38 }
  0x30   :  { %1008 = vmatprep.subr.bf16.mxu1 %v1175_v39  ;;  %1081 = vmatprep.subr.bf16.mxu0 %v1224_v24 }
  0x32   :  { %615 = vmatmul.mubr.bf16.gmra.mrb[8].mxu0 %v1179_v41  ;;  %647 = vmatmul.mubr.bf16.gmra.mrb[8].mxu1 %v1184_v42 }
  0x33   :  { %1009 = vmatpush3.bf16.msra.mxu1 %v1178_v40  ;;  %1082 = vmatpush3.bf16.msra.mxu0 %v1180_v43 }
  0x34   :  { %1010 = vmatprep.subr.bf16.mxu1 %v1183_v44  ;;  %1083 = vmatprep.subr.bf16.mxu0 %v1224_v24 }
  0x35   :  { %622 = vmatprep.mubr.bf16.mxu0 %v1188_v45  ;;  %687 = vmatprep.mubr.bf16.mxu1 %v1197_v46 }
  0x37   :  { %1011 = vmatpush3.bf16.msra.mxu1 %v1185_v47  ;;  %1084 = vmatpush3.bf16.msra.mxu0 %v1186_v48 }
  0x38   :  { %1012 = vmatprep.subr.bf16.mxu1 %v1187_v49  ;;  %1085 = vmatprep.subr.bf16.mxu0 %v1224_v24 }
  0x3a   :  { %623 = vmatmul.mubr.bf16.gmra.mrb[12].mxu0 %v1191_v51 }
  0x3b   :  { %1013 = vmatpush3.bf16.msra.mxu1 %v1190_v50  ;;  %1086 = vmatpush3.bf16.msra.mxu0 %v1192_v52 }
  0x3c   :  { %1014 = vmatprep.subr.bf16.mxu1 %v1193_v53  ;;  %1087 = vmatprep.subr.bf16.mxu0 %v1224_v24 }
  0x3d   :  { %1089 = vmatprep.mubr.msk.bf16.mxu0 %vm1225_vm0, %v1224_v24 }
  0x3f   :  { %1015 = vmatpush3.bf16.msra.mxu1 %v1194_v54  ;;  %1088 = vmatpush3.bf16.msra.mxu0 %v1198_v55 }
  0x42   :  { %688 = vmatmul.mubr.bf16.vlgmr.msra.gmra.mrb[12].mxu1 %v1195_v56  ;;  %1090 = vmatmul.mubr.bf16.vlgmr.msra.gmra.mrb[16].mxu0 %v1199_v57  ;;  %v1512_v56 = vld [vmem:[%s1594_s2] ss:$0 sm:$0xff] }
  0x43   :  { %695 = vmatprep.mubr.bf16.mxu1 %v1200_v58  ;;  %1093 = vmatprep.mubr.msk.bf16.mxu0 %vm1225_vm0, %v1224_v24 }
  0x4a   :  { %696 = vmatmul.mubr.bf16.gmra.mrb[16].mxu1 %v1202_v59  ;;  %1094 = vmatmul.mubr.bf16.gmra.mrb[20].mxu0 %v1203_v60 }
  0x4b   :  { %703 = vmatprep.mubr.bf16.mxu1 %v1204_v61  ;;  %1097 = vmatprep.mubr.msk.bf16.mxu0 %vm1225_vm0, %v1224_v24 }
  0x52   :  { %704 = vmatmul.mubr.bf16.gmra.mrb[20].mxu1 %v1206_v62  ;;  %1098 = vmatmul.mubr.bf16.gmra.mrb[24].mxu0 %v1207_v63 }
  0x53   :  { %711 = vmatprep.mubr.bf16.mxu1 %v1208_v0  ;;  %1101 = vmatprep.mubr.msk.bf16.mxu0 %vm1225_vm0, %v1224_v24 }
  0x5a   :  { %712 = vmatmul.mubr.bf16.gmra.mrb[24].mxu1 %v1210_v1  ;;  %1102 = vmatmul.mubr.bf16.gmra.mrb[28].mxu0 %v1211_v2 }
  0x5b   :  { %719 = vmatprep.mubr.bf16.mxu1 %v1212_v3  ;;  %1105 = vmatprep.mubr.msk.bf16.mxu0 %vm1225_vm0, %v1224_v24 }
  0x62   :  { %720 = vmatmul.mubr.bf16.gmra.mrb[28].mxu1 %v1214_v4  ;;  %1106 = vmatmul.mubr.bf16.gmra.mrb[32].mxu0 %v1215_v5 }
  0x63   :  { %727 = vmatprep.mubr.bf16.mxu1 %v1216_v6  ;;  %1109 = vmatprep.mubr.msk.bf16.mxu0 %vm1225_vm0, %v1224_v24 }
  0x6a   :  { %728 = vmatmul.mubr.bf16.gmra.mrb[32].mxu1 %v1218_v7  ;;  %1110 = vmatmul.mubr.bf16.gmra.mrb[36].mxu0 %v1219_v8 }
  0x6b   :  { %735 = vmatprep.mubr.bf16.mxu1 %v1220_v9  ;;  %1113 = vmatprep.mubr.msk.bf16.mxu0 %vm1225_vm0, %v1224_v24 }
  0x72   :  { %736 = vmatmul.mubr.bf16.gmra.mrb[36].mxu1 %v1222_v10  ;;  %1114 = vmatmul.mubr.bf16.gmra.mrb[40].mxu0 %v1223_v11 }
  0xf5   :  { %v982_v12 = vpop.f32.mrb[0].mxu1  ;;  %v958_v13 = vpop.f32.mrb[0].mxu0 }
  0xf6   :  { %v983_v14 = vpop.f32.mrb[1].mxu1  ;;  %v959_v15 = vpop.f32.mrb[1].mxu0 }
  0xf7   :  { %v1493_v16 = vadd.f32 %v983_v14, %v982_v12  ;;  %v985_v17 = vpop.f32.mrb[2].mxu1  ;;  %v960_v18 = vadd.f32 %v959_v15, %v958_v13  ;;  %v961_v19 = vpop.f32.mrb[2].mxu0 }
  0xf8   :  { %v986_v20 = vpop.f32.mrb[3].mxu1  ;;  %v962_v21 = vpop.f32.mrb[3].mxu0 }
  0xf9   :  { %v1495_v22 = vadd.f32 %v986_v20, %v985_v17  ;;  %v963_v23 = vadd.f32 %v962_v21, %v961_v19  ;;  %v601_v59 = vadd.f32 %v960_v18, %v1512_v56 }
  0xfb   :  { %v604_v1 = vadd.f32 %v963_v23, %v1512_v56 }
  0xfd   :  { %v964_v24 = vpop.f32.mrb[4].mxu0  ;;  %v988_v25 = vpop.f32.mrb[4].mxu1 }
  0xfe   :  { %v965_v26 = vpop.f32.mrb[5].mxu0  ;;  %v989_v27 = vpop.f32.mrb[5].mxu1 }
  0xff   :  { %v966_v28 = vadd.f32 %v965_v26, %v964_v24  ;;  %v967_v29 = vpop.f32.mrb[6].mxu0  ;;  %v1497_v30 = vadd.f32 %v989_v27, %v988_v25  ;;  %v991_v31 = vpop.f32.mrb[6].mxu1 }
 0x100   :  { %v968_v32 = vpop.f32.mrb[7].mxu0  ;;  %v992_v33 = vpop.f32.mrb[7].mxu1 }
 0x101   :  { %v969_v34 = vadd.f32 %v968_v32, %v967_v29  ;;  %v1499_v35 = vadd.f32 %v992_v33, %v991_v31  ;;  %v609_v12 = vadd.f32 %v966_v28, %v1512_v56 }
 0x103   :  { %v612_v20 = vadd.f32 %v969_v34, %v1512_v56 }
 0x105   :  { %v970_v36 = vpop.f32.mrb[8].mxu0  ;;  %v994_v37 = vpop.f32.mrb[8].mxu1 }
 0x106   :  { %v971_v38 = vpop.f32.mrb[9].mxu0  ;;  %v995_v39 = vpop.f32.mrb[9].mxu1 }
 0x107   :  { %v972_v40 = vadd.f32 %v971_v38, %v970_v36  ;;  %v973_v41 = vpop.f32.mrb[10].mxu0  ;;  %v1501_v42 = vadd.f32 %v995_v39, %v994_v37  ;;  %v997_v43 = vpop.f32.mrb[10].mxu1 }
 0x108   :  { %v974_v44 = vpop.f32.mrb[11].mxu0  ;;  %v998_v45 = vpop.f32.mrb[11].mxu1 }
 0x109   :  { %v975_v46 = vadd.f32 %v974_v44, %v973_v41  ;;  %v1503_v47 = vadd.f32 %v998_v45, %v997_v43  ;;  %v617_v33 = vadd.f32 %v972_v40, %v1512_v56 }
 0x10b   :  { %v620_v43 = vadd.f32 %v975_v46, %v1512_v56 }
 0x10d   :  { %v976_v48 = vpop.f32.mrb[12].mxu0 }
 0x10e   :  { %v977_v49 = vpop.f32.mrb[13].mxu0 }
 0x10f   :  { %v1505_v50 = vadd.f32 %v977_v49, %v976_v48  ;;  %v979_v51 = vpop.f32.mrb[14].mxu0 }
 0x110   :  { %v980_v52 = vpop.f32.mrb[15].mxu0 }
 0x111   :  { %v1507_v53 = vadd.f32 %v980_v52, %v979_v51 }
 0x115   :  { %v1016_v54 = vpop.f32.mrb[12].mxu1  ;;  %v778_v55 = vpop.f32.mrb[16].mxu0 }
 0x116   :  { %v1017_v57 = vpop.f32.mrb[13].mxu1  ;;  %v1091_v58 = vpop.f32.mrb[17].mxu0 }
 0x117   :  { %v1018_v60 = vadd.f32 %v1017_v57, %v1016_v54  ;;  %v1019_v61 = vpop.f32.mrb[14].mxu1  ;;  %v781_v62 = vpop.f32.mrb[18].mxu0  ;;  %v625_v58 = vadd.f32 %v1505_v50, %v1512_v56 }
 0x118   :  { %v1020_v63 = vpop.f32.mrb[15].mxu1  ;;  %v1092_v0 = vpop.f32.mrb[19].mxu0 }
 0x119   :  { %v690_v2 = vadd.f32 %v1018_v60, %v601_v59  ;;  %v1021_v3 = vadd.f32 %v1020_v63, %v1019_v61  ;;  %v628_v0 = vadd.f32 %v1507_v53, %v1512_v56 }
 0x11b   :  { %v779_v4 = vadd.f32 %v778_v55, %v690_v2  ;;  %v693_v5 = vadd.f32 %v1021_v3, %v604_v1 }
 0x11d   :  { %v833_v6 = vmax.f32 %v779_v4, 0.0  ;;  %v782_v7 = vadd.f32 %v781_v62, %v693_v5  ;;  %v1022_v8 = vpop.f32.mrb[16].mxu1  ;;  %v786_v9 = vpop.f32.mrb[20].mxu0 }
 0x11e   :  { %v1023_v10 = vpop.f32.mrb[17].mxu1  ;;  %v1095_v11 = vpop.f32.mrb[21].mxu0 }
 0x11f   :  { %848 = vst.msk [vmem:[%s1595_s3] sm:$0xff] %vm847_vm1, %v833_v6  ;;  %v834_v13 = vmax.f32 %v782_v7, 0.0  ;;  %v1024_v14 = vadd.f32 %v1023_v10, %v1022_v8  ;;  %v1025_v15 = vpop.f32.mrb[18].mxu1  ;;  %v789_v17 = vpop.f32.mrb[22].mxu0  ;;  %v633_v10 = vadd.f32 %v1493_v16, %v1512_v56 }
 0x120   :  { %v1026_v18 = vpop.f32.mrb[19].mxu1  ;;  %v1096_v19 = vpop.f32.mrb[23].mxu0 }
 0x121   :  { %849 = vst.msk [vmem:[%s1595_s3 + $0x8] sm:$0xff] %vm847_vm1, %v834_v13  ;;  %v698_v21 = vadd.f32 %v1024_v14, %v609_v12  ;;  %v1027_v23 = vadd.f32 %v1026_v18, %v1025_v15 }
 0x123   :  { %v787_v24 = vadd.f32 %v786_v9, %v698_v21  ;;  %v701_v25 = vadd.f32 %v1027_v23, %v612_v20 }
 0x125   :  { %v835_v26 = vmax.f32 %v787_v24, 0.0  ;;  %v790_v27 = vadd.f32 %v789_v17, %v701_v25  ;;  %v1028_v28 = vpop.f32.mrb[20].mxu1  ;;  %v794_v29 = vpop.f32.mrb[24].mxu0  ;;  %v636_v17 = vadd.f32 %v1495_v22, %v1512_v56 }
 0x126   :  { %v1029_v31 = vpop.f32.mrb[21].mxu1  ;;  %v1099_v32 = vpop.f32.mrb[25].mxu0 }
 0x127   :  { %850 = vst.msk [vmem:[%s1595_s3 + $0x10] sm:$0xff] %vm847_vm1, %v835_v26  ;;  %v836_v34 = vmax.f32 %v790_v27, 0.0  ;;  %v1030_v36 = vadd.f32 %v1029_v31, %v1028_v28  ;;  %v1031_v37 = vpop.f32.mrb[22].mxu1  ;;  %v797_v38 = vpop.f32.mrb[26].mxu0  ;;  %v641_v28 = vadd.f32 %v1497_v30, %v1512_v56 }
 0x128   :  { %v1032_v39 = vpop.f32.mrb[23].mxu1  ;;  %v1100_v41 = vpop.f32.mrb[27].mxu0 }
 0x129   :  { %851 = vst.msk [vmem:[%s1595_s3 + $0x18] sm:$0xff] %vm847_vm1, %v836_v34  ;;  %v706_v44 = vadd.f32 %v1030_v36, %v617_v33  ;;  %v1033_v40 = vadd.f32 %v1032_v39, %v1031_v37  ;;  %v644_v36 = vadd.f32 %v1499_v35, %v1512_v56 }
 0x12b   :  { %v795_v45 = vadd.f32 %v794_v29, %v706_v44  ;;  %v709_v48 = vadd.f32 %v1033_v40, %v620_v43 }
 0x12d   :  { %v837_v49 = vmax.f32 %v795_v45, 0.0  ;;  %v798_v51 = vadd.f32 %v797_v38, %v709_v48  ;;  %v1034_v52 = vpop.f32.mrb[24].mxu1  ;;  %v802_v54 = vpop.f32.mrb[28].mxu0 }
 0x12e   :  { %v1035_v55 = vpop.f32.mrb[25].mxu1  ;;  %v1103_v57 = vpop.f32.mrb[29].mxu0 }
 0x12f   :  { %852 = vst.msk [vmem:[%s1595_s3 + $0x20] sm:$0xff] %vm847_vm1, %v837_v49  ;;  %v838_v46 = vmax.f32 %v798_v51, 0.0  ;;  %v1036_v59 = vadd.f32 %v1035_v55, %v1034_v52  ;;  %v1037_v60 = vpop.f32.mrb[26].mxu1  ;;  %v805_v61 = vpop.f32.mrb[30].mxu0  ;;  %v649_v49 = vadd.f32 %v1501_v42, %v1512_v56 }
 0x130   :  { %v1038_v62 = vpop.f32.mrb[27].mxu1  ;;  %v1104_v63 = vpop.f32.mrb[31].mxu0 }
 0x131   :  { %853 = vst.msk [vmem:[%s1595_s3 + $0x28] sm:$0xff] %vm847_vm1, %v838_v46  ;;  %v714_v50 = vadd.f32 %v1036_v59, %v625_v58  ;;  %v1039_v1 = vadd.f32 %v1038_v62, %v1037_v60  ;;  %v652_v58 = vadd.f32 %v1503_v47, %v1512_v56 }
 0x133   :  { %v803_v2 = vadd.f32 %v802_v54, %v714_v50  ;;  %v717_v3 = vadd.f32 %v1039_v1, %v628_v0 }
 0x135   :  { %v839_v4 = vmax.f32 %v803_v2, 0.0  ;;  %v806_v5 = vadd.f32 %v805_v61, %v717_v3  ;;  %v1040_v6 = vpop.f32.mrb[28].mxu1  ;;  %v810_v7 = vpop.f32.mrb[32].mxu0 }
 0x136   :  { %v1041_v8 = vpop.f32.mrb[29].mxu1  ;;  %v1107_v9 = vpop.f32.mrb[33].mxu0 }
 0x137   :  { %854 = vst.msk [vmem:[%s1595_s3 + $0x30] sm:$0xff] %vm847_vm1, %v839_v4  ;;  %v840_v53 = vmax.f32 %v806_v5, 0.0  ;;  %v1042_v11 = vadd.f32 %v1041_v8, %v1040_v6  ;;  %v1043_v12 = vpop.f32.mrb[30].mxu1  ;;  %v813_v13 = vpop.f32.mrb[34].mxu0 }
 0x138   :  { %v1044_v14 = vpop.f32.mrb[31].mxu1  ;;  %v1108_v15 = vpop.f32.mrb[35].mxu0 }
 0x139   :  { %855 = vst.msk [vmem:[%s1595_s3 + $0x38] sm:$0xff] %vm847_vm1, %v840_v53  ;;  %v722_v16 = vadd.f32 %v1042_v11, %v633_v10  ;;  %v1045_v18 = vadd.f32 %v1044_v14, %v1043_v12 }
 0x13b   :  { %v811_v19 = vadd.f32 %v810_v7, %v722_v16  ;;  %v725_v20 = vadd.f32 %v1045_v18, %v636_v17 }
 0x13d   :  { %v841_v21 = vmax.f32 %v811_v19, 0.0  ;;  %v814_v23 = vadd.f32 %v813_v13, %v725_v20  ;;  %v1046_v24 = vpop.f32.mrb[32].mxu1  ;;  %v818_v25 = vpop.f32.mrb[36].mxu0 }
 0x13e   :  { %v1047_v26 = vpop.f32.mrb[33].mxu1  ;;  %v1111_v27 = vpop.f32.mrb[37].mxu0 }
 0x13f   :  { %856 = vst.msk [vmem:[%s1595_s3 + $0x40] sm:$0xff] %vm847_vm1, %v841_v21  ;;  %v842_v22 = vmax.f32 %v814_v23, 0.0  ;;  %v1048_v29 = vadd.f32 %v1047_v26, %v1046_v24  ;;  %v1049_v31 = vpop.f32.mrb[34].mxu1  ;;  %v821_v32 = vpop.f32.mrb[38].mxu0 }
 0x140   :  { %v1050_v33 = vpop.f32.mrb[35].mxu1  ;;  %v1112_v34 = vpop.f32.mrb[39].mxu0 }
 0x141   :  { %857 = vst.msk [vmem:[%s1595_s3 + $0x48] sm:$0xff] %vm847_vm1, %v842_v22  ;;  %v730_v30 = vadd.f32 %v1048_v29, %v641_v28  ;;  %v1051_v37 = vadd.f32 %v1050_v33, %v1049_v31 }
 0x143   :  { %v819_v38 = vadd.f32 %v818_v25, %v730_v30  ;;  %v733_v39 = vadd.f32 %v1051_v37, %v644_v36 }
 0x145   :  { %v843_v41 = vmax.f32 %v819_v38, 0.0  ;;  %v822_v43 = vadd.f32 %v821_v32, %v733_v39  ;;  %v1052_v44 = vpop.f32.mrb[36].mxu1  ;;  %v826_v40 = vpop.f32.mrb[40].mxu0 }
 0x146   :  { %v1053_v45 = vpop.f32.mrb[37].mxu1  ;;  %v1115_v48 = vpop.f32.mrb[41].mxu0 }
 0x147   :  { %858 = vst.msk [vmem:[%s1595_s3 + $0x50] sm:$0xff] %vm847_vm1, %v843_v41  ;;  %v844_v35 = vmax.f32 %v822_v43, 0.0  ;;  %v1054_v51 = vadd.f32 %v1053_v45, %v1052_v44  ;;  %v1055_v52 = vpop.f32.mrb[38].mxu1  ;;  %v829_v54 = vpop.f32.mrb[42].mxu0 }
 0x148   :  { %v1056_v55 = vpop.f32.mrb[39].mxu1  ;;  %v1116_v57 = vpop.f32.mrb[43].mxu0 }
 0x149   :  { %859 = vst.msk [vmem:[%s1595_s3 + $0x58] sm:$0xff] %vm847_vm1, %v844_v35  ;;  %v738_v42 = vadd.f32 %v1054_v51, %v649_v49  ;;  %v1057_v46 = vadd.f32 %v1056_v55, %v1055_v52 }
 0x14b   :  { %v827_v59 = vadd.f32 %v826_v40, %v738_v42  ;;  %v741_v60 = vadd.f32 %v1057_v46, %v652_v58 }
 0x14d   :  { %v845_v61 = vmax.f32 %v827_v59, 0.0  ;;  %v830_v62 = vadd.f32 %v829_v54, %v741_v60 }
 0x14f   :  { %860 = vst.msk [vmem:[%s1595_s3 + $0x60] sm:$0xff] %vm847_vm1, %v845_v61  ;;  %v846_v63 = vmax.f32 %v830_v62, 0.0 }
 0x151   :  { %861 = vst.msk [vmem:[%s1595_s3 + $0x68] sm:$0xff] %vm847_vm1, %v846_v63 }

// kernel: dqn_forward_pallas.7
= control target key start
LH: loop header
LB: loop body
LE: loop exit
PB: predicated region body
PF: predicated region fallthrough
CT: control target
= control target key end

     0   :  { %s20933_s1 = inlined_call_operand.vmem [shape: bf16[3200,1024], index: 1, kind: input, shape index: {}]   ;;  %s20934_s0 = inlined_call_operand.vmem [shape: bf16[16,3200], index: 0, kind: input, shape index: {}]   ;;  %s20935_s2 = inlined_call_operand.vmem [shape: f32[1,1024], index: 2, kind: input, shape index: {}]   ;;  %s20936_s3 = inlined_call_operand.vmem [shape: bf16[1024,256], index: 3, kind: input, shape index: {}]   ;;  %s20937_s4 = inlined_call_operand.vmem [shape: f32[1,256], index: 4, kind: input, shape index: {}]   ;;  %s20938_s5 = inlined_call_operand.vmem [shape: f32[16,128], index: 5, kind: output, shape index: {}]  }
   0x1   :  { %v47_v0 = vld [vmem:[%s20933_s1] sm:$0xff]  ;;  %v15040_v59 = vld [vmem:[%s20934_s0 + $0x14] ss:$100 sps:$4 sm:$0xff]  }
   0x2   :  { %v51_v1 = vld [vmem:[%s20933_s1 + $0x20] sm:$0xff]  ;;  %9933 = vmatprep.mubr.bf16.mxu0 %v15040_v59 }
   0x3   :  { %v303_v2 = vld [vmem:[%s20933_s1 + $0x800] sm:$0xff]  ;;  %v13084_v3 = vcombine.high %v47_v0, %v51_v1  ;;  %v13083_v5 = vcombine.low %v47_v0, %v51_v1 }
   0x4   :  { %v307_v4 = vld [vmem:[%s20933_s1 + $0x820] sm:$0xff] }
   0x5   :  { %v55_v6 = vld [vmem:[%s20933_s1 + $0x40] sm:$0xff]  ;;  %v13340_v8 = vcombine.high %v303_v2, %v307_v4  ;;  %v13339_v9 = vcombine.low %v303_v2, %v307_v4  ;;  %9815 = vmatprep.subr.bf16.mxu1 %v13084_v3 }
   0x6   :  { %v59_v7 = vld [vmem:[%s20933_s1 + $0x60] sm:$0xff]  ;;  %9816 = vmatpush1.bf16.msra.mxu1 %v13083_v5 }
   0x7   :  { %v13092_v10 = vcombine.high %v55_v6, %v59_v7  ;;  %v311_v11 = vld [vmem:[%s20933_s1 + $0x840] sm:$0xff]  ;;  %9901 = vmatprep.subr.bf16.mxu0 %v13340_v8  ;;  %v13091_v18 = vcombine.low %v55_v6, %v59_v7 }
   0x8   :  { %v315_v12 = vld [vmem:[%s20933_s1 + $0x860] sm:$0xff]  ;;  %9902 = vmatpush1.bf16.msra.mxu0 %v13339_v9 }
   0x9   :  { %v63_v13 = vld [vmem:[%s20933_s1 + $0x80] sm:$0xff]  ;;  %v13348_v14 = vcombine.high %v311_v11, %v315_v12  ;;  %9817 = vmatprep.subr.bf16.mxu1 %v13092_v10  ;;  %v13347_v19 = vcombine.low %v311_v11, %v315_v12 }
   0xa   :  { %v67_v15 = vld [vmem:[%s20933_s1 + $0xa0] sm:$0xff]  ;;  %9818 = vmatpush1.bf16.msra.mxu1 %v13091_v18 }
   0xb   :  { %v319_v16 = vld [vmem:[%s20933_s1 + $0x880] sm:$0xff]  ;;  %v13100_v20 = vcombine.high %v63_v13, %v67_v15  ;;  %9903 = vmatprep.subr.bf16.mxu0 %v13348_v14  ;;  %v13099_v26 = vcombine.low %v63_v13, %v67_v15 }
   0xc   :  { %v323_v17 = vld [vmem:[%s20933_s1 + $0x8a0] sm:$0xff]  ;;  %9904 = vmatpush1.bf16.msra.mxu0 %v13347_v19 }
   0xd   :  { %v13356_v21 = vcombine.high %v319_v16, %v323_v17  ;;  %v71_v22 = vld [vmem:[%s20933_s1 + $0xc0] sm:$0xff]  ;;  %9819 = vmatprep.subr.bf16.mxu1 %v13100_v20  ;;  %v13355_v27 = vcombine.low %v319_v16, %v323_v17 }
   0xe   :  { %v75_v23 = vld [vmem:[%s20933_s1 + $0xe0] sm:$0xff]  ;;  %9820 = vmatpush1.bf16.msra.mxu1 %v13099_v26 }
   0xf   :  { %v327_v24 = vld [vmem:[%s20933_s1 + $0x8c0] sm:$0xff]  ;;  %v13108_v28 = vcombine.high %v71_v22, %v75_v23  ;;  %9905 = vmatprep.subr.bf16.mxu0 %v13356_v21  ;;  %v13107_v34 = vcombine.low %v71_v22, %v75_v23 }
  0x10   :  { %v331_v25 = vld [vmem:[%s20933_s1 + $0x8e0] sm:$0xff]  ;;  %9906 = vmatpush1.bf16.msra.mxu0 %v13355_v27 }
  0x11   :  { %v13364_v29 = vcombine.high %v327_v24, %v331_v25  ;;  %v79_v30 = vld [vmem:[%s20933_s1 + $0x100] sm:$0xff]  ;;  %9821 = vmatprep.subr.bf16.mxu1 %v13108_v28  ;;  %v13363_v35 = vcombine.low %v327_v24, %v331_v25 }
  0x12   :  { %v83_v31 = vld [vmem:[%s20933_s1 + $0x120] sm:$0xff]  ;;  %9822 = vmatpush1.bf16.msra.mxu1 %v13107_v34 }
  0x13   :  { %v335_v32 = vld [vmem:[%s20933_s1 + $0x900] sm:$0xff]  ;;  %v13116_v36 = vcombine.high %v79_v30, %v83_v31  ;;  %9907 = vmatprep.subr.bf16.mxu0 %v13364_v29  ;;  %v13115_v42 = vcombine.low %v79_v30, %v83_v31 }
  0x14   :  { %v339_v33 = vld [vmem:[%s20933_s1 + $0x920] sm:$0xff]  ;;  %9908 = vmatpush1.bf16.msra.mxu0 %v13363_v35 }
  0x15   :  { %v13372_v37 = vcombine.high %v335_v32, %v339_v33  ;;  %v87_v38 = vld [vmem:[%s20933_s1 + $0x140] sm:$0xff]  ;;  %9823 = vmatprep.subr.bf16.mxu1 %v13116_v36  ;;  %v13371_v43 = vcombine.low %v335_v32, %v339_v33 }
  0x16   :  { %v91_v39 = vld [vmem:[%s20933_s1 + $0x160] sm:$0xff]  ;;  %9824 = vmatpush1.bf16.msra.mxu1 %v13115_v42 }
  0x17   :  { %v343_v40 = vld [vmem:[%s20933_s1 + $0x940] sm:$0xff]  ;;  %v13124_v44 = vcombine.high %v87_v38, %v91_v39  ;;  %9909 = vmatprep.subr.bf16.mxu0 %v13372_v37  ;;  %v13123_v50 = vcombine.low %v87_v38, %v91_v39 }
  0x18   :  { %v347_v41 = vld [vmem:[%s20933_s1 + $0x960] sm:$0xff]  ;;  %9910 = vmatpush1.bf16.msra.mxu0 %v13371_v43 }
  0x19   :  { %v13380_v45 = vcombine.high %v343_v40, %v347_v41  ;;  %v95_v46 = vld [vmem:[%s20933_s1 + $0x180] sm:$0xff]  ;;  %9825 = vmatprep.subr.bf16.mxu1 %v13124_v44  ;;  %v13379_v52 = vcombine.low %v343_v40, %v347_v41 }
  0x1a   :  { %v99_v47 = vld [vmem:[%s20933_s1 + $0x1a0] sm:$0xff]  ;;  %9826 = vmatpush1.bf16.msra.mxu1 %v13123_v50 }
  0x1b   :  { %v351_v48 = vld [vmem:[%s20933_s1 + $0x980] sm:$0xff]  ;;  %v13132_v53 = vcombine.high %v95_v46, %v99_v47  ;;  %9911 = vmatprep.subr.bf16.mxu0 %v13380_v45  ;;  %v13131_v60 = vcombine.low %v95_v46, %v99_v47 }
  0x1c   :  { %v355_v49 = vld [vmem:[%s20933_s1 + $0x9a0] sm:$0xff]  ;;  %9912 = vmatpush1.bf16.msra.mxu0 %v13379_v52 }
  0x1d   :  { %v103_v51 = vld [vmem:[%s20933_s1 + $0x1c0] sm:$0xff]  ;;  %v13388_v55 = vcombine.high %v351_v48, %v355_v49  ;;  %9827 = vmatprep.subr.bf16.mxu1 %v13132_v53  ;;  %v13387_v61 = vcombine.low %v351_v48, %v355_v49 }
  0x1e   :  { %v107_v54 = vld [vmem:[%s20933_s1 + $0x1e0] sm:$0xff]  ;;  %9828 = vmatpush1.bf16.msra.mxu1 %v13131_v60 }
  0x1f   :  { %v359_v56 = vld [vmem:[%s20933_s1 + $0x9c0] sm:$0xff]  ;;  %v13140_v62 = vcombine.high %v103_v51, %v107_v54  ;;  %9913 = vmatprep.subr.bf16.mxu0 %v13388_v55  ;;  %v13139_v4 = vcombine.low %v103_v51, %v107_v54 }
  0x20   :  { %v363_v57 = vld [vmem:[%s20933_s1 + $0x9e0] sm:$0xff]  ;;  %9914 = vmatpush1.bf16.msra.mxu0 %v13387_v61 }
  0x21   :  { %v15470_v58 = vld [vmem:[%s20934_s0 + $0x4] ss:$100 sps:$4 sm:$0xff]   ;;  %v13396_v63 = vcombine.high %v359_v56, %v363_v57  ;;  %9829 = vmatprep.subr.bf16.mxu1 %v13140_v62  ;;  %v13395_v5 = vcombine.low %v359_v56, %v363_v57 }
  0x22   :  { %9847 = vmatprep.mubr.bf16.mxu1 %v15470_v58  ;;  %v111_v0 = vld [vmem:[%s20933_s1 + $0x200] sm:$0xff]  ;;  %9830 = vmatpush1.bf16.msra.mxu1 %v13139_v4 }
  0x23   :  { %v115_v1 = vld [vmem:[%s20933_s1 + $0x220] sm:$0xff]  ;;  %9915 = vmatprep.subr.bf16.mxu0 %v13396_v63 }
  0x24   :  { %v367_v2 = vld [vmem:[%s20933_s1 + $0xa00] sm:$0xff]  ;;  %v13148_v6 = vcombine.high %v111_v0, %v115_v1  ;;  %v13147_v12 = vcombine.low %v111_v0, %v115_v1  ;;  %9916 = vmatpush1.bf16.msra.mxu0 %v13395_v5 }
  0x25   :  { %v371_v3 = vld [vmem:[%s20933_s1 + $0xa20] sm:$0xff] }
  0x26   :  { %v13404_v7 = vcombine.high %v367_v2, %v371_v3  ;;  %v119_v8 = vld [vmem:[%s20933_s1 + $0x240] sm:$0xff]  ;;  %9831 = vmatprep.subr.bf16.mxu1 %v13148_v6  ;;  %v13403_v13 = vcombine.low %v367_v2, %v371_v3 }
  0x27   :  { %v123_v9 = vld [vmem:[%s20933_s1 + $0x260] sm:$0xff]  ;;  %9832 = vmatpush1.bf16.msra.mxu1 %v13147_v12 }
  0x28   :  { %v375_v10 = vld [vmem:[%s20933_s1 + $0xa40] sm:$0xff]  ;;  %v13156_v14 = vcombine.high %v119_v8, %v123_v9  ;;  %9917 = vmatprep.subr.bf16.mxu0 %v13404_v7  ;;  %v13155_v20 = vcombine.low %v119_v8, %v123_v9 }
  0x29   :  { %v379_v11 = vld [vmem:[%s20933_s1 + $0xa60] sm:$0xff]  ;;  %9918 = vmatpush1.bf16.msra.mxu0 %v13403_v13 }
  0x2a   :  { %v13412_v15 = vcombine.high %v375_v10, %v379_v11  ;;  %v127_v16 = vld [vmem:[%s20933_s1 + $0x280] sm:$0xff]  ;;  %9833 = vmatprep.subr.bf16.mxu1 %v13156_v14  ;;  %v13411_v21 = vcombine.low %v375_v10, %v379_v11 }
  0x2b   :  { %v131_v17 = vld [vmem:[%s20933_s1 + $0x2a0] sm:$0xff]  ;;  %9834 = vmatpush1.bf16.msra.mxu1 %v13155_v20 }
  0x2c   :  { %v383_v18 = vld [vmem:[%s20933_s1 + $0xa80] sm:$0xff]  ;;  %v13164_v22 = vcombine.high %v127_v16, %v131_v17  ;;  %9919 = vmatprep.subr.bf16.mxu0 %v13412_v15  ;;  %v13163_v28 = vcombine.low %v127_v16, %v131_v17  ;;  %v15043_v15 = vld [vmem:[%s20934_s0 + $0x10] ss:$100 sps:$4 sm:$0xff]  }
  0x2d   :  { %v387_v19 = vld [vmem:[%s20933_s1 + $0xaa0] sm:$0xff]  ;;  %9920 = vmatpush1.bf16.msra.mxu0 %v13411_v21  ;;  %v15613_v21 = vld [vmem:[%s20934_s0 + $0xc] ss:$100 sps:$4 sm:$0xff]  }
  0x2e   :  { %v13420_v23 = vcombine.high %v383_v18, %v387_v19  ;;  %v135_v24 = vld [vmem:[%s20933_s1 + $0x2c0] sm:$0xff]  ;;  %9835 = vmatprep.subr.bf16.mxu1 %v13164_v22  ;;  %v13419_v29 = vcombine.low %v383_v18, %v387_v19 }
  0x2f   :  { %v139_v25 = vld [vmem:[%s20933_s1 + $0x2e0] sm:$0xff]  ;;  %9836 = vmatpush1.bf16.msra.mxu1 %v13163_v28 }
  0x30   :  { %v391_v26 = vld [vmem:[%s20933_s1 + $0xac0] sm:$0xff]  ;;  %v13172_v30 = vcombine.high %v135_v24, %v139_v25  ;;  %9921 = vmatprep.subr.bf16.mxu0 %v13420_v23  ;;  %v13171_v36 = vcombine.low %v135_v24, %v139_v25 }
  0x31   :  { %v395_v27 = vld [vmem:[%s20933_s1 + $0xae0] sm:$0xff]  ;;  %9922 = vmatpush1.bf16.msra.mxu0 %v13419_v29 }
  0x32   :  { %v13428_v31 = vcombine.high %v391_v26, %v395_v27  ;;  %v143_v32 = vld [vmem:[%s20933_s1 + $0x300] sm:$0xff]  ;;  %9837 = vmatprep.subr.bf16.mxu1 %v13172_v30  ;;  %v13427_v37 = vcombine.low %v391_v26, %v395_v27 }
  0x33   :  { %v147_v33 = vld [vmem:[%s20933_s1 + $0x320] sm:$0xff]  ;;  %9838 = vmatpush1.bf16.msra.mxu1 %v13171_v36 }
  0x34   :  { %v399_v34 = vld [vmem:[%s20933_s1 + $0xb00] sm:$0xff]  ;;  %v13180_v38 = vcombine.high %v143_v32, %v147_v33  ;;  %9923 = vmatprep.subr.bf16.mxu0 %v13428_v31  ;;  %v13179_v44 = vcombine.low %v143_v32, %v147_v33 }
  0x35   :  { %v403_v35 = vld [vmem:[%s20933_s1 + $0xb20] sm:$0xff]  ;;  %9924 = vmatpush1.bf16.msra.mxu0 %v13427_v37 }
  0x36   :  { %v13436_v39 = vcombine.high %v399_v34, %v403_v35  ;;  %v151_v40 = vld [vmem:[%s20933_s1 + $0x340] sm:$0xff]  ;;  %9839 = vmatprep.subr.bf16.mxu1 %v13180_v38  ;;  %v13435_v45 = vcombine.low %v399_v34, %v403_v35 }
  0x37   :  { %v155_v41 = vld [vmem:[%s20933_s1 + $0x360] sm:$0xff]  ;;  %9840 = vmatpush1.bf16.msra.mxu1 %v13179_v44 }
  0x38   :  { %v407_v42 = vld [vmem:[%s20933_s1 + $0xb40] sm:$0xff]  ;;  %v13188_v46 = vcombine.high %v151_v40, %v155_v41  ;;  %9925 = vmatprep.subr.bf16.mxu0 %v13436_v39  ;;  %v13187_v52 = vcombine.low %v151_v40, %v155_v41 }
  0x39   :  { %v411_v43 = vld [vmem:[%s20933_s1 + $0xb60] sm:$0xff]  ;;  %9926 = vmatpush1.bf16.msra.mxu0 %v13435_v45 }
  0x3a   :  { %v13444_v47 = vcombine.high %v407_v42, %v411_v43  ;;  %v159_v48 = vld [vmem:[%s20933_s1 + $0x380] sm:$0xff]  ;;  %9841 = vmatprep.subr.bf16.mxu1 %v13188_v46  ;;  %v13443_v53 = vcombine.low %v407_v42, %v411_v43 }
  0x3b   :  { %v163_v49 = vld [vmem:[%s20933_s1 + $0x3a0] sm:$0xff]  ;;  %9842 = vmatpush1.bf16.msra.mxu1 %v13187_v52 }
  0x3c   :  { %v415_v50 = vld [vmem:[%s20933_s1 + $0xb80] sm:$0xff]  ;;  %v13196_v54 = vcombine.high %v159_v48, %v163_v49  ;;  %9927 = vmatprep.subr.bf16.mxu0 %v13444_v47  ;;  %v13195_v61 = vcombine.low %v159_v48, %v163_v49 }
  0x3d   :  { %v419_v51 = vld [vmem:[%s20933_s1 + $0xba0] sm:$0xff]  ;;  %9928 = vmatpush1.bf16.msra.mxu0 %v13443_v53 }
  0x3e   :  { %v13452_v55 = vcombine.high %v415_v50, %v419_v51  ;;  %v167_v56 = vld [vmem:[%s20933_s1 + $0x3c0] sm:$0xff]  ;;  %9843 = vmatprep.subr.bf16.mxu1 %v13196_v54  ;;  %v13451_v62 = vcombine.low %v415_v50, %v419_v51 }
  0x3f   :  { %v171_v57 = vld [vmem:[%s20933_s1 + $0x3e0] sm:$0xff]  ;;  %9844 = vmatpush1.bf16.msra.mxu1 %v13195_v61 }
  0x40   :  { %v423_v59 = vld [vmem:[%s20933_s1 + $0xbc0] sm:$0xff]  ;;  %v13204_v63 = vcombine.high %v167_v56, %v171_v57  ;;  %9929 = vmatprep.subr.bf16.mxu0 %v13452_v55  ;;  %v13203_v5 = vcombine.low %v167_v56, %v171_v57 }
  0x41   :  { %v427_v60 = vld [vmem:[%s20933_s1 + $0xbe0] sm:$0xff]  ;;  %9930 = vmatpush1.bf16.msra.mxu0 %v13451_v62 }
  0x42   :  { %v13460_v0 = vcombine.high %v423_v59, %v427_v60  ;;  %v175_v1 = vld [vmem:[%s20933_s1 + $0x400] sm:$0xff]  ;;  %9845 = vmatprep.subr.bf16.mxu1 %v13204_v63  ;;  %v13459_v6 = vcombine.low %v423_v59, %v427_v60 }
  0x43   :  { %v179_v2 = vld [vmem:[%s20933_s1 + $0x420] sm:$0xff]  ;;  %9846 = vmatpush1.bf16.msra.mxu1 %v13203_v5 }
  0x44   :  { %v431_v3 = vld [vmem:[%s20933_s1 + $0xc00] sm:$0xff]  ;;  %v13212_v7 = vcombine.high %v175_v1, %v179_v2  ;;  %9931 = vmatprep.subr.bf16.mxu0 %v13460_v0  ;;  %v13211_v14 = vcombine.low %v175_v1, %v179_v2 }
  0x45   :  { %v435_v4 = vld [vmem:[%s20933_s1 + $0xc20] sm:$0xff]  ;;  %9932 = vmatpush1.bf16.msra.mxu0 %v13459_v6 }
  0x46   :  { %v13468_v8 = vcombine.high %v431_v3, %v435_v4  ;;  %v183_v9 = vld [vmem:[%s20933_s1 + $0x440] sm:$0xff]  ;;  %9858 = vmatprep.subr.bf16.mxu1 %v13212_v7  ;;  %v13467_v16 = vcombine.low %v431_v3, %v435_v4 }
  0x47   :  { %v187_v10 = vld [vmem:[%s20933_s1 + $0x460] sm:$0xff] }
  0x48   :  { %v15593_v11 = vld [vmem:[%s20934_s0] ss:$100 sps:$4 sm:$0xff]   ;;  %v13220_v17 = vcombine.high %v183_v9, %v187_v10  ;;  %9944 = vmatprep.subr.bf16.mxu0 %v13468_v8  ;;  %9934 = vmatmul.mubr.bf16.vlgmr.msra.gmra.mrb[0].mxu0 %v15043_v15  ;;  %v13219_v25 = vcombine.low %v183_v9, %v187_v10 }
  0x49   :  { %v439_v12 = vld [vmem:[%s20933_s1 + $0xc40] sm:$0xff]  ;;  %9848 = vmatmul.mubr.bf16.vlgmr.msra.gmra.mrb[0].mxu1 %v15593_v11  ;;  %9945 = vmatpush1.bf16.msra.mxu0 %v13467_v16 }
  0x4a   :  { %v443_v13 = vld [vmem:[%s20933_s1 + $0xc60] sm:$0xff]  ;;  %9859 = vmatpush1.bf16.msra.mxu1 %v13211_v14  ;;  %9890 = vmatprep.mubr.bf16.mxu1 %v15613_v21 }
  0x4b   :  { %v13476_v18 = vcombine.high %v439_v12, %v443_v13  ;;  %v191_v19 = vld [vmem:[%s20933_s1 + $0x480] sm:$0xff]  ;;  %9860 = vmatprep.subr.bf16.mxu1 %v13220_v17  ;;  %v13475_v26 = vcombine.low %v439_v12, %v443_v13 }
  0x4c   :  { %v195_v20 = vld [vmem:[%s20933_s1 + $0x4a0] sm:$0xff] }
  0x4d   :  { %v447_v22 = vld [vmem:[%s20933_s1 + $0xc80] sm:$0xff]  ;;  %v13228_v27 = vcombine.high %v191_v19, %v195_v20  ;;  %9946 = vmatprep.subr.bf16.mxu0 %v13476_v18  ;;  %v13227_v33 = vcombine.low %v191_v19, %v195_v20 }
  0x4e   :  { %v451_v23 = vld [vmem:[%s20933_s1 + $0xca0] sm:$0xff]  ;;  %9861 = vmatpush1.bf16.msra.mxu1 %v13219_v25  ;;  %9947 = vmatpush1.bf16.msra.mxu0 %v13475_v26 }
  0x4f   :  { %v15047_v24 = vld [vmem:[%s20934_s0 + $0x1c] ss:$100 sps:$4 sm:$0xff]   ;;  %v13484_v28 = vcombine.high %v447_v22, %v451_v23  ;;  %9862 = vmatprep.subr.bf16.mxu1 %v13228_v27  ;;  %v13483_v34 = vcombine.low %v447_v22, %v451_v23 }
  0x50   :  { %v199_v29 = vld [vmem:[%s20933_s1 + $0x4c0] sm:$0xff]  ;;  %9976 = vmatprep.mubr.bf16.mxu0 %v15047_v24 }
  0x51   :  { %v203_v30 = vld [vmem:[%s20933_s1 + $0x4e0] sm:$0xff]  ;;  %9948 = vmatprep.subr.bf16.mxu0 %v13484_v28 }
  0x52   :  { %v455_v31 = vld [vmem:[%s20933_s1 + $0xcc0] sm:$0xff]  ;;  %v13236_v35 = vcombine.high %v199_v29, %v203_v30  ;;  %9863 = vmatpush1.bf16.msra.mxu1 %v13227_v33  ;;  %v13235_v41 = vcombine.low %v199_v29, %v203_v30  ;;  %9949 = vmatpush1.bf16.msra.mxu0 %v13483_v34 }
  0x53   :  { %v459_v32 = vld [vmem:[%s20933_s1 + $0xce0] sm:$0xff] }
  0x54   :  { %v207_v36 = vld [vmem:[%s20933_s1 + $0x500] sm:$0xff]  ;;  %v13492_v38 = vcombine.high %v455_v31, %v459_v32  ;;  %9864 = vmatprep.subr.bf16.mxu1 %v13236_v35  ;;  %v13491_v42 = vcombine.low %v455_v31, %v459_v32 }
  0x55   :  { %v211_v37 = vld [vmem:[%s20933_s1 + $0x520] sm:$0xff] }
  0x56   :  { %v463_v39 = vld [vmem:[%s20933_s1 + $0xd00] sm:$0xff]  ;;  %v13244_v43 = vcombine.high %v207_v36, %v211_v37  ;;  %9950 = vmatprep.subr.bf16.mxu0 %v13492_v38  ;;  %9865 = vmatpush1.bf16.msra.mxu1 %v13235_v41  ;;  %v13243_v49 = vcombine.low %v207_v36, %v211_v37 }
  0x57   :  { %v467_v40 = vld [vmem:[%s20933_s1 + $0xd20] sm:$0xff]  ;;  %9951 = vmatpush1.bf16.msra.mxu0 %v13491_v42 }
  0x58   :  { %v215_v44 = vld [vmem:[%s20933_s1 + $0x540] sm:$0xff]  ;;  %v13500_v47 = vcombine.high %v463_v39, %v467_v40  ;;  %9866 = vmatprep.subr.bf16.mxu1 %v13244_v43  ;;  %v13499_v50 = vcombine.low %v463_v39, %v467_v40 }
  0x59   :  { %v219_v45 = vld [vmem:[%s20933_s1 + $0x560] sm:$0xff] }
  0x5a   :  { %v471_v46 = vld [vmem:[%s20933_s1 + $0xd40] sm:$0xff]  ;;  %v13252_v51 = vcombine.high %v215_v44, %v219_v45  ;;  %9952 = vmatprep.subr.bf16.mxu0 %v13500_v47  ;;  %9867 = vmatpush1.bf16.msra.mxu1 %v13243_v49  ;;  %v13251_v57 = vcombine.low %v215_v44, %v219_v45 }
  0x5b   :  { %v475_v48 = vld [vmem:[%s20933_s1 + $0xd60] sm:$0xff]  ;;  %9953 = vmatpush1.bf16.msra.mxu0 %v13499_v50 }
  0x5c   :  { %v13508_v52 = vcombine.high %v471_v46, %v475_v48  ;;  %v223_v53 = vld [vmem:[%s20933_s1 + $0x580] sm:$0xff]  ;;  %9868 = vmatprep.subr.bf16.mxu1 %v13252_v51  ;;  %v13507_v59 = vcombine.low %v471_v46, %v475_v48 }
  0x5d   :  { %v227_v54 = vld [vmem:[%s20933_s1 + $0x5a0] sm:$0xff] }
  0x5e   :  { %v479_v55 = vld [vmem:[%s20933_s1 + $0xd80] sm:$0xff]  ;;  %v13260_v60 = vcombine.high %v223_v53, %v227_v54  ;;  %9954 = vmatprep.subr.bf16.mxu0 %v13508_v52  ;;  %9869 = vmatpush1.bf16.msra.mxu1 %v13251_v57  ;;  %v13259_v2 = vcombine.low %v223_v53, %v227_v54 }
  0x5f   :  { %v483_v56 = vld [vmem:[%s20933_s1 + $0xda0] sm:$0xff]  ;;  %9955 = vmatpush1.bf16.msra.mxu0 %v13507_v59 }
  0x60   :  { %v13516_v61 = vcombine.high %v479_v55, %v483_v56  ;;  %v231_v62 = vld [vmem:[%s20933_s1 + $0x5c0] sm:$0xff]  ;;  %9870 = vmatprep.subr.bf16.mxu1 %v13260_v60  ;;  %v13515_v3 = vcombine.low %v479_v55, %v483_v56 }
  0x61   :  { %v235_v63 = vld [vmem:[%s20933_s1 + $0x5e0] sm:$0xff] }
  0x62   :  { %v487_v0 = vld [vmem:[%s20933_s1 + $0xdc0] sm:$0xff]  ;;  %v13268_v4 = vcombine.high %v231_v62, %v235_v63  ;;  %9956 = vmatprep.subr.bf16.mxu0 %v13516_v61  ;;  %9871 = vmatpush1.bf16.msra.mxu1 %v13259_v2  ;;  %v13267_v10 = vcombine.low %v231_v62, %v235_v63 }
  0x63   :  { %v491_v1 = vld [vmem:[%s20933_s1 + $0xde0] sm:$0xff]  ;;  %9957 = vmatpush1.bf16.msra.mxu0 %v13515_v3 }
  0x64   :  { %v13524_v5 = vcombine.high %v487_v0, %v491_v1  ;;  %v239_v6 = vld [vmem:[%s20933_s1 + $0x600] sm:$0xff]  ;;  %9872 = vmatprep.subr.bf16.mxu1 %v13268_v4  ;;  %v13523_v12 = vcombine.low %v487_v0, %v491_v1 }
  0x65   :  { %v243_v7 = vld [vmem:[%s20933_s1 + $0x620] sm:$0xff] }
  0x66   :  { %v495_v8 = vld [vmem:[%s20933_s1 + $0xe00] sm:$0xff]  ;;  %v13276_v13 = vcombine.high %v239_v6, %v243_v7  ;;  %9958 = vmatprep.subr.bf16.mxu0 %v13524_v5  ;;  %9873 = vmatpush1.bf16.msra.mxu1 %v13267_v10  ;;  %v13275_v19 = vcombine.low %v239_v6, %v243_v7  ;;  %v52_v10 = vld [vmem:[%s20933_s1 + $0x28] sm:$0xff] }
  0x67   :  { %v499_v9 = vld [vmem:[%s20933_s1 + $0xe20] sm:$0xff]  ;;  %9959 = vmatpush1.bf16.msra.mxu0 %v13523_v12 }
  0x68   :  { %v13532_v14 = vcombine.high %v495_v8, %v499_v9  ;;  %v247_v15 = vld [vmem:[%s20933_s1 + $0x640] sm:$0xff]  ;;  %9874 = vmatprep.subr.bf16.mxu1 %v13276_v13  ;;  %v13531_v20 = vcombine.low %v495_v8, %v499_v9  ;;  %v48_v9 = vld [vmem:[%s20933_s1 + $0x8] sm:$0xff] }
  0x69   :  { %v251_v16 = vld [vmem:[%s20933_s1 + $0x660] sm:$0xff] }
  0x6a   :  { %v503_v17 = vld [vmem:[%s20933_s1 + $0xe40] sm:$0xff]  ;;  %v13284_v22 = vcombine.high %v247_v15, %v251_v16  ;;  %9960 = vmatprep.subr.bf16.mxu0 %v13532_v14  ;;  %9875 = vmatpush1.bf16.msra.mxu1 %v13275_v19  ;;  %v13283_v28 = vcombine.low %v247_v15, %v251_v16  ;;  %v13086_v16 = vcombine.high %v48_v9, %v52_v10  ;;  %v60_v19 = vld [vmem:[%s20933_s1 + $0x68] sm:$0xff] }
  0x6b   :  { %v507_v18 = vld [vmem:[%s20933_s1 + $0xe60] sm:$0xff]  ;;  %9961 = vmatpush1.bf16.msra.mxu0 %v13531_v20  ;;  %v15803_v20 = vld [vmem:[%s20934_s0 + $0x8] ss:$100 sps:$4 sm:$0xff]  }
  0x6c   :  { %v13540_v23 = vcombine.high %v503_v17, %v507_v18  ;;  %v255_v24 = vld [vmem:[%s20933_s1 + $0x680] sm:$0xff]  ;;  %9876 = vmatprep.subr.bf16.mxu1 %v13284_v22  ;;  %v13539_v29 = vcombine.low %v503_v17, %v507_v18  ;;  %v56_v18 = vld [vmem:[%s20933_s1 + $0x48] sm:$0xff] }
  0x6d   :  { %v259_v25 = vld [vmem:[%s20933_s1 + $0x6a0] sm:$0xff] }
  0x6e   :  { %v511_v26 = vld [vmem:[%s20933_s1 + $0xe80] sm:$0xff]  ;;  %v13292_v30 = vcombine.high %v255_v24, %v259_v25  ;;  %9962 = vmatprep.subr.bf16.mxu0 %v13540_v23  ;;  %9877 = vmatpush1.bf16.msra.mxu1 %v13283_v28  ;;  %v13291_v36 = vcombine.low %v255_v24, %v259_v25  ;;  %v13085_v24 = vcombine.low %v48_v9, %v52_v10  ;;  %v15049_v25 = vld [vmem:[%s20934_s0 + $0x18] ss:$100 sps:$4 sm:$0xff]  }
  0x6f   :  { %v515_v27 = vld [vmem:[%s20933_s1 + $0xea0] sm:$0xff]  ;;  %9963 = vmatpush1.bf16.msra.mxu0 %v13539_v29  ;;  %v64_v29 = vld [vmem:[%s20933_s1 + $0x88] sm:$0xff] }
  0x70   :  { %v13548_v31 = vcombine.high %v511_v26, %v515_v27  ;;  %v263_v32 = vld [vmem:[%s20933_s1 + $0x6c0] sm:$0xff]  ;;  %9878 = vmatprep.subr.bf16.mxu1 %v13292_v30  ;;  %v13547_v37 = vcombine.low %v511_v26, %v515_v27  ;;  %v13094_v27 = vcombine.high %v56_v18, %v60_v19  ;;  %v68_v30 = vld [vmem:[%s20933_s1 + $0xa8] sm:$0xff] }
  0x71   :  { %v267_v33 = vld [vmem:[%s20933_s1 + $0x6e0] sm:$0xff] }
  0x72   :  { %v519_v34 = vld [vmem:[%s20933_s1 + $0xec0] sm:$0xff]  ;;  %v13300_v38 = vcombine.high %v263_v32, %v267_v33  ;;  %9964 = vmatprep.subr.bf16.mxu0 %v13548_v31  ;;  %9879 = vmatpush1.bf16.msra.mxu1 %v13291_v36  ;;  %v13299_v44 = vcombine.low %v263_v32, %v267_v33  ;;  %v13102_v36 = vcombine.high %v64_v29, %v68_v30 }
  0x73   :  { %v523_v35 = vld [vmem:[%s20933_s1 + $0xee0] sm:$0xff]  ;;  %9965 = vmatpush1.bf16.msra.mxu0 %v13547_v37 }
  0x74   :  { %v13556_v39 = vcombine.high %v519_v34, %v523_v35  ;;  %v271_v40 = vld [vmem:[%s20933_s1 + $0x700] sm:$0xff]  ;;  %9880 = vmatprep.subr.bf16.mxu1 %v13300_v38  ;;  %v13555_v45 = vcombine.low %v519_v34, %v523_v35  ;;  %v13093_v34 = vcombine.low %v56_v18, %v60_v19  ;;  %v72_v38 = vld [vmem:[%s20933_s1 + $0xc8] sm:$0xff] }
  0x75   :  { %v275_v41 = vld [vmem:[%s20933_s1 + $0x720] sm:$0xff] }
  0x76   :  { %v527_v42 = vld [vmem:[%s20933_s1 + $0xf00] sm:$0xff]  ;;  %v13308_v46 = vcombine.high %v271_v40, %v275_v41  ;;  %9966 = vmatprep.subr.bf16.mxu0 %v13556_v39  ;;  %9881 = vmatpush1.bf16.msra.mxu1 %v13299_v44  ;;  %v13307_v52 = vcombine.low %v271_v40, %v275_v41  ;;  %v76_v39 = vld [vmem:[%s20933_s1 + $0xe8] sm:$0xff] }
  0x77   :  { %v531_v43 = vld [vmem:[%s20933_s1 + $0xf20] sm:$0xff]  ;;  %9967 = vmatpush1.bf16.msra.mxu0 %v13555_v45  ;;  %v13110_v44 = vcombine.high %v72_v38, %v76_v39 }
  0x78   :  { %v13564_v47 = vcombine.high %v527_v42, %v531_v43  ;;  %v279_v48 = vld [vmem:[%s20933_s1 + $0x740] sm:$0xff]  ;;  %9882 = vmatprep.subr.bf16.mxu1 %v13308_v46  ;;  %v13563_v53 = vcombine.low %v527_v42, %v531_v43  ;;  %v13101_v42 = vcombine.low %v64_v29, %v68_v30  ;;  %v80_v46 = vld [vmem:[%s20933_s1 + $0x108] sm:$0xff] }
  0x79   :  { %v283_v49 = vld [vmem:[%s20933_s1 + $0x760] sm:$0xff] }
  0x7a   :  { %v535_v50 = vld [vmem:[%s20933_s1 + $0xf40] sm:$0xff]  ;;  %v13316_v54 = vcombine.high %v279_v48, %v283_v49  ;;  %9968 = vmatprep.subr.bf16.mxu0 %v13564_v47  ;;  %9883 = vmatpush1.bf16.msra.mxu1 %v13307_v52  ;;  %v13315_v61 = vcombine.low %v279_v48, %v283_v49  ;;  %v84_v47 = vld [vmem:[%s20933_s1 + $0x128] sm:$0xff]  ;;  %v13109_v49 = vcombine.low %v72_v38, %v76_v39 }
  0x7b   :  { %v539_v51 = vld [vmem:[%s20933_s1 + $0xf60] sm:$0xff]  ;;  %9969 = vmatpush1.bf16.msra.mxu0 %v13563_v53  ;;  %v88_v53 = vld [vmem:[%s20933_s1 + $0x148] sm:$0xff] }
  0x7c   :  { %v13572_v55 = vcombine.high %v535_v50, %v539_v51  ;;  %v287_v56 = vld [vmem:[%s20933_s1 + $0x780] sm:$0xff]  ;;  %9884 = vmatprep.subr.bf16.mxu1 %v13316_v54  ;;  %v13571_v62 = vcombine.low %v535_v50, %v539_v51  ;;  %v13118_v51 = vcombine.high %v80_v46, %v84_v47  ;;  %v92_v54 = vld [vmem:[%s20933_s1 + $0x168] sm:$0xff] }
  0x7d   :  { %v291_v57 = vld [vmem:[%s20933_s1 + $0x7a0] sm:$0xff] }
  0x7e   :  { %v543_v59 = vld [vmem:[%s20933_s1 + $0xf80] sm:$0xff]  ;;  %v13324_v63 = vcombine.high %v287_v56, %v291_v57  ;;  %9970 = vmatprep.subr.bf16.mxu0 %v13572_v55  ;;  %9885 = vmatpush1.bf16.msra.mxu1 %v13315_v61  ;;  %v13323_v5 = vcombine.low %v287_v56, %v291_v57  ;;  %v13117_v57 = vcombine.low %v80_v46, %v84_v47 }
  0x7f   :  { %v547_v60 = vld [vmem:[%s20933_s1 + $0xfa0] sm:$0xff]  ;;  %9971 = vmatpush1.bf16.msra.mxu0 %v13571_v62  ;;  %v96_v62 = vld [vmem:[%s20933_s1 + $0x188] sm:$0xff] }
  0x80   :  { %v13580_v0 = vcombine.high %v543_v59, %v547_v60  ;;  %v295_v1 = vld [vmem:[%s20933_s1 + $0x7c0] sm:$0xff]  ;;  %9886 = vmatprep.subr.bf16.mxu1 %v13324_v63  ;;  %v13579_v6 = vcombine.low %v543_v59, %v547_v60  ;;  %v13126_v60 = vcombine.high %v88_v53, %v92_v54  ;;  %v100_v63 = vld [vmem:[%s20933_s1 + $0x1a8] sm:$0xff] }
  0x81   :  { %v299_v2 = vld [vmem:[%s20933_s1 + $0x7e0] sm:$0xff]  ;;  %v13133_v10 = vcombine.low %v96_v62, %v100_v63 }
  0x82   :  { %v551_v3 = vld [vmem:[%s20933_s1 + $0xfc0] sm:$0xff]  ;;  %v13332_v7 = vcombine.high %v295_v1, %v299_v2  ;;  %9972 = vmatprep.subr.bf16.mxu0 %v13580_v0  ;;  %9887 = vmatpush1.bf16.msra.mxu1 %v13323_v5  ;;  %v13331_v14 = vcombine.low %v295_v1, %v299_v2  ;;  %v13125_v2 = vcombine.low %v88_v53, %v92_v54 }
  0x83   :  { %v555_v4 = vld [vmem:[%s20933_s1 + $0xfe0] sm:$0xff]  ;;  %9973 = vmatpush1.bf16.msra.mxu0 %v13579_v6  ;;  %v104_v6 = vld [vmem:[%s20933_s1 + $0x1c8] sm:$0xff] }
  0x84   :  { %v13588_v8 = vcombine.high %v551_v3, %v555_v4  ;;  %v559_v12 = vld [vmem:[%s20933_s1 + $0x1000] sm:$0xff]  ;;  %9888 = vmatprep.subr.bf16.mxu1 %v13332_v7  ;;  %v13587_v15 = vcombine.low %v551_v3, %v555_v4  ;;  %v13134_v4 = vcombine.high %v96_v62, %v100_v63  ;;  %v108_v7 = vld [vmem:[%s20933_s1 + $0x1e8] sm:$0xff] }
  0x85   :  { %v563_v13 = vld [vmem:[%s20933_s1 + $0x1020] sm:$0xff]  ;;  %v13141_v19 = vcombine.low %v104_v6, %v108_v7 }
  0x86   :  { %9974 = vmatprep.subr.bf16.mxu0 %v13588_v8  ;;  %v13596_v17 = vcombine.high %v559_v12, %v563_v13  ;;  %v567_v22 = vld [vmem:[%s20933_s1 + $0x1040] sm:$0xff]  ;;  %9889 = vmatpush1.bf16.msra.mxu1 %v13331_v14  ;;  %v13595_v26 = vcombine.low %v559_v12, %v563_v13  ;;  %v13142_v13 = vcombine.high %v104_v6, %v108_v7 }
  0x87   :  { %v571_v23 = vld [vmem:[%s20933_s1 + $0x1060] sm:$0xff]  ;;  %9975 = vmatpush1.bf16.msra.mxu0 %v13587_v15  ;;  %10374 = vmatprep.subr.bf16.mxu1 %v13086_v16  ;;  %v112_v15 = vld [vmem:[%s20933_s1 + $0x208] sm:$0xff] }
  0x88   :  { %9987 = vmatprep.subr.bf16.mxu0 %v13596_v17  ;;  %v13604_v28 = vcombine.high %v567_v22, %v571_v23  ;;  %v15050_v31 = vld [vmem:[%s20934_s0 + $0x24] ss:$100 sps:$4 sm:$0xff]   ;;  %v13603_v35 = vcombine.low %v567_v22, %v571_v23 }
  0x89   :  { %9891 = vmatmul.mubr.bf16.vlgmr.msra.gmra.mrb[0].mxu1 %v15803_v20  ;;  %v575_v32 = vld [vmem:[%s20933_s1 + $0x1080] sm:$0xff]  ;;  %v116_v16 = vld [vmem:[%s20933_s1 + $0x228] sm:$0xff] }
  0x8a   :  { %v579_v33 = vld [vmem:[%s20933_s1 + $0x10a0] sm:$0xff]  ;;  %9977 = vmatmul.mubr.bf16.vlgmr.msra.gmra.mrb[0].mxu0 %v15049_v25  ;;  %10375 = vmatpush1.bf16.msra.mxu1 %v13085_v24  ;;  %v13150_v23 = vcombine.high %v112_v15, %v116_v16  ;;  %v120_v25 = vld [vmem:[%s20933_s1 + $0x248] sm:$0xff]  ;;  %v13149_v29 = vcombine.low %v112_v15, %v116_v16 }
  0x8b   :  { %9988 = vmatpush1.bf16.msra.mxu0 %v13595_v26  ;;  %10376 = vmatprep.subr.bf16.mxu1 %v13094_v27  ;;  %v13612_v37 = vcombine.high %v575_v32, %v579_v33  ;;  %v583_v40 = vld [vmem:[%s20933_s1 + $0x10c0] sm:$0xff]  ;;  %v13611_v43 = vcombine.low %v575_v32, %v579_v33  ;;  %v124_v26 = vld [vmem:[%s20933_s1 + $0x268] sm:$0xff] }
  0x8c   :  { %9989 = vmatprep.subr.bf16.mxu0 %v13604_v28  ;;  %10019 = vmatprep.mubr.bf16.mxu0 %v15050_v31  ;;  %v587_v41 = vld [vmem:[%s20933_s1 + $0x10e0] sm:$0xff]  ;;  %v13158_v31 = vcombine.high %v120_v25, %v124_v26  ;;  %v128_v33 = vld [vmem:[%s20933_s1 + $0x288] sm:$0xff] }
  0x8d   :  { %10406 = vmatprep.mubr.bf16.mxu1 %v15470_v58  ;;  %v13620_v45 = vcombine.high %v583_v40, %v587_v41  ;;  %v591_v58 = vld [vmem:[%s20933_s1 + $0x1100] sm:$0xff]  ;;  %v13619_v50 = vcombine.low %v583_v40, %v587_v41  ;;  %v136_v41 = vld [vmem:[%s20933_s1 + $0x2c8] sm:$0xff] }
  0x8e   :  { %10377 = vmatpush1.bf16.msra.mxu1 %v13093_v34  ;;  %v595_v48 = vld [vmem:[%s20933_s1 + $0x1120] sm:$0xff]  ;;  %v132_v34 = vld [vmem:[%s20933_s1 + $0x2a8] sm:$0xff] }
  0x8f   :  { %9990 = vmatpush1.bf16.msra.mxu0 %v13603_v35  ;;  %10378 = vmatprep.subr.bf16.mxu1 %v13102_v36  ;;  %v13628_v52 = vcombine.high %v591_v58, %v595_v48  ;;  %v599_v55 = vld [vmem:[%s20933_s1 + $0x1140] sm:$0xff]  ;;  %v13627_v59 = vcombine.low %v591_v58, %v595_v48  ;;  %v13166_v39 = vcombine.high %v128_v33, %v132_v34  ;;  %v144_v48 = vld [vmem:[%s20933_s1 + $0x308] sm:$0xff] }
  0x90   :  { %9991 = vmatprep.subr.bf16.mxu0 %v13612_v37  ;;  %v603_v56 = vld [vmem:[%s20933_s1 + $0x1160] sm:$0xff]  ;;  %v13157_v37 = vcombine.low %v120_v25, %v124_v26 }
  0x91   :  { %v13636_v61 = vcombine.high %v599_v55, %v603_v56  ;;  %v607_v0 = vld [vmem:[%s20933_s1 + $0x1180] sm:$0xff]  ;;  %v13635_v3 = vcombine.low %v599_v55, %v603_v56  ;;  %v152_v56 = vld [vmem:[%s20933_s1 + $0x348] sm:$0xff] }
  0x92   :  { %10379 = vmatpush1.bf16.msra.mxu1 %v13101_v42  ;;  %v611_v1 = vld [vmem:[%s20933_s1 + $0x11a0] sm:$0xff]  ;;  %v140_v42 = vld [vmem:[%s20933_s1 + $0x2e8] sm:$0xff] }
  0x93   :  { %9992 = vmatpush1.bf16.msra.mxu0 %v13611_v43  ;;  %10380 = vmatprep.subr.bf16.mxu1 %v13110_v44  ;;  %v13644_v5 = vcombine.high %v607_v0, %v611_v1  ;;  %v615_v8 = vld [vmem:[%s20933_s1 + $0x11c0] sm:$0xff]  ;;  %v13643_v12 = vcombine.low %v607_v0, %v611_v1  ;;  %v13174_v47 = vcombine.high %v136_v41, %v140_v42  ;;  %v160_v1 = vld [vmem:[%s20933_s1 + $0x388] sm:$0xff] }
  0x94   :  { %9993 = vmatprep.subr.bf16.mxu0 %v13620_v45  ;;  %v619_v9 = vld [vmem:[%s20933_s1 + $0x11e0] sm:$0xff]  ;;  %v13165_v45 = vcombine.low %v128_v33, %v132_v34 }
  0x95   :  { %v13652_v14 = vcombine.high %v615_v8, %v619_v9  ;;  %v623_v17 = vld [vmem:[%s20933_s1 + $0x1200] sm:$0xff]  ;;  %v13651_v22 = vcombine.low %v615_v8, %v619_v9  ;;  %v168_v9 = vld [vmem:[%s20933_s1 + $0x3c8] sm:$0xff] }
  0x96   :  { %10381 = vmatpush1.bf16.msra.mxu1 %v13109_v49  ;;  %v627_v18 = vld [vmem:[%s20933_s1 + $0x1220] sm:$0xff]  ;;  %v148_v49 = vld [vmem:[%s20933_s1 + $0x328] sm:$0xff] }
  0x97   :  { %9994 = vmatpush1.bf16.msra.mxu0 %v13619_v50  ;;  %10382 = vmatprep.subr.bf16.mxu1 %v13118_v51  ;;  %v13660_v24 = vcombine.high %v623_v17, %v627_v18  ;;  %v631_v27 = vld [vmem:[%s20933_s1 + $0x1240] sm:$0xff]  ;;  %v13659_v30 = vcombine.low %v623_v17, %v627_v18  ;;  %v13182_v54 = vcombine.high %v144_v48, %v148_v49  ;;  %v176_v18 = vld [vmem:[%s20933_s1 + $0x408] sm:$0xff] }
  0x98   :  { %9995 = vmatprep.subr.bf16.mxu0 %v13628_v52  ;;  %v635_v28 = vld [vmem:[%s20933_s1 + $0x1260] sm:$0xff]  ;;  %v13173_v52 = vcombine.low %v136_v41, %v140_v42 }
  0x99   :  { %v13668_v32 = vcombine.high %v631_v27, %v635_v28  ;;  %v639_v35 = vld [vmem:[%s20933_s1 + $0x1280] sm:$0xff]  ;;  %v13667_v38 = vcombine.low %v631_v27, %v635_v28  ;;  %v184_v28 = vld [vmem:[%s20933_s1 + $0x448] sm:$0xff] }
  0x9a   :  { %10383 = vmatpush1.bf16.msra.mxu1 %v13117_v57  ;;  %v643_v36 = vld [vmem:[%s20933_s1 + $0x12a0] sm:$0xff]  ;;  %v156_v57 = vld [vmem:[%s20933_s1 + $0x368] sm:$0xff] }
  0x9b   :  { %9996 = vmatpush1.bf16.msra.mxu0 %v13627_v59  ;;  %10384 = vmatprep.subr.bf16.mxu1 %v13126_v60  ;;  %v13676_v40 = vcombine.high %v639_v35, %v643_v36  ;;  %v647_v43 = vld [vmem:[%s20933_s1 + $0x12c0] sm:$0xff]  ;;  %v13675_v46 = vcombine.low %v639_v35, %v643_v36  ;;  %v13190_v63 = vcombine.high %v152_v56, %v156_v57 }
  0x9c   :  { %9997 = vmatprep.subr.bf16.mxu0 %v13636_v61  ;;  %v651_v44 = vld [vmem:[%s20933_s1 + $0x12e0] sm:$0xff]  ;;  %v13181_v61 = vcombine.low %v144_v48, %v148_v49 }
  0x9d   :  { %v13684_v58 = vcombine.high %v647_v43, %v651_v44  ;;  %v655_v50 = vld [vmem:[%s20933_s1 + $0x1300] sm:$0xff]  ;;  %v13683_v53 = vcombine.low %v647_v43, %v651_v44 }
  0x9e   :  { %10385 = vmatpush1.bf16.msra.mxu1 %v13125_v2  ;;  %v659_v51 = vld [vmem:[%s20933_s1 + $0x1320] sm:$0xff]  ;;  %v164_v2 = vld [vmem:[%s20933_s1 + $0x3a8] sm:$0xff] }
  0x9f   :  { %9998 = vmatpush1.bf16.msra.mxu0 %v13635_v3  ;;  %10386 = vmatprep.subr.bf16.mxu1 %v13134_v4  ;;  %v13692_v55 = vcombine.high %v655_v50, %v659_v51  ;;  %v663_v59 = vld [vmem:[%s20933_s1 + $0x1340] sm:$0xff]  ;;  %v13691_v62 = vcombine.low %v655_v50, %v659_v51  ;;  %v13198_v7 = vcombine.high %v160_v1, %v164_v2 }
  0xa0   :  { %9999 = vmatprep.subr.bf16.mxu0 %v13644_v5  ;;  %v667_v60 = vld [vmem:[%s20933_s1 + $0x1360] sm:$0xff]  ;;  %v13189_v5 = vcombine.low %v152_v56, %v156_v57 }
  0xa1   :  { %v13700_v0 = vcombine.high %v663_v59, %v667_v60  ;;  %v671_v3 = vld [vmem:[%s20933_s1 + $0x1380] sm:$0xff]  ;;  %v13699_v6 = vcombine.low %v663_v59, %v667_v60  ;;  %v216_v60 = vld [vmem:[%s20933_s1 + $0x548] sm:$0xff] }
  0xa2   :  { %10387 = vmatpush1.bf16.msra.mxu1 %v13133_v10  ;;  %v675_v4 = vld [vmem:[%s20933_s1 + $0x13a0] sm:$0xff]  ;;  %v172_v10 = vld [vmem:[%s20933_s1 + $0x3e8] sm:$0xff] }
  0xa3   :  { %10000 = vmatpush1.bf16.msra.mxu0 %v13643_v12  ;;  %10388 = vmatprep.subr.bf16.mxu1 %v13142_v13  ;;  %v13708_v8 = vcombine.high %v671_v3, %v675_v4  ;;  %v679_v12 = vld [vmem:[%s20933_s1 + $0x13c0] sm:$0xff]  ;;  %v13707_v15 = vcombine.low %v671_v3, %v675_v4  ;;  %v13206_v16 = vcombine.high %v168_v9, %v172_v10  ;;  %v224_v4 = vld [vmem:[%s20933_s1 + $0x588] sm:$0xff] }
  0xa4   :  { %10001 = vmatprep.subr.bf16.mxu0 %v13652_v14  ;;  %v683_v13 = vld [vmem:[%s20933_s1 + $0x13e0] sm:$0xff]  ;;  %v13197_v14 = vcombine.low %v160_v1, %v164_v2 }
  0xa5   :  { %v13716_v17 = vcombine.high %v679_v12, %v683_v13  ;;  %v13715_v25 = vcombine.low %v679_v12, %v683_v13  ;;  %v15052_v33 = vld [vmem:[%s20934_s0 + $0x20] ss:$100 sps:$4 sm:$0xff]   ;;  %v232_v13 = vld [vmem:[%s20933_s1 + $0x5c8] sm:$0xff] }
  0xa6   :  { %10389 = vmatpush1.bf16.msra.mxu1 %v13141_v19  ;;  %v180_v19 = vld [vmem:[%s20933_s1 + $0x428] sm:$0xff]  ;;  %v707_v41 = vld [vmem:[%s20933_s1 + $0x14a0] sm:$0xff] }
  0xa7   :  { %10002 = vmatpush1.bf16.msra.mxu0 %v13651_v22  ;;  %10390 = vmatprep.subr.bf16.mxu1 %v13150_v23  ;;  %v687_v22 = vld [vmem:[%s20933_s1 + $0x1400] sm:$0xff]  ;;  %v13214_v26 = vcombine.high %v176_v18, %v180_v19 }
  0xa8   :  { %10003 = vmatprep.subr.bf16.mxu0 %v13660_v24  ;;  %v691_v23 = vld [vmem:[%s20933_s1 + $0x1420] sm:$0xff]  ;;  %v13205_v24 = vcombine.low %v168_v9, %v172_v10 }
  0xa9   :  { %v13724_v27 = vcombine.high %v687_v22, %v691_v23  ;;  %v13723_v34 = vcombine.low %v687_v22, %v691_v23  ;;  %v240_v23 = vld [vmem:[%s20933_s1 + $0x608] sm:$0xff] }
  0xaa   :  { %10391 = vmatpush1.bf16.msra.mxu1 %v13149_v29  ;;  %v188_v29 = vld [vmem:[%s20933_s1 + $0x468] sm:$0xff] }
  0xab   :  { %10004 = vmatpush1.bf16.msra.mxu0 %v13659_v30  ;;  %10392 = vmatprep.subr.bf16.mxu1 %v13158_v31  ;;  %v695_v30 = vld [vmem:[%s20933_s1 + $0x1440] sm:$0xff]  ;;  %v13222_v35 = vcombine.high %v184_v28, %v188_v29  ;;  %v13221_v42 = vcombine.low %v184_v28, %v188_v29 }
  0xac   :  { %10005 = vmatprep.subr.bf16.mxu0 %v13668_v32  ;;  %v699_v31 = vld [vmem:[%s20933_s1 + $0x1460] sm:$0xff]  ;;  %v13213_v32 = vcombine.low %v176_v18, %v180_v19 }
  0xad   :  { %v13732_v36 = vcombine.high %v695_v30, %v699_v31  ;;  %v13731_v43 = vcombine.low %v695_v30, %v699_v31  ;;  %v248_v31 = vld [vmem:[%s20933_s1 + $0x648] sm:$0xff] }
  0xae   :  { %10393 = vmatpush1.bf16.msra.mxu1 %v13157_v37  ;;  %v192_v37 = vld [vmem:[%s20933_s1 + $0x488] sm:$0xff] }
  0xaf   :  { %10006 = vmatpush1.bf16.msra.mxu0 %v13667_v38  ;;  %10394 = vmatprep.subr.bf16.mxu1 %v13166_v39  ;;  %v196_v38 = vld [vmem:[%s20933_s1 + $0x4a8] sm:$0xff] }
  0xb0   :  { %10007 = vmatprep.subr.bf16.mxu0 %v13676_v40  ;;  %v15053_v39 = vld [vmem:[%s20934_s0 + $0x2c] ss:$100 sps:$4 sm:$0xff]   ;;  %v703_v40 = vld [vmem:[%s20933_s1 + $0x1480] sm:$0xff]  ;;  %v13230_v44 = vcombine.high %v192_v37, %v196_v38  ;;  %v13229_v48 = vcombine.low %v192_v37, %v196_v38 }
  0xb1   :  { %v13739_v49 = vcombine.low %v703_v40, %v707_v41 }
  0xb2   :  { %10395 = vmatpush1.bf16.msra.mxu1 %v13165_v45  ;;  %v13740_v45 = vcombine.high %v703_v40, %v707_v41  ;;  %v260_v40 = vld [vmem:[%s20933_s1 + $0x6a8] sm:$0xff]  ;;  %v767_v41 = vld [vmem:[%s20933_s1 + $0x1680] sm:$0xff] }
  0xb3   :  { %10008 = vmatpush1.bf16.msra.mxu0 %v13675_v46  ;;  %10396 = vmatprep.subr.bf16.mxu1 %v13174_v47  ;;  %v204_v46 = vld [vmem:[%s20933_s1 + $0x4e8] sm:$0xff]  ;;  %v711_v47 = vld [vmem:[%s20933_s1 + $0x14c0] sm:$0xff] }
  0xb4   :  { %10009 = vmatprep.subr.bf16.mxu0 %v13684_v58  ;;  %v715_v58 = vld [vmem:[%s20933_s1 + $0x14e0] sm:$0xff] }
  0xb5   :  { %v13748_v51 = vcombine.high %v711_v47, %v715_v58  ;;  %v13747_v56 = vcombine.low %v711_v47, %v715_v58  ;;  %v268_v47 = vld [vmem:[%s20933_s1 + $0x6e8] sm:$0xff]  ;;  %v775_v58 = vld [vmem:[%s20933_s1 + $0x16c0] sm:$0xff] }
  0xb6   :  { %10397 = vmatpush1.bf16.msra.mxu1 %v13173_v52  ;;  %v208_v52 = vld [vmem:[%s20933_s1 + $0x508] sm:$0xff] }
  0xb7   :  { %10010 = vmatpush1.bf16.msra.mxu0 %v13683_v53  ;;  %10398 = vmatprep.subr.bf16.mxu1 %v13182_v54  ;;  %v212_v53 = vld [vmem:[%s20933_s1 + $0x528] sm:$0xff]  ;;  %v723_v54 = vld [vmem:[%s20933_s1 + $0x1520] sm:$0xff] }
  0xb8   :  { %10011 = vmatprep.subr.bf16.mxu0 %v13692_v55  ;;  %v13246_v57 = vcombine.high %v208_v52, %v212_v53 }
  0xba   :  { %10399 = vmatpush1.bf16.msra.mxu1 %v13181_v61  ;;  %v220_v61 = vld [vmem:[%s20933_s1 + $0x568] sm:$0xff] }
  0xbb   :  { %10012 = vmatpush1.bf16.msra.mxu0 %v13691_v62  ;;  %10400 = vmatprep.subr.bf16.mxu1 %v13190_v63  ;;  %v727_v62 = vld [vmem:[%s20933_s1 + $0x1540] sm:$0xff]  ;;  %v13254_v2 = vcombine.high %v216_v60, %v220_v61 }
  0xbc   :  { %10013 = vmatprep.subr.bf16.mxu0 %v13700_v0  ;;  %v731_v63 = vld [vmem:[%s20933_s1 + $0x1560] sm:$0xff]  ;;  %v13245_v0 = vcombine.low %v208_v52, %v212_v53  ;;  %v272_v53 = vld [vmem:[%s20933_s1 + $0x708] sm:$0xff] }
  0xbd   :  { %v13764_v3 = vcombine.high %v727_v62, %v731_v63  ;;  %v13763_v9 = vcombine.low %v727_v62, %v731_v63  ;;  %v284_v62 = vld [vmem:[%s20933_s1 + $0x768] sm:$0xff]  ;;  %v791_v63 = vld [vmem:[%s20933_s1 + $0x1740] sm:$0xff] }
  0xbe   :  { %10401 = vmatpush1.bf16.msra.mxu1 %v13189_v5  ;;  %v228_v5 = vld [vmem:[%s20933_s1 + $0x5a8] sm:$0xff] }
  0xbf   :  { %10014 = vmatpush1.bf16.msra.mxu0 %v13699_v6  ;;  %10402 = vmatprep.subr.bf16.mxu1 %v13198_v7  ;;  %v735_v6 = vld [vmem:[%s20933_s1 + $0x1580] sm:$0xff]  ;;  %v13262_v10 = vcombine.high %v224_v4, %v228_v5 }
  0xc0   :  { %10015 = vmatprep.subr.bf16.mxu0 %v13708_v8  ;;  %v739_v7 = vld [vmem:[%s20933_s1 + $0x15a0] sm:$0xff]  ;;  %v13253_v8 = vcombine.low %v216_v60, %v220_v61  ;;  %v280_v61 = vld [vmem:[%s20933_s1 + $0x748] sm:$0xff] }
  0xc1   :  { %v13772_v12 = vcombine.high %v735_v6, %v739_v7  ;;  %v13771_v18 = vcombine.low %v735_v6, %v739_v7  ;;  %v292_v6 = vld [vmem:[%s20933_s1 + $0x7a8] sm:$0xff]  ;;  %v799_v7 = vld [vmem:[%s20933_s1 + $0x1780] sm:$0xff] }
  0xc2   :  { %10403 = vmatpush1.bf16.msra.mxu1 %v13197_v14  ;;  %v236_v14 = vld [vmem:[%s20933_s1 + $0x5e8] sm:$0xff] }
  0xc3   :  { %10016 = vmatpush1.bf16.msra.mxu0 %v13707_v15  ;;  %10404 = vmatprep.subr.bf16.mxu1 %v13206_v16  ;;  %v743_v15 = vld [vmem:[%s20933_s1 + $0x15c0] sm:$0xff]  ;;  %v13270_v19 = vcombine.high %v232_v13, %v236_v14 }
  0xc4   :  { %10017 = vmatprep.subr.bf16.mxu0 %v13716_v17  ;;  %v747_v16 = vld [vmem:[%s20933_s1 + $0x15e0] sm:$0xff]  ;;  %v13261_v17 = vcombine.low %v224_v4, %v228_v5  ;;  %v288_v5 = vld [vmem:[%s20933_s1 + $0x788] sm:$0xff] }
  0xc5   :  { %v13780_v22 = vcombine.high %v743_v15, %v747_v16  ;;  %v13779_v28 = vcombine.low %v743_v15, %v747_v16  ;;  %v300_v15 = vld [vmem:[%s20933_s1 + $0x7e8] sm:$0xff]  ;;  %v807_v16 = vld [vmem:[%s20933_s1 + $0x17c0] sm:$0xff] }
  0xc6   :  { %10405 = vmatpush1.bf16.msra.mxu1 %v13205_v24  ;;  %v244_v24 = vld [vmem:[%s20933_s1 + $0x628] sm:$0xff] }
  0xc7   :  { %10018 = vmatpush1.bf16.msra.mxu0 %v13715_v25  ;;  %10417 = vmatprep.subr.bf16.mxu1 %v13214_v26  ;;  %v751_v25 = vld [vmem:[%s20933_s1 + $0x1600] sm:$0xff]  ;;  %v13278_v29 = vcombine.high %v240_v23, %v244_v24 }
  0xc8   :  { %10030 = vmatprep.subr.bf16.mxu0 %v13724_v27  ;;  %v755_v26 = vld [vmem:[%s20933_s1 + $0x1620] sm:$0xff]  ;;  %v13269_v27 = vcombine.low %v232_v13, %v236_v14  ;;  %v296_v14 = vld [vmem:[%s20933_s1 + $0x7c8] sm:$0xff] }
  0xc9   :  { %10407 = vmatmul.mubr.bf16.vlgmr.msra.gmra.mrb[4].mxu1 %v15593_v11  ;;  %v200_v11 = vld [vmem:[%s20933_s1 + $0x4c8] sm:$0xff]  ;;  %v13788_v30 = vcombine.high %v751_v25, %v755_v26 }
  0xca   :  { %10020 = vmatmul.mubr.bf16.vlgmr.msra.gmra.mrb[0].mxu0 %v15052_v33  ;;  %10418 = vmatpush1.bf16.msra.mxu1 %v13213_v32  ;;  %v13238_v50 = vcombine.high %v200_v11, %v204_v46  ;;  %v13237_v55 = vcombine.low %v200_v11, %v204_v46  ;;  %v252_v32 = vld [vmem:[%s20933_s1 + $0x668] sm:$0xff]  ;;  %v759_v33 = vld [vmem:[%s20933_s1 + $0x1640] sm:$0xff] }
  0xcb   :  { %10031 = vmatpush1.bf16.msra.mxu0 %v13723_v34  ;;  %10419 = vmatprep.subr.bf16.mxu1 %v13222_v35  ;;  %v763_v34 = vld [vmem:[%s20933_s1 + $0x1660] sm:$0xff]  ;;  %v13277_v35 = vcombine.low %v240_v23, %v244_v24  ;;  %v13286_v37 = vcombine.high %v248_v31, %v252_v32  ;;  %v264_v46 = vld [vmem:[%s20933_s1 + $0x6c8] sm:$0xff] }
  0xcc   :  { %10032 = vmatprep.subr.bf16.mxu0 %v13732_v36  ;;  %10062 = vmatprep.mubr.bf16.mxu0 %v15053_v39  ;;  %v13787_v36 = vcombine.low %v751_v25, %v755_v26  ;;  %v13796_v38 = vcombine.high %v759_v33, %v763_v34  ;;  %v256_v39 = vld [vmem:[%s20933_s1 + $0x688] sm:$0xff]  ;;  %v815_v26 = vld [vmem:[%s20933_s1 + $0x1800] sm:$0xff] }
  0xcd   :  { %10449 = vmatprep.mubr.bf16.mxu1 %v15613_v21  ;;  %v719_v21 = vld [vmem:[%s20933_s1 + $0x1500] sm:$0xff]  ;;  %v304_v24 = vld [vmem:[%s20933_s1 + $0x808] sm:$0xff] }
  0xce   :  { %10420 = vmatpush1.bf16.msra.mxu1 %v13221_v42  ;;  %v13756_v59 = vcombine.high %v719_v21, %v723_v54  ;;  %v13755_v1 = vcombine.low %v719_v21, %v723_v54  ;;  %v771_v42 = vld [vmem:[%s20933_s1 + $0x16a0] sm:$0xff]  ;;  %v276_v21 = vld [vmem:[%s20933_s1 + $0x728] sm:$0xff] }
  0xcf   :  { %10033 = vmatpush1.bf16.msra.mxu0 %v13731_v43  ;;  %10421 = vmatprep.subr.bf16.mxu1 %v13230_v44  ;;  %v13285_v43 = vcombine.low %v248_v31, %v252_v32  ;;  %v13795_v44 = vcombine.low %v759_v33, %v763_v34  ;;  %v13804_v11 = vcombine.high %v767_v41, %v771_v42  ;;  %v783_v54 = vld [vmem:[%s20933_s1 + $0x1700] sm:$0xff]  ;;  %v308_v25 = vld [vmem:[%s20933_s1 + $0x828] sm:$0xff] }
  0xd0   :  { %10034 = vmatprep.subr.bf16.mxu0 %v13740_v45  ;;  %v13294_v45 = vcombine.high %v256_v39, %v260_v40  ;;  %v312_v32 = vld [vmem:[%s20933_s1 + $0x848] sm:$0xff]  ;;  %v823_v34 = vld [vmem:[%s20933_s1 + $0x1840] sm:$0xff] }
  0xd1   :  { %v316_v33 = vld [vmem:[%s20933_s1 + $0x868] sm:$0xff] }
  0xd2   :  { %10422 = vmatpush1.bf16.msra.mxu1 %v13229_v48  ;;  %v779_v48 = vld [vmem:[%s20933_s1 + $0x16e0] sm:$0xff] }
  0xd3   :  { %10035 = vmatpush1.bf16.msra.mxu0 %v13739_v49  ;;  %10423 = vmatprep.subr.bf16.mxu1 %v13238_v50  ;;  %v13293_v49 = vcombine.low %v256_v39, %v260_v40  ;;  %v13803_v50 = vcombine.low %v767_v41, %v771_v42  ;;  %v13812_v52 = vcombine.high %v775_v58, %v779_v48  ;;  %v320_v41 = vld [vmem:[%s20933_s1 + $0x888] sm:$0xff] }
  0xd4   :  { %10036 = vmatprep.subr.bf16.mxu0 %v13748_v51  ;;  %v13302_v51 = vcombine.high %v264_v46, %v268_v47  ;;  %v13350_v39 = vcombine.high %v312_v32, %v316_v33  ;;  %v324_v42 = vld [vmem:[%s20933_s1 + $0x8a8] sm:$0xff] }
  0xd6   :  { %10424 = vmatpush1.bf16.msra.mxu1 %v13237_v55  ;;  %v787_v55 = vld [vmem:[%s20933_s1 + $0x1720] sm:$0xff] }
  0xd7   :  { %10037 = vmatpush1.bf16.msra.mxu0 %v13747_v56  ;;  %10425 = vmatprep.subr.bf16.mxu1 %v13246_v57  ;;  %v13301_v56 = vcombine.low %v264_v46, %v268_v47  ;;  %v13811_v57 = vcombine.low %v775_v58, %v779_v48  ;;  %v13820_v60 = vcombine.high %v783_v54, %v787_v55  ;;  %v332_v48 = vld [vmem:[%s20933_s1 + $0x8e8] sm:$0xff] }
  0xd8   :  { %10038 = vmatprep.subr.bf16.mxu0 %v13756_v59  ;;  %v13310_v59 = vcombine.high %v272_v53, %v276_v21  ;;  %v13358_v47 = vcombine.high %v320_v41, %v324_v42 }
  0xda   :  { %10426 = vmatpush1.bf16.msra.mxu1 %v13245_v0  ;;  %v795_v0 = vld [vmem:[%s20933_s1 + $0x1760] sm:$0xff] }
  0xdb   :  { %10039 = vmatpush1.bf16.msra.mxu0 %v13755_v1  ;;  %10427 = vmatprep.subr.bf16.mxu1 %v13254_v2  ;;  %v13309_v1 = vcombine.low %v272_v53, %v276_v21  ;;  %v13819_v2 = vcombine.low %v783_v54, %v787_v55  ;;  %v13828_v4 = vcombine.high %v791_v63, %v795_v0  ;;  %v336_v55 = vld [vmem:[%s20933_s1 + $0x908] sm:$0xff] }
  0xdc   :  { %10040 = vmatprep.subr.bf16.mxu0 %v13764_v3  ;;  %v13318_v3 = vcombine.high %v280_v61, %v284_v62 }
  0xde   :  { %10428 = vmatpush1.bf16.msra.mxu1 %v13253_v8  ;;  %v803_v8 = vld [vmem:[%s20933_s1 + $0x17a0] sm:$0xff] }
  0xdf   :  { %10041 = vmatpush1.bf16.msra.mxu0 %v13763_v9  ;;  %10429 = vmatprep.subr.bf16.mxu1 %v13262_v10  ;;  %v13317_v9 = vcombine.low %v280_v61, %v284_v62  ;;  %v13827_v10 = vcombine.low %v791_v63, %v795_v0  ;;  %v13836_v13 = vcombine.high %v799_v7, %v803_v8  ;;  %v344_v0 = vld [vmem:[%s20933_s1 + $0x948] sm:$0xff] }
  0xe0   :  { %10042 = vmatprep.subr.bf16.mxu0 %v13772_v12  ;;  %v13326_v12 = vcombine.high %v288_v5, %v292_v6 }
  0xe2   :  { %10430 = vmatpush1.bf16.msra.mxu1 %v13261_v17  ;;  %v811_v17 = vld [vmem:[%s20933_s1 + $0x17e0] sm:$0xff] }
  0xe3   :  { %10043 = vmatpush1.bf16.msra.mxu0 %v13771_v18  ;;  %10431 = vmatprep.subr.bf16.mxu1 %v13270_v19  ;;  %v13325_v18 = vcombine.low %v288_v5, %v292_v6  ;;  %v13835_v19 = vcombine.low %v799_v7, %v803_v8  ;;  %v13844_v23 = vcombine.high %v807_v16, %v811_v17  ;;  %v352_v8 = vld [vmem:[%s20933_s1 + $0x988] sm:$0xff] }
  0xe4   :  { %10044 = vmatprep.subr.bf16.mxu0 %v13780_v22  ;;  %v13334_v22 = vcombine.high %v296_v14, %v300_v15 }
  0xe6   :  { %10432 = vmatpush1.bf16.msra.mxu1 %v13269_v27  ;;  %v819_v27 = vld [vmem:[%s20933_s1 + $0x1820] sm:$0xff] }
  0xe7   :  { %10045 = vmatpush1.bf16.msra.mxu0 %v13779_v28  ;;  %10433 = vmatprep.subr.bf16.mxu1 %v13278_v29  ;;  %v13333_v28 = vcombine.low %v296_v14, %v300_v15  ;;  %v13843_v29 = vcombine.low %v807_v16, %v811_v17  ;;  %v13852_v31 = vcombine.high %v815_v26, %v819_v27  ;;  %v360_v17 = vld [vmem:[%s20933_s1 + $0x9c8] sm:$0xff] }
  0xe8   :  { %10046 = vmatprep.subr.bf16.mxu0 %v13788_v30  ;;  %v13342_v30 = vcombine.high %v304_v24, %v308_v25 }
  0xea   :  { %10434 = vmatpush1.bf16.msra.mxu1 %v13277_v35  ;;  %v827_v35 = vld [vmem:[%s20933_s1 + $0x1860] sm:$0xff] }
  0xeb   :  { %10047 = vmatpush1.bf16.msra.mxu0 %v13787_v36  ;;  %10435 = vmatprep.subr.bf16.mxu1 %v13286_v37  ;;  %v13341_v36 = vcombine.low %v304_v24, %v308_v25  ;;  %v15055_v37 = vld [vmem:[%s20934_s0 + $0x28] ss:$100 sps:$4 sm:$0xff]   ;;  %v13860_v40 = vcombine.high %v823_v34, %v827_v35  ;;  %v13859_v46 = vcombine.low %v823_v34, %v827_v35 }
  0xec   :  { %10048 = vmatprep.subr.bf16.mxu0 %v13796_v38  ;;  %v13851_v38 = vcombine.low %v815_v26, %v819_v27  ;;  %v368_v27 = vld [vmem:[%s20933_s1 + $0xa08] sm:$0xff] }
  0xed   :  { %v376_v35 = vld [vmem:[%s20933_s1 + $0xa48] sm:$0xff] }
  0xee   :  { %10436 = vmatpush1.bf16.msra.mxu1 %v13285_v43  ;;  %v15056_v43 = vld [vmem:[%s20934_s0 + $0x34] ss:$100 sps:$4 sm:$0xff]  }
  0xef   :  { %10049 = vmatpush1.bf16.msra.mxu0 %v13795_v44  ;;  %10437 = vmatprep.subr.bf16.mxu1 %v13294_v45  ;;  %v831_v44 = vld [vmem:[%s20933_s1 + $0x1880] sm:$0xff] }
  0xf0   :  { %10050 = vmatprep.subr.bf16.mxu0 %v13804_v11  ;;  %v835_v45 = vld [vmem:[%s20933_s1 + $0x18a0] sm:$0xff]  ;;  %v13349_v11 = vcombine.low %v312_v32, %v316_v33 }
  0xf1   :  { %v13868_v58 = vcombine.high %v831_v44, %v835_v45  ;;  %v13867_v53 = vcombine.low %v831_v44, %v835_v45  ;;  %v388_v44 = vld [vmem:[%s20933_s1 + $0xaa8] sm:$0xff]  ;;  %v895_v45 = vld [vmem:[%s20933_s1 + $0x1a80] sm:$0xff] }
  0xf2   :  { %10438 = vmatpush1.bf16.msra.mxu1 %v13293_v49  ;;  %v839_v49 = vld [vmem:[%s20933_s1 + $0x18c0] sm:$0xff] }
  0xf3   :  { %10051 = vmatpush1.bf16.msra.mxu0 %v13803_v50  ;;  %10439 = vmatprep.subr.bf16.mxu1 %v13302_v51  ;;  %v843_v50 = vld [vmem:[%s20933_s1 + $0x18e0] sm:$0xff]  ;;  %v15267_v51 = vld [vmem:[%s20934_s0 + $0x14] ss:$100 sps:$4 sm:$0xff]  }
  0xf4   :  { %10052 = vmatprep.subr.bf16.mxu0 %v13812_v52  ;;  %v13357_v52 = vcombine.low %v320_v41, %v324_v42  ;;  %v13876_v54 = vcombine.high %v839_v49, %v843_v50  ;;  %v13875_v61 = vcombine.low %v839_v49, %v843_v50  ;;  %v396_v49 = vld [vmem:[%s20933_s1 + $0xae8] sm:$0xff]  ;;  %v903_v50 = vld [vmem:[%s20933_s1 + $0x1ac0] sm:$0xff] }
  0xf6   :  { %10440 = vmatpush1.bf16.msra.mxu1 %v13301_v56  ;;  %v340_v56 = vld [vmem:[%s20933_s1 + $0x928] sm:$0xff] }
  0xf7   :  { %10053 = vmatpush1.bf16.msra.mxu0 %v13811_v57  ;;  %10441 = vmatprep.subr.bf16.mxu1 %v13310_v59  ;;  %v847_v57 = vld [vmem:[%s20933_s1 + $0x1900] sm:$0xff]  ;;  %v13374_v62 = vcombine.high %v336_v55, %v340_v56 }
  0xf8   :  { %10054 = vmatprep.subr.bf16.mxu0 %v13820_v60  ;;  %v851_v59 = vld [vmem:[%s20933_s1 + $0x1920] sm:$0xff] }
  0xf9   :  { %v13884_v63 = vcombine.high %v847_v57, %v851_v59  ;;  %v13883_v5 = vcombine.low %v847_v57, %v851_v59  ;;  %v911_v57 = vld [vmem:[%s20933_s1 + $0x1b00] sm:$0xff] }
  0xfa   :  { %10442 = vmatpush1.bf16.msra.mxu1 %v13309_v1  ;;  %v348_v1 = vld [vmem:[%s20933_s1 + $0x968] sm:$0xff]  ;;  %v915_v59 = vld [vmem:[%s20933_s1 + $0x1b20] sm:$0xff] }
  0xfb   :  { %10055 = vmatpush1.bf16.msra.mxu0 %v13819_v2  ;;  %10443 = vmatprep.subr.bf16.mxu1 %v13318_v3  ;;  %v855_v2 = vld [vmem:[%s20933_s1 + $0x1940] sm:$0xff]  ;;  %v13382_v6 = vcombine.high %v344_v0, %v348_v1 }
  0xfc   :  { %10056 = vmatprep.subr.bf16.mxu0 %v13828_v4  ;;  %v859_v3 = vld [vmem:[%s20933_s1 + $0x1960] sm:$0xff]  ;;  %v13373_v4 = vcombine.low %v336_v55, %v340_v56  ;;  %v400_v55 = vld [vmem:[%s20933_s1 + $0xb08] sm:$0xff] }
  0xfd   :  { %v13892_v7 = vcombine.high %v855_v2, %v859_v3  ;;  %v13891_v14 = vcombine.low %v855_v2, %v859_v3  ;;  %v404_v56 = vld [vmem:[%s20933_s1 + $0xb28] sm:$0xff]  ;;  %v919_v2 = vld [vmem:[%s20933_s1 + $0x1b40] sm:$0xff] }
  0xfe   :  { %10444 = vmatpush1.bf16.msra.mxu1 %v13317_v9  ;;  %v356_v9 = vld [vmem:[%s20933_s1 + $0x9a8] sm:$0xff]  ;;  %v923_v3 = vld [vmem:[%s20933_s1 + $0x1b60] sm:$0xff] }
  0xff   :  { %10057 = vmatpush1.bf16.msra.mxu0 %v13827_v10  ;;  %10445 = vmatprep.subr.bf16.mxu1 %v13326_v12  ;;  %v863_v10 = vld [vmem:[%s20933_s1 + $0x1980] sm:$0xff]  ;;  %v13390_v15 = vcombine.high %v352_v8, %v356_v9 }
 0x100   :  { %10058 = vmatprep.subr.bf16.mxu0 %v13836_v13  ;;  %v867_v12 = vld [vmem:[%s20933_s1 + $0x19a0] sm:$0xff]  ;;  %v13381_v13 = vcombine.low %v344_v0, %v348_v1  ;;  %v408_v0 = vld [vmem:[%s20933_s1 + $0xb48] sm:$0xff] }
 0x101   :  { %v13900_v16 = vcombine.high %v863_v10, %v867_v12  ;;  %v13899_v24 = vcombine.low %v863_v10, %v867_v12  ;;  %v412_v1 = vld [vmem:[%s20933_s1 + $0xb68] sm:$0xff]  ;;  %v927_v10 = vld [vmem:[%s20933_s1 + $0x1b80] sm:$0xff] }
 0x102   :  { %10446 = vmatpush1.bf16.msra.mxu1 %v13325_v18  ;;  %v364_v18 = vld [vmem:[%s20933_s1 + $0x9e8] sm:$0xff]  ;;  %v931_v12 = vld [vmem:[%s20933_s1 + $0x1ba0] sm:$0xff] }
 0x103   :  { %10059 = vmatpush1.bf16.msra.mxu0 %v13835_v19  ;;  %10447 = vmatprep.subr.bf16.mxu1 %v13334_v22  ;;  %v871_v19 = vld [vmem:[%s20933_s1 + $0x19c0] sm:$0xff]  ;;  %v13398_v25 = vcombine.high %v360_v17, %v364_v18 }
 0x104   :  { %10060 = vmatprep.subr.bf16.mxu0 %v13844_v23  ;;  %v875_v22 = vld [vmem:[%s20933_s1 + $0x19e0] sm:$0xff]  ;;  %v13389_v23 = vcombine.low %v352_v8, %v356_v9  ;;  %v416_v8 = vld [vmem:[%s20933_s1 + $0xb88] sm:$0xff] }
 0x105   :  { %v13908_v26 = vcombine.high %v871_v19, %v875_v22  ;;  %v13907_v32 = vcombine.low %v871_v19, %v875_v22  ;;  %v420_v9 = vld [vmem:[%s20933_s1 + $0xba8] sm:$0xff]  ;;  %v935_v19 = vld [vmem:[%s20933_s1 + $0x1bc0] sm:$0xff] }
 0x106   :  { %10448 = vmatpush1.bf16.msra.mxu1 %v13333_v28  ;;  %v372_v28 = vld [vmem:[%s20933_s1 + $0xa28] sm:$0xff]  ;;  %v939_v22 = vld [vmem:[%s20933_s1 + $0x1be0] sm:$0xff] }
 0x107   :  { %10061 = vmatpush1.bf16.msra.mxu0 %v13843_v29  ;;  %10460 = vmatprep.subr.bf16.mxu1 %v13342_v30  ;;  %v879_v29 = vld [vmem:[%s20933_s1 + $0x1a00] sm:$0xff]  ;;  %v13406_v33 = vcombine.high %v368_v27, %v372_v28 }
 0x108   :  { %10073 = vmatprep.subr.bf16.mxu0 %v13852_v31  ;;  %v883_v30 = vld [vmem:[%s20933_s1 + $0x1a20] sm:$0xff]  ;;  %v13397_v31 = vcombine.low %v360_v17, %v364_v18  ;;  %v424_v17 = vld [vmem:[%s20933_s1 + $0xbc8] sm:$0xff] }
 0x109   :  { %10450 = vmatmul.mubr.bf16.vlgmr.msra.gmra.mrb[4].mxu1 %v15803_v20  ;;  %v328_v20 = vld [vmem:[%s20933_s1 + $0x8c8] sm:$0xff]  ;;  %v13916_v34 = vcombine.high %v879_v29, %v883_v30 }
 0x10a   :  { %10063 = vmatmul.mubr.bf16.vlgmr.msra.gmra.mrb[0].mxu0 %v15055_v37  ;;  %10461 = vmatpush1.bf16.msra.mxu1 %v13341_v36  ;;  %v13366_v21 = vcombine.high %v328_v20, %v332_v48  ;;  %v13365_v60 = vcombine.low %v328_v20, %v332_v48  ;;  %v380_v36 = vld [vmem:[%s20933_s1 + $0xa68] sm:$0xff]  ;;  %v887_v37 = vld [vmem:[%s20933_s1 + $0x1a40] sm:$0xff] }
 0x10b   :  { %10074 = vmatpush1.bf16.msra.mxu0 %v13851_v38  ;;  %10462 = vmatprep.subr.bf16.mxu1 %v13350_v39  ;;  %v891_v38 = vld [vmem:[%s20933_s1 + $0x1a60] sm:$0xff]  ;;  %v13405_v39 = vcombine.low %v368_v27, %v372_v28  ;;  %v13414_v41 = vcombine.high %v376_v35, %v380_v36  ;;  %v392_v48 = vld [vmem:[%s20933_s1 + $0xac8] sm:$0xff] }
 0x10c   :  { %10075 = vmatprep.subr.bf16.mxu0 %v13860_v40  ;;  %10105 = vmatprep.mubr.bf16.mxu0 %v15056_v43  ;;  %v13915_v40 = vcombine.low %v879_v29, %v883_v30  ;;  %v13924_v42 = vcombine.high %v887_v37, %v891_v38  ;;  %v384_v43 = vld [vmem:[%s20933_s1 + $0xa88] sm:$0xff]  ;;  %v943_v29 = vld [vmem:[%s20933_s1 + $0x1c00] sm:$0xff] }
 0x10d   :  { %10492 = vmatprep.mubr.bf16.mxu1 %v15267_v51  ;;  %v907_v51 = vld [vmem:[%s20933_s1 + $0x1ae0] sm:$0xff]  ;;  %v428_v18 = vld [vmem:[%s20933_s1 + $0xbe8] sm:$0xff] }
 0x10e   :  { %10463 = vmatpush1.bf16.msra.mxu1 %v13349_v11  ;;  %v899_v11 = vld [vmem:[%s20933_s1 + $0x1aa0] sm:$0xff]  ;;  %v432_v27 = vld [vmem:[%s20933_s1 + $0xc08] sm:$0xff] }
 0x10f   :  { %10076 = vmatpush1.bf16.msra.mxu0 %v13859_v46  ;;  %10464 = vmatprep.subr.bf16.mxu1 %v13358_v47  ;;  %v13413_v46 = vcombine.low %v376_v35, %v380_v36  ;;  %v13923_v47 = vcombine.low %v887_v37, %v891_v38  ;;  %v13932_v20 = vcombine.high %v895_v45, %v899_v11  ;;  %v436_v28 = vld [vmem:[%s20933_s1 + $0xc28] sm:$0xff]  ;;  %v947_v30 = vld [vmem:[%s20933_s1 + $0x1c20] sm:$0xff] }
 0x110   :  { %10077 = vmatprep.subr.bf16.mxu0 %v13868_v58  ;;  %v13422_v58 = vcombine.high %v384_v43, %v388_v44  ;;  %v440_v35 = vld [vmem:[%s20933_s1 + $0xc48] sm:$0xff]  ;;  %v951_v37 = vld [vmem:[%s20933_s1 + $0x1c40] sm:$0xff] }
 0x111   :  { %v444_v36 = vld [vmem:[%s20933_s1 + $0xc68] sm:$0xff]  ;;  %v955_v38 = vld [vmem:[%s20933_s1 + $0x1c60] sm:$0xff] }
 0x112   :  { %10465 = vmatpush1.bf16.msra.mxu1 %v13357_v52  ;;  %v13421_v52 = vcombine.low %v384_v43, %v388_v44  ;;  %v13988_v43 = vcombine.high %v951_v37, %v955_v38  ;;  %v448_v44 = vld [vmem:[%s20933_s1 + $0xc88] sm:$0xff] }
 0x113   :  { %10078 = vmatpush1.bf16.msra.mxu0 %v13867_v53  ;;  %10466 = vmatprep.subr.bf16.mxu1 %v13366_v21  ;;  %v13931_v53 = vcombine.low %v895_v45, %v899_v11  ;;  %v13430_v21 = vcombine.high %v392_v48, %v396_v49  ;;  %v452_v45 = vld [vmem:[%s20933_s1 + $0xca8] sm:$0xff]  ;;  %v15059_v11 = vld [vmem:[%s20934_s0 + $0x3c] ss:$100 sps:$4 sm:$0xff]  }
 0x114   :  { %10079 = vmatprep.subr.bf16.mxu0 %v13876_v54  ;;  %v13940_v54 = vcombine.high %v903_v50, %v907_v51 }
 0x116   :  { %10467 = vmatpush1.bf16.msra.mxu1 %v13365_v60  ;;  %v13429_v60 = vcombine.low %v392_v48, %v396_v49  ;;  %v13987_v48 = vcombine.low %v951_v37, %v955_v38  ;;  %v13486_v49 = vcombine.high %v448_v44, %v452_v45  ;;  %v1007_v37 = vld [vmem:[%s20933_s1 + $0x1e00] sm:$0xff] }
 0x117   :  { %10080 = vmatpush1.bf16.msra.mxu0 %v13875_v61  ;;  %10468 = vmatprep.subr.bf16.mxu1 %v13374_v62  ;;  %v13939_v61 = vcombine.low %v903_v50, %v907_v51  ;;  %v13438_v62 = vcombine.high %v400_v55, %v404_v56  ;;  %v456_v51 = vld [vmem:[%s20933_s1 + $0xcc8] sm:$0xff]  ;;  %v1011_v38 = vld [vmem:[%s20933_s1 + $0x1e20] sm:$0xff] }
 0x118   :  { %10081 = vmatprep.subr.bf16.mxu0 %v13884_v63  ;;  %v13948_v63 = vcombine.high %v911_v57, %v915_v59 }
 0x11a   :  { %10469 = vmatpush1.bf16.msra.mxu1 %v13373_v4  ;;  %v13437_v4 = vcombine.low %v400_v55, %v404_v56  ;;  %v13485_v55 = vcombine.low %v448_v44, %v452_v45  ;;  %v508_v44 = vld [vmem:[%s20933_s1 + $0xe68] sm:$0xff]  ;;  %v1015_v45 = vld [vmem:[%s20933_s1 + $0x1e40] sm:$0xff] }
 0x11b   :  { %10082 = vmatpush1.bf16.msra.mxu0 %v13883_v5  ;;  %10470 = vmatprep.subr.bf16.mxu1 %v13382_v6  ;;  %v13947_v5 = vcombine.low %v911_v57, %v915_v59  ;;  %v13446_v6 = vcombine.high %v408_v0, %v412_v1 }
 0x11c   :  { %10083 = vmatprep.subr.bf16.mxu0 %v13892_v7  ;;  %v13956_v7 = vcombine.high %v919_v2, %v923_v3 }
 0x11e   :  { %10471 = vmatpush1.bf16.msra.mxu1 %v13381_v13  ;;  %v13445_v13 = vcombine.low %v408_v0, %v412_v1 }
 0x11f   :  { %10084 = vmatpush1.bf16.msra.mxu0 %v13891_v14  ;;  %10472 = vmatprep.subr.bf16.mxu1 %v13390_v15  ;;  %v13955_v14 = vcombine.low %v919_v2, %v923_v3  ;;  %v13454_v15 = vcombine.high %v416_v8, %v420_v9 }
 0x120   :  { %10085 = vmatprep.subr.bf16.mxu0 %v13900_v16  ;;  %v13964_v16 = vcombine.high %v927_v10, %v931_v12 }
 0x122   :  { %10473 = vmatpush1.bf16.msra.mxu1 %v13389_v23  ;;  %v13453_v23 = vcombine.low %v416_v8, %v420_v9 }
 0x123   :  { %10086 = vmatpush1.bf16.msra.mxu0 %v13899_v24  ;;  %10474 = vmatprep.subr.bf16.mxu1 %v13398_v25  ;;  %v13963_v24 = vcombine.low %v927_v10, %v931_v12  ;;  %v13462_v25 = vcombine.high %v424_v17, %v428_v18 }
 0x124   :  { %10087 = vmatprep.subr.bf16.mxu0 %v13908_v26  ;;  %v13972_v26 = vcombine.high %v935_v19, %v939_v22 }
 0x126   :  { %10475 = vmatpush1.bf16.msra.mxu1 %v13397_v31  ;;  %v13461_v31 = vcombine.low %v424_v17, %v428_v18 }
 0x127   :  { %10088 = vmatpush1.bf16.msra.mxu0 %v13907_v32  ;;  %10476 = vmatprep.subr.bf16.mxu1 %v13406_v33  ;;  %v13971_v32 = vcombine.low %v935_v19, %v939_v22  ;;  %v13470_v33 = vcombine.high %v432_v27, %v436_v28 }
 0x128   :  { %10089 = vmatprep.subr.bf16.mxu0 %v13916_v34  ;;  %v13980_v34 = vcombine.high %v943_v29, %v947_v30 }
 0x12a   :  { %10477 = vmatpush1.bf16.msra.mxu1 %v13405_v39  ;;  %v13469_v39 = vcombine.low %v432_v27, %v436_v28  ;;  %v999_v27 = vld [vmem:[%s20933_s1 + $0x1dc0] sm:$0xff] }
 0x12b   :  { %10090 = vmatpush1.bf16.msra.mxu0 %v13915_v40  ;;  %10478 = vmatprep.subr.bf16.mxu1 %v13414_v41  ;;  %v15058_v40 = vld [vmem:[%s20934_s0 + $0x30] ss:$100 sps:$4 sm:$0xff]   ;;  %v13979_v41 = vcombine.low %v943_v29, %v947_v30  ;;  %v1003_v28 = vld [vmem:[%s20933_s1 + $0x1de0] sm:$0xff] }
 0x12c   :  { %10091 = vmatprep.subr.bf16.mxu0 %v13924_v42  ;;  %v13478_v42 = vcombine.high %v440_v35, %v444_v36 }
 0x12e   :  { %10479 = vmatpush1.bf16.msra.mxu1 %v13413_v46  ;;  %v15268_v46 = vld [vmem:[%s20934_s0 + $0x10] ss:$100 sps:$4 sm:$0xff]  }
 0x12f   :  { %10092 = vmatpush1.bf16.msra.mxu0 %v13923_v47  ;;  %10480 = vmatprep.subr.bf16.mxu1 %v13422_v58  ;;  %v959_v47 = vld [vmem:[%s20933_s1 + $0x1c80] sm:$0xff] }
 0x130   :  { %10093 = vmatprep.subr.bf16.mxu0 %v13932_v20  ;;  %v963_v58 = vld [vmem:[%s20933_s1 + $0x1ca0] sm:$0xff]  ;;  %v13477_v20 = vcombine.low %v440_v35, %v444_v36  ;;  %v496_v35 = vld [vmem:[%s20933_s1 + $0xe08] sm:$0xff] }
 0x131   :  { %v13996_v50 = vcombine.high %v959_v47, %v963_v58  ;;  %v13995_v56 = vcombine.low %v959_v47, %v963_v58  ;;  %v500_v36 = vld [vmem:[%s20933_s1 + $0xe28] sm:$0xff]  ;;  %v14043_v47 = vcombine.low %v1007_v37, %v1011_v38 }
 0x132   :  { %10481 = vmatpush1.bf16.msra.mxu1 %v13421_v52  ;;  %v460_v52 = vld [vmem:[%s20933_s1 + $0xce8] sm:$0xff] }
 0x133   :  { %10094 = vmatpush1.bf16.msra.mxu0 %v13931_v53  ;;  %10482 = vmatprep.subr.bf16.mxu1 %v13430_v21  ;;  %v967_v53 = vld [vmem:[%s20933_s1 + $0x1cc0] sm:$0xff]  ;;  %v13494_v57 = vcombine.high %v456_v51, %v460_v52  ;;  %v13493_v0 = vcombine.low %v456_v51, %v460_v52 }
 0x134   :  { %10095 = vmatprep.subr.bf16.mxu0 %v13940_v54  ;;  %v971_v21 = vld [vmem:[%s20933_s1 + $0x1ce0] sm:$0xff] }
 0x135   :  { %v15269_v54 = vld [vmem:[%s20934_s0 + $0x1c] ss:$100 sps:$4 sm:$0xff]   ;;  %v14004_v59 = vcombine.high %v967_v53, %v971_v21  ;;  %v14003_v1 = vcombine.low %v967_v53, %v971_v21 }
 0x136   :  { %10483 = vmatpush1.bf16.msra.mxu1 %v13429_v60  ;;  %v464_v60 = vld [vmem:[%s20933_s1 + $0xd08] sm:$0xff]  ;;  %v1027_v51 = vld [vmem:[%s20933_s1 + $0x1ea0] sm:$0xff] }
 0x137   :  { %10096 = vmatpush1.bf16.msra.mxu0 %v13939_v61  ;;  %10484 = vmatprep.subr.bf16.mxu1 %v13438_v62  ;;  %v468_v61 = vld [vmem:[%s20933_s1 + $0xd28] sm:$0xff]  ;;  %v975_v62 = vld [vmem:[%s20933_s1 + $0x1d00] sm:$0xff] }
 0x138   :  { %10097 = vmatprep.subr.bf16.mxu0 %v13948_v63  ;;  %v979_v63 = vld [vmem:[%s20933_s1 + $0x1d20] sm:$0xff]  ;;  %v13502_v2 = vcombine.high %v464_v60, %v468_v61  ;;  %v13501_v8 = vcombine.low %v464_v60, %v468_v61 }
 0x139   :  { %v14012_v3 = vcombine.high %v975_v62, %v979_v63  ;;  %v14011_v9 = vcombine.low %v975_v62, %v979_v63 }
 0x13a   :  { %10485 = vmatpush1.bf16.msra.mxu1 %v13437_v4  ;;  %v472_v4 = vld [vmem:[%s20933_s1 + $0xd48] sm:$0xff] }
 0x13b   :  { %10098 = vmatpush1.bf16.msra.mxu0 %v13947_v5  ;;  %10486 = vmatprep.subr.bf16.mxu1 %v13446_v6  ;;  %v476_v5 = vld [vmem:[%s20933_s1 + $0xd68] sm:$0xff]  ;;  %v983_v6 = vld [vmem:[%s20933_s1 + $0x1d40] sm:$0xff] }
 0x13c   :  { %10099 = vmatprep.subr.bf16.mxu0 %v13956_v7  ;;  %v987_v7 = vld [vmem:[%s20933_s1 + $0x1d60] sm:$0xff]  ;;  %v13510_v10 = vcombine.high %v472_v4, %v476_v5  ;;  %v13509_v17 = vcombine.low %v472_v4, %v476_v5 }
 0x13d   :  { %v14020_v12 = vcombine.high %v983_v6, %v987_v7  ;;  %v14019_v18 = vcombine.low %v983_v6, %v987_v7 }
 0x13e   :  { %10487 = vmatpush1.bf16.msra.mxu1 %v13445_v13  ;;  %v480_v13 = vld [vmem:[%s20933_s1 + $0xd88] sm:$0xff] }
 0x13f   :  { %10100 = vmatpush1.bf16.msra.mxu0 %v13955_v14  ;;  %10488 = vmatprep.subr.bf16.mxu1 %v13454_v15  ;;  %v484_v14 = vld [vmem:[%s20933_s1 + $0xda8] sm:$0xff]  ;;  %v991_v15 = vld [vmem:[%s20933_s1 + $0x1d80] sm:$0xff] }
 0x140   :  { %10101 = vmatprep.subr.bf16.mxu0 %v13964_v16  ;;  %v995_v16 = vld [vmem:[%s20933_s1 + $0x1da0] sm:$0xff]  ;;  %v13518_v19 = vcombine.high %v480_v13, %v484_v14  ;;  %v13517_v30 = vcombine.low %v480_v13, %v484_v14 }
 0x142   :  { %10489 = vmatpush1.bf16.msra.mxu1 %v13453_v23  ;;  %v14028_v23 = vcombine.high %v991_v15, %v995_v16 }
 0x143   :  { %10102 = vmatpush1.bf16.msra.mxu0 %v13963_v24  ;;  %10490 = vmatprep.subr.bf16.mxu1 %v13462_v25  ;;  %v488_v24 = vld [vmem:[%s20933_s1 + $0xdc8] sm:$0xff] }
 0x144   :  { %10103 = vmatprep.subr.bf16.mxu0 %v13972_v26  ;;  %v492_v25 = vld [vmem:[%s20933_s1 + $0xde8] sm:$0xff] }
 0x146   :  { %10491 = vmatpush1.bf16.msra.mxu1 %v13461_v31 }
 0x147   :  { %10104 = vmatpush1.bf16.msra.mxu0 %v13971_v32  ;;  %10503 = vmatprep.subr.bf16.mxu1 %v13470_v33  ;;  %v14027_v32 = vcombine.low %v991_v15, %v995_v16  ;;  %v13526_v33 = vcombine.high %v488_v24, %v492_v25 }
 0x148   :  { %10116 = vmatprep.subr.bf16.mxu0 %v13980_v34  ;;  %v14036_v34 = vcombine.high %v999_v27, %v1003_v28 }
 0x149   :  { %10493 = vmatmul.mubr.bf16.vlgmr.msra.gmra.mrb[4].mxu1 %v15268_v46  ;;  %v13533_v46 = vcombine.low %v496_v35, %v500_v36 }
 0x14a   :  { %10106 = vmatmul.mubr.bf16.vlgmr.msra.gmra.mrb[0].mxu0 %v15058_v40  ;;  %10504 = vmatpush1.bf16.msra.mxu1 %v13469_v39  ;;  %v13525_v39 = vcombine.low %v488_v24, %v492_v25  ;;  %v14035_v40 = vcombine.low %v999_v27, %v1003_v28 }
 0x14b   :  { %10117 = vmatpush1.bf16.msra.mxu0 %v13979_v41  ;;  %10505 = vmatprep.subr.bf16.mxu1 %v13478_v42  ;;  %v13534_v41 = vcombine.high %v496_v35, %v500_v36  ;;  %v14044_v42 = vcombine.high %v1007_v37, %v1011_v38 }
 0x14c   :  { %10118 = vmatprep.subr.bf16.mxu0 %v13988_v43  ;;  %10148 = vmatprep.mubr.bf16.mxu0 %v15059_v11  ;;  %v504_v43 = vld [vmem:[%s20933_s1 + $0xe48] sm:$0xff]  ;;  %v1019_v11 = vld [vmem:[%s20933_s1 + $0x1e60] sm:$0xff] }
 0x14d   :  { %10535 = vmatprep.mubr.bf16.mxu1 %v15269_v54  ;;  %v13542_v58 = vcombine.high %v504_v43, %v508_v44  ;;  %v13541_v52 = vcombine.low %v504_v43, %v508_v44  ;;  %v14051_v53 = vcombine.low %v1015_v45, %v1019_v11 }
 0x14e   :  { %10506 = vmatpush1.bf16.msra.mxu1 %v13477_v20  ;;  %v14052_v20 = vcombine.high %v1015_v45, %v1019_v11 }
 0x14f   :  { %10119 = vmatpush1.bf16.msra.mxu0 %v13987_v48  ;;  %10507 = vmatprep.subr.bf16.mxu1 %v13486_v49  ;;  %v512_v48 = vld [vmem:[%s20933_s1 + $0xe88] sm:$0xff] }
 0x150   :  { %10120 = vmatprep.subr.bf16.mxu0 %v13996_v50  ;;  %v516_v49 = vld [vmem:[%s20933_s1 + $0xea8] sm:$0xff]  ;;  %v1023_v50 = vld [vmem:[%s20933_s1 + $0x1e80] sm:$0xff] }
 0x151   :  { %v13550_v21 = vcombine.high %v512_v48, %v516_v49  ;;  %v14060_v54 = vcombine.high %v1023_v50, %v1027_v51  ;;  %v13549_v60 = vcombine.low %v512_v48, %v516_v49  ;;  %v14059_v61 = vcombine.low %v1023_v50, %v1027_v51  ;;  %v15061_v49 = vld [vmem:[%s20934_s0 + $0x38] ss:$100 sps:$4 sm:$0xff]  }
 0x152   :  { %10508 = vmatpush1.bf16.msra.mxu1 %v13485_v55  ;;  %v520_v55 = vld [vmem:[%s20933_s1 + $0xec8] sm:$0xff] }
 0x153   :  { %10121 = vmatpush1.bf16.msra.mxu0 %v13995_v56  ;;  %10509 = vmatprep.subr.bf16.mxu1 %v13494_v57  ;;  %v524_v56 = vld [vmem:[%s20933_s1 + $0xee8] sm:$0xff]  ;;  %v1031_v57 = vld [vmem:[%s20933_s1 + $0x1ec0] sm:$0xff] }
 0x154   :  { %10122 = vmatprep.subr.bf16.mxu0 %v14004_v59  ;;  %v1035_v59 = vld [vmem:[%s20933_s1 + $0x1ee0] sm:$0xff]  ;;  %v13558_v62 = vcombine.high %v520_v55, %v524_v56  ;;  %v13557_v4 = vcombine.low %v520_v55, %v524_v56  ;;  %v15270_v55 = vld [vmem:[%s20934_s0 + $0x18] ss:$100 sps:$4 sm:$0xff]  }
 0x155   :  { %v14068_v63 = vcombine.high %v1031_v57, %v1035_v59  ;;  %v14067_v5 = vcombine.low %v1031_v57, %v1035_v59  ;;  %v1087_v56 = vld [vmem:[%s20933_s1 + $0x2080] sm:$0xff] }
 0x156   :  { %10510 = vmatpush1.bf16.msra.mxu1 %v13493_v0  ;;  %v528_v0 = vld [vmem:[%s20933_s1 + $0xf08] sm:$0xff]  ;;  %v1091_v57 = vld [vmem:[%s20933_s1 + $0x20a0] sm:$0xff] }
 0x157   :  { %10123 = vmatpush1.bf16.msra.mxu0 %v14003_v1  ;;  %10511 = vmatprep.subr.bf16.mxu1 %v13502_v2  ;;  %v532_v1 = vld [vmem:[%s20933_s1 + $0xf28] sm:$0xff]  ;;  %v1039_v2 = vld [vmem:[%s20933_s1 + $0x1f00] sm:$0xff] }
 0x158   :  { %10124 = vmatprep.subr.bf16.mxu0 %v14012_v3  ;;  %v1043_v3 = vld [vmem:[%s20933_s1 + $0x1f20] sm:$0xff]  ;;  %v13566_v6 = vcombine.high %v528_v0, %v532_v1  ;;  %v13565_v13 = vcombine.low %v528_v0, %v532_v1  ;;  %v588_v0 = vld [vmem:[%s20933_s1 + $0x10e8] sm:$0xff] }
 0x159   :  { %v14076_v7 = vcombine.high %v1039_v2, %v1043_v3  ;;  %v14075_v14 = vcombine.low %v1039_v2, %v1043_v3  ;;  %v1095_v1 = vld [vmem:[%s20933_s1 + $0x20c0] sm:$0xff] }
 0x15a   :  { %10512 = vmatpush1.bf16.msra.mxu1 %v13501_v8  ;;  %v536_v8 = vld [vmem:[%s20933_s1 + $0xf48] sm:$0xff]  ;;  %v1099_v2 = vld [vmem:[%s20933_s1 + $0x20e0] sm:$0xff] }
 0x15b   :  { %10125 = vmatpush1.bf16.msra.mxu0 %v14011_v9  ;;  %10513 = vmatprep.subr.bf16.mxu1 %v13510_v10  ;;  %v540_v9 = vld [vmem:[%s20933_s1 + $0xf68] sm:$0xff]  ;;  %v1047_v10 = vld [vmem:[%s20933_s1 + $0x1f40] sm:$0xff] }
 0x15c   :  { %v16485_v22 = vpop.f32.mrb[0].mxu1  ;;  %10126 = vmatprep.subr.bf16.mxu0 %v14020_v12  ;;  %v1051_v12 = vld [vmem:[%s20933_s1 + $0x1f60] sm:$0xff]  ;;  %v13574_v15 = vcombine.high %v536_v8, %v540_v9  ;;  %v13573_v24 = vcombine.low %v536_v8, %v540_v9  ;;  %v592_v8 = vld [vmem:[%s20933_s1 + $0x1108] sm:$0xff] }
 0x15d   :  { %v16493_v26 = vpop.f32.mrb[1].mxu1  ;;  %v14084_v16 = vcombine.high %v1047_v10, %v1051_v12  ;;  %v14083_v25 = vcombine.low %v1047_v10, %v1051_v12  ;;  %v15271_v3 = vld [vmem:[%s20934_s0 + $0x24] ss:$100 sps:$4 sm:$0xff]  }
 0x15e   :  { %v16501_v29 = vpop.f32.mrb[2].mxu1  ;;  %10514 = vmatpush1.bf16.msra.mxu1 %v13509_v17  ;;  %v544_v17 = vld [vmem:[%s20933_s1 + $0xf88] sm:$0xff]  ;;  %v1103_v10 = vld [vmem:[%s20933_s1 + $0x2100] sm:$0xff] }
 0x15f   :  { %10127 = vmatpush1.bf16.msra.mxu0 %v14019_v18  ;;  %v16503_v31 = vpop.f32.mrb[3].mxu1  ;;  %10515 = vmatprep.subr.bf16.mxu1 %v13518_v19  ;;  %v548_v18 = vld [vmem:[%s20933_s1 + $0xfa8] sm:$0xff]  ;;  %v1055_v19 = vld [vmem:[%s20933_s1 + $0x1f80] sm:$0xff] }
 0x160   :  { %10128 = vmatprep.subr.bf16.mxu0 %v14028_v23  ;;  %v1059_v23 = vld [vmem:[%s20933_s1 + $0x1fa0] sm:$0xff]  ;;  %v13582_v27 = vcombine.high %v544_v17, %v548_v18  ;;  %v13581_v35 = vcombine.low %v544_v17, %v548_v18  ;;  %v596_v9 = vld [vmem:[%s20933_s1 + $0x1128] sm:$0xff] }
 0x161   :  { %v14092_v28 = vcombine.high %v1055_v19, %v1059_v23  ;;  %v14091_v36 = vcombine.low %v1055_v19, %v1059_v23  ;;  %v1107_v12 = vld [vmem:[%s20933_s1 + $0x2120] sm:$0xff]  ;;  %v600_v17 = vld [vmem:[%s20933_s1 + $0x1148] sm:$0xff] }
 0x162   :  { %10516 = vmatpush1.bf16.msra.mxu1 %v13517_v30  ;;  %v552_v30 = vld [vmem:[%s20933_s1 + $0xfc8] sm:$0xff]  ;;  %v1111_v19 = vld [vmem:[%s20933_s1 + $0x2140] sm:$0xff] }
 0x163   :  { %10129 = vmatpush1.bf16.msra.mxu0 %v14027_v32  ;;  %10517 = vmatprep.subr.bf16.mxu1 %v13526_v33  ;;  %v556_v32 = vld [vmem:[%s20933_s1 + $0xfe8] sm:$0xff]  ;;  %v1063_v33 = vld [vmem:[%s20933_s1 + $0x1fc0] sm:$0xff] }
 0x164   :  { %10130 = vmatprep.subr.bf16.mxu0 %v14036_v34  ;;  %v1067_v34 = vld [vmem:[%s20933_s1 + $0x1fe0] sm:$0xff]  ;;  %v13590_v37 = vcombine.high %v552_v30, %v556_v32  ;;  %v13589_v43 = vcombine.low %v552_v30, %v556_v32  ;;  %v604_v18 = vld [vmem:[%s20933_s1 + $0x1168] sm:$0xff] }
 0x165   :  { %v14100_v38 = vcombine.high %v1063_v33, %v1067_v34  ;;  %v14099_v44 = vcombine.low %v1063_v33, %v1067_v34  ;;  %v1115_v23 = vld [vmem:[%s20933_s1 + $0x2160] sm:$0xff]  ;;  %v608_v30 = vld [vmem:[%s20933_s1 + $0x1188] sm:$0xff] }
 0x166   :  { %10518 = vmatpush1.bf16.msra.mxu1 %v13525_v39  ;;  %v560_v39 = vld [vmem:[%s20933_s1 + $0x1008] sm:$0xff]  ;;  %v1119_v33 = vld [vmem:[%s20933_s1 + $0x2180] sm:$0xff] }
 0x167   :  { %10131 = vmatpush1.bf16.msra.mxu0 %v14035_v40  ;;  %10519 = vmatprep.subr.bf16.mxu1 %v13534_v41  ;;  %v564_v40 = vld [vmem:[%s20933_s1 + $0x1028] sm:$0xff]  ;;  %v1071_v41 = vld [vmem:[%s20933_s1 + $0x2000] sm:$0xff] }
 0x168   :  { %10132 = vmatprep.subr.bf16.mxu0 %v14044_v42  ;;  %v1075_v42 = vld [vmem:[%s20933_s1 + $0x2020] sm:$0xff]  ;;  %v13598_v45 = vcombine.high %v560_v39, %v564_v40  ;;  %v13597_v48 = vcombine.low %v560_v39, %v564_v40  ;;  %v612_v32 = vld [vmem:[%s20933_s1 + $0x11a8] sm:$0xff] }
 0x169   :  { %v14108_v11 = vcombine.high %v1071_v41, %v1075_v42  ;;  %v14107_v50 = vcombine.low %v1071_v41, %v1075_v42  ;;  %v1123_v34 = vld [vmem:[%s20933_s1 + $0x21a0] sm:$0xff]  ;;  %v616_v39 = vld [vmem:[%s20933_s1 + $0x11c8] sm:$0xff] }
 0x16a   :  { %10520 = vmatpush1.bf16.msra.mxu1 %v13533_v46  ;;  %v568_v46 = vld [vmem:[%s20933_s1 + $0x1048] sm:$0xff]  ;;  %v1127_v41 = vld [vmem:[%s20933_s1 + $0x21c0] sm:$0xff] }
 0x16b   :  { %10133 = vmatpush1.bf16.msra.mxu0 %v14043_v47  ;;  %10521 = vmatprep.subr.bf16.mxu1 %v13542_v58  ;;  %v572_v47 = vld [vmem:[%s20933_s1 + $0x1068] sm:$0xff]  ;;  %v1079_v58 = vld [vmem:[%s20933_s1 + $0x2040] sm:$0xff] }
 0x16c   :  { %10134 = vmatprep.subr.bf16.mxu0 %v14052_v20  ;;  %v1083_v20 = vld [vmem:[%s20933_s1 + $0x2060] sm:$0xff]  ;;  %v13606_v51 = vcombine.high %v568_v46, %v572_v47  ;;  %v13605_v59 = vcombine.low %v568_v46, %v572_v47  ;;  %v620_v40 = vld [vmem:[%s20933_s1 + $0x11e8] sm:$0xff] }
 0x16d   :  { %v1131_v42 = vld [vmem:[%s20933_s1 + $0x21e0] sm:$0xff]  ;;  %v624_v46 = vld [vmem:[%s20933_s1 + $0x1208] sm:$0xff] }
 0x16e   :  { %10522 = vmatpush1.bf16.msra.mxu1 %v13541_v52  ;;  %v14116_v52 = vcombine.high %v1079_v58, %v1083_v20  ;;  %v628_v47 = vld [vmem:[%s20933_s1 + $0x1228] sm:$0xff] }
 0x16f   :  { %10135 = vmatpush1.bf16.msra.mxu0 %v14051_v53  ;;  %10523 = vmatprep.subr.bf16.mxu1 %v13550_v21  ;;  %v576_v53 = vld [vmem:[%s20933_s1 + $0x1088] sm:$0xff] }
 0x170   :  { %10136 = vmatprep.subr.bf16.mxu0 %v14060_v54  ;;  %v580_v21 = vld [vmem:[%s20933_s1 + $0x10a8] sm:$0xff] }
 0x171   :  { %v15062_v54 = vld [vmem:[%s20934_s0 + $0x44] ss:$100 sps:$4 sm:$0xff]  }
 0x172   :  { %10524 = vmatpush1.bf16.msra.mxu1 %v13549_v60  ;;  %v14115_v60 = vcombine.low %v1079_v58, %v1083_v20  ;;  %v1135_v58 = vld [vmem:[%s20933_s1 + $0x2200] sm:$0xff] }
 0x173   :  { %10137 = vmatpush1.bf16.msra.mxu0 %v14059_v61  ;;  %10525 = vmatprep.subr.bf16.mxu1 %v13558_v62  ;;  %v13614_v61 = vcombine.high %v576_v53, %v580_v21  ;;  %v14124_v62 = vcombine.high %v1087_v56, %v1091_v57  ;;  %v1139_v20 = vld [vmem:[%s20933_s1 + $0x2220] sm:$0xff] }
 0x174   :  { %10138 = vmatprep.subr.bf16.mxu0 %v14068_v63  ;;  %v584_v63 = vld [vmem:[%s20933_s1 + $0x10c8] sm:$0xff] }
 0x176   :  { %10526 = vmatpush1.bf16.msra.mxu1 %v13557_v4  ;;  %v13613_v4 = vcombine.low %v576_v53, %v580_v21  ;;  %v636_v53 = vld [vmem:[%s20933_s1 + $0x1268] sm:$0xff]  ;;  %v1143_v21 = vld [vmem:[%s20933_s1 + $0x2240] sm:$0xff] }
 0x177   :  { %10139 = vmatpush1.bf16.msra.mxu0 %v14067_v5  ;;  %10527 = vmatprep.subr.bf16.mxu1 %v13566_v6  ;;  %v14123_v5 = vcombine.low %v1087_v56, %v1091_v57  ;;  %v13622_v6 = vcombine.high %v584_v63, %v588_v0  ;;  %v14171_v56 = vcombine.low %v1135_v58, %v1139_v20 }
 0x178   :  { %10140 = vmatprep.subr.bf16.mxu0 %v14076_v7  ;;  %v14132_v7 = vcombine.high %v1095_v1, %v1099_v2 }
 0x17a   :  { %10528 = vmatpush1.bf16.msra.mxu1 %v13565_v13  ;;  %v13621_v13 = vcombine.low %v584_v63, %v588_v0  ;;  %v1155_v63 = vld [vmem:[%s20933_s1 + $0x22a0] sm:$0xff] }
 0x17b   :  { %10141 = vmatpush1.bf16.msra.mxu0 %v14075_v14  ;;  %10529 = vmatprep.subr.bf16.mxu1 %v13574_v15  ;;  %v14131_v14 = vcombine.low %v1095_v1, %v1099_v2  ;;  %v13630_v15 = vcombine.high %v592_v8, %v596_v9 }
 0x17c   :  { %10142 = vmatprep.subr.bf16.mxu0 %v14084_v16  ;;  %v14140_v16 = vcombine.high %v1103_v10, %v1107_v12 }
 0x17e   :  { %10530 = vmatpush1.bf16.msra.mxu1 %v13573_v24  ;;  %v13629_v24 = vcombine.low %v592_v8, %v596_v9 }
 0x17f   :  { %10143 = vmatpush1.bf16.msra.mxu0 %v14083_v25  ;;  %10531 = vmatprep.subr.bf16.mxu1 %v13582_v27  ;;  %v14139_v25 = vcombine.low %v1103_v10, %v1107_v12  ;;  %v13638_v27 = vcombine.high %v600_v17, %v604_v18 }
 0x180   :  { %10144 = vmatprep.subr.bf16.mxu0 %v14092_v28  ;;  %v14148_v28 = vcombine.high %v1111_v19, %v1115_v23 }
 0x182   :  { %10532 = vmatpush1.bf16.msra.mxu1 %v13581_v35  ;;  %v13637_v35 = vcombine.low %v600_v17, %v604_v18 }
 0x183   :  { %10145 = vmatpush1.bf16.msra.mxu0 %v14091_v36  ;;  %10533 = vmatprep.subr.bf16.mxu1 %v13590_v37  ;;  %v14147_v36 = vcombine.low %v1111_v19, %v1115_v23  ;;  %v13646_v37 = vcombine.high %v608_v30, %v612_v32 }
 0x184   :  { %10146 = vmatprep.subr.bf16.mxu0 %v14100_v38  ;;  %v14156_v38 = vcombine.high %v1119_v33, %v1123_v34 }
 0x186   :  { %10534 = vmatpush1.bf16.msra.mxu1 %v13589_v43  ;;  %v13645_v43 = vcombine.low %v608_v30, %v612_v32 }
 0x187   :  { %10147 = vmatpush1.bf16.msra.mxu0 %v14099_v44  ;;  %10546 = vmatprep.subr.bf16.mxu1 %v13598_v45  ;;  %v14155_v44 = vcombine.low %v1119_v33, %v1123_v34  ;;  %v13654_v45 = vcombine.high %v616_v39, %v620_v40 }
 0x188   :  { %10159 = vmatprep.subr.bf16.mxu0 %v14108_v11  ;;  %v14164_v11 = vcombine.high %v1127_v41, %v1131_v42 }
 0x189   :  { %10536 = vmatmul.mubr.bf16.vlgmr.msra.gmra.mrb[4].mxu1 %v15270_v55  ;;  %v13661_v55 = vcombine.low %v624_v46, %v628_v47 }
 0x18a   :  { %10149 = vmatmul.mubr.bf16.vlgmr.msra.gmra.mrb[0].mxu0 %v15061_v49  ;;  %10547 = vmatpush1.bf16.msra.mxu1 %v13597_v48  ;;  %v13653_v48 = vcombine.low %v616_v39, %v620_v40  ;;  %v14163_v49 = vcombine.low %v1127_v41, %v1131_v42 }
 0x18b   :  { %10160 = vmatpush1.bf16.msra.mxu0 %v14107_v50  ;;  %10548 = vmatprep.subr.bf16.mxu1 %v13606_v51  ;;  %v13662_v50 = vcombine.high %v624_v46, %v628_v47  ;;  %v14172_v51 = vcombine.high %v1135_v58, %v1139_v20 }
 0x18c   :  { %10161 = vmatprep.subr.bf16.mxu0 %v14116_v52  ;;  %10191 = vmatprep.mubr.bf16.mxu0 %v15062_v54  ;;  %v632_v52 = vld [vmem:[%s20933_s1 + $0x1248] sm:$0xff]  ;;  %v1147_v54 = vld [vmem:[%s20933_s1 + $0x2260] sm:$0xff] }
 0x18d   :  { %10578 = vmatprep.mubr.bf16.mxu1 %v15271_v3  ;;  %v13670_v57 = vcombine.high %v632_v52, %v636_v53  ;;  %v13669_v0 = vcombine.low %v632_v52, %v636_v53  ;;  %v14179_v1 = vcombine.low %v1143_v21, %v1147_v54 }
 0x18e   :  { %10549 = vmatpush1.bf16.msra.mxu1 %v13605_v59  ;;  %v14180_v59 = vcombine.high %v1143_v21, %v1147_v54 }
 0x18f   :  { %10162 = vmatpush1.bf16.msra.mxu0 %v14115_v60  ;;  %10550 = vmatprep.subr.bf16.mxu1 %v13614_v61  ;;  %v640_v60 = vld [vmem:[%s20933_s1 + $0x1288] sm:$0xff] }
 0x190   :  { %10163 = vmatprep.subr.bf16.mxu0 %v14124_v62  ;;  %v644_v61 = vld [vmem:[%s20933_s1 + $0x12a8] sm:$0xff]  ;;  %v1151_v62 = vld [vmem:[%s20933_s1 + $0x2280] sm:$0xff] }
 0x191   :  { %v13678_v2 = vcombine.high %v640_v60, %v644_v61  ;;  %v14188_v3 = vcombine.high %v1151_v62, %v1155_v63  ;;  %v13677_v8 = vcombine.low %v640_v60, %v644_v61  ;;  %v14187_v9 = vcombine.low %v1151_v62, %v1155_v63  ;;  %v15064_v61 = vld [vmem:[%s20934_s0 + $0x40] ss:$100 sps:$4 sm:$0xff]  }
 0x192   :  { %10551 = vmatpush1.bf16.msra.mxu1 %v13613_v4  ;;  %v648_v4 = vld [vmem:[%s20933_s1 + $0x12c8] sm:$0xff] }
 0x193   :  { %10164 = vmatpush1.bf16.msra.mxu0 %v14123_v5  ;;  %10552 = vmatprep.subr.bf16.mxu1 %v13622_v6  ;;  %v652_v5 = vld [vmem:[%s20933_s1 + $0x12e8] sm:$0xff]  ;;  %v1159_v6 = vld [vmem:[%s20933_s1 + $0x22c0] sm:$0xff] }
 0x194   :  { %10165 = vmatprep.subr.bf16.mxu0 %v14132_v7  ;;  %v1163_v7 = vld [vmem:[%s20933_s1 + $0x22e0] sm:$0xff]  ;;  %v13686_v10 = vcombine.high %v648_v4, %v652_v5  ;;  %v13685_v17 = vcombine.low %v648_v4, %v652_v5 }
 0x195   :  { %v14196_v12 = vcombine.high %v1159_v6, %v1163_v7  ;;  %v14195_v18 = vcombine.low %v1159_v6, %v1163_v7  ;;  %v15272_v4 = vld [vmem:[%s20934_s0 + $0x20] ss:$100 sps:$4 sm:$0xff]  }
 0x196   :  { %10553 = vmatpush1.bf16.msra.mxu1 %v13621_v13  ;;  %v656_v13 = vld [vmem:[%s20933_s1 + $0x1308] sm:$0xff]  ;;  %v1215_v5 = vld [vmem:[%s20933_s1 + $0x2480] sm:$0xff] }
 0x197   :  { %10166 = vmatpush1.bf16.msra.mxu0 %v14131_v14  ;;  %10554 = vmatprep.subr.bf16.mxu1 %v13630_v15  ;;  %v660_v14 = vld [vmem:[%s20933_s1 + $0x1328] sm:$0xff]  ;;  %v1167_v15 = vld [vmem:[%s20933_s1 + $0x2300] sm:$0xff] }
 0x198   :  { %10167 = vmatprep.subr.bf16.mxu0 %v14140_v16  ;;  %v1171_v16 = vld [vmem:[%s20933_s1 + $0x2320] sm:$0xff]  ;;  %v13694_v19 = vcombine.high %v656_v13, %v660_v14  ;;  %v13693_v30 = vcombine.low %v656_v13, %v660_v14  ;;  %v716_v13 = vld [vmem:[%s20933_s1 + $0x14e8] sm:$0xff] }
 0x199   :  { %v14204_v23 = vcombine.high %v1167_v15, %v1171_v16  ;;  %v14203_v32 = vcombine.low %v1167_v15, %v1171_v16  ;;  %v1219_v6 = vld [vmem:[%s20933_s1 + $0x24a0] sm:$0xff]  ;;  %v15273_v16 = vld [vmem:[%s20934_s0 + $0x2c] ss:$100 sps:$4 sm:$0xff]  }
 0x19a   :  { %10555 = vmatpush1.bf16.msra.mxu1 %v13629_v24  ;;  %v664_v24 = vld [vmem:[%s20933_s1 + $0x1348] sm:$0xff]  ;;  %v1223_v14 = vld [vmem:[%s20933_s1 + $0x24c0] sm:$0xff] }
 0x19b   :  { %10168 = vmatpush1.bf16.msra.mxu0 %v14139_v25  ;;  %10556 = vmatprep.subr.bf16.mxu1 %v13638_v27  ;;  %v668_v25 = vld [vmem:[%s20933_s1 + $0x1368] sm:$0xff]  ;;  %v1175_v27 = vld [vmem:[%s20933_s1 + $0x2340] sm:$0xff] }
 0x19c   :  { %10169 = vmatprep.subr.bf16.mxu0 %v14148_v28  ;;  %v1179_v28 = vld [vmem:[%s20933_s1 + $0x2360] sm:$0xff]  ;;  %v13702_v33 = vcombine.high %v664_v24, %v668_v25  ;;  %v13701_v39 = vcombine.low %v664_v24, %v668_v25  ;;  %v720_v24 = vld [vmem:[%s20933_s1 + $0x1508] sm:$0xff] }
 0x19d   :  { %v14212_v34 = vcombine.high %v1175_v27, %v1179_v28  ;;  %v14211_v40 = vcombine.low %v1175_v27, %v1179_v28  ;;  %v1227_v15 = vld [vmem:[%s20933_s1 + $0x24e0] sm:$0xff]  ;;  %v724_v25 = vld [vmem:[%s20933_s1 + $0x1528] sm:$0xff] }
 0x19e   :  { %10557 = vmatpush1.bf16.msra.mxu1 %v13637_v35  ;;  %v672_v35 = vld [vmem:[%s20933_s1 + $0x1388] sm:$0xff]  ;;  %v1231_v27 = vld [vmem:[%s20933_s1 + $0x2500] sm:$0xff] }
 0x19f   :  { %10170 = vmatpush1.bf16.msra.mxu0 %v14147_v36  ;;  %10558 = vmatprep.subr.bf16.mxu1 %v13646_v37  ;;  %v676_v36 = vld [vmem:[%s20933_s1 + $0x13a8] sm:$0xff]  ;;  %v1183_v37 = vld [vmem:[%s20933_s1 + $0x2380] sm:$0xff] }
 0x1a0   :  { %10171 = vmatprep.subr.bf16.mxu0 %v14156_v38  ;;  %v1187_v38 = vld [vmem:[%s20933_s1 + $0x23a0] sm:$0xff]  ;;  %v13710_v41 = vcombine.high %v672_v35, %v676_v36  ;;  %v13709_v46 = vcombine.low %v672_v35, %v676_v36  ;;  %v728_v35 = vld [vmem:[%s20933_s1 + $0x1548] sm:$0xff] }
 0x1a1   :  { %v14220_v42 = vcombine.high %v1183_v37, %v1187_v38  ;;  %v14219_v47 = vcombine.low %v1183_v37, %v1187_v38  ;;  %v1235_v28 = vld [vmem:[%s20933_s1 + $0x2520] sm:$0xff]  ;;  %v732_v36 = vld [vmem:[%s20933_s1 + $0x1568] sm:$0xff] }
 0x1a2   :  { %10559 = vmatpush1.bf16.msra.mxu1 %v13645_v43  ;;  %v680_v43 = vld [vmem:[%s20933_s1 + $0x13c8] sm:$0xff]  ;;  %v1239_v37 = vld [vmem:[%s20933_s1 + $0x2540] sm:$0xff] }
 0x1a3   :  { %10172 = vmatpush1.bf16.msra.mxu0 %v14155_v44  ;;  %10560 = vmatprep.subr.bf16.mxu1 %v13654_v45  ;;  %v684_v44 = vld [vmem:[%s20933_s1 + $0x13e8] sm:$0xff]  ;;  %v1191_v45 = vld [vmem:[%s20933_s1 + $0x23c0] sm:$0xff] }
 0x1a4   :  { %10173 = vmatprep.subr.bf16.mxu0 %v14164_v11  ;;  %v1195_v11 = vld [vmem:[%s20933_s1 + $0x23e0] sm:$0xff]  ;;  %v13718_v58 = vcombine.high %v680_v43, %v684_v44  ;;  %v13717_v52 = vcombine.low %v680_v43, %v684_v44  ;;  %v736_v43 = vld [vmem:[%s20933_s1 + $0x1588] sm:$0xff] }
 0x1a5   :  { %v14228_v20 = vcombine.high %v1191_v45, %v1195_v11  ;;  %v14227_v53 = vcombine.low %v1191_v45, %v1195_v11  ;;  %v1243_v38 = vld [vmem:[%s20933_s1 + $0x2560] sm:$0xff]  ;;  %v740_v44 = vld [vmem:[%s20933_s1 + $0x15a8] sm:$0xff] }
 0x1a6   :  { %10561 = vmatpush1.bf16.msra.mxu1 %v13653_v48  ;;  %v688_v48 = vld [vmem:[%s20933_s1 + $0x1408] sm:$0xff]  ;;  %v1247_v45 = vld [vmem:[%s20933_s1 + $0x2580] sm:$0xff] }
 0x1a7   :  { %10174 = vmatpush1.bf16.msra.mxu0 %v14163_v49  ;;  %10562 = vmatprep.subr.bf16.mxu1 %v13662_v50  ;;  %v692_v49 = vld [vmem:[%s20933_s1 + $0x1428] sm:$0xff]  ;;  %v1199_v50 = vld [vmem:[%s20933_s1 + $0x2400] sm:$0xff] }
 0x1a8   :  { %10175 = vmatprep.subr.bf16.mxu0 %v14172_v51  ;;  %v1203_v51 = vld [vmem:[%s20933_s1 + $0x2420] sm:$0xff]  ;;  %v13726_v21 = vcombine.high %v688_v48, %v692_v49  ;;  %v13725_v60 = vcombine.low %v688_v48, %v692_v49  ;;  %v744_v48 = vld [vmem:[%s20933_s1 + $0x15c8] sm:$0xff] }
 0x1a9   :  { %v14236_v54 = vcombine.high %v1199_v50, %v1203_v51  ;;  %v14235_v62 = vcombine.low %v1199_v50, %v1203_v51  ;;  %v1251_v11 = vld [vmem:[%s20933_s1 + $0x25a0] sm:$0xff]  ;;  %v748_v49 = vld [vmem:[%s20933_s1 + $0x15e8] sm:$0xff] }
 0x1aa   :  { %10563 = vmatpush1.bf16.msra.mxu1 %v13661_v55  ;;  %v696_v55 = vld [vmem:[%s20933_s1 + $0x1448] sm:$0xff]  ;;  %v1255_v50 = vld [vmem:[%s20933_s1 + $0x25c0] sm:$0xff] }
 0x1ab   :  { %10176 = vmatpush1.bf16.msra.mxu0 %v14171_v56  ;;  %10564 = vmatprep.subr.bf16.mxu1 %v13670_v57  ;;  %v700_v56 = vld [vmem:[%s20933_s1 + $0x1468] sm:$0xff]  ;;  %v1207_v57 = vld [vmem:[%s20933_s1 + $0x2440] sm:$0xff] }
 0x1ac   :  { %10177 = vmatprep.subr.bf16.mxu0 %v14180_v59  ;;  %v1211_v59 = vld [vmem:[%s20933_s1 + $0x2460] sm:$0xff]  ;;  %v13734_v63 = vcombine.high %v696_v55, %v700_v56  ;;  %v13733_v7 = vcombine.low %v696_v55, %v700_v56  ;;  %v752_v55 = vld [vmem:[%s20933_s1 + $0x1608] sm:$0xff] }
 0x1ad   :  { %v1259_v51 = vld [vmem:[%s20933_s1 + $0x25e0] sm:$0xff]  ;;  %v756_v56 = vld [vmem:[%s20933_s1 + $0x1628] sm:$0xff] }
 0x1ae   :  { %10565 = vmatpush1.bf16.msra.mxu1 %v13669_v0  ;;  %v14244_v0 = vcombine.high %v1207_v57, %v1211_v59 }
 0x1af   :  { %10178 = vmatpush1.bf16.msra.mxu0 %v14179_v1  ;;  %10566 = vmatprep.subr.bf16.mxu1 %v13678_v2  ;;  %v704_v1 = vld [vmem:[%s20933_s1 + $0x1488] sm:$0xff] }
 0x1b0   :  { %10179 = vmatprep.subr.bf16.mxu0 %v14188_v3  ;;  %v708_v2 = vld [vmem:[%s20933_s1 + $0x14a8] sm:$0xff] }
 0x1b1   :  { %v15065_v3 = vld [vmem:[%s20934_s0 + $0x4c] ss:$100 sps:$4 sm:$0xff]  }
 0x1b2   :  { %10567 = vmatpush1.bf16.msra.mxu1 %v13677_v8  ;;  %v14243_v8 = vcombine.low %v1207_v57, %v1211_v59  ;;  %v1263_v57 = vld [vmem:[%s20933_s1 + $0x2600] sm:$0xff] }
 0x1b3   :  { %10180 = vmatpush1.bf16.msra.mxu0 %v14187_v9  ;;  %10568 = vmatprep.subr.bf16.mxu1 %v13686_v10  ;;  %v13742_v9 = vcombine.high %v704_v1, %v708_v2  ;;  %v14252_v10 = vcombine.high %v1215_v5, %v1219_v6  ;;  %v1267_v59 = vld [vmem:[%s20933_s1 + $0x2620] sm:$0xff] }
 0x1b4   :  { %10181 = vmatprep.subr.bf16.mxu0 %v14196_v12  ;;  %v712_v12 = vld [vmem:[%s20933_s1 + $0x14c8] sm:$0xff] }
 0x1b6   :  { %10569 = vmatpush1.bf16.msra.mxu1 %v13685_v17  ;;  %v13741_v17 = vcombine.low %v704_v1, %v708_v2  ;;  %v764_v1 = vld [vmem:[%s20933_s1 + $0x1668] sm:$0xff]  ;;  %v1271_v2 = vld [vmem:[%s20933_s1 + $0x2640] sm:$0xff] }
 0x1b7   :  { %10182 = vmatpush1.bf16.msra.mxu0 %v14195_v18  ;;  %10570 = vmatprep.subr.bf16.mxu1 %v13694_v19  ;;  %v14251_v18 = vcombine.low %v1215_v5, %v1219_v6  ;;  %v13750_v19 = vcombine.high %v712_v12, %v716_v13  ;;  %v14299_v5 = vcombine.low %v1263_v57, %v1267_v59 }
 0x1b8   :  { %10183 = vmatprep.subr.bf16.mxu0 %v14204_v23  ;;  %v14260_v23 = vcombine.high %v1223_v14, %v1227_v15 }
 0x1ba   :  { %10571 = vmatpush1.bf16.msra.mxu1 %v13693_v30  ;;  %v13749_v30 = vcombine.low %v712_v12, %v716_v13  ;;  %v1283_v12 = vld [vmem:[%s20933_s1 + $0x26a0] sm:$0xff] }
 0x1bb   :  { %10184 = vmatpush1.bf16.msra.mxu0 %v14203_v32  ;;  %10572 = vmatprep.subr.bf16.mxu1 %v13702_v33  ;;  %v14259_v32 = vcombine.low %v1223_v14, %v1227_v15  ;;  %v13758_v33 = vcombine.high %v720_v24, %v724_v25 }
 0x1bc   :  { %10185 = vmatprep.subr.bf16.mxu0 %v14212_v34  ;;  %v14268_v34 = vcombine.high %v1231_v27, %v1235_v28 }
 0x1be   :  { %10573 = vmatpush1.bf16.msra.mxu1 %v13701_v39  ;;  %v13757_v39 = vcombine.low %v720_v24, %v724_v25 }
 0x1bf   :  { %10186 = vmatpush1.bf16.msra.mxu0 %v14211_v40  ;;  %10574 = vmatprep.subr.bf16.mxu1 %v13710_v41  ;;  %v14267_v40 = vcombine.low %v1231_v27, %v1235_v28  ;;  %v13766_v41 = vcombine.high %v728_v35, %v732_v36 }
 0x1c0   :  { %10187 = vmatprep.subr.bf16.mxu0 %v14220_v42  ;;  %v14276_v42 = vcombine.high %v1239_v37, %v1243_v38 }
 0x1c2   :  { %10575 = vmatpush1.bf16.msra.mxu1 %v13709_v46  ;;  %v13765_v46 = vcombine.low %v728_v35, %v732_v36 }
 0x1c3   :  { %10188 = vmatpush1.bf16.msra.mxu0 %v14219_v47  ;;  %10576 = vmatprep.subr.bf16.mxu1 %v13718_v58  ;;  %v14275_v47 = vcombine.low %v1239_v37, %v1243_v38  ;;  %v13774_v58 = vcombine.high %v736_v43, %v740_v44 }
 0x1c4   :  { %10189 = vmatprep.subr.bf16.mxu0 %v14228_v20  ;;  %v14284_v20 = vcombine.high %v1247_v45, %v1251_v11 }
 0x1c6   :  { %10577 = vmatpush1.bf16.msra.mxu1 %v13717_v52  ;;  %v13773_v52 = vcombine.low %v736_v43, %v740_v44 }
 0x1c7   :  { %10190 = vmatpush1.bf16.msra.mxu0 %v14227_v53  ;;  %10589 = vmatprep.subr.bf16.mxu1 %v13726_v21  ;;  %v14283_v53 = vcombine.low %v1247_v45, %v1251_v11  ;;  %v13782_v21 = vcombine.high %v744_v48, %v748_v49 }
 0x1c8   :  { %10202 = vmatprep.subr.bf16.mxu0 %v14236_v54  ;;  %v14292_v54 = vcombine.high %v1255_v50, %v1259_v51 }
 0x1c9   :  { %10579 = vmatmul.mubr.bf16.vlgmr.msra.gmra.mrb[4].mxu1 %v15272_v4  ;;  %v13789_v4 = vcombine.low %v752_v55, %v756_v56 }
 0x1ca   :  { %10192 = vmatmul.mubr.bf16.vlgmr.msra.gmra.mrb[0].mxu0 %v15064_v61  ;;  %10590 = vmatpush1.bf16.msra.mxu1 %v13725_v60  ;;  %v13781_v60 = vcombine.low %v744_v48, %v748_v49  ;;  %v14291_v61 = vcombine.low %v1255_v50, %v1259_v51 }
 0x1cb   :  { %10203 = vmatpush1.bf16.msra.mxu0 %v14235_v62  ;;  %10591 = vmatprep.subr.bf16.mxu1 %v13734_v63  ;;  %v13790_v62 = vcombine.high %v752_v55, %v756_v56  ;;  %v14300_v63 = vcombine.high %v1263_v57, %v1267_v59 }
 0x1cc   :  { %10204 = vmatprep.subr.bf16.mxu0 %v14244_v0  ;;  %10234 = vmatprep.mubr.bf16.mxu0 %v15065_v3  ;;  %v760_v0 = vld [vmem:[%s20933_s1 + $0x1648] sm:$0xff]  ;;  %v1275_v3 = vld [vmem:[%s20933_s1 + $0x2660] sm:$0xff] }
 0x1cd   :  { %10621 = vmatprep.mubr.bf16.mxu1 %v15273_v16  ;;  %v13798_v6 = vcombine.high %v760_v0, %v764_v1  ;;  %v13797_v13 = vcombine.low %v760_v0, %v764_v1  ;;  %v14307_v14 = vcombine.low %v1271_v2, %v1275_v3 }
 0x1ce   :  { %10592 = vmatpush1.bf16.msra.mxu1 %v13733_v7  ;;  %v14308_v7 = vcombine.high %v1271_v2, %v1275_v3 }
 0x1cf   :  { %10205 = vmatpush1.bf16.msra.mxu0 %v14243_v8  ;;  %10593 = vmatprep.subr.bf16.mxu1 %v13742_v9  ;;  %v768_v8 = vld [vmem:[%s20933_s1 + $0x1688] sm:$0xff] }
 0x1d0   :  { %10206 = vmatprep.subr.bf16.mxu0 %v14252_v10  ;;  %v772_v9 = vld [vmem:[%s20933_s1 + $0x16a8] sm:$0xff]  ;;  %v1279_v10 = vld [vmem:[%s20933_s1 + $0x2680] sm:$0xff] }
 0x1d1   :  { %v13806_v15 = vcombine.high %v768_v8, %v772_v9  ;;  %v14316_v16 = vcombine.high %v1279_v10, %v1283_v12  ;;  %v13805_v24 = vcombine.low %v768_v8, %v772_v9  ;;  %v14315_v25 = vcombine.low %v1279_v10, %v1283_v12  ;;  %v15067_v9 = vld [vmem:[%s20934_s0 + $0x48] ss:$100 sps:$4 sm:$0xff]  }
 0x1d2   :  { %10594 = vmatpush1.bf16.msra.mxu1 %v13741_v17  ;;  %v776_v17 = vld [vmem:[%s20933_s1 + $0x16c8] sm:$0xff] }
 0x1d3   :  { %10207 = vmatpush1.bf16.msra.mxu0 %v14251_v18  ;;  %10595 = vmatprep.subr.bf16.mxu1 %v13750_v19  ;;  %v780_v18 = vld [vmem:[%s20933_s1 + $0x16e8] sm:$0xff]  ;;  %v1287_v19 = vld [vmem:[%s20933_s1 + $0x26c0] sm:$0xff] }
 0x1d4   :  { %10208 = vmatprep.subr.bf16.mxu0 %v14260_v23  ;;  %v1291_v23 = vld [vmem:[%s20933_s1 + $0x26e0] sm:$0xff]  ;;  %v13814_v27 = vcombine.high %v776_v17, %v780_v18  ;;  %v13813_v35 = vcombine.low %v776_v17, %v780_v18  ;;  %v15274_v17 = vld [vmem:[%s20934_s0 + $0x28] ss:$100 sps:$4 sm:$0xff]  }
 0x1d5   :  { %v14324_v28 = vcombine.high %v1287_v19, %v1291_v23  ;;  %v14323_v36 = vcombine.low %v1287_v19, %v1291_v23  ;;  %v1343_v18 = vld [vmem:[%s20933_s1 + $0x2880] sm:$0xff] }
 0x1d6   :  { %10596 = vmatpush1.bf16.msra.mxu1 %v13749_v30  ;;  %v784_v30 = vld [vmem:[%s20933_s1 + $0x1708] sm:$0xff]  ;;  %v1347_v19 = vld [vmem:[%s20933_s1 + $0x28a0] sm:$0xff] }
 0x1d7   :  { %10209 = vmatpush1.bf16.msra.mxu0 %v14259_v32  ;;  %10597 = vmatprep.subr.bf16.mxu1 %v13758_v33  ;;  %v788_v32 = vld [vmem:[%s20933_s1 + $0x1728] sm:$0xff]  ;;  %v1295_v33 = vld [vmem:[%s20933_s1 + $0x2700] sm:$0xff] }
 0x1d8   :  { %10210 = vmatprep.subr.bf16.mxu0 %v14268_v34  ;;  %v1299_v34 = vld [vmem:[%s20933_s1 + $0x2720] sm:$0xff]  ;;  %v13822_v37 = vcombine.high %v784_v30, %v788_v32  ;;  %v13821_v43 = vcombine.low %v784_v30, %v788_v32  ;;  %v844_v30 = vld [vmem:[%s20933_s1 + $0x18e8] sm:$0xff] }
 0x1d9   :  { %v14332_v38 = vcombine.high %v1295_v33, %v1299_v34  ;;  %v14331_v44 = vcombine.low %v1295_v33, %v1299_v34  ;;  %v1351_v32 = vld [vmem:[%s20933_s1 + $0x28c0] sm:$0xff]  ;;  %v15275_v34 = vld [vmem:[%s20934_s0 + $0x34] ss:$100 sps:$4 sm:$0xff]  }
 0x1da   :  { %10598 = vmatpush1.bf16.msra.mxu1 %v13757_v39  ;;  %v792_v39 = vld [vmem:[%s20933_s1 + $0x1748] sm:$0xff]  ;;  %v1355_v33 = vld [vmem:[%s20933_s1 + $0x28e0] sm:$0xff] }
 0x1db   :  { %10211 = vmatpush1.bf16.msra.mxu0 %v14267_v40  ;;  %10599 = vmatprep.subr.bf16.mxu1 %v13766_v41  ;;  %v796_v40 = vld [vmem:[%s20933_s1 + $0x1768] sm:$0xff]  ;;  %v1303_v41 = vld [vmem:[%s20933_s1 + $0x2740] sm:$0xff] }
 0x1dc   :  { %10212 = vmatprep.subr.bf16.mxu0 %v14276_v42  ;;  %v1307_v42 = vld [vmem:[%s20933_s1 + $0x2760] sm:$0xff]  ;;  %v13830_v45 = vcombine.high %v792_v39, %v796_v40  ;;  %v13829_v48 = vcombine.low %v792_v39, %v796_v40  ;;  %v848_v39 = vld [vmem:[%s20933_s1 + $0x1908] sm:$0xff] }
 0x1dd   :  { %v14340_v11 = vcombine.high %v1303_v41, %v1307_v42  ;;  %v14339_v49 = vcombine.low %v1303_v41, %v1307_v42  ;;  %v852_v40 = vld [vmem:[%s20933_s1 + $0x1928] sm:$0xff]  ;;  %v1359_v41 = vld [vmem:[%s20933_s1 + $0x2900] sm:$0xff] }
 0x1de   :  { %10600 = vmatpush1.bf16.msra.mxu1 %v13765_v46  ;;  %v800_v46 = vld [vmem:[%s20933_s1 + $0x1788] sm:$0xff]  ;;  %v1363_v42 = vld [vmem:[%s20933_s1 + $0x2920] sm:$0xff] }
 0x1df   :  { %10213 = vmatpush1.bf16.msra.mxu0 %v14275_v47  ;;  %10601 = vmatprep.subr.bf16.mxu1 %v13774_v58  ;;  %v804_v47 = vld [vmem:[%s20933_s1 + $0x17a8] sm:$0xff]  ;;  %v1311_v58 = vld [vmem:[%s20933_s1 + $0x2780] sm:$0xff] }
 0x1e0   :  { %10214 = vmatprep.subr.bf16.mxu0 %v14284_v20  ;;  %v1315_v20 = vld [vmem:[%s20933_s1 + $0x27a0] sm:$0xff]  ;;  %v13838_v50 = vcombine.high %v800_v46, %v804_v47  ;;  %v13837_v55 = vcombine.low %v800_v46, %v804_v47  ;;  %v856_v46 = vld [vmem:[%s20933_s1 + $0x1948] sm:$0xff] }
 0x1e1   :  { %v14348_v51 = vcombine.high %v1311_v58, %v1315_v20  ;;  %v14347_v56 = vcombine.low %v1311_v58, %v1315_v20  ;;  %v860_v47 = vld [vmem:[%s20933_s1 + $0x1968] sm:$0xff]  ;;  %v1367_v58 = vld [vmem:[%s20933_s1 + $0x2940] sm:$0xff] }
 0x1e2   :  { %10602 = vmatpush1.bf16.msra.mxu1 %v13773_v52  ;;  %v808_v52 = vld [vmem:[%s20933_s1 + $0x17c8] sm:$0xff]  ;;  %v1371_v20 = vld [vmem:[%s20933_s1 + $0x2960] sm:$0xff] }
 0x1e3   :  { %10215 = vmatpush1.bf16.msra.mxu0 %v14283_v53  ;;  %10603 = vmatprep.subr.bf16.mxu1 %v13782_v21  ;;  %v812_v53 = vld [vmem:[%s20933_s1 + $0x17e8] sm:$0xff]  ;;  %v1319_v21 = vld [vmem:[%s20933_s1 + $0x27c0] sm:$0xff] }
 0x1e4   :  { %10216 = vmatprep.subr.bf16.mxu0 %v14292_v54  ;;  %v1323_v54 = vld [vmem:[%s20933_s1 + $0x27e0] sm:$0xff]  ;;  %v13846_v57 = vcombine.high %v808_v52, %v812_v53  ;;  %v13845_v0 = vcombine.low %v808_v52, %v812_v53  ;;  %v864_v52 = vld [vmem:[%s20933_s1 + $0x1988] sm:$0xff] }
 0x1e5   :  { %v14356_v59 = vcombine.high %v1319_v21, %v1323_v54  ;;  %v14355_v1 = vcombine.low %v1319_v21, %v1323_v54  ;;  %v868_v53 = vld [vmem:[%s20933_s1 + $0x19a8] sm:$0xff]  ;;  %v1375_v21 = vld [vmem:[%s20933_s1 + $0x2980] sm:$0xff] }
 0x1e6   :  { %10604 = vmatpush1.bf16.msra.mxu1 %v13781_v60  ;;  %v816_v60 = vld [vmem:[%s20933_s1 + $0x1808] sm:$0xff]  ;;  %v1379_v54 = vld [vmem:[%s20933_s1 + $0x29a0] sm:$0xff] }
 0x1e7   :  { %10217 = vmatpush1.bf16.msra.mxu0 %v14291_v61  ;;  %10605 = vmatprep.subr.bf16.mxu1 %v13790_v62  ;;  %v820_v61 = vld [vmem:[%s20933_s1 + $0x1828] sm:$0xff]  ;;  %v1327_v62 = vld [vmem:[%s20933_s1 + $0x2800] sm:$0xff] }
 0x1e8   :  { %10218 = vmatprep.subr.bf16.mxu0 %v14300_v63  ;;  %v1331_v63 = vld [vmem:[%s20933_s1 + $0x2820] sm:$0xff]  ;;  %v13854_v2 = vcombine.high %v816_v60, %v820_v61  ;;  %v13853_v8 = vcombine.low %v816_v60, %v820_v61  ;;  %v872_v60 = vld [vmem:[%s20933_s1 + $0x19c8] sm:$0xff] }
 0x1e9   :  { %v14364_v3 = vcombine.high %v1327_v62, %v1331_v63  ;;  %v14363_v10 = vcombine.low %v1327_v62, %v1331_v63  ;;  %v876_v61 = vld [vmem:[%s20933_s1 + $0x19e8] sm:$0xff]  ;;  %v1383_v62 = vld [vmem:[%s20933_s1 + $0x29c0] sm:$0xff] }
 0x1ea   :  { %10606 = vmatpush1.bf16.msra.mxu1 %v13789_v4  ;;  %v824_v4 = vld [vmem:[%s20933_s1 + $0x1848] sm:$0xff]  ;;  %v1387_v63 = vld [vmem:[%s20933_s1 + $0x29e0] sm:$0xff] }
 0x1eb   :  { %10219 = vmatpush1.bf16.msra.mxu0 %v14299_v5  ;;  %10607 = vmatprep.subr.bf16.mxu1 %v13798_v6  ;;  %v828_v5 = vld [vmem:[%s20933_s1 + $0x1868] sm:$0xff]  ;;  %v1335_v6 = vld [vmem:[%s20933_s1 + $0x2840] sm:$0xff] }
 0x1ec   :  { %10220 = vmatprep.subr.bf16.mxu0 %v14308_v7  ;;  %v1339_v7 = vld [vmem:[%s20933_s1 + $0x2860] sm:$0xff]  ;;  %v13862_v12 = vcombine.high %v824_v4, %v828_v5  ;;  %v13861_v23 = vcombine.low %v824_v4, %v828_v5  ;;  %v880_v4 = vld [vmem:[%s20933_s1 + $0x1a08] sm:$0xff] }
 0x1ed   :  { %v884_v5 = vld [vmem:[%s20933_s1 + $0x1a28] sm:$0xff] }
 0x1ee   :  { %10608 = vmatpush1.bf16.msra.mxu1 %v13797_v13  ;;  %v14372_v13 = vcombine.high %v1335_v6, %v1339_v7 }
 0x1ef   :  { %10221 = vmatpush1.bf16.msra.mxu0 %v14307_v14  ;;  %10609 = vmatprep.subr.bf16.mxu1 %v13806_v15  ;;  %v832_v14 = vld [vmem:[%s20933_s1 + $0x1888] sm:$0xff] }
 0x1f0   :  { %10222 = vmatprep.subr.bf16.mxu0 %v14316_v16  ;;  %v836_v15 = vld [vmem:[%s20933_s1 + $0x18a8] sm:$0xff]  ;;  %v15068_v16 = vld [vmem:[%s20934_s0 + $0x54] ss:$100 sps:$4 sm:$0xff]  }
 0x1f2   :  { %10610 = vmatpush1.bf16.msra.mxu1 %v13805_v24  ;;  %v14371_v24 = vcombine.low %v1335_v6, %v1339_v7  ;;  %v1391_v6 = vld [vmem:[%s20933_s1 + $0x2a00] sm:$0xff] }
 0x1f3   :  { %10223 = vmatpush1.bf16.msra.mxu0 %v14315_v25  ;;  %10611 = vmatprep.subr.bf16.mxu1 %v13814_v27  ;;  %v13870_v25 = vcombine.high %v832_v14, %v836_v15  ;;  %v14380_v27 = vcombine.high %v1343_v18, %v1347_v19  ;;  %v1395_v7 = vld [vmem:[%s20933_s1 + $0x2a20] sm:$0xff] }
 0x1f4   :  { %10224 = vmatprep.subr.bf16.mxu0 %v14324_v28  ;;  %v840_v28 = vld [vmem:[%s20933_s1 + $0x18c8] sm:$0xff] }
 0x1f6   :  { %10612 = vmatpush1.bf16.msra.mxu1 %v13813_v35  ;;  %v13869_v35 = vcombine.low %v832_v14, %v836_v15  ;;  %v892_v14 = vld [vmem:[%s20933_s1 + $0x1a68] sm:$0xff]  ;;  %v1399_v15 = vld [vmem:[%s20933_s1 + $0x2a40] sm:$0xff] }
 0x1f7   :  { %10225 = vmatpush1.bf16.msra.mxu0 %v14323_v36  ;;  %10613 = vmatprep.subr.bf16.mxu1 %v13822_v37  ;;  %v14379_v36 = vcombine.low %v1343_v18, %v1347_v19  ;;  %v13878_v37 = vcombine.high %v840_v28, %v844_v30  ;;  %v14427_v18 = vcombine.low %v1391_v6, %v1395_v7 }
 0x1f8   :  { %10226 = vmatprep.subr.bf16.mxu0 %v14332_v38  ;;  %v14388_v38 = vcombine.high %v1351_v32, %v1355_v33 }
 0x1fa   :  { %10614 = vmatpush1.bf16.msra.mxu1 %v13821_v43  ;;  %v13877_v43 = vcombine.low %v840_v28, %v844_v30  ;;  %v1407_v28 = vld [vmem:[%s20933_s1 + $0x2a80] sm:$0xff] }
 0x1fb   :  { %10227 = vmatpush1.bf16.msra.mxu0 %v14331_v44  ;;  %10615 = vmatprep.subr.bf16.mxu1 %v13830_v45  ;;  %v14387_v44 = vcombine.low %v1351_v32, %v1355_v33  ;;  %v13886_v45 = vcombine.high %v848_v39, %v852_v40  ;;  %v1411_v30 = vld [vmem:[%s20933_s1 + $0x2aa0] sm:$0xff] }
 0x1fc   :  { %10228 = vmatprep.subr.bf16.mxu0 %v14340_v11  ;;  %v14396_v11 = vcombine.high %v1359_v41, %v1363_v42 }
 0x1fe   :  { %10616 = vmatpush1.bf16.msra.mxu1 %v13829_v48  ;;  %v13885_v48 = vcombine.low %v848_v39, %v852_v40  ;;  %v1419_v39 = vld [vmem:[%s20933_s1 + $0x2ae0] sm:$0xff] }
 0x1ff   :  { %10229 = vmatpush1.bf16.msra.mxu0 %v14339_v49  ;;  %10617 = vmatprep.subr.bf16.mxu1 %v13838_v50  ;;  %v14395_v49 = vcombine.low %v1359_v41, %v1363_v42  ;;  %v13894_v50 = vcombine.high %v856_v46, %v860_v47  ;;  %v14443_v41 = vcombine.low %v1407_v28, %v1411_v30 }
 0x200   :  { %10230 = vmatprep.subr.bf16.mxu0 %v14348_v51  ;;  %v14404_v51 = vcombine.high %v1367_v58, %v1371_v20 }
 0x202   :  { %10618 = vmatpush1.bf16.msra.mxu1 %v13837_v55  ;;  %v13893_v55 = vcombine.low %v856_v46, %v860_v47  ;;  %v1427_v46 = vld [vmem:[%s20933_s1 + $0x2b20] sm:$0xff] }
 0x203   :  { %10231 = vmatpush1.bf16.msra.mxu0 %v14347_v56  ;;  %10619 = vmatprep.subr.bf16.mxu1 %v13846_v57  ;;  %v14403_v56 = vcombine.low %v1367_v58, %v1371_v20  ;;  %v13902_v57 = vcombine.high %v864_v52, %v868_v53 }
 0x204   :  { %10232 = vmatprep.subr.bf16.mxu0 %v14356_v59  ;;  %v14412_v59 = vcombine.high %v1375_v21, %v1379_v54 }
 0x206   :  { %10620 = vmatpush1.bf16.msra.mxu1 %v13845_v0  ;;  %v13901_v0 = vcombine.low %v864_v52, %v868_v53  ;;  %v1435_v52 = vld [vmem:[%s20933_s1 + $0x2b60] sm:$0xff] }
 0x207   :  { %10233 = vmatpush1.bf16.msra.mxu0 %v14355_v1  ;;  %10632 = vmatprep.subr.bf16.mxu1 %v13854_v2  ;;  %v14411_v1 = vcombine.low %v1375_v21, %v1379_v54  ;;  %v13910_v2 = vcombine.high %v872_v60, %v876_v61 }
 0x208   :  { %10245 = vmatprep.subr.bf16.mxu0 %v14364_v3  ;;  %v14420_v3 = vcombine.high %v1383_v62, %v1387_v63 }
 0x209   :  { %10622 = vmatmul.mubr.bf16.vlgmr.msra.gmra.mrb[4].mxu1 %v15274_v17  ;;  %v13917_v17 = vcombine.low %v880_v4, %v884_v5 }
 0x20a   :  { %10235 = vmatmul.mubr.bf16.vlgmr.msra.gmra.mrb[0].mxu0 %v15067_v9  ;;  %10633 = vmatpush1.bf16.msra.mxu1 %v13853_v8  ;;  %v13909_v8 = vcombine.low %v872_v60, %v876_v61  ;;  %v14419_v9 = vcombine.low %v1383_v62, %v1387_v63  ;;  %v1443_v60 = vld [vmem:[%s20933_s1 + $0x2ba0] sm:$0xff] }
 0x20b   :  { %10246 = vmatpush1.bf16.msra.mxu0 %v14363_v10  ;;  %10634 = vmatprep.subr.bf16.mxu1 %v13862_v12  ;;  %v13918_v10 = vcombine.high %v880_v4, %v884_v5  ;;  %v14428_v12 = vcombine.high %v1391_v6, %v1395_v7  ;;  %v1451_v4 = vld [vmem:[%s20933_s1 + $0x2be0] sm:$0xff] }
 0x20c   :  { %10247 = vmatprep.subr.bf16.mxu0 %v14372_v13  ;;  %10277 = vmatprep.mubr.bf16.mxu0 %v15068_v16  ;;  %v888_v13 = vld [vmem:[%s20933_s1 + $0x1a48] sm:$0xff]  ;;  %v1403_v16 = vld [vmem:[%s20933_s1 + $0x2a60] sm:$0xff] }
 0x20d   :  { %10664 = vmatprep.mubr.bf16.mxu1 %v15275_v34  ;;  %v13926_v19 = vcombine.high %v888_v13, %v892_v14  ;;  %v13925_v32 = vcombine.low %v888_v13, %v892_v14  ;;  %v14435_v33 = vcombine.low %v1399_v15, %v1403_v16  ;;  %v1459_v13 = vld [vmem:[%s20933_s1 + $0x2c20] sm:$0xff] }
 0x20e   :  { %10635 = vmatpush1.bf16.msra.mxu1 %v13861_v23  ;;  %v14436_v23 = vcombine.high %v1399_v15, %v1403_v16 }
 0x20f   :  { %10248 = vmatpush1.bf16.msra.mxu0 %v14371_v24  ;;  %10636 = vmatprep.subr.bf16.mxu1 %v13870_v25  ;;  %v896_v24 = vld [vmem:[%s20933_s1 + $0x1a88] sm:$0xff] }
 0x210   :  { %10249 = vmatprep.subr.bf16.mxu0 %v14380_v27  ;;  %v900_v25 = vld [vmem:[%s20933_s1 + $0x1aa8] sm:$0xff]  ;;  %v15340_v27 = vmov 0  }
 0x211   :  { %15036 = vset.pattern.permute.xlu1 %v15340_v27  ;;  %15037 = vset.pattern.permute.xlu0 %v15340_v27  ;;  %v13934_v34 = vcombine.high %v896_v24, %v900_v25  ;;  %v13933_v40 = vcombine.low %v896_v24, %v900_v25  ;;  %v1467_v24 = vld [vmem:[%s20933_s1 + $0x2c60] sm:$0xff] }
 0x212   :  { %10637 = vmatpush1.bf16.msra.mxu1 %v13869_v35  ;;  %v14444_v35 = vcombine.high %v1407_v28, %v1411_v30  ;;  %v15070_v28 = vld [vmem:[%s20934_s0 + $0x50] ss:$100 sps:$4 sm:$0xff]  }
 0x213   :  { %10250 = vmatpush1.bf16.msra.mxu0 %v14379_v36  ;;  %10638 = vmatprep.subr.bf16.mxu1 %v13878_v37  ;;  %v904_v36 = vld [vmem:[%s20933_s1 + $0x1ac8] sm:$0xff] }
 0x214   :  { %10251 = vmatprep.subr.bf16.mxu0 %v14388_v38  ;;  %v908_v37 = vld [vmem:[%s20933_s1 + $0x1ae8] sm:$0xff]  ;;  %v1415_v38 = vld [vmem:[%s20933_s1 + $0x2ac0] sm:$0xff] }
 0x215   :  { %v13942_v42 = vcombine.high %v904_v36, %v908_v37  ;;  %v13941_v47 = vcombine.low %v904_v36, %v908_v37  ;;  %v14451_v58 = vcombine.low %v1415_v38, %v1419_v39  ;;  %v15071_v36 = vld [vmem:[%s20934_s0 + $0x5c] ss:$100 sps:$4 sm:$0xff]   ;;  %v15276_v37 = vld [vmem:[%s20934_s0 + $0x30] ss:$100 sps:$4 sm:$0xff]  }
 0x216   :  { %10639 = vmatpush1.bf16.msra.mxu1 %v13877_v43  ;;  %v14452_v43 = vcombine.high %v1415_v38, %v1419_v39  ;;  %v1471_v38 = vld [vmem:[%s20933_s1 + $0x2c80] sm:$0xff] }
 0x217   :  { %10252 = vmatpush1.bf16.msra.mxu0 %v14387_v44  ;;  %10640 = vmatprep.subr.bf16.mxu1 %v13886_v45  ;;  %v912_v44 = vld [vmem:[%s20933_s1 + $0x1b08] sm:$0xff]  ;;  %v1475_v39 = vld [vmem:[%s20933_s1 + $0x2ca0] sm:$0xff] }
 0x218   :  { %10253 = vmatprep.subr.bf16.mxu0 %v14396_v11  ;;  %v916_v45 = vld [vmem:[%s20933_s1 + $0x1b28] sm:$0xff]  ;;  %v1423_v11 = vld [vmem:[%s20933_s1 + $0x2b00] sm:$0xff] }
 0x219   :  { %v13950_v20 = vcombine.high %v912_v44, %v916_v45  ;;  %v13949_v53 = vcombine.low %v912_v44, %v916_v45  ;;  %v14459_v21 = vcombine.low %v1423_v11, %v1427_v46  ;;  %v968_v44 = vld [vmem:[%s20933_s1 + $0x1cc8] sm:$0xff] }
 0x21a   :  { %10641 = vmatpush1.bf16.msra.mxu1 %v13885_v48  ;;  %v14460_v48 = vcombine.high %v1423_v11, %v1427_v46  ;;  %v972_v45 = vld [vmem:[%s20933_s1 + $0x1ce8] sm:$0xff]  ;;  %v1479_v11 = vld [vmem:[%s20933_s1 + $0x2cc0] sm:$0xff] }
 0x21b   :  { %10254 = vmatpush1.bf16.msra.mxu0 %v14395_v49  ;;  %10642 = vmatprep.subr.bf16.mxu1 %v13894_v50  ;;  %v920_v49 = vld [vmem:[%s20933_s1 + $0x1b48] sm:$0xff]  ;;  %v1483_v46 = vld [vmem:[%s20933_s1 + $0x2ce0] sm:$0xff] }
 0x21c   :  { %10255 = vmatprep.subr.bf16.mxu0 %v14404_v51  ;;  %v924_v50 = vld [vmem:[%s20933_s1 + $0x1b68] sm:$0xff]  ;;  %v1431_v51 = vld [vmem:[%s20933_s1 + $0x2b40] sm:$0xff] }
 0x21d   :  { %v13958_v54 = vcombine.high %v920_v49, %v924_v50  ;;  %v13957_v61 = vcombine.low %v920_v49, %v924_v50  ;;  %v14467_v62 = vcombine.low %v1431_v51, %v1435_v52  ;;  %v14516_v49 = vcombine.high %v1479_v11, %v1483_v46  ;;  %v976_v50 = vld [vmem:[%s20933_s1 + $0x1d08] sm:$0xff] }
 0x21e   :  { %10643 = vmatpush1.bf16.msra.mxu1 %v13893_v55  ;;  %v14468_v55 = vcombine.high %v1431_v51, %v1435_v52  ;;  %v980_v51 = vld [vmem:[%s20933_s1 + $0x1d28] sm:$0xff]  ;;  %v1487_v52 = vld [vmem:[%s20933_s1 + $0x2d00] sm:$0xff] }
 0x21f   :  { %10256 = vmatpush1.bf16.msra.mxu0 %v14403_v56  ;;  %10644 = vmatprep.subr.bf16.mxu1 %v13902_v57  ;;  %v928_v56 = vld [vmem:[%s20933_s1 + $0x1b88] sm:$0xff] }
 0x220   :  { %10257 = vmatprep.subr.bf16.mxu0 %v14412_v59  ;;  %v932_v57 = vld [vmem:[%s20933_s1 + $0x1ba8] sm:$0xff]  ;;  %v1439_v59 = vld [vmem:[%s20933_s1 + $0x2b80] sm:$0xff] }
 0x221   :  { %v13966_v63 = vcombine.high %v928_v56, %v932_v57  ;;  %v13965_v5 = vcombine.low %v928_v56, %v932_v57  ;;  %v14475_v6 = vcombine.low %v1439_v59, %v1443_v60  ;;  %v984_v57 = vld [vmem:[%s20933_s1 + $0x1d48] sm:$0xff] }
 0x222   :  { %10645 = vmatpush1.bf16.msra.mxu1 %v13901_v0  ;;  %v14476_v0 = vcombine.high %v1439_v59, %v1443_v60  ;;  %v988_v59 = vld [vmem:[%s20933_s1 + $0x1d68] sm:$0xff]  ;;  %v1495_v60 = vld [vmem:[%s20933_s1 + $0x2d40] sm:$0xff] }
 0x223   :  { %10258 = vmatpush1.bf16.msra.mxu0 %v14411_v1  ;;  %10646 = vmatprep.subr.bf16.mxu1 %v13910_v2  ;;  %v936_v1 = vld [vmem:[%s20933_s1 + $0x1bc8] sm:$0xff] }
 0x224   :  { %10259 = vmatprep.subr.bf16.mxu0 %v14420_v3  ;;  %v940_v2 = vld [vmem:[%s20933_s1 + $0x1be8] sm:$0xff]  ;;  %v1447_v3 = vld [vmem:[%s20933_s1 + $0x2bc0] sm:$0xff] }
 0x225   :  { %v13974_v7 = vcombine.high %v936_v1, %v940_v2  ;;  %v13973_v14 = vcombine.low %v936_v1, %v940_v2  ;;  %v14483_v15 = vcombine.low %v1447_v3, %v1451_v4  ;;  %v992_v2 = vld [vmem:[%s20933_s1 + $0x1d88] sm:$0xff] }
 0x226   :  { %10647 = vmatpush1.bf16.msra.mxu1 %v13909_v8  ;;  %v14484_v8 = vcombine.high %v1447_v3, %v1451_v4  ;;  %v996_v3 = vld [vmem:[%s20933_s1 + $0x1da8] sm:$0xff]  ;;  %v1503_v4 = vld [vmem:[%s20933_s1 + $0x2d80] sm:$0xff] }
 0x227   :  { %10260 = vmatpush1.bf16.msra.mxu0 %v14419_v9  ;;  %10648 = vmatprep.subr.bf16.mxu1 %v13918_v10  ;;  %v944_v9 = vld [vmem:[%s20933_s1 + $0x1c08] sm:$0xff] }
 0x228   :  { %10261 = vmatprep.subr.bf16.mxu0 %v14428_v12  ;;  %v948_v10 = vld [vmem:[%s20933_s1 + $0x1c28] sm:$0xff]  ;;  %v1455_v12 = vld [vmem:[%s20933_s1 + $0x2c00] sm:$0xff] }
 0x229   :  { %v13982_v16 = vcombine.high %v944_v9, %v948_v10  ;;  %v13981_v25 = vcombine.low %v944_v9, %v948_v10  ;;  %v14491_v30 = vcombine.low %v1455_v12, %v1459_v13  ;;  %v1000_v10 = vld [vmem:[%s20933_s1 + $0x1dc8] sm:$0xff] }
 0x22a   :  { %10649 = vmatpush1.bf16.msra.mxu1 %v13917_v17  ;;  %v14492_v17 = vcombine.high %v1455_v12, %v1459_v13  ;;  %v1004_v12 = vld [vmem:[%s20933_s1 + $0x1de8] sm:$0xff]  ;;  %v1511_v13 = vld [vmem:[%s20933_s1 + $0x2dc0] sm:$0xff] }
 0x22b   :  { %10262 = vmatpush1.bf16.msra.mxu0 %v14427_v18  ;;  %10650 = vmatprep.subr.bf16.mxu1 %v13926_v19  ;;  %v952_v18 = vld [vmem:[%s20933_s1 + $0x1c48] sm:$0xff] }
 0x22c   :  { %10263 = vmatprep.subr.bf16.mxu0 %v14436_v23  ;;  %v956_v19 = vld [vmem:[%s20933_s1 + $0x1c68] sm:$0xff]  ;;  %v1463_v23 = vld [vmem:[%s20933_s1 + $0x2c40] sm:$0xff] }
 0x22e   :  { %10651 = vmatpush1.bf16.msra.mxu1 %v13925_v32  ;;  %v13990_v32 = vcombine.high %v952_v18, %v956_v19 }
 0x22f   :  { %10264 = vmatpush1.bf16.msra.mxu0 %v14435_v33  ;;  %10652 = vmatprep.subr.bf16.mxu1 %v13934_v34  ;;  %v14500_v33 = vcombine.high %v1463_v23, %v1467_v24  ;;  %v960_v34 = vld [vmem:[%s20933_s1 + $0x1c88] sm:$0xff] }
 0x230   :  { %10265 = vmatprep.subr.bf16.mxu0 %v14444_v35  ;;  %v964_v35 = vld [vmem:[%s20933_s1 + $0x1ca8] sm:$0xff] }
 0x232   :  { %10653 = vmatpush1.bf16.msra.mxu1 %v13933_v40  ;;  %v13989_v40 = vcombine.low %v952_v18, %v956_v19  ;;  %v1008_v19 = vld [vmem:[%s20933_s1 + $0x1e08] sm:$0xff] }
 0x233   :  { %10266 = vmatpush1.bf16.msra.mxu0 %v14443_v41  ;;  %10654 = vmatprep.subr.bf16.mxu1 %v13942_v42  ;;  %v14499_v41 = vcombine.low %v1463_v23, %v1467_v24  ;;  %v13998_v42 = vcombine.high %v960_v34, %v964_v35  ;;  %v1012_v23 = vld [vmem:[%s20933_s1 + $0x1e28] sm:$0xff]  ;;  %v1519_v24 = vld [vmem:[%s20933_s1 + $0x2e00] sm:$0xff] }
 0x234   :  { %10267 = vmatprep.subr.bf16.mxu0 %v14452_v43  ;;  %v14508_v43 = vcombine.high %v1471_v38, %v1475_v39 }
 0x236   :  { %10655 = vmatpush1.bf16.msra.mxu1 %v13941_v47  ;;  %v15277_v47 = vld [vmem:[%s20934_s0 + $0x3c] ss:$100 sps:$4 sm:$0xff]  }
 0x237   :  { %10268 = vmatpush1.bf16.msra.mxu0 %v14451_v58  ;;  %10656 = vmatprep.subr.bf16.mxu1 %v13950_v20  ;;  %v13997_v58 = vcombine.low %v960_v34, %v964_v35  ;;  %v14507_v20 = vcombine.low %v1471_v38, %v1475_v39  ;;  %v1016_v34 = vld [vmem:[%s20933_s1 + $0x1e48] sm:$0xff]  ;;  %v14045_v38 = vcombine.low %v1008_v19, %v1012_v23 }
 0x238   :  { %10269 = vmatprep.subr.bf16.mxu0 %v14460_v48  ;;  %v14006_v48 = vcombine.high %v968_v44, %v972_v45  ;;  %v1020_v35 = vld [vmem:[%s20933_s1 + $0x1e68] sm:$0xff] }
 0x23a   :  { %10657 = vmatpush1.bf16.msra.mxu1 %v13949_v53  ;;  %v1491_v53 = vld [vmem:[%s20933_s1 + $0x2d20] sm:$0xff] }
 0x23b   :  { %10270 = vmatpush1.bf16.msra.mxu0 %v14459_v21  ;;  %10658 = vmatprep.subr.bf16.mxu1 %v13958_v54  ;;  %v14005_v21 = vcombine.low %v968_v44, %v972_v45  ;;  %v14515_v54 = vcombine.low %v1479_v11, %v1483_v46  ;;  %v14524_v56 = vcombine.high %v1487_v52, %v1491_v53  ;;  %v1535_v44 = vld [vmem:[%s20933_s1 + $0x2e80] sm:$0xff] }
 0x23c   :  { %10271 = vmatprep.subr.bf16.mxu0 %v14468_v55  ;;  %v14014_v55 = vcombine.high %v976_v50, %v980_v51  ;;  %v1539_v45 = vld [vmem:[%s20933_s1 + $0x2ea0] sm:$0xff]  ;;  %v14053_v11 = vcombine.low %v1016_v34, %v1020_v35 }
 0x23e   :  { %10659 = vmatpush1.bf16.msra.mxu1 %v13957_v61  ;;  %v1499_v61 = vld [vmem:[%s20933_s1 + $0x2d60] sm:$0xff] }
 0x23f   :  { %10272 = vmatpush1.bf16.msra.mxu0 %v14467_v62  ;;  %10660 = vmatprep.subr.bf16.mxu1 %v13966_v63  ;;  %v14013_v62 = vcombine.low %v976_v50, %v980_v51  ;;  %v14523_v63 = vcombine.low %v1487_v52, %v1491_v53  ;;  %v14532_v1 = vcombine.high %v1495_v60, %v1499_v61  ;;  %v1547_v50 = vld [vmem:[%s20933_s1 + $0x2ee0] sm:$0xff] }
 0x240   :  { %10273 = vmatprep.subr.bf16.mxu0 %v14476_v0  ;;  %v14022_v0 = vcombine.high %v984_v57, %v988_v59  ;;  %v14571_v52 = vcombine.low %v1535_v44, %v1539_v45 }
 0x242   :  { %10661 = vmatpush1.bf16.msra.mxu1 %v13965_v5  ;;  %v1507_v5 = vld [vmem:[%s20933_s1 + $0x2da0] sm:$0xff] }
 0x243   :  { %10274 = vmatpush1.bf16.msra.mxu0 %v14475_v6  ;;  %10662 = vmatprep.subr.bf16.mxu1 %v13974_v7  ;;  %v14021_v6 = vcombine.low %v984_v57, %v988_v59  ;;  %v14531_v7 = vcombine.low %v1495_v60, %v1499_v61  ;;  %v14540_v9 = vcombine.high %v1503_v4, %v1507_v5  ;;  %v1555_v57 = vld [vmem:[%s20933_s1 + $0x2f20] sm:$0xff] }
 0x244   :  { %10275 = vmatprep.subr.bf16.mxu0 %v14484_v8  ;;  %v14030_v8 = vcombine.high %v992_v2, %v996_v3 }
 0x246   :  { %10663 = vmatpush1.bf16.msra.mxu1 %v13973_v14  ;;  %v1515_v14 = vld [vmem:[%s20933_s1 + $0x2de0] sm:$0xff] }
 0x247   :  { %10276 = vmatpush1.bf16.msra.mxu0 %v14483_v15  ;;  %10675 = vmatprep.subr.bf16.mxu1 %v13982_v16  ;;  %v14029_v15 = vcombine.low %v992_v2, %v996_v3  ;;  %v14539_v16 = vcombine.low %v1503_v4, %v1507_v5  ;;  %v14548_v18 = vcombine.high %v1511_v13, %v1515_v14  ;;  %v1563_v2 = vld [vmem:[%s20933_s1 + $0x2f60] sm:$0xff] }
 0x248   :  { %10288 = vmatprep.subr.bf16.mxu0 %v14492_v17  ;;  %v14038_v17 = vcombine.high %v1000_v10, %v1004_v12 }
 0x249   :  { %10665 = vmatmul.mubr.bf16.vlgmr.msra.gmra.mrb[4].mxu1 %v15276_v37  ;;  %v1531_v37 = vld [vmem:[%s20933_s1 + $0x2e60] sm:$0xff] }
 0x24a   :  { %10278 = vmatmul.mubr.bf16.vlgmr.msra.gmra.mrb[0].mxu0 %v15070_v28  ;;  %10676 = vmatpush1.bf16.msra.mxu1 %v13981_v25  ;;  %v1523_v25 = vld [vmem:[%s20933_s1 + $0x2e20] sm:$0xff]  ;;  %v14037_v28 = vcombine.low %v1000_v10, %v1004_v12 }
 0x24b   :  { %10289 = vmatpush1.bf16.msra.mxu0 %v14491_v30  ;;  %10677 = vmatprep.subr.bf16.mxu1 %v13990_v32  ;;  %v14547_v30 = vcombine.low %v1511_v13, %v1515_v14  ;;  %v14046_v32 = vcombine.high %v1008_v19, %v1012_v23  ;;  %v14555_v39 = vcombine.low %v1519_v24, %v1523_v25  ;;  %v1571_v10 = vld [vmem:[%s20933_s1 + $0x2fa0] sm:$0xff] }
 0x24c   :  { %10290 = vmatprep.subr.bf16.mxu0 %v14500_v33  ;;  %10320 = vmatprep.mubr.bf16.mxu0 %v15071_v36  ;;  %v14556_v33 = vcombine.high %v1519_v24, %v1523_v25  ;;  %v1527_v36 = vld [vmem:[%s20933_s1 + $0x2e40] sm:$0xff] }
 0x24d   :  { %10707 = vmatprep.mubr.bf16.mxu1 %v15277_v47  ;;  %v14563_v46 = vcombine.low %v1527_v36, %v1531_v37  ;;  %v1579_v19 = vld [vmem:[%s20933_s1 + $0x2fe0] sm:$0xff] }
 0x24e   :  { %10678 = vmatpush1.bf16.msra.mxu1 %v13989_v40  ;;  %v14054_v40 = vcombine.high %v1016_v34, %v1020_v35  ;;  %v1587_v34 = vld [vmem:[%s20933_s1 + $0x3020] sm:$0xff] }
 0x24f   :  { %10291 = vmatpush1.bf16.msra.mxu0 %v14499_v41  ;;  %10679 = vmatprep.subr.bf16.mxu1 %v13998_v42  ;;  %v14564_v41 = vcombine.high %v1527_v36, %v1531_v37  ;;  %v1024_v42 = vld [vmem:[%s20933_s1 + $0x1e88] sm:$0xff] }
 0x250   :  { %10292 = vmatprep.subr.bf16.mxu0 %v14508_v43  ;;  %v1028_v43 = vld [vmem:[%s20933_s1 + $0x1ea8] sm:$0xff] }
 0x251   :  { %v14062_v47 = vcombine.high %v1024_v42, %v1028_v43  ;;  %v14061_v51 = vcombine.low %v1024_v42, %v1028_v43  ;;  %v1595_v42 = vld [vmem:[%s20933_s1 + $0x3060] sm:$0xff] }
 0x252   :  { %10680 = vmatpush1.bf16.msra.mxu1 %v13997_v58  ;;  %v14572_v58 = vcombine.high %v1535_v44, %v1539_v45  ;;  %v15073_v44 = vld [vmem:[%s20934_s0 + $0x58] ss:$100 sps:$4 sm:$0xff]  }
 0x253   :  { %10293 = vmatpush1.bf16.msra.mxu0 %v14507_v20  ;;  %10681 = vmatprep.subr.bf16.mxu1 %v14006_v48  ;;  %v1032_v20 = vld [vmem:[%s20933_s1 + $0x1ec8] sm:$0xff] }
 0x254   :  { %10294 = vmatprep.subr.bf16.mxu0 %v14516_v49  ;;  %v1036_v48 = vld [vmem:[%s20933_s1 + $0x1ee8] sm:$0xff]  ;;  %v1543_v49 = vld [vmem:[%s20933_s1 + $0x2ec0] sm:$0xff] }
 0x255   :  { %v14070_v53 = vcombine.high %v1032_v20, %v1036_v48  ;;  %v14069_v59 = vcombine.low %v1032_v20, %v1036_v48  ;;  %v14579_v60 = vcombine.low %v1543_v49, %v1547_v50  ;;  %v15278_v20 = vld [vmem:[%s20934_s0 + $0x38] ss:$100 sps:$4 sm:$0xff]   ;;  %v1599_v48 = vld [vmem:[%s20933_s1 + $0x3080] sm:$0xff] }
 0x256   :  { %10682 = vmatpush1.bf16.msra.mxu1 %v14005_v21  ;;  %v14580_v21 = vcombine.high %v1543_v49, %v1547_v50  ;;  %v1603_v49 = vld [vmem:[%s20933_s1 + $0x30a0] sm:$0xff] }
 0x257   :  { %10295 = vmatpush1.bf16.msra.mxu0 %v14515_v54  ;;  %10683 = vmatprep.subr.bf16.mxu1 %v14014_v55  ;;  %v1040_v54 = vld [vmem:[%s20933_s1 + $0x1f08] sm:$0xff] }
 0x258   :  { %10296 = vmatprep.subr.bf16.mxu0 %v14524_v56  ;;  %v1044_v55 = vld [vmem:[%s20933_s1 + $0x1f28] sm:$0xff]  ;;  %v1551_v56 = vld [vmem:[%s20933_s1 + $0x2f00] sm:$0xff] }
 0x259   :  { %v14078_v61 = vcombine.high %v1040_v54, %v1044_v55  ;;  %v14077_v3 = vcombine.low %v1040_v54, %v1044_v55  ;;  %v14587_v4 = vcombine.low %v1551_v56, %v1555_v57  ;;  %v1100_v54 = vld [vmem:[%s20933_s1 + $0x20e8] sm:$0xff]  ;;  %v1607_v55 = vld [vmem:[%s20933_s1 + $0x30c0] sm:$0xff] }
 0x25a   :  { %10684 = vmatpush1.bf16.msra.mxu1 %v14013_v62  ;;  %v14588_v62 = vcombine.high %v1551_v56, %v1555_v57  ;;  %v1611_v56 = vld [vmem:[%s20933_s1 + $0x30e0] sm:$0xff] }
 0x25b   :  { %10297 = vmatpush1.bf16.msra.mxu0 %v14523_v63  ;;  %10685 = vmatprep.subr.bf16.mxu1 %v14022_v0  ;;  %v1048_v63 = vld [vmem:[%s20933_s1 + $0x1f48] sm:$0xff] }
 0x25c   :  { %10298 = vmatprep.subr.bf16.mxu0 %v14532_v1  ;;  %v1052_v0 = vld [vmem:[%s20933_s1 + $0x1f68] sm:$0xff]  ;;  %v1559_v1 = vld [vmem:[%s20933_s1 + $0x2f40] sm:$0xff] }
 0x25d   :  { %v14086_v5 = vcombine.high %v1048_v63, %v1052_v0  ;;  %v14085_v12 = vcombine.low %v1048_v63, %v1052_v0  ;;  %v14595_v13 = vcombine.low %v1559_v1, %v1563_v2  ;;  %v15279_v57 = vld [vmem:[%s20934_s0 + $0x44] ss:$100 sps:$4 sm:$0xff]  }
 0x25e   :  { %10686 = vmatpush1.bf16.msra.mxu1 %v14021_v6  ;;  %v14596_v6 = vcombine.high %v1559_v1, %v1563_v2  ;;  %v1104_v63 = vld [vmem:[%s20933_s1 + $0x2108] sm:$0xff]  ;;  %v1615_v1 = vld [vmem:[%s20933_s1 + $0x3100] sm:$0xff] }
 0x25f   :  { %10299 = vmatpush1.bf16.msra.mxu0 %v14531_v7  ;;  %10687 = vmatprep.subr.bf16.mxu1 %v14030_v8  ;;  %v1056_v7 = vld [vmem:[%s20933_s1 + $0x1f88] sm:$0xff]  ;;  %v1619_v2 = vld [vmem:[%s20933_s1 + $0x3120] sm:$0xff] }
 0x260   :  { %10300 = vmatprep.subr.bf16.mxu0 %v14540_v9  ;;  %v1060_v8 = vld [vmem:[%s20933_s1 + $0x1fa8] sm:$0xff]  ;;  %v1567_v9 = vld [vmem:[%s20933_s1 + $0x2f80] sm:$0xff] }
 0x261   :  { %v14094_v14 = vcombine.high %v1056_v7, %v1060_v8  ;;  %v14093_v23 = vcombine.low %v1056_v7, %v1060_v8  ;;  %v14603_v24 = vcombine.low %v1567_v9, %v1571_v10  ;;  %v1108_v0 = vld [vmem:[%s20933_s1 + $0x2128] sm:$0xff] }
 0x262   :  { %10688 = vmatpush1.bf16.msra.mxu1 %v14029_v15  ;;  %v14604_v15 = vcombine.high %v1567_v9, %v1571_v10  ;;  %v1112_v7 = vld [vmem:[%s20933_s1 + $0x2148] sm:$0xff]  ;;  %v1623_v9 = vld [vmem:[%s20933_s1 + $0x3140] sm:$0xff] }
 0x263   :  { %10301 = vmatpush1.bf16.msra.mxu0 %v14539_v16  ;;  %10689 = vmatprep.subr.bf16.mxu1 %v14038_v17  ;;  %v1064_v16 = vld [vmem:[%s20933_s1 + $0x1fc8] sm:$0xff]  ;;  %v1627_v10 = vld [vmem:[%s20933_s1 + $0x3160] sm:$0xff] }
 0x264   :  { %10302 = vmatprep.subr.bf16.mxu0 %v14548_v18  ;;  %v1068_v17 = vld [vmem:[%s20933_s1 + $0x1fe8] sm:$0xff]  ;;  %v1575_v18 = vld [vmem:[%s20933_s1 + $0x2fc0] sm:$0xff] }
 0x265   :  { %v14102_v25 = vcombine.high %v1064_v16, %v1068_v17  ;;  %v14101_v35 = vcombine.low %v1064_v16, %v1068_v17  ;;  %v14611_v36 = vcombine.low %v1575_v18, %v1579_v19  ;;  %v1116_v8 = vld [vmem:[%s20933_s1 + $0x2168] sm:$0xff] }
 0x266   :  { %10690 = vmatpush1.bf16.msra.mxu1 %v14037_v28  ;;  %v14612_v28 = vcombine.high %v1575_v18, %v1579_v19  ;;  %v1120_v16 = vld [vmem:[%s20933_s1 + $0x2188] sm:$0xff]  ;;  %v1631_v18 = vld [vmem:[%s20933_s1 + $0x3180] sm:$0xff] }
 0x267   :  { %10303 = vmatpush1.bf16.msra.mxu0 %v14547_v30  ;;  %10691 = vmatprep.subr.bf16.mxu1 %v14046_v32  ;;  %v1072_v30 = vld [vmem:[%s20933_s1 + $0x2008] sm:$0xff]  ;;  %v1635_v19 = vld [vmem:[%s20933_s1 + $0x31a0] sm:$0xff] }
 0x268   :  { %10304 = vmatprep.subr.bf16.mxu0 %v14556_v33  ;;  %v1076_v32 = vld [vmem:[%s20933_s1 + $0x2028] sm:$0xff]  ;;  %v1583_v33 = vld [vmem:[%s20933_s1 + $0x3000] sm:$0xff] }
 0x269   :  { %v14110_v37 = vcombine.high %v1072_v30, %v1076_v32  ;;  %v14109_v43 = vcombine.low %v1072_v30, %v1076_v32  ;;  %v14619_v45 = vcombine.low %v1583_v33, %v1587_v34  ;;  %v1124_v17 = vld [vmem:[%s20933_s1 + $0x21a8] sm:$0xff] }
 0x26a   :  { %10692 = vmatpush1.bf16.msra.mxu1 %v14045_v38  ;;  %v14620_v38 = vcombine.high %v1583_v33, %v1587_v34  ;;  %v1128_v30 = vld [vmem:[%s20933_s1 + $0x21c8] sm:$0xff]  ;;  %v1639_v33 = vld [vmem:[%s20933_s1 + $0x31c0] sm:$0xff] }
 0x26b   :  { %10305 = vmatpush1.bf16.msra.mxu0 %v14555_v39  ;;  %10693 = vmatprep.subr.bf16.mxu1 %v14054_v40  ;;  %v1080_v39 = vld [vmem:[%s20933_s1 + $0x2048] sm:$0xff]  ;;  %v1643_v34 = vld [vmem:[%s20933_s1 + $0x31e0] sm:$0xff] }
 0x26c   :  { %10306 = vmatprep.subr.bf16.mxu0 %v14564_v41  ;;  %v1084_v40 = vld [vmem:[%s20933_s1 + $0x2068] sm:$0xff]  ;;  %v1591_v41 = vld [vmem:[%s20933_s1 + $0x3040] sm:$0xff] }
 0x26d   :  { %v14117_v50 = vcombine.low %v1080_v39, %v1084_v40  ;;  %v1132_v32 = vld [vmem:[%s20933_s1 + $0x21e8] sm:$0xff] }
 0x26e   :  { %10694 = vmatpush1.bf16.msra.mxu1 %v14053_v11  ;;  %v14118_v11 = vcombine.high %v1080_v39, %v1084_v40  ;;  %v1136_v39 = vld [vmem:[%s20933_s1 + $0x2208] sm:$0xff] }
 0x26f   :  { %10307 = vmatpush1.bf16.msra.mxu0 %v14563_v46  ;;  %10695 = vmatprep.subr.bf16.mxu1 %v14062_v47  ;;  %v14628_v46 = vcombine.high %v1591_v41, %v1595_v42  ;;  %v1088_v47 = vld [vmem:[%s20933_s1 + $0x2088] sm:$0xff] }
 0x270   :  { %10308 = vmatprep.subr.bf16.mxu0 %v14572_v58  ;;  %v1092_v58 = vld [vmem:[%s20933_s1 + $0x20a8] sm:$0xff] }
 0x271   :  { %v1140_v40 = vld [vmem:[%s20933_s1 + $0x2228] sm:$0xff] }
 0x272   :  { %10696 = vmatpush1.bf16.msra.mxu1 %v14061_v51  ;;  %v14627_v51 = vcombine.low %v1591_v41, %v1595_v42  ;;  %v49_v41 = vld [vmem:[%s20933_s1 + $0x10] sm:$0xff] }
 0x273   :  { %10309 = vmatpush1.bf16.msra.mxu0 %v14571_v52  ;;  %10697 = vmatprep.subr.bf16.mxu1 %v14070_v53  ;;  %v14126_v52 = vcombine.high %v1088_v47, %v1092_v58  ;;  %v14636_v53 = vcombine.high %v1599_v48, %v1603_v49  ;;  %v53_v42 = vld [vmem:[%s20933_s1 + $0x30] sm:$0xff] }
 0x274   :  { %10310 = vmatprep.subr.bf16.mxu0 %v14580_v21  ;;  %v1096_v21 = vld [vmem:[%s20933_s1 + $0x20c8] sm:$0xff] }
 0x276   :  { %10698 = vmatpush1.bf16.msra.mxu1 %v14069_v59  ;;  %v14125_v59 = vcombine.low %v1088_v47, %v1092_v58  ;;  %v1148_v47 = vld [vmem:[%s20933_s1 + $0x2268] sm:$0xff]  ;;  %v57_v58 = vld [vmem:[%s20933_s1 + $0x50] sm:$0xff] }
 0x277   :  { %10311 = vmatpush1.bf16.msra.mxu0 %v14579_v60  ;;  %10699 = vmatprep.subr.bf16.mxu1 %v14078_v61  ;;  %v14635_v60 = vcombine.low %v1599_v48, %v1603_v49  ;;  %v14134_v61 = vcombine.high %v1096_v21, %v1100_v54  ;;  %v15074_v48 = vld [vmem:[%s20934_s0 + $0x60] ss:$100 sps:$4 sm:$0xff]   ;;  %v14173_v49 = vcombine.low %v1136_v39, %v1140_v40 }
 0x278   :  { %10312 = vmatprep.subr.bf16.mxu0 %v14588_v62  ;;  %v14644_v62 = vcombine.high %v1607_v55, %v1611_v56 }
 0x27a   :  { %10700 = vmatpush1.bf16.msra.mxu1 %v14077_v3  ;;  %v14133_v3 = vcombine.low %v1096_v21, %v1100_v54  ;;  %v1156_v21 = vld [vmem:[%s20933_s1 + $0x22a8] sm:$0xff]  ;;  %v65_v54 = vld [vmem:[%s20933_s1 + $0x90] sm:$0xff] }
 0x27b   :  { %10313 = vmatpush1.bf16.msra.mxu0 %v14587_v4  ;;  %10701 = vmatprep.subr.bf16.mxu1 %v14086_v5  ;;  %v14643_v4 = vcombine.low %v1607_v55, %v1611_v56  ;;  %v14142_v5 = vcombine.high %v1104_v63, %v1108_v0  ;;  %v69_v55 = vld [vmem:[%s20933_s1 + $0xb0] sm:$0xff] }
 0x27c   :  { %10314 = vmatprep.subr.bf16.mxu0 %v14596_v6  ;;  %v14652_v6 = vcombine.high %v1615_v1, %v1619_v2 }
 0x27e   :  { %10702 = vmatpush1.bf16.msra.mxu1 %v14085_v12  ;;  %v14141_v12 = vcombine.low %v1104_v63, %v1108_v0  ;;  %v15280_v63 = vld [vmem:[%s20934_s0 + $0x4] ss:$100 sps:$4 sm:$0xff]   ;;  %v73_v0 = vld [vmem:[%s20933_s1 + $0xd0] sm:$0xff] }
 0x27f   :  { %10315 = vmatpush1.bf16.msra.mxu0 %v14595_v13  ;;  %10703 = vmatprep.subr.bf16.mxu1 %v14094_v14  ;;  %v14651_v13 = vcombine.low %v1615_v1, %v1619_v2  ;;  %v14150_v14 = vcombine.high %v1112_v7, %v1116_v8  ;;  %v77_v1 = vld [vmem:[%s20933_s1 + $0xf0] sm:$0xff] }
 0x280   :  { %10316 = vmatprep.subr.bf16.mxu0 %v14604_v15  ;;  %v14660_v15 = vcombine.high %v1623_v9, %v1627_v10 }
 0x282   :  { %10704 = vmatpush1.bf16.msra.mxu1 %v14093_v23  ;;  %v14149_v23 = vcombine.low %v1112_v7, %v1116_v8  ;;  %v1172_v7 = vld [vmem:[%s20933_s1 + $0x2328] sm:$0xff]  ;;  %v81_v8 = vld [vmem:[%s20933_s1 + $0x110] sm:$0xff] }
 0x283   :  { %10317 = vmatpush1.bf16.msra.mxu0 %v14603_v24  ;;  %10705 = vmatprep.subr.bf16.mxu1 %v14102_v25  ;;  %v14659_v24 = vcombine.low %v1623_v9, %v1627_v10  ;;  %v14158_v25 = vcombine.high %v1120_v16, %v1124_v17  ;;  %v85_v9 = vld [vmem:[%s20933_s1 + $0x130] sm:$0xff] }
 0x284   :  { %10318 = vmatprep.subr.bf16.mxu0 %v14612_v28  ;;  %v14668_v28 = vcombine.high %v1631_v18, %v1635_v19 }
 0x286   :  { %10706 = vmatpush1.bf16.msra.mxu1 %v14101_v35  ;;  %v14157_v35 = vcombine.low %v1120_v16, %v1124_v17  ;;  %v1180_v16 = vld [vmem:[%s20933_s1 + $0x2368] sm:$0xff]  ;;  %v89_v17 = vld [vmem:[%s20933_s1 + $0x150] sm:$0xff] }
 0x287   :  { %10319 = vmatpush1.bf16.msra.mxu0 %v14611_v36  ;;  %10718 = vmatprep.subr.bf16.mxu1 %v14110_v37  ;;  %v14667_v36 = vcombine.low %v1631_v18, %v1635_v19  ;;  %v14166_v37 = vcombine.high %v1128_v30, %v1132_v32  ;;  %v93_v18 = vld [vmem:[%s20933_s1 + $0x170] sm:$0xff] }
 0x288   :  { %10331 = vmatprep.subr.bf16.mxu0 %v14620_v38  ;;  %v14676_v38 = vcombine.high %v1639_v33, %v1643_v34 }
 0x289   :  { %10708 = vmatmul.mubr.bf16.vlgmr.msra.gmra.mrb[4].mxu1 %v15278_v20  ;;  %v61_v20 = vld [vmem:[%s20933_s1 + $0x70] sm:$0xff] }
 0x28a   :  { %10321 = vmatmul.mubr.bf16.vlgmr.msra.gmra.mrb[0].mxu0 %v15073_v44  ;;  %10719 = vmatpush1.bf16.msra.mxu1 %v14109_v43  ;;  %v14165_v43 = vcombine.low %v1128_v30, %v1132_v32  ;;  %v14675_v44 = vcombine.low %v1639_v33, %v1643_v34  ;;  %v1188_v30 = vld [vmem:[%s20933_s1 + $0x23a8] sm:$0xff]  ;;  %v97_v32 = vld [vmem:[%s20933_s1 + $0x190] sm:$0xff] }
 0x28b   :  { %10332 = vmatpush1.bf16.msra.mxu0 %v14619_v45  ;;  %10720 = vmatprep.subr.bf16.mxu1 %v14118_v11  ;;  %v14174_v45 = vcombine.high %v1136_v39, %v1140_v40  ;;  %v13088_v11 = vcombine.high %v49_v41, %v53_v42  ;;  %v101_v33 = vld [vmem:[%s20933_s1 + $0x1b0] sm:$0xff]  ;;  %v1196_v39 = vld [vmem:[%s20933_s1 + $0x23e8] sm:$0xff] }
 0x28c   :  { %10333 = vmatprep.subr.bf16.mxu0 %v14628_v46  ;;  %10363 = vmatprep.mubr.bf16.mxu0 %v15340_v27  ;;  %v1144_v46 = vld [vmem:[%s20933_s1 + $0x2248] sm:$0xff]  ;;  %v105_v40 = vld [vmem:[%s20933_s1 + $0x1d0] sm:$0xff] }
 0x28d   :  { %10750 = vmatprep.mubr.bf16.mxu1 %v15279_v57  ;;  %v14181_v56 = vcombine.low %v1144_v46, %v1148_v47  ;;  %v13095_v57 = vcombine.low %v57_v58, %v61_v20 }
 0x28e   :  { %10721 = vmatpush1.bf16.msra.mxu1 %v14117_v50  ;;  %v13087_v50 = vcombine.low %v49_v41, %v53_v42  ;;  %v109_v41 = vld [vmem:[%s20933_s1 + $0x1f0] sm:$0xff] }
 0x28f   :  { %10334 = vmatpush1.bf16.msra.mxu0 %v14627_v51  ;;  %10722 = vmatprep.subr.bf16.mxu1 %v14126_v52  ;;  %v14182_v51 = vcombine.high %v1144_v46, %v1148_v47  ;;  %v13096_v52 = vcombine.high %v57_v58, %v61_v20  ;;  %v1204_v46 = vld [vmem:[%s20933_s1 + $0x2428] sm:$0xff]  ;;  %v113_v47 = vld [vmem:[%s20933_s1 + $0x210] sm:$0xff] }
 0x290   :  { %10335 = vmatprep.subr.bf16.mxu0 %v14636_v53  ;;  %v1152_v53 = vld [vmem:[%s20933_s1 + $0x2288] sm:$0xff]  ;;  %v117_v58 = vld [vmem:[%s20933_s1 + $0x230] sm:$0xff] }
 0x291   :  { %v14189_v2 = vcombine.low %v1152_v53, %v1156_v21 }
 0x292   :  { %10723 = vmatpush1.bf16.msra.mxu1 %v14125_v59  ;;  %v14190_v59 = vcombine.high %v1152_v53, %v1156_v21  ;;  %v121_v53 = vld [vmem:[%s20933_s1 + $0x250] sm:$0xff] }
 0x293   :  { %10336 = vmatpush1.bf16.msra.mxu0 %v14635_v60  ;;  %10724 = vmatprep.subr.bf16.mxu1 %v14134_v61  ;;  %v13104_v60 = vcombine.high %v65_v54, %v69_v55  ;;  %v1160_v61 = vld [vmem:[%s20933_s1 + $0x22c8] sm:$0xff]  ;;  %v125_v21 = vld [vmem:[%s20933_s1 + $0x270] sm:$0xff] }
 0x294   :  { %10337 = vmatprep.subr.bf16.mxu0 %v14644_v62  ;;  %v1164_v62 = vld [vmem:[%s20933_s1 + $0x22e8] sm:$0xff] }
 0x295   :  { %v14197_v10 = vcombine.low %v1160_v61, %v1164_v62 }
 0x296   :  { %10725 = vmatpush1.bf16.msra.mxu1 %v14133_v3  ;;  %v13103_v3 = vcombine.low %v65_v54, %v69_v55  ;;  %v13151_v55 = vcombine.low %v113_v47, %v117_v58 }
 0x297   :  { %10338 = vmatpush1.bf16.msra.mxu0 %v14643_v4  ;;  %10726 = vmatprep.subr.bf16.mxu1 %v14142_v5  ;;  %v14198_v4 = vcombine.high %v1160_v61, %v1164_v62  ;;  %v13112_v5 = vcombine.high %v73_v0, %v77_v1  ;;  %v15281_v61 = vld [vmem:[%s20934_s0 + $0x40] ss:$100 sps:$4 sm:$0xff]   ;;  %v129_v62 = vld [vmem:[%s20933_s1 + $0x290] sm:$0xff] }
 0x298   :  { %10339 = vmatprep.subr.bf16.mxu0 %v14652_v6  ;;  %v1168_v6 = vld [vmem:[%s20933_s1 + $0x2308] sm:$0xff] }
 0x299   :  { %v14205_v19 = vcombine.low %v1168_v6, %v1172_v7 }
 0x29a   :  { %10727 = vmatpush1.bf16.msra.mxu1 %v14141_v12  ;;  %v13111_v12 = vcombine.low %v73_v0, %v77_v1  ;;  %v15282_v1 = vld [vmem:[%s20934_s0 + $0x4c] ss:$100 sps:$4 sm:$0xff]  }
 0x29b   :  { %10340 = vmatpush1.bf16.msra.mxu0 %v14651_v13  ;;  %10728 = vmatprep.subr.bf16.mxu1 %v14150_v14  ;;  %v14206_v13 = vcombine.high %v1168_v6, %v1172_v7  ;;  %v13120_v14 = vcombine.high %v81_v8, %v85_v9  ;;  %v1228_v6 = vld [vmem:[%s20933_s1 + $0x24e8] sm:$0xff]  ;;  %v137_v7 = vld [vmem:[%s20933_s1 + $0x2d0] sm:$0xff] }
 0x29c   :  { %10341 = vmatprep.subr.bf16.mxu0 %v14660_v15  ;;  %v1176_v15 = vld [vmem:[%s20933_s1 + $0x2348] sm:$0xff] }
 0x29d   :  { %v14213_v34 = vcombine.low %v1176_v15, %v1180_v16 }
 0x29e   :  { %10729 = vmatpush1.bf16.msra.mxu1 %v14149_v23  ;;  %v13119_v23 = vcombine.low %v81_v8, %v85_v9  ;;  %v141_v8 = vld [vmem:[%s20933_s1 + $0x2f0] sm:$0xff] }
 0x29f   :  { %10342 = vmatpush1.bf16.msra.mxu0 %v14659_v24  ;;  %10730 = vmatprep.subr.bf16.mxu1 %v14158_v25  ;;  %v14214_v24 = vcombine.high %v1176_v15, %v1180_v16  ;;  %v13128_v25 = vcombine.high %v89_v17, %v93_v18  ;;  %v1236_v15 = vld [vmem:[%s20933_s1 + $0x2528] sm:$0xff]  ;;  %v145_v16 = vld [vmem:[%s20933_s1 + $0x310] sm:$0xff] }
 0x2a0   :  { %10343 = vmatprep.subr.bf16.mxu0 %v14668_v28  ;;  %v1184_v28 = vld [vmem:[%s20933_s1 + $0x2388] sm:$0xff] }
 0x2a1   :  { %v14221_v42 = vcombine.low %v1184_v28, %v1188_v30 }
 0x2a2   :  { %10731 = vmatpush1.bf16.msra.mxu1 %v14157_v35  ;;  %v13127_v35 = vcombine.low %v89_v17, %v93_v18  ;;  %v149_v17 = vld [vmem:[%s20933_s1 + $0x330] sm:$0xff] }
 0x2a3   :  { %10344 = vmatpush1.bf16.msra.mxu0 %v14667_v36  ;;  %10732 = vmatprep.subr.bf16.mxu1 %v14166_v37  ;;  %v14222_v36 = vcombine.high %v1184_v28, %v1188_v30  ;;  %v13136_v37 = vcombine.high %v97_v32, %v101_v33  ;;  %v1244_v28 = vld [vmem:[%s20933_s1 + $0x2568] sm:$0xff]  ;;  %v153_v30 = vld [vmem:[%s20933_s1 + $0x350] sm:$0xff] }
 0x2a4   :  { %10345 = vmatprep.subr.bf16.mxu0 %v14676_v38  ;;  %v1192_v38 = vld [vmem:[%s20933_s1 + $0x23c8] sm:$0xff] }
 0x2a5   :  { %v14229_v20 = vcombine.low %v1192_v38, %v1196_v39 }
 0x2a6   :  { %10733 = vmatpush1.bf16.msra.mxu1 %v14165_v43  ;;  %v13135_v43 = vcombine.low %v97_v32, %v101_v33  ;;  %v157_v32 = vld [vmem:[%s20933_s1 + $0x370] sm:$0xff] }
 0x2a7   :  { %10346 = vmatpush1.bf16.msra.mxu0 %v14675_v44  ;;  %10734 = vmatprep.subr.bf16.mxu1 %v14174_v45  ;;  %v14230_v44 = vcombine.high %v1192_v38, %v1196_v39  ;;  %v13144_v45 = vcombine.high %v105_v40, %v109_v41  ;;  %v1252_v38 = vld [vmem:[%s20933_s1 + $0x25a8] sm:$0xff]  ;;  %v161_v39 = vld [vmem:[%s20933_s1 + $0x390] sm:$0xff] }
 0x2a8   :  { %10933 = vmatprep.subr.bf16.mxu0 %v13088_v11  ;;  %v1200_v11 = vld [vmem:[%s20933_s1 + $0x2408] sm:$0xff] }
 0x2a9   :  { %v14237_v54 = vcombine.low %v1200_v11, %v1204_v46 }
 0x2aa   :  { %10364 = vmatmul.mubr.bf16.vlgmr.msra.gmra.mrb[0].mxu0 %v15074_v48  ;;  %10735 = vmatpush1.bf16.msra.mxu1 %v14173_v49  ;;  %v13143_v48 = vcombine.low %v105_v40, %v109_v41  ;;  %v14238_v49 = vcombine.high %v1200_v11, %v1204_v46  ;;  %v165_v40 = vld [vmem:[%s20933_s1 + $0x3b0] sm:$0xff]  ;;  %v1260_v11 = vld [vmem:[%s20933_s1 + $0x25e8] sm:$0xff] }
 0x2ab   :  { %10934 = vmatpush1.bf16.msra.mxu0 %v13087_v50  ;;  %10736 = vmatprep.subr.bf16.mxu1 %v14182_v51  ;;  %v13152_v50 = vcombine.high %v113_v47, %v117_v58  ;;  %v1208_v51 = vld [vmem:[%s20933_s1 + $0x2448] sm:$0xff]  ;;  %v169_v46 = vld [vmem:[%s20933_s1 + $0x3d0] sm:$0xff] }
 0x2ac   :  { %10935 = vmatprep.subr.bf16.mxu0 %v13096_v52  ;;  %10965 = vmatprep.mubr.bf16.mxu0 %v15280_v63  ;;  %v1212_v52 = vld [vmem:[%s20933_s1 + $0x2468] sm:$0xff]  ;;  %v133_v63 = vld [vmem:[%s20933_s1 + $0x2b0] sm:$0xff] }
 0x2ad   :  { %v14245_v0 = vcombine.low %v1208_v51, %v1212_v52  ;;  %v173_v47 = vld [vmem:[%s20933_s1 + $0x3f0] sm:$0xff] }
 0x2ae   :  { %10737 = vmatpush1.bf16.msra.mxu1 %v14181_v56  ;;  %v14246_v56 = vcombine.high %v1208_v51, %v1212_v52  ;;  %v1268_v51 = vld [vmem:[%s20933_s1 + $0x2628] sm:$0xff]  ;;  %v177_v52 = vld [vmem:[%s20933_s1 + $0x410] sm:$0xff] }
 0x2af   :  { %10936 = vmatpush1.bf16.msra.mxu0 %v13095_v57  ;;  %10738 = vmatprep.subr.bf16.mxu1 %v14190_v59  ;;  %v13160_v57 = vcombine.high %v121_v53, %v125_v21  ;;  %v1216_v59 = vld [vmem:[%s20933_s1 + $0x2488] sm:$0xff] }
 0x2b0   :  { %10937 = vmatprep.subr.bf16.mxu0 %v13104_v60  ;;  %v1220_v60 = vld [vmem:[%s20933_s1 + $0x24a8] sm:$0xff] }
 0x2b1   :  { %v14253_v9 = vcombine.low %v1216_v59, %v1220_v60 }
 0x2b2   :  { %10739 = vmatpush1.bf16.msra.mxu1 %v14189_v2  ;;  %v13159_v2 = vcombine.low %v121_v53, %v125_v21  ;;  %v181_v53 = vld [vmem:[%s20933_s1 + $0x430] sm:$0xff] }
 0x2b3   :  { %10938 = vmatpush1.bf16.msra.mxu0 %v13103_v3  ;;  %10740 = vmatprep.subr.bf16.mxu1 %v14198_v4  ;;  %v14254_v3 = vcombine.high %v1216_v59, %v1220_v60  ;;  %v13168_v4 = vcombine.high %v129_v62, %v133_v63  ;;  %v1276_v59 = vld [vmem:[%s20933_s1 + $0x2668] sm:$0xff]  ;;  %v185_v60 = vld [vmem:[%s20933_s1 + $0x450] sm:$0xff] }
 0x2b4   :  { %10939 = vmatprep.subr.bf16.mxu0 %v13112_v5  ;;  %v1224_v5 = vld [vmem:[%s20933_s1 + $0x24c8] sm:$0xff] }
 0x2b5   :  { %v14261_v18 = vcombine.low %v1224_v5, %v1228_v6 }
 0x2b6   :  { %10741 = vmatpush1.bf16.msra.mxu1 %v14197_v10  ;;  %v13167_v10 = vcombine.low %v129_v62, %v133_v63  ;;  %v13215_v63 = vcombine.low %v177_v52, %v181_v53 }
 0x2b7   :  { %10940 = vmatpush1.bf16.msra.mxu0 %v13111_v12  ;;  %10742 = vmatprep.subr.bf16.mxu1 %v14206_v13  ;;  %v14262_v12 = vcombine.high %v1224_v5, %v1228_v6  ;;  %v13176_v13 = vcombine.high %v137_v7, %v141_v8  ;;  %v197_v5 = vld [vmem:[%s20933_s1 + $0x4b0] sm:$0xff]  ;;  %v15283_v6 = vld [vmem:[%s20934_s0] ss:$100 sps:$4 sm:$0xff]  }
 0x2b8   :  { %10941 = vmatprep.subr.bf16.mxu0 %v13120_v14  ;;  %v1232_v14 = vld [vmem:[%s20933_s1 + $0x2508] sm:$0xff] }
 0x2b9   :  { %v14269_v33 = vcombine.low %v1232_v14, %v1236_v15 }
 0x2ba   :  { %10743 = vmatpush1.bf16.msra.mxu1 %v14205_v19  ;;  %v13175_v19 = vcombine.low %v137_v7, %v141_v8 }
 0x2bb   :  { %10942 = vmatpush1.bf16.msra.mxu0 %v13119_v23  ;;  %10744 = vmatprep.subr.bf16.mxu1 %v14214_v24  ;;  %v14270_v23 = vcombine.high %v1232_v14, %v1236_v15  ;;  %v13184_v24 = vcombine.high %v145_v16, %v149_v17  ;;  %v15284_v14 = vld [vmem:[%s20934_s0 + $0xc] ss:$100 sps:$4 sm:$0xff]  }
 0x2bc   :  { %10943 = vmatprep.subr.bf16.mxu0 %v13128_v25  ;;  %v1240_v25 = vld [vmem:[%s20933_s1 + $0x2548] sm:$0xff]  ;;  %v201_v15 = vld [vmem:[%s20933_s1 + $0x4d0] sm:$0xff] }
 0x2bd   :  { %v14277_v41 = vcombine.low %v1240_v25, %v1244_v28 }
 0x2be   :  { %10745 = vmatpush1.bf16.msra.mxu1 %v14213_v34  ;;  %v13183_v34 = vcombine.low %v145_v16, %v149_v17  ;;  %v205_v16 = vld [vmem:[%s20933_s1 + $0x4f0] sm:$0xff] }
 0x2bf   :  { %10944 = vmatpush1.bf16.msra.mxu0 %v13127_v35  ;;  %10746 = vmatprep.subr.bf16.mxu1 %v14222_v36  ;;  %v14278_v35 = vcombine.high %v1240_v25, %v1244_v28  ;;  %v13192_v36 = vcombine.high %v153_v30, %v157_v32  ;;  %v1300_v25 = vld [vmem:[%s20933_s1 + $0x2728] sm:$0xff]  ;;  %v209_v28 = vld [vmem:[%s20933_s1 + $0x510] sm:$0xff] }
 0x2c0   :  { %10945 = vmatprep.subr.bf16.mxu0 %v13136_v37  ;;  %v1248_v37 = vld [vmem:[%s20933_s1 + $0x2588] sm:$0xff] }
 0x2c1   :  { %v14285_v58 = vcombine.low %v1248_v37, %v1252_v38 }
 0x2c2   :  { %10747 = vmatpush1.bf16.msra.mxu1 %v14221_v42  ;;  %v13191_v42 = vcombine.low %v153_v30, %v157_v32  ;;  %v213_v30 = vld [vmem:[%s20933_s1 + $0x530] sm:$0xff] }
 0x2c3   :  { %10946 = vmatpush1.bf16.msra.mxu0 %v13135_v43  ;;  %10748 = vmatprep.subr.bf16.mxu1 %v14230_v44  ;;  %v14286_v43 = vcombine.high %v1248_v37, %v1252_v38  ;;  %v13200_v44 = vcombine.high %v161_v39, %v165_v40  ;;  %v1308_v37 = vld [vmem:[%s20933_s1 + $0x2768] sm:$0xff]  ;;  %v217_v38 = vld [vmem:[%s20933_s1 + $0x550] sm:$0xff] }
 0x2c4   :  { %10947 = vmatprep.subr.bf16.mxu0 %v13144_v45  ;;  %v1256_v45 = vld [vmem:[%s20933_s1 + $0x25c8] sm:$0xff] }
 0x2c5   :  { %v14293_v21 = vcombine.low %v1256_v45, %v1260_v11 }
 0x2c6   :  { %10749 = vmatpush1.bf16.msra.mxu1 %v14229_v20  ;;  %v13199_v20 = vcombine.low %v161_v39, %v165_v40  ;;  %v221_v39 = vld [vmem:[%s20933_s1 + $0x570] sm:$0xff] }
 0x2c7   :  { %10948 = vmatpush1.bf16.msra.mxu0 %v13143_v48  ;;  %10761 = vmatprep.subr.bf16.mxu1 %v14238_v49  ;;  %v14294_v48 = vcombine.high %v1256_v45, %v1260_v11  ;;  %v13208_v49 = vcombine.high %v169_v46, %v173_v47  ;;  %v1316_v45 = vld [vmem:[%s20933_s1 + $0x27a8] sm:$0xff]  ;;  %v225_v11 = vld [vmem:[%s20933_s1 + $0x590] sm:$0xff] }
 0x2c8   :  { %10949 = vmatprep.subr.bf16.mxu0 %v13152_v50  ;;  %v1264_v50 = vld [vmem:[%s20933_s1 + $0x2608] sm:$0xff] }
 0x2c9   :  { %10751 = vmatmul.mubr.bf16.vlgmr.msra.gmra.mrb[4].mxu1 %v15281_v61  ;;  %v189_v61 = vld [vmem:[%s20933_s1 + $0x470] sm:$0xff]  ;;  %v14301_v62 = vcombine.low %v1264_v50, %v1268_v51 }
 0x2ca   :  { %10762 = vmatpush1.bf16.msra.mxu1 %v14237_v54  ;;  %10793 = vmatprep.mubr.bf16.mxu1 %v15282_v1  ;;  %v13207_v54 = vcombine.low %v169_v46, %v173_v47  ;;  %v13224_v1 = vcombine.high %v185_v60, %v189_v61  ;;  %v13223_v8 = vcombine.low %v185_v60, %v189_v61  ;;  %v229_v46 = vld [vmem:[%s20933_s1 + $0x5b0] sm:$0xff] }
 0x2cb   :  { %10950 = vmatpush1.bf16.msra.mxu0 %v13151_v55  ;;  %10763 = vmatprep.subr.bf16.mxu1 %v14246_v56  ;;  %v14302_v55 = vcombine.high %v1264_v50, %v1268_v51  ;;  %v13216_v56 = vcombine.high %v177_v52, %v181_v53  ;;  %v1324_v50 = vld [vmem:[%s20933_s1 + $0x27e8] sm:$0xff]  ;;  %v233_v51 = vld [vmem:[%s20933_s1 + $0x5d0] sm:$0xff] }
 0x2cc   :  { %10951 = vmatprep.subr.bf16.mxu0 %v13160_v57  ;;  %v1272_v57 = vld [vmem:[%s20933_s1 + $0x2648] sm:$0xff]  ;;  %v237_v52 = vld [vmem:[%s20933_s1 + $0x5f0] sm:$0xff] }
 0x2cd   :  { %v14309_v7 = vcombine.low %v1272_v57, %v1276_v59  ;;  %v245_v60 = vld [vmem:[%s20933_s1 + $0x630] sm:$0xff] }
 0x2ce   :  { %10764 = vmatpush1.bf16.msra.mxu1 %v14245_v0  ;;  %v14310_v0 = vcombine.high %v1272_v57, %v1276_v59  ;;  %v1332_v57 = vld [vmem:[%s20933_s1 + $0x2828] sm:$0xff]  ;;  %v241_v59 = vld [vmem:[%s20933_s1 + $0x610] sm:$0xff] }
 0x2cf   :  { %10952 = vmatpush1.bf16.msra.mxu0 %v13159_v2  ;;  %10765 = vmatprep.subr.bf16.mxu1 %v14254_v3  ;;  %v1280_v2 = vld [vmem:[%s20933_s1 + $0x2688] sm:$0xff] }
 0x2d0   :  { %10953 = vmatprep.subr.bf16.mxu0 %v13168_v4  ;;  %v1284_v3 = vld [vmem:[%s20933_s1 + $0x26a8] sm:$0xff]  ;;  %v193_v4 = vld [vmem:[%s20933_s1 + $0x490] sm:$0xff] }
 0x2d1   :  { %v14317_v17 = vcombine.low %v1280_v2, %v1284_v3 }
 0x2d2   :  { %10766 = vmatpush1.bf16.msra.mxu1 %v14253_v9  ;;  %v14318_v9 = vcombine.high %v1280_v2, %v1284_v3  ;;  %v1340_v2 = vld [vmem:[%s20933_s1 + $0x2868] sm:$0xff]  ;;  %v249_v3 = vld [vmem:[%s20933_s1 + $0x650] sm:$0xff] }
 0x2d3   :  { %10954 = vmatpush1.bf16.msra.mxu0 %v13167_v10  ;;  %10767 = vmatprep.subr.bf16.mxu1 %v14262_v12  ;;  %v13232_v10 = vcombine.high %v193_v4, %v197_v5  ;;  %v1288_v12 = vld [vmem:[%s20933_s1 + $0x26c8] sm:$0xff] }
 0x2d4   :  { %10955 = vmatprep.subr.bf16.mxu0 %v13176_v13  ;;  %v1292_v13 = vld [vmem:[%s20933_s1 + $0x26e8] sm:$0xff] }
 0x2d5   :  { %v14325_v32 = vcombine.low %v1288_v12, %v1292_v13 }
 0x2d6   :  { %10768 = vmatpush1.bf16.msra.mxu1 %v14261_v18  ;;  %v13231_v18 = vcombine.low %v193_v4, %v197_v5  ;;  %v253_v4 = vld [vmem:[%s20933_s1 + $0x670] sm:$0xff] }
 0x2d7   :  { %10956 = vmatpush1.bf16.msra.mxu0 %v13175_v19  ;;  %10769 = vmatprep.subr.bf16.mxu1 %v14270_v23  ;;  %v14326_v19 = vcombine.high %v1288_v12, %v1292_v13  ;;  %v13240_v23 = vcombine.high %v201_v15, %v205_v16  ;;  %v15285_v12 = vld [vmem:[%s20934_s0 + $0x48] ss:$100 sps:$4 sm:$0xff]   ;;  %v257_v13 = vld [vmem:[%s20933_s1 + $0x690] sm:$0xff] }
 0x2d8   :  { %10957 = vmatprep.subr.bf16.mxu0 %v13184_v24  ;;  %v1296_v24 = vld [vmem:[%s20933_s1 + $0x2708] sm:$0xff] }
 0x2d9   :  { %v14333_v40 = vcombine.low %v1296_v24, %v1300_v25 }
 0x2da   :  { %10770 = vmatpush1.bf16.msra.mxu1 %v14269_v33  ;;  %v13239_v33 = vcombine.low %v201_v15, %v205_v16  ;;  %v15286_v16 = vld [vmem:[%s20934_s0 + $0x54] ss:$100 sps:$4 sm:$0xff]  }
 0x2db   :  { %10958 = vmatpush1.bf16.msra.mxu0 %v13183_v34  ;;  %10771 = vmatprep.subr.bf16.mxu1 %v14278_v35  ;;  %v14334_v34 = vcombine.high %v1296_v24, %v1300_v25  ;;  %v13248_v35 = vcombine.high %v209_v28, %v213_v30  ;;  %v1356_v24 = vld [vmem:[%s20933_s1 + $0x28e8] sm:$0xff]  ;;  %v265_v25 = vld [vmem:[%s20933_s1 + $0x6d0] sm:$0xff] }
 0x2dc   :  { %10959 = vmatprep.subr.bf16.mxu0 %v13192_v36  ;;  %v1304_v36 = vld [vmem:[%s20933_s1 + $0x2748] sm:$0xff] }
 0x2dd   :  { %v14341_v47 = vcombine.low %v1304_v36, %v1308_v37 }
 0x2de   :  { %10772 = vmatpush1.bf16.msra.mxu1 %v14277_v41  ;;  %v13247_v41 = vcombine.low %v209_v28, %v213_v30  ;;  %v269_v28 = vld [vmem:[%s20933_s1 + $0x6f0] sm:$0xff] }
 0x2df   :  { %10960 = vmatpush1.bf16.msra.mxu0 %v13191_v42  ;;  %10773 = vmatprep.subr.bf16.mxu1 %v14286_v43  ;;  %v14342_v42 = vcombine.high %v1304_v36, %v1308_v37  ;;  %v13256_v43 = vcombine.high %v217_v38, %v221_v39  ;;  %v1364_v36 = vld [vmem:[%s20933_s1 + $0x2928] sm:$0xff]  ;;  %v273_v37 = vld [vmem:[%s20933_s1 + $0x710] sm:$0xff] }
 0x2e0   :  { %10961 = vmatprep.subr.bf16.mxu0 %v13200_v44  ;;  %v1312_v44 = vld [vmem:[%s20933_s1 + $0x2788] sm:$0xff] }
 0x2e1   :  { %v14349_v53 = vcombine.low %v1312_v44, %v1316_v45 }
 0x2e2   :  { %10774 = vmatpush1.bf16.msra.mxu1 %v14285_v58  ;;  %v13255_v58 = vcombine.low %v217_v38, %v221_v39  ;;  %v277_v38 = vld [vmem:[%s20933_s1 + $0x730] sm:$0xff] }
 0x2e3   :  { %10962 = vmatpush1.bf16.msra.mxu0 %v13199_v20  ;;  %10775 = vmatprep.subr.bf16.mxu1 %v14294_v48  ;;  %v14350_v20 = vcombine.high %v1312_v44, %v1316_v45  ;;  %v13264_v48 = vcombine.high %v225_v11, %v229_v46  ;;  %v1372_v44 = vld [vmem:[%s20933_s1 + $0x2968] sm:$0xff]  ;;  %v281_v45 = vld [vmem:[%s20933_s1 + $0x750] sm:$0xff] }
 0x2e4   :  { %10963 = vmatprep.subr.bf16.mxu0 %v13208_v49  ;;  %v1320_v49 = vld [vmem:[%s20933_s1 + $0x27c8] sm:$0xff] }
 0x2e5   :  { %v14357_v61 = vcombine.low %v1320_v49, %v1324_v50 }
 0x2e6   :  { %10776 = vmatpush1.bf16.msra.mxu1 %v14293_v21  ;;  %v13263_v21 = vcombine.low %v225_v11, %v229_v46  ;;  %v285_v11 = vld [vmem:[%s20933_s1 + $0x770] sm:$0xff] }
 0x2e7   :  { %10964 = vmatpush1.bf16.msra.mxu0 %v13207_v54  ;;  %10777 = vmatprep.subr.bf16.mxu1 %v14302_v55  ;;  %v14358_v54 = vcombine.high %v1320_v49, %v1324_v50  ;;  %v13272_v55 = vcombine.high %v233_v51, %v237_v52  ;;  %v1380_v49 = vld [vmem:[%s20933_s1 + $0x29a8] sm:$0xff]  ;;  %v289_v50 = vld [vmem:[%s20933_s1 + $0x790] sm:$0xff] }
 0x2e8   :  { %10976 = vmatprep.subr.bf16.mxu0 %v13216_v56  ;;  %v1328_v56 = vld [vmem:[%s20933_s1 + $0x2808] sm:$0xff] }
 0x2e9   :  { %v14365_v5 = vcombine.low %v1328_v56, %v1332_v57 }
 0x2ea   :  { %10778 = vmatpush1.bf16.msra.mxu1 %v14301_v62  ;;  %10966 = vmatmul.mubr.bf16.vlgmr.msra.gmra.mrb[4].mxu0 %v15283_v6  ;;  %v13271_v62 = vcombine.low %v233_v51, %v237_v52  ;;  %v13279_v6 = vcombine.low %v241_v59, %v245_v60  ;;  %v293_v51 = vld [vmem:[%s20933_s1 + $0x7b0] sm:$0xff] }
 0x2eb   :  { %10977 = vmatpush1.bf16.msra.mxu0 %v13215_v63  ;;  %10779 = vmatprep.subr.bf16.mxu1 %v14310_v0  ;;  %v14366_v63 = vcombine.high %v1328_v56, %v1332_v57  ;;  %v13280_v0 = vcombine.high %v241_v59, %v245_v60  ;;  %v1388_v56 = vld [vmem:[%s20933_s1 + $0x29e8] sm:$0xff]  ;;  %v297_v57 = vld [vmem:[%s20933_s1 + $0x7d0] sm:$0xff] }
 0x2ec   :  { %10978 = vmatprep.subr.bf16.mxu0 %v13224_v1  ;;  %11008 = vmatprep.mubr.bf16.mxu0 %v15284_v14  ;;  %v1336_v1 = vld [vmem:[%s20933_s1 + $0x2848] sm:$0xff]  ;;  %v261_v14 = vld [vmem:[%s20933_s1 + $0x6b0] sm:$0xff] }
 0x2ed   :  { %v14373_v15 = vcombine.low %v1336_v1, %v1340_v2  ;;  %v301_v59 = vld [vmem:[%s20933_s1 + $0x7f0] sm:$0xff] }
 0x2ee   :  { %10780 = vmatpush1.bf16.msra.mxu1 %v14309_v7  ;;  %v14374_v7 = vcombine.high %v1336_v1, %v1340_v2  ;;  %v1396_v1 = vld [vmem:[%s20933_s1 + $0x2a28] sm:$0xff]  ;;  %v305_v2 = vld [vmem:[%s20933_s1 + $0x810] sm:$0xff] }
 0x2ef   :  { %10979 = vmatpush1.bf16.msra.mxu0 %v13223_v8  ;;  %10781 = vmatprep.subr.bf16.mxu1 %v14318_v9  ;;  %v13288_v8 = vcombine.high %v249_v3, %v253_v4  ;;  %v1344_v9 = vld [vmem:[%s20933_s1 + $0x2888] sm:$0xff] }
 0x2f0   :  { %10980 = vmatprep.subr.bf16.mxu0 %v13232_v10  ;;  %v1348_v10 = vld [vmem:[%s20933_s1 + $0x28a8] sm:$0xff] }
 0x2f1   :  { %v14381_v30 = vcombine.low %v1344_v9, %v1348_v10 }
 0x2f2   :  { %10782 = vmatpush1.bf16.msra.mxu1 %v14317_v17  ;;  %v13287_v17 = vcombine.low %v249_v3, %v253_v4  ;;  %v309_v3 = vld [vmem:[%s20933_s1 + $0x830] sm:$0xff] }
 0x2f3   :  { %10981 = vmatpush1.bf16.msra.mxu0 %v13231_v18  ;;  %10783 = vmatprep.subr.bf16.mxu1 %v14326_v19  ;;  %v14382_v18 = vcombine.high %v1344_v9, %v1348_v10  ;;  %v13296_v19 = vcombine.high %v257_v13, %v261_v14  ;;  %v1404_v9 = vld [vmem:[%s20933_s1 + $0x2a68] sm:$0xff]  ;;  %v313_v10 = vld [vmem:[%s20933_s1 + $0x850] sm:$0xff] }
 0x2f4   :  { %10982 = vmatprep.subr.bf16.mxu0 %v13240_v23  ;;  %v1352_v23 = vld [vmem:[%s20933_s1 + $0x28c8] sm:$0xff] }
 0x2f5   :  { %v14389_v39 = vcombine.low %v1352_v23, %v1356_v24 }
 0x2f6   :  { %10784 = vmatpush1.bf16.msra.mxu1 %v14325_v32  ;;  %v13295_v32 = vcombine.low %v257_v13, %v261_v14  ;;  %v13343_v14 = vcombine.low %v305_v2, %v309_v3 }
 0x2f7   :  { %10983 = vmatpush1.bf16.msra.mxu0 %v13239_v33  ;;  %10785 = vmatprep.subr.bf16.mxu1 %v14334_v34  ;;  %v14390_v33 = vcombine.high %v1352_v23, %v1356_v24  ;;  %v13304_v34 = vcombine.high %v265_v25, %v269_v28  ;;  %v325_v23 = vld [vmem:[%s20933_s1 + $0x8b0] sm:$0xff]  ;;  %v15287_v24 = vld [vmem:[%s20934_s0 + $0x8] ss:$100 sps:$4 sm:$0xff]  }
 0x2f8   :  { %10984 = vmatprep.subr.bf16.mxu0 %v13248_v35  ;;  %v1360_v35 = vld [vmem:[%s20933_s1 + $0x2908] sm:$0xff] }
 0x2f9   :  { %v14397_v46 = vcombine.low %v1360_v35, %v1364_v36 }
 0x2fa   :  { %10786 = vmatpush1.bf16.msra.mxu1 %v14333_v40  ;;  %v13303_v40 = vcombine.low %v265_v25, %v269_v28 }
 0x2fb   :  { %10985 = vmatpush1.bf16.msra.mxu0 %v13247_v41  ;;  %10787 = vmatprep.subr.bf16.mxu1 %v14342_v42  ;;  %v14398_v41 = vcombine.high %v1360_v35, %v1364_v36  ;;  %v13312_v42 = vcombine.high %v273_v37, %v277_v38  ;;  %v15288_v35 = vld [vmem:[%s20934_s0 + $0x14] ss:$100 sps:$4 sm:$0xff]  }
 0x2fc   :  { %10986 = vmatprep.subr.bf16.mxu0 %v13256_v43  ;;  %v1368_v43 = vld [vmem:[%s20933_s1 + $0x2948] sm:$0xff]  ;;  %v329_v36 = vld [vmem:[%s20933_s1 + $0x8d0] sm:$0xff] }
 0x2fd   :  { %v14405_v52 = vcombine.low %v1368_v43, %v1372_v44 }
 0x2fe   :  { %10788 = vmatpush1.bf16.msra.mxu1 %v14341_v47  ;;  %v13311_v47 = vcombine.low %v273_v37, %v277_v38  ;;  %v333_v37 = vld [vmem:[%s20933_s1 + $0x8f0] sm:$0xff] }
 0x2ff   :  { %10987 = vmatpush1.bf16.msra.mxu0 %v13255_v58  ;;  %10789 = vmatprep.subr.bf16.mxu1 %v14350_v20  ;;  %v14406_v58 = vcombine.high %v1368_v43, %v1372_v44  ;;  %v13320_v20 = vcombine.high %v281_v45, %v285_v11  ;;  %v1428_v43 = vld [vmem:[%s20933_s1 + $0x2b28] sm:$0xff]  ;;  %v337_v44 = vld [vmem:[%s20933_s1 + $0x910] sm:$0xff] }
 0x300   :  { %10988 = vmatprep.subr.bf16.mxu0 %v13264_v48  ;;  %v1376_v48 = vld [vmem:[%s20933_s1 + $0x2988] sm:$0xff] }
 0x301   :  { %v14413_v60 = vcombine.low %v1376_v48, %v1380_v49 }
 0x302   :  { %10790 = vmatpush1.bf16.msra.mxu1 %v14349_v53  ;;  %v13319_v53 = vcombine.low %v281_v45, %v285_v11  ;;  %v341_v45 = vld [vmem:[%s20933_s1 + $0x930] sm:$0xff] }
 0x303   :  { %10989 = vmatpush1.bf16.msra.mxu0 %v13263_v21  ;;  %10791 = vmatprep.subr.bf16.mxu1 %v14358_v54  ;;  %v14414_v21 = vcombine.high %v1376_v48, %v1380_v49  ;;  %v13328_v54 = vcombine.high %v289_v50, %v293_v51  ;;  %v1436_v48 = vld [vmem:[%s20933_s1 + $0x2b68] sm:$0xff]  ;;  %v345_v49 = vld [vmem:[%s20933_s1 + $0x950] sm:$0xff] }
 0x304   :  { %10990 = vmatprep.subr.bf16.mxu0 %v13272_v55  ;;  %v1384_v55 = vld [vmem:[%s20933_s1 + $0x29c8] sm:$0xff] }
 0x305   :  { %v14421_v4 = vcombine.low %v1384_v55, %v1388_v56 }
 0x306   :  { %10792 = vmatpush1.bf16.msra.mxu1 %v14357_v61  ;;  %v13327_v61 = vcombine.low %v289_v50, %v293_v51  ;;  %v349_v50 = vld [vmem:[%s20933_s1 + $0x970] sm:$0xff] }
 0x307   :  { %10991 = vmatpush1.bf16.msra.mxu0 %v13271_v62  ;;  %10804 = vmatprep.subr.bf16.mxu1 %v14366_v63  ;;  %v14422_v62 = vcombine.high %v1384_v55, %v1388_v56  ;;  %v13336_v63 = vcombine.high %v297_v57, %v301_v59  ;;  %v1444_v55 = vld [vmem:[%s20933_s1 + $0x2ba8] sm:$0xff]  ;;  %v353_v56 = vld [vmem:[%s20933_s1 + $0x990] sm:$0xff] }
 0x308   :  { %10992 = vmatprep.subr.bf16.mxu0 %v13280_v0  ;;  %v1392_v0 = vld [vmem:[%s20933_s1 + $0x2a08] sm:$0xff] }
 0x309   :  { %10794 = vmatmul.mubr.bf16.vlgmr.msra.gmra.mrb[4].mxu1 %v15285_v12  ;;  %v317_v12 = vld [vmem:[%s20933_s1 + $0x870] sm:$0xff]  ;;  %v14429_v13 = vcombine.low %v1392_v0, %v1396_v1 }
 0x30a   :  { %10805 = vmatpush1.bf16.msra.mxu1 %v14365_v5  ;;  %10836 = vmatprep.mubr.bf16.mxu1 %v15286_v16  ;;  %v13335_v5 = vcombine.low %v297_v57, %v301_v59  ;;  %v13352_v16 = vcombine.high %v313_v10, %v317_v12  ;;  %v13351_v28 = vcombine.low %v313_v10, %v317_v12  ;;  %v357_v57 = vld [vmem:[%s20933_s1 + $0x9b0] sm:$0xff] }
 0x30b   :  { %10993 = vmatpush1.bf16.msra.mxu0 %v13279_v6  ;;  %10806 = vmatprep.subr.bf16.mxu1 %v14374_v7  ;;  %v14430_v6 = vcombine.high %v1392_v0, %v1396_v1  ;;  %v13344_v7 = vcombine.high %v305_v2, %v309_v3  ;;  %v1452_v0 = vld [vmem:[%s20933_s1 + $0x2be8] sm:$0xff]  ;;  %v361_v1 = vld [vmem:[%s20933_s1 + $0x9d0] sm:$0xff] }
 0x30c   :  { %10994 = vmatprep.subr.bf16.mxu0 %v13288_v8  ;;  %v1400_v8 = vld [vmem:[%s20933_s1 + $0x2a48] sm:$0xff]  ;;  %v365_v2 = vld [vmem:[%s20933_s1 + $0x9f0] sm:$0xff] }
 0x30d   :  { %v14437_v25 = vcombine.low %v1400_v8, %v1404_v9  ;;  %v373_v10 = vld [vmem:[%s20933_s1 + $0xa30] sm:$0xff] }
 0x30e   :  { %10807 = vmatpush1.bf16.msra.mxu1 %v14373_v15  ;;  %v14438_v15 = vcombine.high %v1400_v8, %v1404_v9  ;;  %v1460_v8 = vld [vmem:[%s20933_s1 + $0x2c28] sm:$0xff]  ;;  %v369_v9 = vld [vmem:[%s20933_s1 + $0xa10] sm:$0xff] }
 0x30f   :  { %10995 = vmatpush1.bf16.msra.mxu0 %v13287_v17  ;;  %10808 = vmatprep.subr.bf16.mxu1 %v14382_v18  ;;  %v1408_v17 = vld [vmem:[%s20933_s1 + $0x2a88] sm:$0xff] }
 0x310   :  { %10996 = vmatprep.subr.bf16.mxu0 %v13296_v19  ;;  %v1412_v18 = vld [vmem:[%s20933_s1 + $0x2aa8] sm:$0xff]  ;;  %v321_v19 = vld [vmem:[%s20933_s1 + $0x890] sm:$0xff] }
 0x311   :  { %v14445_v38 = vcombine.low %v1408_v17, %v1412_v18 }
 0x312   :  { %10809 = vmatpush1.bf16.msra.mxu1 %v14381_v30  ;;  %v14446_v30 = vcombine.high %v1408_v17, %v1412_v18  ;;  %v1468_v17 = vld [vmem:[%s20933_s1 + $0x2c68] sm:$0xff]  ;;  %v377_v18 = vld [vmem:[%s20933_s1 + $0xa50] sm:$0xff] }
 0x313   :  { %10997 = vmatpush1.bf16.msra.mxu0 %v13295_v32  ;;  %10810 = vmatprep.subr.bf16.mxu1 %v14390_v33  ;;  %v13360_v32 = vcombine.high %v321_v19, %v325_v23  ;;  %v1416_v33 = vld [vmem:[%s20933_s1 + $0x2ac8] sm:$0xff] }
 0x314   :  { %10998 = vmatprep.subr.bf16.mxu0 %v13304_v34  ;;  %v1420_v34 = vld [vmem:[%s20933_s1 + $0x2ae8] sm:$0xff] }
 0x315   :  { %v14453_v11 = vcombine.low %v1416_v33, %v1420_v34 }
 0x316   :  { %10811 = vmatpush1.bf16.msra.mxu1 %v14389_v39  ;;  %v13359_v39 = vcombine.low %v321_v19, %v325_v23  ;;  %v381_v19 = vld [vmem:[%s20933_s1 + $0xa70] sm:$0xff] }
 0x317   :  { %10999 = vmatpush1.bf16.msra.mxu0 %v13303_v40  ;;  %10812 = vmatprep.subr.bf16.mxu1 %v14398_v41  ;;  %v14454_v40 = vcombine.high %v1416_v33, %v1420_v34  ;;  %v13368_v41 = vcombine.high %v329_v36, %v333_v37  ;;  %v15289_v33 = vld [vmem:[%s20934_s0 + $0x50] ss:$100 sps:$4 sm:$0xff]  }
 0x318   :  { %11000 = vmatprep.subr.bf16.mxu0 %v13312_v42  ;;  %v1424_v42 = vld [vmem:[%s20933_s1 + $0x2b08] sm:$0xff]  ;;  %v385_v34 = vld [vmem:[%s20933_s1 + $0xa90] sm:$0xff] }
 0x319   :  { %v14461_v51 = vcombine.low %v1424_v42, %v1428_v43 }
 0x31a   :  { %10813 = vmatpush1.bf16.msra.mxu1 %v14397_v46  ;;  %v13367_v46 = vcombine.low %v329_v36, %v333_v37  ;;  %v15290_v37 = vld [vmem:[%s20934_s0 + $0x5c] ss:$100 sps:$4 sm:$0xff]  }
 0x31b   :  { %11001 = vmatpush1.bf16.msra.mxu0 %v13311_v47  ;;  %10814 = vmatprep.subr.bf16.mxu1 %v14406_v58  ;;  %v14462_v47 = vcombine.high %v1424_v42, %v1428_v43  ;;  %v13376_v58 = vcombine.high %v337_v44, %v341_v45  ;;  %v1484_v42 = vld [vmem:[%s20933_s1 + $0x2ce8] sm:$0xff]  ;;  %v393_v43 = vld [vmem:[%s20933_s1 + $0xad0] sm:$0xff] }
 0x31c   :  { %11002 = vmatprep.subr.bf16.mxu0 %v13320_v20  ;;  %v1432_v20 = vld [vmem:[%s20933_s1 + $0x2b48] sm:$0xff] }
 0x31d   :  { %v14469_v59 = vcombine.low %v1432_v20, %v1436_v48 }
 0x31e   :  { %10815 = vmatpush1.bf16.msra.mxu1 %v14405_v52  ;;  %v13375_v52 = vcombine.low %v337_v44, %v341_v45  ;;  %v397_v44 = vld [vmem:[%s20933_s1 + $0xaf0] sm:$0xff] }
 0x31f   :  { %11003 = vmatpush1.bf16.msra.mxu0 %v13319_v53  ;;  %10816 = vmatprep.subr.bf16.mxu1 %v14414_v21  ;;  %v14470_v53 = vcombine.high %v1432_v20, %v1436_v48  ;;  %v13384_v21 = vcombine.high %v345_v49, %v349_v50  ;;  %v1492_v20 = vld [vmem:[%s20933_s1 + $0x2d28] sm:$0xff]  ;;  %v401_v48 = vld [vmem:[%s20933_s1 + $0xb10] sm:$0xff] }
 0x320   :  { %11004 = vmatprep.subr.bf16.mxu0 %v13328_v54  ;;  %v1440_v54 = vld [vmem:[%s20933_s1 + $0x2b88] sm:$0xff] }
 0x321   :  { %v14477_v3 = vcombine.low %v1440_v54, %v1444_v55 }
 0x322   :  { %10817 = vmatpush1.bf16.msra.mxu1 %v14413_v60  ;;  %v13383_v60 = vcombine.low %v345_v49, %v349_v50  ;;  %v405_v49 = vld [vmem:[%s20933_s1 + $0xb30] sm:$0xff] }
 0x323   :  { %11005 = vmatpush1.bf16.msra.mxu0 %v13327_v61  ;;  %10818 = vmatprep.subr.bf16.mxu1 %v14422_v62  ;;  %v14478_v61 = vcombine.high %v1440_v54, %v1444_v55  ;;  %v13392_v62 = vcombine.high %v353_v56, %v357_v57  ;;  %v1500_v54 = vld [vmem:[%s20933_s1 + $0x2d68] sm:$0xff]  ;;  %v409_v55 = vld [vmem:[%s20933_s1 + $0xb50] sm:$0xff] }
 0x324   :  { %11006 = vmatprep.subr.bf16.mxu0 %v13336_v63  ;;  %v1448_v63 = vld [vmem:[%s20933_s1 + $0x2bc8] sm:$0xff] }
 0x325   :  { %v14485_v12 = vcombine.low %v1448_v63, %v1452_v0 }
 0x326   :  { %10819 = vmatpush1.bf16.msra.mxu1 %v14421_v4  ;;  %v13391_v4 = vcombine.low %v353_v56, %v357_v57  ;;  %v413_v56 = vld [vmem:[%s20933_s1 + $0xb70] sm:$0xff] }
 0x327   :  { %11007 = vmatpush1.bf16.msra.mxu0 %v13335_v5  ;;  %10820 = vmatprep.subr.bf16.mxu1 %v14430_v6  ;;  %v14486_v5 = vcombine.high %v1448_v63, %v1452_v0  ;;  %v13400_v6 = vcombine.high %v361_v1, %v365_v2  ;;  %v1508_v63 = vld [vmem:[%s20933_s1 + $0x2da8] sm:$0xff]  ;;  %v417_v0 = vld [vmem:[%s20933_s1 + $0xb90] sm:$0xff] }
 0x328   :  { %11019 = vmatprep.subr.bf16.mxu0 %v13344_v7  ;;  %v1456_v7 = vld [vmem:[%s20933_s1 + $0x2c08] sm:$0xff] }
 0x329   :  { %v14493_v23 = vcombine.low %v1456_v7, %v1460_v8 }
 0x32a   :  { %10821 = vmatpush1.bf16.msra.mxu1 %v14429_v13  ;;  %11009 = vmatmul.mubr.bf16.vlgmr.msra.gmra.mrb[4].mxu0 %v15287_v24  ;;  %v13399_v13 = vcombine.low %v361_v1, %v365_v2  ;;  %v13407_v24 = vcombine.low %v369_v9, %v373_v10  ;;  %v421_v1 = vld [vmem:[%s20933_s1 + $0xbb0] sm:$0xff] }
 0x32b   :  { %11020 = vmatpush1.bf16.msra.mxu0 %v13343_v14  ;;  %10822 = vmatprep.subr.bf16.mxu1 %v14438_v15  ;;  %v14494_v14 = vcombine.high %v1456_v7, %v1460_v8  ;;  %v13408_v15 = vcombine.high %v369_v9, %v373_v10  ;;  %v1516_v7 = vld [vmem:[%s20933_s1 + $0x2de8] sm:$0xff]  ;;  %v425_v8 = vld [vmem:[%s20933_s1 + $0xbd0] sm:$0xff] }
 0x32c   :  { %11021 = vmatprep.subr.bf16.mxu0 %v13352_v16  ;;  %11051 = vmatprep.mubr.bf16.mxu0 %v15288_v35  ;;  %v1464_v16 = vld [vmem:[%s20933_s1 + $0x2c48] sm:$0xff]  ;;  %v389_v35 = vld [vmem:[%s20933_s1 + $0xab0] sm:$0xff] }
 0x32d   :  { %v14501_v36 = vcombine.low %v1464_v16, %v1468_v17  ;;  %v429_v9 = vld [vmem:[%s20933_s1 + $0xbf0] sm:$0xff] }
 0x32e   :  { %10823 = vmatpush1.bf16.msra.mxu1 %v14437_v25  ;;  %v14502_v25 = vcombine.high %v1464_v16, %v1468_v17  ;;  %v1524_v16 = vld [vmem:[%s20933_s1 + $0x2e28] sm:$0xff]  ;;  %v433_v17 = vld [vmem:[%s20933_s1 + $0xc10] sm:$0xff] }
 0x32f   :  { %11022 = vmatpush1.bf16.msra.mxu0 %v13351_v28  ;;  %10824 = vmatprep.subr.bf16.mxu1 %v14446_v30  ;;  %v13416_v28 = vcombine.high %v377_v18, %v381_v19  ;;  %v1472_v30 = vld [vmem:[%s20933_s1 + $0x2c88] sm:$0xff] }
 0x330   :  { %11023 = vmatprep.subr.bf16.mxu0 %v13360_v32  ;;  %v1476_v32 = vld [vmem:[%s20933_s1 + $0x2ca8] sm:$0xff] }
 0x331   :  { %v14509_v45 = vcombine.low %v1472_v30, %v1476_v32 }
 0x332   :  { %10825 = vmatpush1.bf16.msra.mxu1 %v14445_v38  ;;  %v13415_v38 = vcombine.low %v377_v18, %v381_v19  ;;  %v437_v18 = vld [vmem:[%s20933_s1 + $0xc30] sm:$0xff] }
 0x333   :  { %11024 = vmatpush1.bf16.msra.mxu0 %v13359_v39  ;;  %10826 = vmatprep.subr.bf16.mxu1 %v14454_v40  ;;  %v14510_v39 = vcombine.high %v1472_v30, %v1476_v32  ;;  %v13424_v40 = vcombine.high %v385_v34, %v389_v35  ;;  %v1532_v30 = vld [vmem:[%s20933_s1 + $0x2e68] sm:$0xff]  ;;  %v441_v32 = vld [vmem:[%s20933_s1 + $0xc50] sm:$0xff] }
 0x334   :  { %11025 = vmatprep.subr.bf16.mxu0 %v13368_v41  ;;  %v1480_v41 = vld [vmem:[%s20933_s1 + $0x2cc8] sm:$0xff] }
 0x335   :  { %v14517_v50 = vcombine.low %v1480_v41, %v1484_v42 }
 0x336   :  { %10827 = vmatpush1.bf16.msra.mxu1 %v14453_v11  ;;  %v13423_v11 = vcombine.low %v385_v34, %v389_v35  ;;  %v13471_v35 = vcombine.low %v433_v17, %v437_v18 }
 0x337   :  { %11026 = vmatpush1.bf16.msra.mxu0 %v13367_v46  ;;  %10828 = vmatprep.subr.bf16.mxu1 %v14462_v47  ;;  %v14518_v46 = vcombine.high %v1480_v41, %v1484_v42  ;;  %v13432_v47 = vcombine.high %v393_v43, %v397_v44  ;;  %v453_v41 = vld [vmem:[%s20933_s1 + $0xcb0] sm:$0xff] }
 0x338   :  { %11027 = vmatprep.subr.bf16.mxu0 %v13376_v58  ;;  %v1488_v58 = vld [vmem:[%s20933_s1 + $0x2d08] sm:$0xff]  ;;  %v15291_v42 = vld [vmem:[%s20934_s0 + $0x10] ss:$100 sps:$4 sm:$0xff]  }
 0x339   :  { %v14525_v57 = vcombine.low %v1488_v58, %v1492_v20 }
 0x33a   :  { %10829 = vmatpush1.bf16.msra.mxu1 %v14461_v51  ;;  %v13431_v51 = vcombine.low %v393_v43, %v397_v44 }
 0x33b   :  { %11028 = vmatpush1.bf16.msra.mxu0 %v13375_v52  ;;  %10830 = vmatprep.subr.bf16.mxu1 %v14470_v53  ;;  %v14526_v52 = vcombine.high %v1488_v58, %v1492_v20  ;;  %v13440_v53 = vcombine.high %v401_v48, %v405_v49  ;;  %v1548_v58 = vld [vmem:[%s20933_s1 + $0x2ee8] sm:$0xff]  ;;  %v15292_v20 = vld [vmem:[%s20934_s0 + $0x1c] ss:$100 sps:$4 sm:$0xff]  }
 0x33c   :  { %11029 = vmatprep.subr.bf16.mxu0 %v13384_v21  ;;  %v1496_v21 = vld [vmem:[%s20933_s1 + $0x2d48] sm:$0xff] }
 0x33d   :  { %v14533_v2 = vcombine.low %v1496_v21, %v1500_v54 }
 0x33e   :  { %10831 = vmatpush1.bf16.msra.mxu1 %v14469_v59  ;;  %v13439_v59 = vcombine.low %v401_v48, %v405_v49  ;;  %v457_v48 = vld [vmem:[%s20933_s1 + $0xcd0] sm:$0xff] }
 0x33f   :  { %11030 = vmatpush1.bf16.msra.mxu0 %v13383_v60  ;;  %10832 = vmatprep.subr.bf16.mxu1 %v14478_v61  ;;  %v14534_v60 = vcombine.high %v1496_v21, %v1500_v54  ;;  %v13448_v61 = vcombine.high %v409_v55, %v413_v56  ;;  %v461_v49 = vld [vmem:[%s20933_s1 + $0xcf0] sm:$0xff]  ;;  %v1552_v54 = vld [vmem:[%s20933_s1 + $0x2f08] sm:$0xff] }
 0x340   :  { %11031 = vmatprep.subr.bf16.mxu0 %v13392_v62  ;;  %v1504_v62 = vld [vmem:[%s20933_s1 + $0x2d88] sm:$0xff]  ;;  %v13496_v21 = vcombine.high %v457_v48, %v461_v49 }
 0x341   :  { %v14541_v10 = vcombine.low %v1504_v62, %v1508_v63 }
 0x342   :  { %10833 = vmatpush1.bf16.msra.mxu1 %v14477_v3  ;;  %v13447_v3 = vcombine.low %v409_v55, %v413_v56  ;;  %v1556_v55 = vld [vmem:[%s20933_s1 + $0x2f28] sm:$0xff]  ;;  %v465_v56 = vld [vmem:[%s20933_s1 + $0xd10] sm:$0xff] }
 0x343   :  { %11032 = vmatpush1.bf16.msra.mxu0 %v13391_v4  ;;  %10834 = vmatprep.subr.bf16.mxu1 %v14486_v5  ;;  %v14542_v4 = vcombine.high %v1504_v62, %v1508_v63  ;;  %v13456_v5 = vcombine.high %v417_v0, %v421_v1 }
 0x344   :  { %11033 = vmatprep.subr.bf16.mxu0 %v13400_v6  ;;  %v1512_v6 = vld [vmem:[%s20933_s1 + $0x2dc8] sm:$0xff] }
 0x345   :  { %v14549_v19 = vcombine.low %v1512_v6, %v1516_v7 }
 0x346   :  { %10835 = vmatpush1.bf16.msra.mxu1 %v14485_v12  ;;  %v13455_v12 = vcombine.low %v417_v0, %v421_v1  ;;  %v1560_v0 = vld [vmem:[%s20933_s1 + $0x2f48] sm:$0xff] }
 0x347   :  { %11034 = vmatpush1.bf16.msra.mxu0 %v13399_v13  ;;  %10847 = vmatprep.subr.bf16.mxu1 %v14494_v14  ;;  %v14550_v13 = vcombine.high %v1512_v6, %v1516_v7  ;;  %v13464_v14 = vcombine.high %v425_v8, %v429_v9  ;;  %v1564_v1 = vld [vmem:[%s20933_s1 + $0x2f68] sm:$0xff]  ;;  %v14589_v6 = vcombine.low %v1552_v54, %v1556_v55 }
 0x348   :  { %11035 = vmatprep.subr.bf16.mxu0 %v13408_v15  ;;  %v1520_v15 = vld [vmem:[%s20933_s1 + $0x2e08] sm:$0xff] }
 0x349   :  { %10837 = vmatmul.mubr.bf16.vlgmr.msra.gmra.mrb[4].mxu1 %v15289_v33  ;;  %v445_v33 = vld [vmem:[%s20933_s1 + $0xc70] sm:$0xff]  ;;  %v14557_v34 = vcombine.low %v1520_v15, %v1524_v16 }
 0x34a   :  { %10848 = vmatpush1.bf16.msra.mxu1 %v14493_v23  ;;  %10879 = vmatprep.mubr.bf16.mxu1 %v15290_v37  ;;  %v13463_v23 = vcombine.low %v425_v8, %v429_v9  ;;  %v13480_v37 = vcombine.high %v441_v32, %v445_v33  ;;  %v13479_v44 = vcombine.low %v441_v32, %v445_v33  ;;  %v489_v33 = vld [vmem:[%s20933_s1 + $0xdd0] sm:$0xff] }
 0x34b   :  { %11036 = vmatpush1.bf16.msra.mxu0 %v13407_v24  ;;  %10849 = vmatprep.subr.bf16.mxu1 %v14502_v25  ;;  %v14558_v24 = vcombine.high %v1520_v15, %v1524_v16  ;;  %v13472_v25 = vcombine.high %v433_v17, %v437_v18  ;;  %v14598_v8 = vcombine.high %v1560_v0, %v1564_v1  ;;  %v481_v15 = vld [vmem:[%s20933_s1 + $0xd90] sm:$0xff] }
 0x34c   :  { %11037 = vmatprep.subr.bf16.mxu0 %v13416_v28  ;;  %v1528_v28 = vld [vmem:[%s20933_s1 + $0x2e48] sm:$0xff]  ;;  %v485_v16 = vld [vmem:[%s20933_s1 + $0xdb0] sm:$0xff]  ;;  %v14597_v17 = vcombine.low %v1560_v0, %v1564_v1 }
 0x34d   :  { %v14565_v43 = vcombine.low %v1528_v28, %v1532_v30 }
 0x34e   :  { %10850 = vmatpush1.bf16.msra.mxu1 %v14501_v36  ;;  %v14566_v36 = vcombine.high %v1528_v28, %v1532_v30  ;;  %v1580_v28 = vld [vmem:[%s20933_s1 + $0x2fe8] sm:$0xff] }
 0x34f   :  { %11038 = vmatpush1.bf16.msra.mxu0 %v13415_v38  ;;  %10851 = vmatprep.subr.bf16.mxu1 %v14510_v39  ;;  %v1536_v38 = vld [vmem:[%s20933_s1 + $0x2e88] sm:$0xff] }
 0x350   :  { %11039 = vmatprep.subr.bf16.mxu0 %v13424_v40  ;;  %v1540_v39 = vld [vmem:[%s20933_s1 + $0x2ea8] sm:$0xff]  ;;  %v449_v40 = vld [vmem:[%s20933_s1 + $0xc90] sm:$0xff] }
 0x352   :  { %10852 = vmatpush1.bf16.msra.mxu1 %v14509_v45  ;;  %v14574_v45 = vcombine.high %v1536_v38, %v1540_v39 }
 0x353   :  { %11040 = vmatpush1.bf16.msra.mxu0 %v13423_v11  ;;  %10853 = vmatprep.subr.bf16.mxu1 %v14518_v46  ;;  %v1649_v11 = vlaneseq  ;;  %v13488_v46 = vcombine.high %v449_v40, %v453_v41 }
 0x354   :  { %11041 = vmatprep.subr.bf16.mxu0 %v13432_v47  ;;  %v1544_v47 = vld [vmem:[%s20933_s1 + $0x2ec8] sm:$0xff] }
 0x356   :  { %10854 = vmatpush1.bf16.msra.mxu1 %v14517_v50  ;;  %v14573_v50 = vcombine.low %v1536_v38, %v1540_v39 }
 0x357   :  { %11042 = vmatpush1.bf16.msra.mxu0 %v13431_v51  ;;  %10855 = vmatprep.subr.bf16.mxu1 %v14526_v52  ;;  %v13487_v51 = vcombine.low %v449_v40, %v453_v41  ;;  %v14582_v52 = vcombine.high %v1544_v47, %v1548_v58 }
 0x358   :  { %11043 = vmatprep.subr.bf16.mxu0 %v13440_v53  ;;  %v18192_v53 = vshrl.u32 %v1649_v11, 7 }
 0x35a   :  { %10856 = vmatpush1.bf16.msra.mxu1 %v14525_v57  ;;  %v469_v57 = vld [vmem:[%s20933_s1 + $0xd30] sm:$0xff]  ;;  %v1651_v62 = vsub.s32 0, %v18192_v53 }
 0x35b   :  { %11044 = vmatpush1.bf16.msra.mxu0 %v13439_v59  ;;  %10857 = vmatprep.subr.bf16.mxu1 %v14534_v60  ;;  %v14581_v59 = vcombine.low %v1544_v47, %v1548_v58  ;;  %v13495_v60 = vcombine.low %v457_v48, %v461_v49  ;;  %v13504_v63 = vcombine.high %v465_v56, %v469_v57  ;;  %v501_v47 = vld [vmem:[%s20933_s1 + $0xe30] sm:$0xff] }
 0x35c   :  { %11045 = vmatprep.subr.bf16.mxu0 %v13448_v61  ;;  %v14590_v61 = vcombine.high %v1552_v54, %v1556_v55  ;;  %v13503_v7 = vcombine.low %v465_v56, %v469_v57  ;;  %v1592_v55 = vld [vmem:[%s20933_s1 + $0x3048] sm:$0xff] }
 0x35d   :  { %v1596_v56 = vld [vmem:[%s20933_s1 + $0x3068] sm:$0xff] }
 0x35e   :  { %10858 = vmatpush1.bf16.msra.mxu1 %v14533_v2  ;;  %v1647_v2 = vld [vmem:[%s20935_s2] sm:$0xff]  ;;  %v14630_v0 = vcombine.high %v1592_v55, %v1596_v56 }
 0x35f   :  { %11046 = vmatpush1.bf16.msra.mxu0 %v13447_v3  ;;  %10859 = vmatprep.subr.bf16.mxu1 %v14542_v4  ;;  %v1655_v3 = vsub.s32 1, %v18192_v53  ;;  %v473_v4 = vld [vmem:[%s20933_s1 + $0xd50] sm:$0xff]  ;;  %v1652_v9 = vrot.slane %v1647_v2, %v1651_v62 }
 0x360   :  { %11047 = vmatprep.subr.bf16.mxu0 %v13456_v5  ;;  %v477_v5 = vld [vmem:[%s20933_s1 + $0xd70] sm:$0xff] }
 0x361   :  { %v13511_v18 = vcombine.low %v473_v4, %v477_v5 }
 0x362   :  { %10860 = vmatpush1.bf16.msra.mxu1 %v14541_v10  ;;  %v13512_v10 = vcombine.high %v473_v4, %v477_v5  ;;  %v1604_v4 = vld [vmem:[%s20933_s1 + $0x30a8] sm:$0xff]  ;;  %v15293_v5 = vld [vmem:[%s20934_s0 + $0x58] ss:$100 sps:$4 sm:$0xff]  }
 0x363   :  { %11048 = vmatpush1.bf16.msra.mxu0 %v13455_v12  ;;  %10861 = vmatprep.subr.bf16.mxu1 %v14550_v13  ;;  %v1568_v12 = vld [vmem:[%s20933_s1 + $0x2f88] sm:$0xff] }
 0x364   :  { %11049 = vmatprep.subr.bf16.mxu0 %v13464_v14  ;;  %v1572_v13 = vld [vmem:[%s20933_s1 + $0x2fa8] sm:$0xff]  ;;  %v1656_v14 = vrot.slane %v1647_v2, %v1655_v3 }
 0x365   :  { %v14605_v38 = vcombine.low %v1568_v12, %v1572_v13  ;;  %v1600_v2 = vld [vmem:[%s20933_s1 + $0x3088] sm:$0xff] }
 0x366   :  { %10862 = vmatpush1.bf16.msra.mxu1 %v14549_v19  ;;  %v14606_v19 = vcombine.high %v1568_v12, %v1572_v13  ;;  %v14813_v30 = vadd.f32 %v16493_v26, %v1656_v14  ;;  %v13519_v26 = vcombine.low %v481_v15, %v485_v16  ;;  %v1608_v13 = vld [vmem:[%s20933_s1 + $0x30c8] sm:$0xff] }
 0x367   :  { %11050 = vmatpush1.bf16.msra.mxu0 %v13463_v23  ;;  %10863 = vmatprep.subr.bf16.mxu1 %v14558_v24  ;;  %v14811_v23 = vadd.f32 %v16485_v22, %v1652_v9  ;;  %v13520_v24 = vcombine.high %v481_v15, %v485_v16  ;;  %v493_v22 = vld [vmem:[%s20933_s1 + $0xdf0] sm:$0xff] }
 0x368   :  { %11062 = vmatprep.subr.bf16.mxu0 %v13472_v25  ;;  %v1576_v25 = vld [vmem:[%s20933_s1 + $0x2fc8] sm:$0xff]  ;;  %v521_v15 = vld [vmem:[%s20933_s1 + $0xed0] sm:$0xff] }
 0x369   :  { %v14614_v41 = vcombine.high %v1576_v25, %v1580_v28  ;;  %v14613_v48 = vcombine.low %v1576_v25, %v1580_v28  ;;  %v525_v16 = vld [vmem:[%s20933_s1 + $0xef0] sm:$0xff]  ;;  %v1620_v25 = vld [vmem:[%s20933_s1 + $0x3128] sm:$0xff] }
 0x36a   :  { %10864 = vmatpush1.bf16.msra.mxu1 %v14557_v34  ;;  %11052 = vmatmul.mubr.bf16.vlgmr.msra.gmra.mrb[4].mxu0 %v15291_v42  ;;  %v14815_v34 = vadd.f32 %v16501_v29, %v1652_v9  ;;  %v1584_v29 = vld [vmem:[%s20933_s1 + $0x3008] sm:$0xff]  ;;  %v529_v28 = vld [vmem:[%s20933_s1 + $0xf10] sm:$0xff] }
 0x36b   :  { %11063 = vmatpush1.bf16.msra.mxu0 %v13471_v35  ;;  %10865 = vmatprep.subr.bf16.mxu1 %v14566_v36  ;;  %v14817_v35 = vadd.f32 %v16503_v31, %v1656_v14  ;;  %v1588_v31 = vld [vmem:[%s20933_s1 + $0x3028] sm:$0xff] }
 0x36c   :  { %11064 = vmatprep.subr.bf16.mxu0 %v13480_v37  ;;  %11094 = vmatprep.mubr.bf16.mxu0 %v15292_v20  ;;  %v1612_v14 = vld [vmem:[%s20933_s1 + $0x30e8] sm:$0xff] }
 0x36e   :  { %10866 = vmatpush1.bf16.msra.mxu1 %v14565_v43 }
 0x36f   :  { %11065 = vmatpush1.bf16.msra.mxu0 %v13479_v44  ;;  %10867 = vmatprep.subr.bf16.mxu1 %v14574_v45  ;;  %v13528_v44 = vcombine.high %v489_v33, %v493_v22 }
 0x370   :  { %11066 = vmatprep.subr.bf16.mxu0 %v13488_v46  ;;  %v497_v46 = vld [vmem:[%s20933_s1 + $0xe10] sm:$0xff] }
 0x371   :  { %v13536_v54 = vcombine.high %v497_v46, %v501_v47 }
 0x372   :  { %10868 = vmatpush1.bf16.msra.mxu1 %v14573_v50 }
 0x373   :  { %11067 = vmatpush1.bf16.msra.mxu0 %v13487_v51  ;;  %10869 = vmatprep.subr.bf16.mxu1 %v14582_v52  ;;  %v13527_v51 = vcombine.low %v489_v33, %v493_v22  ;;  %v14622_v52 = vcombine.high %v1584_v29, %v1588_v31  ;;  %v13559_v33 = vcombine.low %v521_v15, %v525_v16 }
 0x374   :  { %11068 = vmatprep.subr.bf16.mxu0 %v13496_v21 }
 0x376   :  { %10870 = vmatpush1.bf16.msra.mxu1 %v14581_v59  ;;  %v505_v59 = vld [vmem:[%s20933_s1 + $0xe50] sm:$0xff] }
 0x377   :  { %11069 = vmatpush1.bf16.msra.mxu0 %v13495_v60  ;;  %10871 = vmatprep.subr.bf16.mxu1 %v14590_v61  ;;  %v509_v60 = vld [vmem:[%s20933_s1 + $0xe70] sm:$0xff]  ;;  %v14621_v61 = vcombine.low %v1584_v29, %v1588_v31 }
 0x378   :  { %11070 = vmatprep.subr.bf16.mxu0 %v13504_v63  ;;  %v13535_v63 = vcombine.low %v497_v46, %v501_v47  ;;  %v13544_v1 = vcombine.high %v505_v59, %v509_v60  ;;  %v13543_v9 = vcombine.low %v505_v59, %v509_v60  ;;  %v549_v29 = vld [vmem:[%s20933_s1 + $0xfb0] sm:$0xff] }
 0x379   :  { %v561_v59 = vld [vmem:[%s20933_s1 + $0x1010] sm:$0xff] }
 0x37a   :  { %10872 = vmatpush1.bf16.msra.mxu1 %v14589_v6  ;;  %v513_v6 = vld [vmem:[%s20933_s1 + $0xe90] sm:$0xff] }
 0x37b   :  { %11071 = vmatpush1.bf16.msra.mxu0 %v13503_v7  ;;  %10873 = vmatprep.subr.bf16.mxu1 %v14598_v8  ;;  %v517_v7 = vld [vmem:[%s20933_s1 + $0xeb0] sm:$0xff]  ;;  %v14629_v8 = vcombine.low %v1592_v55, %v1596_v56  ;;  %v50_v55 = vld [vmem:[%s20933_s1 + $0x18] sm:$0xff] }
 0x37c   :  { %11072 = vmatprep.subr.bf16.mxu0 %v13512_v10  ;;  %v14638_v10 = vcombine.high %v1600_v2, %v1604_v4  ;;  %v13552_v12 = vcombine.high %v513_v6, %v517_v7  ;;  %v54_v56 = vld [vmem:[%s20933_s1 + $0x38] sm:$0xff]  ;;  %v565_v60 = vld [vmem:[%s20933_s1 + $0x1030] sm:$0xff] }
 0x37d   :  { %v10365_v32 = vpop.f32.mrb[0].mxu0 }
 0x37e   :  { %v14812_v36 = vadd.f32 %v14811_v23, %v10365_v32  ;;  %v10367_v37 = vpop.f32.mrb[1].mxu0  ;;  %10874 = vmatpush1.bf16.msra.mxu1 %v14597_v17  ;;  %v14637_v17 = vcombine.low %v1600_v2, %v1604_v4  ;;  %v13560_v23 = vcombine.high %v521_v15, %v525_v16  ;;  %v14645_v32 = vcombine.low %v1608_v13, %v1612_v14  ;;  %v58_v2 = vld [vmem:[%s20933_s1 + $0x58] sm:$0xff]  ;;  %v577_v15 = vld [vmem:[%s20933_s1 + $0x1090] sm:$0xff] }
 0x37f   :  { %v14814_v39 = vadd.f32 %v14813_v30, %v10367_v37  ;;  %v10369_v40 = vpop.f32.mrb[2].mxu0  ;;  %11073 = vmatpush1.bf16.msra.mxu0 %v13511_v18  ;;  %10875 = vmatprep.subr.bf16.mxu1 %v14606_v19  ;;  %v13551_v18 = vcombine.low %v513_v6, %v517_v7  ;;  %v14646_v19 = vcombine.high %v1608_v13, %v1612_v14  ;;  %v533_v30 = vld [vmem:[%s20933_s1 + $0xf30] sm:$0xff]  ;;  %v62_v4 = vld [vmem:[%s20933_s1 + $0x78] sm:$0xff]  ;;  %v15294_v14 = vld [vmem:[%s20934_s0 + $0x60] ss:$100 sps:$4 sm:$0xff]  }
 0x380   :  { %v14816_v42 = vadd.f32 %v14815_v34, %v10369_v40  ;;  %v10371_v43 = vpop.f32.mrb[3].mxu0  ;;  %11074 = vmatprep.subr.bf16.mxu0 %v13520_v24  ;;  %v12051_v58 = vmax.f32 %v14812_v36, 0.0  ;;  %v1616_v24 = vld [vmem:[%s20933_s1 + $0x3108] sm:$0xff]  ;;  %v13568_v34 = vcombine.high %v529_v28, %v533_v30  ;;  %v537_v37 = vld [vmem:[%s20933_s1 + $0xf50] sm:$0xff]  ;;  %v13567_v40 = vcombine.low %v529_v28, %v533_v30  ;;  %v70_v13 = vld [vmem:[%s20933_s1 + $0xb8] sm:$0xff] }
 0x381   :  { %v14818_v45 = vadd.f32 %v14817_v35, %v10371_v43  ;;  %v12052_v49 = vmax.f32 %v14814_v39, 0.0  ;;  %v14654_v22 = vcombine.high %v1616_v24, %v1620_v25  ;;  %v1624_v35 = vld [vmem:[%s20933_s1 + $0x3148] sm:$0xff]  ;;  %v14653_v39 = vcombine.low %v1616_v24, %v1620_v25  ;;  %v573_v6 = vld [vmem:[%s20933_s1 + $0x1070] sm:$0xff]  ;;  %v74_v25 = vld [vmem:[%s20933_s1 + $0xd8] sm:$0xff] }
 0x382   :  { %v12059_v20 = vmax.f32 %v14816_v42, 0.0  ;;  %10876 = vmatpush1.bf16.msra.mxu1 %v14605_v38  ;;  %v1628_v36 = vld [vmem:[%s20933_s1 + $0x3168] sm:$0xff]  ;;  %v541_v38 = vld [vmem:[%s20933_s1 + $0xf70] sm:$0xff]  ;;  %v13089_v7 = vcombine.low %v50_v55, %v54_v56  ;;  %v78_v28 = vld [vmem:[%s20933_s1 + $0xf8] sm:$0xff] }
 0x383   :  { %v12060_v50 = vmax.f32 %v14818_v45, 0.0  ;;  %11075 = vmatpush1.bf16.msra.mxu0 %v13519_v26  ;;  %10877 = vmatprep.subr.bf16.mxu1 %v14614_v41  ;;  %v14662_v26 = vcombine.high %v1624_v35, %v1628_v36  ;;  %v13576_v41 = vcombine.high %v537_v37, %v541_v38  ;;  %v1632_v42 = vld [vmem:[%s20933_s1 + $0x3188] sm:$0xff]  ;;  %v14661_v31 = vcombine.low %v1624_v35, %v1628_v36  ;;  %v581_v16 = vld [vmem:[%s20933_s1 + $0x10b0] sm:$0xff] }
 0x384   :  { %v18267_v21 = vpack.c.bf16 %v12059_v20, %v12051_v58  ;;  %11076 = vmatprep.subr.bf16.mxu0 %v13528_v44  ;;  %v1636_v43 = vld [vmem:[%s20933_s1 + $0x31a8] sm:$0xff]  ;;  %v545_v44 = vld [vmem:[%s20933_s1 + $0xf90] sm:$0xff]  ;;  %v13575_v45 = vcombine.low %v537_v37, %v541_v38  ;;  %v13616_v24 = vcombine.high %v577_v15, %v581_v16  ;;  %v13615_v35 = vcombine.low %v577_v15, %v581_v16  ;;  %v82_v38 = vld [vmem:[%s20933_s1 + $0x118] sm:$0xff] }
 0x385   :  { %v18275_v57 = vpack.c.bf16 %v12060_v50, %v12052_v49  ;;  %v14670_v46 = vcombine.high %v1632_v42, %v1636_v43  ;;  %v13584_v47 = vcombine.high %v545_v44, %v549_v29  ;;  %v1640_v58 = vld [vmem:[%s20933_s1 + $0x31c8] sm:$0xff]  ;;  %v557_v49 = vld [vmem:[%s20933_s1 + $0xff0] sm:$0xff]  ;;  %v14669_v50 = vcombine.low %v1632_v42, %v1636_v43  ;;  %v122_v15 = vld [vmem:[%s20933_s1 + $0x258] sm:$0xff] }
 0x386   :  { %10878 = vmatpush1.bf16.msra.mxu1 %v14613_v48  ;;  %v1644_v20 = vld [vmem:[%s20933_s1 + $0x31e8] sm:$0xff]  ;;  %v553_v48 = vld [vmem:[%s20933_s1 + $0xfd0] sm:$0xff]  ;;  %v13114_v36 = vcombine.high %v74_v25, %v78_v28  ;;  %v126_v16 = vld [vmem:[%s20933_s1 + $0x278] sm:$0xff] }
 0x387   :  { %11077 = vmatpush1.bf16.msra.mxu0 %v13527_v51  ;;  %10890 = vmatprep.subr.bf16.mxu1 %v14622_v52  ;;  %v13583_v51 = vcombine.low %v545_v44, %v549_v29  ;;  %v14678_v52 = vcombine.high %v1640_v58, %v1644_v20  ;;  %v15296_v30 = vld [vmem:[%s20934_s0 + $0x24] ss:$100 sps:$4 sm:$0xff]   ;;  %v90_v29 = vld [vmem:[%s20933_s1 + $0x158] sm:$0xff] }
 0x388   :  { %11078 = vmatprep.subr.bf16.mxu0 %v13536_v54  ;;  %v13592_v54 = vcombine.high %v553_v48, %v557_v49 }
 0x389   :  { %10880 = vmatmul.mubr.bf16.vlgmr.msra.gmra.mrb[4].mxu1 %v15293_v5  ;;  %v569_v5 = vld [vmem:[%s20933_s1 + $0x1050] sm:$0xff] }
 0x38a   :  { %10891 = vmatpush1.bf16.msra.mxu1 %v14621_v61  ;;  %10922 = vmatprep.mubr.bf16.mxu1 %v15340_v27  ;;  %v14677_v61 = vcombine.low %v1640_v58, %v1644_v20 }
 0x38b   :  { %11079 = vmatpush1.bf16.msra.mxu0 %v13535_v63  ;;  %10892 = vmatprep.subr.bf16.mxu1 %v14630_v0  ;;  %v13591_v63 = vcombine.low %v553_v48, %v557_v49  ;;  %v13090_v0 = vcombine.high %v50_v55, %v54_v56  ;;  %v98_v49 = vld [vmem:[%s20933_s1 + $0x198] sm:$0xff] }
 0x38c   :  { %11080 = vmatprep.subr.bf16.mxu0 %v13544_v1  ;;  %v13600_v1 = vcombine.high %v561_v59, %v565_v60 }
 0x38e   :  { %10893 = vmatpush1.bf16.msra.mxu1 %v14629_v8  ;;  %v13599_v8 = vcombine.low %v561_v59, %v565_v60  ;;  %v106_v60 = vld [vmem:[%s20933_s1 + $0x1d8] sm:$0xff] }
 0x38f   :  { %11081 = vmatpush1.bf16.msra.mxu0 %v13543_v9  ;;  %10894 = vmatprep.subr.bf16.mxu1 %v14638_v10  ;;  %v13098_v9 = vcombine.high %v58_v2, %v62_v4  ;;  %v13608_v10 = vcombine.high %v569_v5, %v573_v6 }
 0x390   :  { %11082 = vmatprep.subr.bf16.mxu0 %v13552_v12  ;;  %v66_v12 = vld [vmem:[%s20933_s1 + $0x98] sm:$0xff] }
 0x392   :  { %10895 = vmatpush1.bf16.msra.mxu1 %v14637_v17  ;;  %v15295_v17 = vld [vmem:[%s20934_s0 + $0x18] ss:$100 sps:$4 sm:$0xff]  }
 0x393   :  { %11083 = vmatpush1.bf16.msra.mxu0 %v13551_v18  ;;  %10896 = vmatprep.subr.bf16.mxu1 %v14646_v19  ;;  %v13097_v18 = vcombine.low %v58_v2, %v62_v4  ;;  %v13607_v19 = vcombine.low %v569_v5, %v573_v6  ;;  %v114_v6 = vld [vmem:[%s20933_s1 + $0x218] sm:$0xff] }
 0x394   :  { %11084 = vmatprep.subr.bf16.mxu0 %v13560_v23  ;;  %v13106_v23 = vcombine.high %v66_v12, %v70_v13 }
 0x396   :  { %10897 = vmatpush1.bf16.msra.mxu1 %v14645_v32  ;;  %v585_v32 = vld [vmem:[%s20933_s1 + $0x10d0] sm:$0xff] }
 0x397   :  { %11085 = vmatpush1.bf16.msra.mxu0 %v13559_v33  ;;  %10898 = vmatprep.subr.bf16.mxu1 %v14654_v22  ;;  %v589_v33 = vld [vmem:[%s20933_s1 + $0x10f0] sm:$0xff]  ;;  %v15297_v22 = vld [vmem:[%s20934_s0 + $0x4] ss:$100 sps:$4 sm:$0xff]  }
 0x398   :  { %11086 = vmatprep.subr.bf16.mxu0 %v13568_v34  ;;  %v13105_v34 = vcombine.low %v66_v12, %v70_v13  ;;  %v13624_v37 = vcombine.high %v585_v32, %v589_v33  ;;  %v13623_v42 = vcombine.low %v585_v32, %v589_v33  ;;  %v641_v32 = vld [vmem:[%s20933_s1 + $0x1290] sm:$0xff] }
 0x399   :  { %v645_v33 = vld [vmem:[%s20933_s1 + $0x12b0] sm:$0xff] }
 0x39a   :  { %10899 = vmatpush1.bf16.msra.mxu1 %v14653_v39  ;;  %v86_v39 = vld [vmem:[%s20933_s1 + $0x138] sm:$0xff] }
 0x39b   :  { %11087 = vmatpush1.bf16.msra.mxu0 %v13567_v40  ;;  %10900 = vmatprep.subr.bf16.mxu1 %v14662_v26  ;;  %v593_v40 = vld [vmem:[%s20933_s1 + $0x1110] sm:$0xff]  ;;  %v13122_v43 = vcombine.high %v82_v38, %v86_v39 }
 0x39c   :  { %11088 = vmatprep.subr.bf16.mxu0 %v13576_v41  ;;  %v597_v26 = vld [vmem:[%s20933_s1 + $0x1130] sm:$0xff]  ;;  %v13113_v41 = vcombine.low %v74_v25, %v78_v28  ;;  %v130_v28 = vld [vmem:[%s20933_s1 + $0x298] sm:$0xff] }
 0x39d   :  { %v13632_v44 = vcombine.high %v593_v40, %v597_v26  ;;  %v13631_v58 = vcombine.low %v593_v40, %v597_v26  ;;  %v653_v40 = vld [vmem:[%s20933_s1 + $0x12f0] sm:$0xff] }
 0x39e   :  { %10901 = vmatpush1.bf16.msra.mxu1 %v14661_v31  ;;  %v94_v31 = vld [vmem:[%s20933_s1 + $0x178] sm:$0xff] }
 0x39f   :  { %11089 = vmatpush1.bf16.msra.mxu0 %v13575_v45  ;;  %10902 = vmatprep.subr.bf16.mxu1 %v14670_v46  ;;  %v601_v45 = vld [vmem:[%s20933_s1 + $0x1150] sm:$0xff]  ;;  %v13130_v20 = vcombine.high %v90_v29, %v94_v31 }
 0x3a0   :  { %11090 = vmatprep.subr.bf16.mxu0 %v13584_v47  ;;  %v605_v46 = vld [vmem:[%s20933_s1 + $0x1170] sm:$0xff]  ;;  %v13121_v47 = vcombine.low %v82_v38, %v86_v39  ;;  %v142_v38 = vld [vmem:[%s20933_s1 + $0x2f8] sm:$0xff] }
 0x3a1   :  { %v13640_v48 = vcombine.high %v601_v45, %v605_v46  ;;  %v13639_v55 = vcombine.low %v601_v45, %v605_v46  ;;  %v649_v39 = vld [vmem:[%s20933_s1 + $0x12d0] sm:$0xff] }
 0x3a2   :  { %10903 = vmatpush1.bf16.msra.mxu1 %v14669_v50  ;;  %v102_v50 = vld [vmem:[%s20933_s1 + $0x1b8] sm:$0xff]  ;;  %v661_v45 = vld [vmem:[%s20933_s1 + $0x1330] sm:$0xff] }
 0x3a3   :  { %11091 = vmatpush1.bf16.msra.mxu0 %v13583_v51  ;;  %10904 = vmatprep.subr.bf16.mxu1 %v14678_v52  ;;  %v609_v51 = vld [vmem:[%s20933_s1 + $0x1190] sm:$0xff]  ;;  %v13138_v56 = vcombine.high %v98_v49, %v102_v50 }
 0x3a4   :  { %11092 = vmatprep.subr.bf16.mxu0 %v13592_v54  ;;  %v613_v52 = vld [vmem:[%s20933_s1 + $0x11b0] sm:$0xff]  ;;  %v13129_v54 = vcombine.low %v90_v29, %v94_v31  ;;  %v150_v29 = vld [vmem:[%s20933_s1 + $0x338] sm:$0xff] }
 0x3a5   :  { %v13648_v59 = vcombine.high %v609_v51, %v613_v52  ;;  %v13647_v2 = vcombine.low %v609_v51, %v613_v52  ;;  %v657_v31 = vld [vmem:[%s20933_s1 + $0x1310] sm:$0xff] }
 0x3a6   :  { %10905 = vmatpush1.bf16.msra.mxu1 %v14677_v61  ;;  %v110_v61 = vld [vmem:[%s20933_s1 + $0x1f8] sm:$0xff]  ;;  %v669_v51 = vld [vmem:[%s20933_s1 + $0x1370] sm:$0xff] }
 0x3a7   :  { %11093 = vmatpush1.bf16.msra.mxu0 %v13591_v63  ;;  %11492 = vmatprep.subr.bf16.mxu1 %v13090_v0  ;;  %v617_v63 = vld [vmem:[%s20933_s1 + $0x11d0] sm:$0xff]  ;;  %v13146_v4 = vcombine.high %v106_v60, %v110_v61 }
 0x3a8   :  { %11105 = vmatprep.subr.bf16.mxu0 %v13600_v1  ;;  %v621_v0 = vld [vmem:[%s20933_s1 + $0x11f0] sm:$0xff]  ;;  %v13137_v1 = vcombine.low %v98_v49, %v102_v50  ;;  %v158_v49 = vld [vmem:[%s20933_s1 + $0x378] sm:$0xff] }
 0x3a9   :  { %10923 = vmatmul.mubr.bf16.vlgmr.msra.gmra.mrb[4].mxu1 %v15294_v14  ;;  %v13656_v5 = vcombine.high %v617_v63, %v621_v0  ;;  %v13655_v12 = vcombine.low %v617_v63, %v621_v0  ;;  %v665_v50 = vld [vmem:[%s20933_s1 + $0x1350] sm:$0xff] }
 0x3aa   :  { %11095 = vmatmul.mubr.bf16.vlgmr.msra.gmra.mrb[4].mxu0 %v15295_v17  ;;  %11493 = vmatpush1.bf16.msra.mxu1 %v13089_v7  ;;  %v118_v7 = vld [vmem:[%s20933_s1 + $0x238] sm:$0xff]  ;;  %v633_v17 = vld [vmem:[%s20933_s1 + $0x1250] sm:$0xff] }
 0x3ab   :  { %11106 = vmatpush1.bf16.msra.mxu0 %v13599_v8  ;;  %11494 = vmatprep.subr.bf16.mxu1 %v13098_v9  ;;  %v625_v8 = vld [vmem:[%s20933_s1 + $0x1210] sm:$0xff]  ;;  %v13154_v13 = vcombine.high %v114_v6, %v118_v7 }
 0x3ac   :  { %11107 = vmatprep.subr.bf16.mxu0 %v13608_v10  ;;  %11137 = vmatprep.mubr.bf16.mxu0 %v15296_v30  ;;  %v629_v9 = vld [vmem:[%s20933_s1 + $0x1230] sm:$0xff]  ;;  %v13145_v10 = vcombine.low %v106_v60, %v110_v61  ;;  %v134_v30 = vld [vmem:[%s20933_s1 + $0x2b8] sm:$0xff] }
 0x3ad   :  { %11524 = vmatprep.mubr.bf16.mxu1 %v15297_v22  ;;  %v13664_v14 = vcombine.high %v625_v8, %v629_v9  ;;  %v13161_v22 = vcombine.low %v122_v15, %v126_v16  ;;  %v13169_v26 = vcombine.low %v130_v28, %v134_v30  ;;  %v166_v60 = vld [vmem:[%s20933_s1 + $0x3b8] sm:$0xff]  ;;  %v673_v61 = vld [vmem:[%s20933_s1 + $0x1390] sm:$0xff] }
 0x3ae   :  { %11495 = vmatpush1.bf16.msra.mxu1 %v13097_v18  ;;  %v637_v18 = vld [vmem:[%s20933_s1 + $0x1270] sm:$0xff] }
 0x3af   :  { %11108 = vmatpush1.bf16.msra.mxu0 %v13607_v19  ;;  %11496 = vmatprep.subr.bf16.mxu1 %v13106_v23  ;;  %v13153_v19 = vcombine.low %v114_v6, %v118_v7  ;;  %v13663_v23 = vcombine.low %v625_v8, %v629_v9  ;;  %v13672_v25 = vcombine.high %v633_v17, %v637_v18  ;;  %v677_v63 = vld [vmem:[%s20933_s1 + $0x13b0] sm:$0xff]  ;;  %v174_v6 = vld [vmem:[%s20933_s1 + $0x3f8] sm:$0xff] }
 0x3b0   :  { %11109 = vmatprep.subr.bf16.mxu0 %v13616_v24  ;;  %v13162_v24 = vcombine.high %v122_v15, %v126_v16  ;;  %v681_v7 = vld [vmem:[%s20933_s1 + $0x13d0] sm:$0xff]  ;;  %v182_v15 = vld [vmem:[%s20933_s1 + $0x438] sm:$0xff] }
 0x3b1   :  { %v685_v8 = vld [vmem:[%s20933_s1 + $0x13f0] sm:$0xff] }
 0x3b2   :  { %11497 = vmatpush1.bf16.msra.mxu1 %v13105_v34  ;;  %v13671_v34 = vcombine.low %v633_v17, %v637_v18  ;;  %v689_v16 = vld [vmem:[%s20933_s1 + $0x1410] sm:$0xff] }
 0x3b3   :  { %11110 = vmatpush1.bf16.msra.mxu0 %v13615_v35  ;;  %11498 = vmatprep.subr.bf16.mxu1 %v13114_v36  ;;  %v13170_v35 = vcombine.high %v130_v28, %v134_v30  ;;  %v13680_v36 = vcombine.high %v641_v32, %v645_v33  ;;  %v693_v17 = vld [vmem:[%s20933_s1 + $0x1430] sm:$0xff]  ;;  %v190_v28 = vld [vmem:[%s20933_s1 + $0x478] sm:$0xff] }
 0x3b4   :  { %11111 = vmatprep.subr.bf16.mxu0 %v13624_v37  ;;  %v138_v37 = vld [vmem:[%s20933_s1 + $0x2d8] sm:$0xff]  ;;  %v697_v30 = vld [vmem:[%s20933_s1 + $0x1450] sm:$0xff] }
 0x3b5   :  { %v13177_v46 = vcombine.low %v138_v37, %v142_v38 }
 0x3b6   :  { %11499 = vmatpush1.bf16.msra.mxu1 %v13113_v41  ;;  %v13679_v41 = vcombine.low %v641_v32, %v645_v33  ;;  %v701_v32 = vld [vmem:[%s20933_s1 + $0x1470] sm:$0xff] }
 0x3b7   :  { %11112 = vmatpush1.bf16.msra.mxu0 %v13623_v42  ;;  %11500 = vmatprep.subr.bf16.mxu1 %v13122_v43  ;;  %v13178_v42 = vcombine.high %v138_v37, %v142_v38  ;;  %v13688_v43 = vcombine.high %v649_v39, %v653_v40  ;;  %v198_v37 = vld [vmem:[%s20933_s1 + $0x4b8] sm:$0xff]  ;;  %v15298_v38 = vld [vmem:[%s20934_s0] ss:$100 sps:$4 sm:$0xff]  }
 0x3b8   :  { %11113 = vmatprep.subr.bf16.mxu0 %v13632_v44  ;;  %v146_v44 = vld [vmem:[%s20933_s1 + $0x318] sm:$0xff] }
 0x3b9   :  { %v13185_v52 = vcombine.low %v146_v44, %v150_v29 }
 0x3ba   :  { %11501 = vmatpush1.bf16.msra.mxu1 %v13121_v47  ;;  %v13687_v47 = vcombine.low %v649_v39, %v653_v40  ;;  %v705_v39 = vld [vmem:[%s20933_s1 + $0x1490] sm:$0xff] }
 0x3bb   :  { %11114 = vmatpush1.bf16.msra.mxu0 %v13631_v58  ;;  %11502 = vmatprep.subr.bf16.mxu1 %v13130_v20  ;;  %v13186_v58 = vcombine.high %v146_v44, %v150_v29  ;;  %v13696_v20 = vcombine.high %v657_v31, %v661_v45  ;;  %v709_v40 = vld [vmem:[%s20933_s1 + $0x14b0] sm:$0xff]  ;;  %v202_v29 = vld [vmem:[%s20933_s1 + $0x4d8] sm:$0xff] }
 0x3bc   :  { %11115 = vmatprep.subr.bf16.mxu0 %v13640_v48  ;;  %v154_v48 = vld [vmem:[%s20933_s1 + $0x358] sm:$0xff]  ;;  %v13744_v44 = vcombine.high %v705_v39, %v709_v40 }
 0x3bd   :  { %v13193_v0 = vcombine.low %v154_v48, %v158_v49 }
 0x3be   :  { %11503 = vmatpush1.bf16.msra.mxu1 %v13129_v54  ;;  %v13695_v54 = vcombine.low %v657_v31, %v661_v45  ;;  %v206_v31 = vld [vmem:[%s20933_s1 + $0x4f8] sm:$0xff]  ;;  %v15300_v45 = vld [vmem:[%s20934_s0 + $0x2c] ss:$100 sps:$4 sm:$0xff]  }
 0x3bf   :  { %11116 = vmatpush1.bf16.msra.mxu0 %v13639_v55  ;;  %11504 = vmatprep.subr.bf16.mxu1 %v13138_v56  ;;  %v13194_v55 = vcombine.high %v154_v48, %v158_v49  ;;  %v13704_v56 = vcombine.high %v665_v50, %v669_v51  ;;  %v13743_v48 = vcombine.low %v705_v39, %v709_v40  ;;  %v250_v39 = vld [vmem:[%s20933_s1 + $0x658] sm:$0xff] }
 0x3c0   :  { %11117 = vmatprep.subr.bf16.mxu0 %v13648_v59  ;;  %v162_v59 = vld [vmem:[%s20933_s1 + $0x398] sm:$0xff]  ;;  %v13242_v49 = vcombine.high %v202_v29, %v206_v31 }
 0x3c1   :  { %v13201_v9 = vcombine.low %v162_v59, %v166_v60  ;;  %v254_v40 = vld [vmem:[%s20933_s1 + $0x678] sm:$0xff] }
 0x3c2   :  { %11505 = vmatpush1.bf16.msra.mxu1 %v13137_v1  ;;  %v13703_v1 = vcombine.low %v665_v50, %v669_v51  ;;  %v210_v51 = vld [vmem:[%s20933_s1 + $0x518] sm:$0xff] }
 0x3c3   :  { %11118 = vmatpush1.bf16.msra.mxu0 %v13647_v2  ;;  %11506 = vmatprep.subr.bf16.mxu1 %v13146_v4  ;;  %v13202_v2 = vcombine.high %v162_v59, %v166_v60  ;;  %v13712_v4 = vcombine.high %v673_v61, %v677_v63 }
 0x3c4   :  { %11119 = vmatprep.subr.bf16.mxu0 %v13656_v5  ;;  %v170_v5 = vld [vmem:[%s20933_s1 + $0x3d8] sm:$0xff] }
 0x3c5   :  { %v13209_v18 = vcombine.low %v170_v5, %v174_v6 }
 0x3c6   :  { %11507 = vmatpush1.bf16.msra.mxu1 %v13145_v10  ;;  %v13711_v10 = vcombine.low %v673_v61, %v677_v63  ;;  %v218_v63 = vld [vmem:[%s20933_s1 + $0x558] sm:$0xff] }
 0x3c7   :  { %11120 = vmatpush1.bf16.msra.mxu0 %v13655_v12  ;;  %11508 = vmatprep.subr.bf16.mxu1 %v13154_v13  ;;  %v13210_v12 = vcombine.high %v170_v5, %v174_v6  ;;  %v13720_v13 = vcombine.high %v681_v7, %v685_v8 }
 0x3c8   :  { %11121 = vmatprep.subr.bf16.mxu0 %v13664_v14  ;;  %v178_v14 = vld [vmem:[%s20933_s1 + $0x418] sm:$0xff] }
 0x3c9   :  { %v13217_v33 = vcombine.low %v178_v14, %v182_v15 }
 0x3ca   :  { %11509 = vmatpush1.bf16.msra.mxu1 %v13153_v19  ;;  %v13719_v19 = vcombine.low %v681_v7, %v685_v8  ;;  %v226_v8 = vld [vmem:[%s20933_s1 + $0x598] sm:$0xff] }
 0x3cb   :  { %11122 = vmatpush1.bf16.msra.mxu0 %v13663_v23  ;;  %11510 = vmatprep.subr.bf16.mxu1 %v13162_v24  ;;  %v13218_v23 = vcombine.high %v178_v14, %v182_v15  ;;  %v13728_v24 = vcombine.high %v689_v16, %v693_v17 }
 0x3cc   :  { %11123 = vmatprep.subr.bf16.mxu0 %v13672_v25  ;;  %v186_v25 = vld [vmem:[%s20933_s1 + $0x458] sm:$0xff] }
 0x3ce   :  { %11511 = vmatpush1.bf16.msra.mxu1 %v13161_v22  ;;  %v13727_v22 = vcombine.low %v689_v16, %v693_v17  ;;  %v234_v17 = vld [vmem:[%s20933_s1 + $0x5d8] sm:$0xff] }
 0x3cf   :  { %11124 = vmatpush1.bf16.msra.mxu0 %v13671_v34  ;;  %11512 = vmatprep.subr.bf16.mxu1 %v13170_v35  ;;  %v13226_v34 = vcombine.high %v186_v25, %v190_v28  ;;  %v13736_v35 = vcombine.high %v697_v30, %v701_v32 }
 0x3d0   :  { %11125 = vmatprep.subr.bf16.mxu0 %v13680_v36  ;;  %v194_v36 = vld [vmem:[%s20933_s1 + $0x498] sm:$0xff] }
 0x3d2   :  { %11513 = vmatpush1.bf16.msra.mxu1 %v13169_v26  ;;  %v15299_v26 = vld [vmem:[%s20934_s0 + $0x20] ss:$100 sps:$4 sm:$0xff]  }
 0x3d3   :  { %11126 = vmatpush1.bf16.msra.mxu0 %v13679_v41  ;;  %11514 = vmatprep.subr.bf16.mxu1 %v13178_v42  ;;  %v13225_v41 = vcombine.low %v186_v25, %v190_v28  ;;  %v13735_v42 = vcombine.low %v697_v30, %v701_v32  ;;  %v242_v32 = vld [vmem:[%s20933_s1 + $0x618] sm:$0xff] }
 0x3d4   :  { %11127 = vmatprep.subr.bf16.mxu0 %v13688_v43  ;;  %v13234_v43 = vcombine.high %v194_v36, %v198_v37 }
 0x3d6   :  { %11515 = vmatpush1.bf16.msra.mxu1 %v13177_v46  ;;  %v713_v46 = vld [vmem:[%s20933_s1 + $0x14d0] sm:$0xff] }
 0x3d7   :  { %11128 = vmatpush1.bf16.msra.mxu0 %v13687_v47  ;;  %11516 = vmatprep.subr.bf16.mxu1 %v13186_v58  ;;  %v717_v47 = vld [vmem:[%s20933_s1 + $0x14f0] sm:$0xff] }
 0x3d8   :  { %11129 = vmatprep.subr.bf16.mxu0 %v13696_v20  ;;  %v15301_v58 = vld [vmem:[%s20934_s0 + $0xc] ss:$100 sps:$4 sm:$0xff]   ;;  %v13233_v20 = vcombine.low %v194_v36, %v198_v37  ;;  %v13752_v50 = vcombine.high %v713_v46, %v717_v47  ;;  %v13751_v59 = vcombine.low %v713_v46, %v717_v47 }
 0x3d9   :  { %v769_v46 = vld [vmem:[%s20933_s1 + $0x1690] sm:$0xff] }
 0x3da   :  { %11517 = vmatpush1.bf16.msra.mxu1 %v13185_v52  ;;  %v214_v52 = vld [vmem:[%s20933_s1 + $0x538] sm:$0xff]  ;;  %v773_v47 = vld [vmem:[%s20933_s1 + $0x16b0] sm:$0xff] }
 0x3db   :  { %11130 = vmatpush1.bf16.msra.mxu0 %v13695_v54  ;;  %11518 = vmatprep.subr.bf16.mxu1 %v13194_v55  ;;  %v721_v54 = vld [vmem:[%s20933_s1 + $0x1510] sm:$0xff]  ;;  %v13250_v60 = vcombine.high %v210_v51, %v214_v52 }
 0x3dc   :  { %11131 = vmatprep.subr.bf16.mxu0 %v13704_v56  ;;  %v725_v55 = vld [vmem:[%s20933_s1 + $0x1530] sm:$0xff]  ;;  %v13241_v56 = vcombine.low %v202_v29, %v206_v31  ;;  %v258_v31 = vld [vmem:[%s20933_s1 + $0x698] sm:$0xff] }
 0x3dd   :  { %v13760_v61 = vcombine.high %v721_v54, %v725_v55  ;;  %v13759_v5 = vcombine.low %v721_v54, %v725_v55  ;;  %v781_v54 = vld [vmem:[%s20933_s1 + $0x16f0] sm:$0xff] }
 0x3de   :  { %11519 = vmatpush1.bf16.msra.mxu1 %v13193_v0  ;;  %v222_v0 = vld [vmem:[%s20933_s1 + $0x578] sm:$0xff] }
 0x3df   :  { %11132 = vmatpush1.bf16.msra.mxu0 %v13703_v1  ;;  %11520 = vmatprep.subr.bf16.mxu1 %v13202_v2  ;;  %v729_v1 = vld [vmem:[%s20933_s1 + $0x1550] sm:$0xff]  ;;  %v13258_v6 = vcombine.high %v218_v63, %v222_v0 }
 0x3e0   :  { %11133 = vmatprep.subr.bf16.mxu0 %v13712_v4  ;;  %v733_v2 = vld [vmem:[%s20933_s1 + $0x1570] sm:$0xff]  ;;  %v13249_v4 = vcombine.low %v210_v51, %v214_v52  ;;  %v270_v51 = vld [vmem:[%s20933_s1 + $0x6f8] sm:$0xff] }
 0x3e1   :  { %v13768_v7 = vcombine.high %v729_v1, %v733_v2  ;;  %v13767_v14 = vcombine.low %v729_v1, %v733_v2  ;;  %v777_v52 = vld [vmem:[%s20933_s1 + $0x16d0] sm:$0xff] }
 0x3e2   :  { %11521 = vmatpush1.bf16.msra.mxu1 %v13201_v9  ;;  %v230_v9 = vld [vmem:[%s20933_s1 + $0x5b8] sm:$0xff]  ;;  %v789_v1 = vld [vmem:[%s20933_s1 + $0x1730] sm:$0xff] }
 0x3e3   :  { %11134 = vmatpush1.bf16.msra.mxu0 %v13711_v10  ;;  %11522 = vmatprep.subr.bf16.mxu1 %v13210_v12  ;;  %v737_v10 = vld [vmem:[%s20933_s1 + $0x1590] sm:$0xff]  ;;  %v13266_v15 = vcombine.high %v226_v8, %v230_v9 }
 0x3e4   :  { %11135 = vmatprep.subr.bf16.mxu0 %v13720_v13  ;;  %v741_v12 = vld [vmem:[%s20933_s1 + $0x15b0] sm:$0xff]  ;;  %v13257_v13 = vcombine.low %v218_v63, %v222_v0  ;;  %v278_v63 = vld [vmem:[%s20933_s1 + $0x738] sm:$0xff] }
 0x3e5   :  { %v13776_v16 = vcombine.high %v737_v10, %v741_v12  ;;  %v13775_v25 = vcombine.low %v737_v10, %v741_v12  ;;  %v785_v0 = vld [vmem:[%s20933_s1 + $0x1710] sm:$0xff] }
 0x3e6   :  { %11523 = vmatpush1.bf16.msra.mxu1 %v13209_v18  ;;  %v238_v18 = vld [vmem:[%s20933_s1 + $0x5f8] sm:$0xff]  ;;  %v797_v10 = vld [vmem:[%s20933_s1 + $0x1770] sm:$0xff] }
 0x3e7   :  { %11136 = vmatpush1.bf16.msra.mxu0 %v13719_v19  ;;  %11535 = vmatprep.subr.bf16.mxu1 %v13218_v23  ;;  %v745_v19 = vld [vmem:[%s20933_s1 + $0x15d0] sm:$0xff]  ;;  %v13274_v28 = vcombine.high %v234_v17, %v238_v18 }
 0x3e8   :  { %11148 = vmatprep.subr.bf16.mxu0 %v13728_v24  ;;  %v749_v23 = vld [vmem:[%s20933_s1 + $0x15f0] sm:$0xff]  ;;  %v13265_v24 = vcombine.low %v226_v8, %v230_v9  ;;  %v286_v8 = vld [vmem:[%s20933_s1 + $0x778] sm:$0xff] }
 0x3e9   :  { %11525 = vmatmul.mubr.bf16.vlgmr.msra.gmra.mrb[8].mxu1 %v15298_v38  ;;  %v13784_v30 = vcombine.high %v745_v19, %v749_v23  ;;  %v13783_v36 = vcombine.low %v745_v19, %v749_v23  ;;  %v793_v9 = vld [vmem:[%s20933_s1 + $0x1750] sm:$0xff] }
 0x3ea   :  { %11138 = vmatmul.mubr.bf16.vlgmr.msra.gmra.mrb[4].mxu0 %v15299_v26  ;;  %11536 = vmatpush1.bf16.msra.mxu1 %v13217_v33  ;;  %v246_v33 = vld [vmem:[%s20933_s1 + $0x638] sm:$0xff]  ;;  %v761_v26 = vld [vmem:[%s20933_s1 + $0x1650] sm:$0xff] }
 0x3eb   :  { %11149 = vmatpush1.bf16.msra.mxu0 %v13727_v22  ;;  %11537 = vmatprep.subr.bf16.mxu1 %v13226_v34  ;;  %v753_v22 = vld [vmem:[%s20933_s1 + $0x1610] sm:$0xff]  ;;  %v13282_v37 = vcombine.high %v242_v32, %v246_v33 }
 0x3ec   :  { %11150 = vmatprep.subr.bf16.mxu0 %v13736_v35  ;;  %11180 = vmatprep.mubr.bf16.mxu0 %v15300_v45  ;;  %v757_v34 = vld [vmem:[%s20933_s1 + $0x1630] sm:$0xff]  ;;  %v13273_v35 = vcombine.low %v234_v17, %v238_v18  ;;  %v262_v45 = vld [vmem:[%s20933_s1 + $0x6b8] sm:$0xff] }
 0x3ed   :  { %11567 = vmatprep.mubr.bf16.mxu1 %v15301_v58  ;;  %v13792_v38 = vcombine.high %v753_v22, %v757_v34  ;;  %v13289_v58 = vcombine.low %v250_v39, %v254_v40  ;;  %v13297_v55 = vcombine.low %v258_v31, %v262_v45  ;;  %v294_v17 = vld [vmem:[%s20933_s1 + $0x7b8] sm:$0xff]  ;;  %v801_v18 = vld [vmem:[%s20933_s1 + $0x1790] sm:$0xff] }
 0x3ee   :  { %11538 = vmatpush1.bf16.msra.mxu1 %v13225_v41  ;;  %v765_v41 = vld [vmem:[%s20933_s1 + $0x1670] sm:$0xff] }
 0x3ef   :  { %11151 = vmatpush1.bf16.msra.mxu0 %v13735_v42  ;;  %11539 = vmatprep.subr.bf16.mxu1 %v13234_v43  ;;  %v13281_v42 = vcombine.low %v242_v32, %v246_v33  ;;  %v13791_v43 = vcombine.low %v753_v22, %v757_v34  ;;  %v13800_v29 = vcombine.high %v761_v26, %v765_v41  ;;  %v805_v19 = vld [vmem:[%s20933_s1 + $0x17b0] sm:$0xff]  ;;  %v302_v32 = vld [vmem:[%s20933_s1 + $0x7f8] sm:$0xff] }
 0x3f0   :  { %11152 = vmatprep.subr.bf16.mxu0 %v13744_v44  ;;  %v13290_v44 = vcombine.high %v250_v39, %v254_v40  ;;  %v809_v33 = vld [vmem:[%s20933_s1 + $0x17d0] sm:$0xff]  ;;  %v310_v39 = vld [vmem:[%s20933_s1 + $0x838] sm:$0xff] }
 0x3f1   :  { %v813_v22 = vld [vmem:[%s20933_s1 + $0x17f0] sm:$0xff] }
 0x3f2   :  { %11540 = vmatpush1.bf16.msra.mxu1 %v13233_v20  ;;  %v13799_v20 = vcombine.low %v761_v26, %v765_v41  ;;  %v817_v40 = vld [vmem:[%s20933_s1 + $0x1810] sm:$0xff] }
 0x3f3   :  { %11153 = vmatpush1.bf16.msra.mxu0 %v13743_v48  ;;  %11541 = vmatprep.subr.bf16.mxu1 %v13242_v49  ;;  %v13298_v48 = vcombine.high %v258_v31, %v262_v45  ;;  %v13808_v49 = vcombine.high %v769_v46, %v773_v47  ;;  %v821_v26 = vld [vmem:[%s20933_s1 + $0x1830] sm:$0xff]  ;;  %v318_v31 = vld [vmem:[%s20933_s1 + $0x878] sm:$0xff] }
 0x3f4   :  { %11154 = vmatprep.subr.bf16.mxu0 %v13752_v50  ;;  %v266_v50 = vld [vmem:[%s20933_s1 + $0x6d8] sm:$0xff]  ;;  %v825_v45 = vld [vmem:[%s20933_s1 + $0x1850] sm:$0xff] }
 0x3f5   :  { %v13305_v2 = vcombine.low %v266_v50, %v270_v51 }
 0x3f6   :  { %11542 = vmatpush1.bf16.msra.mxu1 %v13241_v56  ;;  %v13807_v56 = vcombine.low %v769_v46, %v773_v47  ;;  %v829_v46 = vld [vmem:[%s20933_s1 + $0x1870] sm:$0xff] }
 0x3f7   :  { %11155 = vmatpush1.bf16.msra.mxu0 %v13751_v59  ;;  %11543 = vmatprep.subr.bf16.mxu1 %v13250_v60  ;;  %v13306_v59 = vcombine.high %v266_v50, %v270_v51  ;;  %v13816_v60 = vcombine.high %v777_v52, %v781_v54  ;;  %v326_v50 = vld [vmem:[%s20933_s1 + $0x8b8] sm:$0xff]  ;;  %v15302_v51 = vld [vmem:[%s20934_s0 + $0x8] ss:$100 sps:$4 sm:$0xff]  }
 0x3f8   :  { %11156 = vmatprep.subr.bf16.mxu0 %v13760_v61  ;;  %v274_v61 = vld [vmem:[%s20933_s1 + $0x718] sm:$0xff] }
 0x3f9   :  { %v13313_v12 = vcombine.low %v274_v61, %v278_v63 }
 0x3fa   :  { %11544 = vmatpush1.bf16.msra.mxu1 %v13249_v4  ;;  %v13815_v4 = vcombine.low %v777_v52, %v781_v54  ;;  %v833_v52 = vld [vmem:[%s20933_s1 + $0x1890] sm:$0xff] }
 0x3fb   :  { %11157 = vmatpush1.bf16.msra.mxu0 %v13759_v5  ;;  %11545 = vmatprep.subr.bf16.mxu1 %v13258_v6  ;;  %v13314_v5 = vcombine.high %v274_v61, %v278_v63  ;;  %v13824_v6 = vcombine.high %v785_v0, %v789_v1  ;;  %v837_v54 = vld [vmem:[%s20933_s1 + $0x18b0] sm:$0xff]  ;;  %v330_v63 = vld [vmem:[%s20933_s1 + $0x8d8] sm:$0xff] }
 0x3fc   :  { %11158 = vmatprep.subr.bf16.mxu0 %v13768_v7  ;;  %v282_v7 = vld [vmem:[%s20933_s1 + $0x758] sm:$0xff]  ;;  %v13872_v61 = vcombine.high %v833_v52, %v837_v54 }
 0x3fd   :  { %v13321_v23 = vcombine.low %v282_v7, %v286_v8 }
 0x3fe   :  { %11546 = vmatpush1.bf16.msra.mxu1 %v13257_v13  ;;  %v13823_v13 = vcombine.low %v785_v0, %v789_v1  ;;  %v334_v0 = vld [vmem:[%s20933_s1 + $0x8f8] sm:$0xff] }
 0x3ff   :  { %11159 = vmatpush1.bf16.msra.mxu0 %v13767_v14  ;;  %11547 = vmatprep.subr.bf16.mxu1 %v13266_v15  ;;  %v13322_v14 = vcombine.high %v282_v7, %v286_v8  ;;  %v13832_v15 = vcombine.high %v793_v9, %v797_v10  ;;  %v15304_v1 = vld [vmem:[%s20934_s0 + $0x34] ss:$100 sps:$4 sm:$0xff]   ;;  %v13871_v7 = vcombine.low %v833_v52, %v837_v54 }
 0x400   :  { %11160 = vmatprep.subr.bf16.mxu0 %v13776_v16  ;;  %v290_v16 = vld [vmem:[%s20933_s1 + $0x798] sm:$0xff]  ;;  %v13370_v8 = vcombine.high %v330_v63, %v334_v0 }
 0x401   :  { %v13329_v34 = vcombine.low %v290_v16, %v294_v17  ;;  %v378_v52 = vld [vmem:[%s20933_s1 + $0xa58] sm:$0xff] }
 0x402   :  { %11548 = vmatpush1.bf16.msra.mxu1 %v13265_v24  ;;  %v13831_v24 = vcombine.low %v793_v9, %v797_v10  ;;  %v338_v10 = vld [vmem:[%s20933_s1 + $0x918] sm:$0xff] }
 0x403   :  { %11161 = vmatpush1.bf16.msra.mxu0 %v13775_v25  ;;  %11549 = vmatprep.subr.bf16.mxu1 %v13274_v28  ;;  %v13330_v25 = vcombine.high %v290_v16, %v294_v17  ;;  %v13840_v28 = vcombine.high %v801_v18, %v805_v19  ;;  %v382_v54 = vld [vmem:[%s20933_s1 + $0xa78] sm:$0xff] }
 0x404   :  { %11162 = vmatprep.subr.bf16.mxu0 %v13784_v30  ;;  %v298_v30 = vld [vmem:[%s20933_s1 + $0x7d8] sm:$0xff] }
 0x405   :  { %v13337_v41 = vcombine.low %v298_v30, %v302_v32 }
 0x406   :  { %11550 = vmatpush1.bf16.msra.mxu1 %v13273_v35  ;;  %v13839_v35 = vcombine.low %v801_v18, %v805_v19  ;;  %v346_v19 = vld [vmem:[%s20933_s1 + $0x958] sm:$0xff] }
 0x407   :  { %11163 = vmatpush1.bf16.msra.mxu0 %v13783_v36  ;;  %11551 = vmatprep.subr.bf16.mxu1 %v13282_v37  ;;  %v13338_v36 = vcombine.high %v298_v30, %v302_v32  ;;  %v13848_v37 = vcombine.high %v809_v33, %v813_v22 }
 0x408   :  { %11164 = vmatprep.subr.bf16.mxu0 %v13792_v38  ;;  %v306_v38 = vld [vmem:[%s20933_s1 + $0x818] sm:$0xff] }
 0x409   :  { %v13345_v47 = vcombine.low %v306_v38, %v310_v39 }
 0x40a   :  { %11552 = vmatpush1.bf16.msra.mxu1 %v13281_v42  ;;  %v13847_v42 = vcombine.low %v809_v33, %v813_v22  ;;  %v354_v22 = vld [vmem:[%s20933_s1 + $0x998] sm:$0xff] }
 0x40b   :  { %11165 = vmatpush1.bf16.msra.mxu0 %v13791_v43  ;;  %11553 = vmatprep.subr.bf16.mxu1 %v13290_v44  ;;  %v13346_v43 = vcombine.high %v306_v38, %v310_v39  ;;  %v13856_v44 = vcombine.high %v817_v40, %v821_v26 }
 0x40c   :  { %11166 = vmatprep.subr.bf16.mxu0 %v13800_v29  ;;  %v314_v29 = vld [vmem:[%s20933_s1 + $0x858] sm:$0xff] }
 0x40e   :  { %11554 = vmatpush1.bf16.msra.mxu1 %v13289_v58  ;;  %v13855_v58 = vcombine.low %v817_v40, %v821_v26  ;;  %v362_v26 = vld [vmem:[%s20933_s1 + $0x9d8] sm:$0xff] }
 0x40f   :  { %11167 = vmatpush1.bf16.msra.mxu0 %v13799_v20  ;;  %11555 = vmatprep.subr.bf16.mxu1 %v13298_v48  ;;  %v13354_v20 = vcombine.high %v314_v29, %v318_v31  ;;  %v13864_v48 = vcombine.high %v825_v45, %v829_v46 }
 0x410   :  { %11168 = vmatprep.subr.bf16.mxu0 %v13808_v49  ;;  %v322_v49 = vld [vmem:[%s20933_s1 + $0x898] sm:$0xff] }
 0x412   :  { %11556 = vmatpush1.bf16.msra.mxu1 %v13297_v55  ;;  %v15303_v55 = vld [vmem:[%s20934_s0 + $0x28] ss:$100 sps:$4 sm:$0xff]  }
 0x413   :  { %11169 = vmatpush1.bf16.msra.mxu0 %v13807_v56  ;;  %11557 = vmatprep.subr.bf16.mxu1 %v13306_v59  ;;  %v13353_v56 = vcombine.low %v314_v29, %v318_v31  ;;  %v13863_v59 = vcombine.low %v825_v45, %v829_v46  ;;  %v370_v46 = vld [vmem:[%s20933_s1 + $0xa18] sm:$0xff] }
 0x414   :  { %11170 = vmatprep.subr.bf16.mxu0 %v13816_v60  ;;  %v13362_v60 = vcombine.high %v322_v49, %v326_v50 }
 0x416   :  { %11558 = vmatpush1.bf16.msra.mxu1 %v13305_v2  ;;  %v841_v2 = vld [vmem:[%s20933_s1 + $0x18d0] sm:$0xff] }
 0x417   :  { %11171 = vmatpush1.bf16.msra.mxu0 %v13815_v4  ;;  %11559 = vmatprep.subr.bf16.mxu1 %v13314_v5  ;;  %v845_v4 = vld [vmem:[%s20933_s1 + $0x18f0] sm:$0xff] }
 0x418   :  { %11172 = vmatprep.subr.bf16.mxu0 %v13824_v6  ;;  %v15305_v5 = vld [vmem:[%s20934_s0 + $0x14] ss:$100 sps:$4 sm:$0xff]   ;;  %v13361_v6 = vcombine.low %v322_v49, %v326_v50  ;;  %v13880_v9 = vcombine.high %v841_v2, %v845_v4  ;;  %v13879_v16 = vcombine.low %v841_v2, %v845_v4 }
 0x419   :  { %v897_v2 = vld [vmem:[%s20933_s1 + $0x1a90] sm:$0xff] }
 0x41a   :  { %11560 = vmatpush1.bf16.msra.mxu1 %v13313_v12  ;;  %v342_v12 = vld [vmem:[%s20933_s1 + $0x938] sm:$0xff]  ;;  %v901_v4 = vld [vmem:[%s20933_s1 + $0x1ab0] sm:$0xff] }
 0x41b   :  { %11173 = vmatpush1.bf16.msra.mxu0 %v13823_v13  ;;  %11561 = vmatprep.subr.bf16.mxu1 %v13322_v14  ;;  %v849_v13 = vld [vmem:[%s20933_s1 + $0x1910] sm:$0xff]  ;;  %v13378_v17 = vcombine.high %v338_v10, %v342_v12 }
 0x41c   :  { %11174 = vmatprep.subr.bf16.mxu0 %v13832_v15  ;;  %v853_v14 = vld [vmem:[%s20933_s1 + $0x1930] sm:$0xff]  ;;  %v13369_v15 = vcombine.low %v330_v63, %v334_v0  ;;  %v386_v0 = vld [vmem:[%s20933_s1 + $0xa98] sm:$0xff] }
 0x41d   :  { %v13888_v18 = vcombine.high %v849_v13, %v853_v14  ;;  %v13887_v30 = vcombine.low %v849_v13, %v853_v14  ;;  %v909_v13 = vld [vmem:[%s20933_s1 + $0x1af0] sm:$0xff] }
 0x41e   :  { %11562 = vmatpush1.bf16.msra.mxu1 %v13321_v23  ;;  %v350_v23 = vld [vmem:[%s20933_s1 + $0x978] sm:$0xff] }
 0x41f   :  { %11175 = vmatpush1.bf16.msra.mxu0 %v13831_v24  ;;  %11563 = vmatprep.subr.bf16.mxu1 %v13330_v25  ;;  %v857_v24 = vld [vmem:[%s20933_s1 + $0x1950] sm:$0xff]  ;;  %v13386_v32 = vcombine.high %v346_v19, %v350_v23 }
 0x420   :  { %11176 = vmatprep.subr.bf16.mxu0 %v13840_v28  ;;  %v861_v25 = vld [vmem:[%s20933_s1 + $0x1970] sm:$0xff]  ;;  %v13377_v28 = vcombine.low %v338_v10, %v342_v12  ;;  %v398_v10 = vld [vmem:[%s20933_s1 + $0xaf8] sm:$0xff] }
 0x421   :  { %v13896_v33 = vcombine.high %v857_v24, %v861_v25  ;;  %v13895_v38 = vcombine.low %v857_v24, %v861_v25  ;;  %v905_v12 = vld [vmem:[%s20933_s1 + $0x1ad0] sm:$0xff] }
 0x422   :  { %11564 = vmatpush1.bf16.msra.mxu1 %v13329_v34  ;;  %v358_v34 = vld [vmem:[%s20933_s1 + $0x9b8] sm:$0xff]  ;;  %v917_v24 = vld [vmem:[%s20933_s1 + $0x1b30] sm:$0xff] }
 0x423   :  { %11177 = vmatpush1.bf16.msra.mxu0 %v13839_v35  ;;  %11565 = vmatprep.subr.bf16.mxu1 %v13338_v36  ;;  %v865_v35 = vld [vmem:[%s20933_s1 + $0x1990] sm:$0xff]  ;;  %v13394_v39 = vcombine.high %v354_v22, %v358_v34 }
 0x424   :  { %11178 = vmatprep.subr.bf16.mxu0 %v13848_v37  ;;  %v869_v36 = vld [vmem:[%s20933_s1 + $0x19b0] sm:$0xff]  ;;  %v13385_v37 = vcombine.low %v346_v19, %v350_v23  ;;  %v406_v19 = vld [vmem:[%s20933_s1 + $0xb38] sm:$0xff] }
 0x425   :  { %v13904_v40 = vcombine.high %v865_v35, %v869_v36  ;;  %v13903_v29 = vcombine.low %v865_v35, %v869_v36  ;;  %v913_v23 = vld [vmem:[%s20933_s1 + $0x1b10] sm:$0xff] }
 0x426   :  { %11566 = vmatpush1.bf16.msra.mxu1 %v13337_v41  ;;  %v366_v41 = vld [vmem:[%s20933_s1 + $0x9f8] sm:$0xff]  ;;  %v925_v35 = vld [vmem:[%s20933_s1 + $0x1b70] sm:$0xff] }
 0x427   :  { %11179 = vmatpush1.bf16.msra.mxu0 %v13847_v42  ;;  %11578 = vmatprep.subr.bf16.mxu1 %v13346_v43  ;;  %v873_v42 = vld [vmem:[%s20933_s1 + $0x19d0] sm:$0xff]  ;;  %v13402_v31 = vcombine.high %v362_v26, %v366_v41 }
 0x428   :  { %11191 = vmatprep.subr.bf16.mxu0 %v13856_v44  ;;  %v877_v43 = vld [vmem:[%s20933_s1 + $0x19f0] sm:$0xff]  ;;  %v13393_v44 = vcombine.low %v354_v22, %v358_v34  ;;  %v414_v22 = vld [vmem:[%s20933_s1 + $0xb78] sm:$0xff] }
 0x429   :  { %11568 = vmatmul.mubr.bf16.vlgmr.msra.gmra.mrb[8].mxu1 %v15302_v51  ;;  %v13912_v45 = vcombine.high %v873_v42, %v877_v43  ;;  %v13911_v49 = vcombine.low %v873_v42, %v877_v43  ;;  %v921_v34 = vld [vmem:[%s20933_s1 + $0x1b50] sm:$0xff] }
 0x42a   :  { %11181 = vmatmul.mubr.bf16.vlgmr.msra.gmra.mrb[4].mxu0 %v15303_v55  ;;  %11579 = vmatpush1.bf16.msra.mxu1 %v13345_v47  ;;  %v374_v47 = vld [vmem:[%s20933_s1 + $0xa38] sm:$0xff]  ;;  %v889_v55 = vld [vmem:[%s20933_s1 + $0x1a50] sm:$0xff] }
 0x42b   :  { %11192 = vmatpush1.bf16.msra.mxu0 %v13855_v58  ;;  %11580 = vmatprep.subr.bf16.mxu1 %v13354_v20  ;;  %v881_v58 = vld [vmem:[%s20933_s1 + $0x1a10] sm:$0xff]  ;;  %v13410_v50 = vcombine.high %v370_v46, %v374_v47 }
 0x42c   :  { %11193 = vmatprep.subr.bf16.mxu0 %v13864_v48  ;;  %11223 = vmatprep.mubr.bf16.mxu0 %v15304_v1  ;;  %v885_v20 = vld [vmem:[%s20933_s1 + $0x1a30] sm:$0xff]  ;;  %v13401_v48 = vcombine.low %v362_v26, %v366_v41  ;;  %v390_v1 = vld [vmem:[%s20933_s1 + $0xab8] sm:$0xff] }
 0x42d   :  { %11610 = vmatprep.mubr.bf16.mxu1 %v15305_v5  ;;  %v13920_v51 = vcombine.high %v881_v58, %v885_v20  ;;  %v13417_v5 = vcombine.low %v378_v52, %v382_v54  ;;  %v13425_v14 = vcombine.low %v386_v0, %v390_v1  ;;  %v422_v26 = vld [vmem:[%s20933_s1 + $0xbb8] sm:$0xff]  ;;  %v929_v41 = vld [vmem:[%s20933_s1 + $0x1b90] sm:$0xff] }
 0x42e   :  { %11581 = vmatpush1.bf16.msra.mxu1 %v13353_v56  ;;  %v893_v56 = vld [vmem:[%s20933_s1 + $0x1a70] sm:$0xff] }
 0x42f   :  { %11194 = vmatpush1.bf16.msra.mxu0 %v13863_v59  ;;  %11582 = vmatprep.subr.bf16.mxu1 %v13362_v60  ;;  %v13409_v59 = vcombine.low %v370_v46, %v374_v47  ;;  %v13919_v60 = vcombine.low %v881_v58, %v885_v20  ;;  %v13928_v63 = vcombine.high %v889_v55, %v893_v56  ;;  %v933_v42 = vld [vmem:[%s20933_s1 + $0x1bb0] sm:$0xff]  ;;  %v430_v46 = vld [vmem:[%s20933_s1 + $0xbf8] sm:$0xff] }
 0x430   :  { %11195 = vmatprep.subr.bf16.mxu0 %v13872_v61  ;;  %v13418_v61 = vcombine.high %v378_v52, %v382_v54  ;;  %v937_v47 = vld [vmem:[%s20933_s1 + $0x1bd0] sm:$0xff]  ;;  %v438_v52 = vld [vmem:[%s20933_s1 + $0xc38] sm:$0xff] }
 0x431   :  { %v941_v58 = vld [vmem:[%s20933_s1 + $0x1bf0] sm:$0xff] }
 0x432   :  { %11583 = vmatpush1.bf16.msra.mxu1 %v13361_v6  ;;  %v13927_v6 = vcombine.low %v889_v55, %v893_v56  ;;  %v945_v54 = vld [vmem:[%s20933_s1 + $0x1c10] sm:$0xff] }
 0x433   :  { %11196 = vmatpush1.bf16.msra.mxu0 %v13871_v7  ;;  %11584 = vmatprep.subr.bf16.mxu1 %v13370_v8  ;;  %v13426_v7 = vcombine.high %v386_v0, %v390_v1  ;;  %v13936_v8 = vcombine.high %v897_v2, %v901_v4  ;;  %v949_v55 = vld [vmem:[%s20933_s1 + $0x1c30] sm:$0xff]  ;;  %v446_v0 = vld [vmem:[%s20933_s1 + $0xc78] sm:$0xff] }
 0x434   :  { %11197 = vmatprep.subr.bf16.mxu0 %v13880_v9  ;;  %v394_v9 = vld [vmem:[%s20933_s1 + $0xad8] sm:$0xff]  ;;  %v953_v1 = vld [vmem:[%s20933_s1 + $0x1c50] sm:$0xff] }
 0x435   :  { %v13433_v25 = vcombine.low %v394_v9, %v398_v10 }
 0x436   :  { %11585 = vmatpush1.bf16.msra.mxu1 %v13369_v15  ;;  %v13935_v15 = vcombine.low %v897_v2, %v901_v4  ;;  %v957_v2 = vld [vmem:[%s20933_s1 + $0x1c70] sm:$0xff] }
 0x437   :  { %11198 = vmatpush1.bf16.msra.mxu0 %v13879_v16  ;;  %11586 = vmatprep.subr.bf16.mxu1 %v13378_v17  ;;  %v13434_v16 = vcombine.high %v394_v9, %v398_v10  ;;  %v13944_v17 = vcombine.high %v905_v12, %v909_v13  ;;  %v454_v9 = vld [vmem:[%s20933_s1 + $0xcb8] sm:$0xff]  ;;  %v15306_v10 = vld [vmem:[%s20934_s0 + $0x10] ss:$100 sps:$4 sm:$0xff]  }
 0x438   :  { %11199 = vmatprep.subr.bf16.mxu0 %v13888_v18  ;;  %v402_v18 = vld [vmem:[%s20933_s1 + $0xb18] sm:$0xff] }
 0x439   :  { %v13441_v36 = vcombine.low %v402_v18, %v406_v19 }
 0x43a   :  { %11587 = vmatpush1.bf16.msra.mxu1 %v13377_v28  ;;  %v13943_v28 = vcombine.low %v905_v12, %v909_v13  ;;  %v961_v12 = vld [vmem:[%s20933_s1 + $0x1c90] sm:$0xff] }
 0x43b   :  { %11200 = vmatpush1.bf16.msra.mxu0 %v13887_v30  ;;  %11588 = vmatprep.subr.bf16.mxu1 %v13386_v32  ;;  %v13442_v30 = vcombine.high %v402_v18, %v406_v19  ;;  %v13952_v32 = vcombine.high %v913_v23, %v917_v24  ;;  %v965_v13 = vld [vmem:[%s20933_s1 + $0x1cb0] sm:$0xff]  ;;  %v458_v19 = vld [vmem:[%s20933_s1 + $0xcd8] sm:$0xff] }
 0x43c   :  { %11201 = vmatprep.subr.bf16.mxu0 %v13896_v33  ;;  %v410_v33 = vld [vmem:[%s20933_s1 + $0xb58] sm:$0xff]  ;;  %v14000_v18 = vcombine.high %v961_v12, %v965_v13 }
 0x43d   :  { %v13449_v43 = vcombine.low %v410_v33, %v414_v22 }
 0x43e   :  { %11589 = vmatpush1.bf16.msra.mxu1 %v13385_v37  ;;  %v13951_v37 = vcombine.low %v913_v23, %v917_v24  ;;  %v462_v23 = vld [vmem:[%s20933_s1 + $0xcf8] sm:$0xff] }
 0x43f   :  { %11202 = vmatpush1.bf16.msra.mxu0 %v13895_v38  ;;  %11590 = vmatprep.subr.bf16.mxu1 %v13394_v39  ;;  %v13450_v38 = vcombine.high %v410_v33, %v414_v22  ;;  %v13960_v39 = vcombine.high %v921_v34, %v925_v35  ;;  %v15308_v24 = vld [vmem:[%s20934_s0 + $0x3c] ss:$100 sps:$4 sm:$0xff]   ;;  %v13999_v33 = vcombine.low %v961_v12, %v965_v13 }
 0x440   :  { %11203 = vmatprep.subr.bf16.mxu0 %v13904_v40  ;;  %v418_v40 = vld [vmem:[%s20933_s1 + $0xb98] sm:$0xff]  ;;  %v13498_v22 = vcombine.high %v458_v19, %v462_v23 }
 0x441   :  { %v13457_v20 = vcombine.low %v418_v40, %v422_v26 }
 0x442   :  { %11591 = vmatpush1.bf16.msra.mxu1 %v13393_v44  ;;  %v13959_v44 = vcombine.low %v921_v34, %v925_v35  ;;  %v466_v35 = vld [vmem:[%s20933_s1 + $0xd18] sm:$0xff] }
 0x443   :  { %11204 = vmatpush1.bf16.msra.mxu0 %v13903_v29  ;;  %11592 = vmatprep.subr.bf16.mxu1 %v13402_v31  ;;  %v13458_v29 = vcombine.high %v418_v40, %v422_v26  ;;  %v13968_v31 = vcombine.high %v929_v41, %v933_v42 }
 0x444   :  { %11205 = vmatprep.subr.bf16.mxu0 %v13912_v45  ;;  %v426_v45 = vld [vmem:[%s20933_s1 + $0xbd8] sm:$0xff] }
 0x445   :  { %v13465_v56 = vcombine.low %v426_v45, %v430_v46 }
 0x446   :  { %11593 = vmatpush1.bf16.msra.mxu1 %v13401_v48  ;;  %v13967_v48 = vcombine.low %v929_v41, %v933_v42  ;;  %v474_v42 = vld [vmem:[%s20933_s1 + $0xd58] sm:$0xff] }
 0x447   :  { %11206 = vmatpush1.bf16.msra.mxu0 %v13911_v49  ;;  %11594 = vmatprep.subr.bf16.mxu1 %v13410_v50  ;;  %v13466_v49 = vcombine.high %v426_v45, %v430_v46  ;;  %v13976_v50 = vcombine.high %v937_v47, %v941_v58  ;;  %v1663_v46 = vsub.s32 3, %v18192_v53 }
 0x448   :  { %11207 = vmatprep.subr.bf16.mxu0 %v13920_v51  ;;  %v434_v51 = vld [vmem:[%s20933_s1 + $0xc18] sm:$0xff] }
 0x449   :  { %v13473_v4 = vcombine.low %v434_v51, %v438_v52 }
 0x44a   :  { %11595 = vmatpush1.bf16.msra.mxu1 %v13409_v59  ;;  %v13975_v59 = vcombine.low %v937_v47, %v941_v58 }
 0x44b   :  { %11208 = vmatpush1.bf16.msra.mxu0 %v13919_v60  ;;  %11596 = vmatprep.subr.bf16.mxu1 %v13418_v61  ;;  %v13474_v60 = vcombine.high %v434_v51, %v438_v52  ;;  %v13984_v61 = vcombine.high %v945_v54, %v949_v55  ;;  %v993_v52 = vld [vmem:[%s20933_s1 + $0x1d90] sm:$0xff] }
 0x44c   :  { %11209 = vmatprep.subr.bf16.mxu0 %v13928_v63  ;;  %v442_v63 = vld [vmem:[%s20933_s1 + $0xc58] sm:$0xff] }
 0x44e   :  { %11597 = vmatpush1.bf16.msra.mxu1 %v13417_v5  ;;  %v13983_v5 = vcombine.low %v945_v54, %v949_v55  ;;  %v997_v54 = vld [vmem:[%s20933_s1 + $0x1db0] sm:$0xff] }
 0x44f   :  { %11210 = vmatpush1.bf16.msra.mxu0 %v13927_v6  ;;  %11598 = vmatprep.subr.bf16.mxu1 %v13426_v7  ;;  %v13482_v6 = vcombine.high %v442_v63, %v446_v0  ;;  %v13992_v7 = vcombine.high %v953_v1, %v957_v2  ;;  %v14031_v13 = vcombine.low %v993_v52, %v997_v54 }
 0x450   :  { %11211 = vmatprep.subr.bf16.mxu0 %v13936_v8  ;;  %v450_v8 = vld [vmem:[%s20933_s1 + $0xc98] sm:$0xff] }
 0x452   :  { %11599 = vmatpush1.bf16.msra.mxu1 %v13425_v14  ;;  %v15307_v14 = vld [vmem:[%s20934_s0 + $0x30] ss:$100 sps:$4 sm:$0xff]  }
 0x453   :  { %11212 = vmatpush1.bf16.msra.mxu0 %v13935_v15  ;;  %11600 = vmatprep.subr.bf16.mxu1 %v13434_v16  ;;  %v13481_v15 = vcombine.low %v442_v63, %v446_v0  ;;  %v13991_v16 = vcombine.low %v953_v1, %v957_v2  ;;  %v14032_v63 = vcombine.high %v993_v52, %v997_v54  ;;  %v490_v0 = vld [vmem:[%s20933_s1 + $0xdd8] sm:$0xff] }
 0x454   :  { %11213 = vmatprep.subr.bf16.mxu0 %v13944_v17  ;;  %v13490_v17 = vcombine.high %v450_v8, %v454_v9  ;;  %v494_v1 = vld [vmem:[%s20933_s1 + $0xdf8] sm:$0xff] }
 0x456   :  { %11601 = vmatpush1.bf16.msra.mxu1 %v13433_v25  ;;  %v969_v25 = vld [vmem:[%s20933_s1 + $0x1cd0] sm:$0xff] }
 0x457   :  { %11214 = vmatpush1.bf16.msra.mxu0 %v13943_v28  ;;  %11602 = vmatprep.subr.bf16.mxu1 %v13442_v30  ;;  %v973_v28 = vld [vmem:[%s20933_s1 + $0x1cf0] sm:$0xff]  ;;  %v15309_v30 = vld [vmem:[%s20934_s0 + $0x1c] ss:$100 sps:$4 sm:$0xff]  }
 0x458   :  { %11215 = vmatprep.subr.bf16.mxu0 %v13952_v32  ;;  %v13489_v32 = vcombine.low %v450_v8, %v454_v9  ;;  %v14008_v34 = vcombine.high %v969_v25, %v973_v28  ;;  %v14007_v40 = vcombine.low %v969_v25, %v973_v28  ;;  %v1013_v25 = vld [vmem:[%s20933_s1 + $0x1e30] sm:$0xff] }
 0x45a   :  { %11603 = vmatpush1.bf16.msra.mxu1 %v13441_v36  ;;  %v470_v36 = vld [vmem:[%s20933_s1 + $0xd38] sm:$0xff] }
 0x45b   :  { %11216 = vmatpush1.bf16.msra.mxu0 %v13951_v37  ;;  %11604 = vmatprep.subr.bf16.mxu1 %v13450_v38  ;;  %v977_v37 = vld [vmem:[%s20933_s1 + $0x1d10] sm:$0xff]  ;;  %v13506_v26 = vcombine.high %v466_v35, %v470_v36  ;;  %v13505_v45 = vcombine.low %v466_v35, %v470_v36 }
 0x45c   :  { %11217 = vmatprep.subr.bf16.mxu0 %v13960_v39  ;;  %v981_v38 = vld [vmem:[%s20933_s1 + $0x1d30] sm:$0xff]  ;;  %v13497_v39 = vcombine.low %v458_v19, %v462_v23 }
 0x45d   :  { %v14016_v41 = vcombine.high %v977_v37, %v981_v38  ;;  %v14015_v47 = vcombine.low %v977_v37, %v981_v38  ;;  %v506_v37 = vld [vmem:[%s20933_s1 + $0xe58] sm:$0xff] }
 0x45e   :  { %11605 = vmatpush1.bf16.msra.mxu1 %v13449_v43  ;;  %v478_v43 = vld [vmem:[%s20933_s1 + $0xd78] sm:$0xff] }
 0x45f   :  { %11218 = vmatpush1.bf16.msra.mxu0 %v13959_v44  ;;  %11606 = vmatprep.subr.bf16.mxu1 %v13458_v29  ;;  %v1659_v44 = vsub.s32 2, %v18192_v53  ;;  %v985_v29 = vld [vmem:[%s20933_s1 + $0x1d50] sm:$0xff]  ;;  %v13514_v58 = vcombine.high %v474_v42, %v478_v43  ;;  %v510_v38 = vld [vmem:[%s20933_s1 + $0xe78] sm:$0xff] }
 0x460   :  { %11219 = vmatprep.subr.bf16.mxu0 %v13968_v31  ;;  %v989_v31 = vld [vmem:[%s20933_s1 + $0x1d70] sm:$0xff] }
 0x462   :  { %11607 = vmatpush1.bf16.msra.mxu1 %v13457_v20  ;;  %v14024_v20 = vcombine.high %v985_v29, %v989_v31 }
 0x463   :  { %11220 = vmatpush1.bf16.msra.mxu0 %v13967_v48  ;;  %11608 = vmatprep.subr.bf16.mxu1 %v13466_v49  ;;  %v482_v48 = vld [vmem:[%s20933_s1 + $0xd98] sm:$0xff] }
 0x464   :  { %11221 = vmatprep.subr.bf16.mxu0 %v13976_v50  ;;  %v486_v49 = vld [vmem:[%s20933_s1 + $0xdb8] sm:$0xff]  ;;  %v15310_v50 = vld [vmem:[%s20935_s2] sm:$0xff] }
 0x465   :  { %v1660_v51 = vrot.slane %v15310_v50, %v1659_v44  ;;  %v1664_v55 = vrot.slane %v15310_v50, %v1663_v46  ;;  %v13521_v9 = vcombine.low %v482_v48, %v486_v49  ;;  %v514_v44 = vld [vmem:[%s20933_s1 + $0xe98] sm:$0xff]  ;;  %v13545_v46 = vcombine.low %v506_v37, %v510_v38  ;;  %v1033_v50 = vld [vmem:[%s20933_s1 + $0x1ed0] sm:$0xff] }
 0x466   :  { %11609 = vmatpush1.bf16.msra.mxu1 %v13465_v56  ;;  %v13513_v56 = vcombine.low %v474_v42, %v478_v43  ;;  %v13546_v42 = vcombine.high %v506_v37, %v510_v38  ;;  %v562_v38 = vld [vmem:[%s20933_s1 + $0x1018] sm:$0xff] }
 0x467   :  { %11222 = vmatpush1.bf16.msra.mxu0 %v13975_v59  ;;  %11621 = vmatprep.subr.bf16.mxu1 %v13474_v60  ;;  %v14023_v59 = vcombine.low %v985_v29, %v989_v31  ;;  %v13522_v60 = vcombine.high %v482_v48, %v486_v49  ;;  %v518_v29 = vld [vmem:[%s20933_s1 + $0xeb8] sm:$0xff]  ;;  %v1025_v31 = vld [vmem:[%s20933_s1 + $0x1e90] sm:$0xff] }
 0x468   :  { %11234 = vmatprep.subr.bf16.mxu0 %v13984_v61  ;;  %v522_v48 = vld [vmem:[%s20933_s1 + $0xed8] sm:$0xff]  ;;  %v13553_v52 = vcombine.low %v514_v44, %v518_v29 }
 0x469   :  { %11611 = vmatmul.mubr.bf16.vlgmr.msra.gmra.mrb[8].mxu1 %v15306_v10  ;;  %v526_v49 = vld [vmem:[%s20933_s1 + $0xef8] sm:$0xff] }
 0x46a   :  { %11224 = vmatmul.mubr.bf16.vlgmr.msra.gmra.mrb[4].mxu0 %v15307_v14  ;;  %11622 = vmatpush1.bf16.msra.mxu1 %v13473_v4  ;;  %v13530_v14 = vcombine.high %v490_v0, %v494_v1 }
 0x46b   :  { %11235 = vmatpush1.bf16.msra.mxu0 %v13983_v5  ;;  %11623 = vmatprep.subr.bf16.mxu1 %v13482_v6  ;;  %v1001_v5 = vld [vmem:[%s20933_s1 + $0x1dd0] sm:$0xff] }
 0x46c   :  { %11236 = vmatprep.subr.bf16.mxu0 %v13992_v7  ;;  %11266 = vmatprep.mubr.bf16.mxu0 %v15308_v24  ;;  %v1005_v6 = vld [vmem:[%s20933_s1 + $0x1df0] sm:$0xff] }
 0x46d   :  { %11653 = vmatprep.mubr.bf16.mxu1 %v15309_v30  ;;  %v1009_v24 = vld [vmem:[%s20933_s1 + $0x1e10] sm:$0xff] }
 0x46e   :  { %11624 = vmatpush1.bf16.msra.mxu1 %v13481_v15  ;;  %v14048_v36 = vcombine.high %v1009_v24, %v1013_v25 }
 0x46f   :  { %11237 = vmatpush1.bf16.msra.mxu0 %v13991_v16  ;;  %11625 = vmatprep.subr.bf16.mxu1 %v13490_v17  ;;  %v14040_v16 = vcombine.high %v1001_v5, %v1005_v6  ;;  %v498_v17 = vld [vmem:[%s20933_s1 + $0xe18] sm:$0xff] }
 0x470   :  { %11238 = vmatprep.subr.bf16.mxu0 %v14000_v18  ;;  %v502_v18 = vld [vmem:[%s20933_s1 + $0xe38] sm:$0xff] }
 0x472   :  { %11626 = vmatpush1.bf16.msra.mxu1 %v13489_v32  ;;  %v13529_v32 = vcombine.low %v490_v0, %v494_v1  ;;  %v13561_v0 = vcombine.low %v522_v48, %v526_v49 }
 0x473   :  { %11239 = vmatpush1.bf16.msra.mxu0 %v13999_v33  ;;  %11627 = vmatprep.subr.bf16.mxu1 %v13498_v22  ;;  %v14039_v22 = vcombine.low %v1001_v5, %v1005_v6  ;;  %v538_v5 = vld [vmem:[%s20933_s1 + $0xf58] sm:$0xff] }
 0x474   :  { %11240 = vmatprep.subr.bf16.mxu0 %v14008_v34  ;;  %v13538_v34 = vcombine.high %v498_v17, %v502_v18  ;;  %v542_v6 = vld [vmem:[%s20933_s1 + $0xf78] sm:$0xff] }
 0x476   :  { %11628 = vmatpush1.bf16.msra.mxu1 %v13497_v39  ;;  %v1017_v39 = vld [vmem:[%s20933_s1 + $0x1e50] sm:$0xff] }
 0x477   :  { %11241 = vmatpush1.bf16.msra.mxu0 %v14007_v40  ;;  %11629 = vmatprep.subr.bf16.mxu1 %v13506_v26  ;;  %v1021_v40 = vld [vmem:[%s20933_s1 + $0x1e70] sm:$0xff]  ;;  %v13537_v26 = vcombine.low %v498_v17, %v502_v18  ;;  %v13577_v18 = vcombine.low %v538_v5, %v542_v6 }
 0x478   :  { %11242 = vmatprep.subr.bf16.mxu0 %v14016_v41  ;;  %v14047_v41 = vcombine.low %v1009_v24, %v1013_v25  ;;  %v14056_v43 = vcombine.high %v1017_v39, %v1021_v40  ;;  %v1061_v17 = vld [vmem:[%s20933_s1 + $0x1fb0] sm:$0xff]  ;;  %v554_v25 = vld [vmem:[%s20933_s1 + $0xfd8] sm:$0xff] }
 0x47a   :  { %11630 = vmatpush1.bf16.msra.mxu1 %v13505_v45  ;;  %v1029_v45 = vld [vmem:[%s20933_s1 + $0x1eb0] sm:$0xff] }
 0x47b   :  { %11243 = vmatpush1.bf16.msra.mxu0 %v14015_v47  ;;  %11631 = vmatprep.subr.bf16.mxu1 %v13514_v58  ;;  %v14055_v47 = vcombine.low %v1017_v39, %v1021_v40  ;;  %v13554_v58 = vcombine.high %v514_v44, %v518_v29  ;;  %v14063_v54 = vcombine.low %v1025_v31, %v1029_v45  ;;  %v566_v39 = vld [vmem:[%s20933_s1 + $0x1038] sm:$0xff]  ;;  %v1073_v40 = vld [vmem:[%s20933_s1 + $0x2010] sm:$0xff] }
 0x47c   :  { %v10924_v61 = vpop.f32.mrb[4].mxu1  ;;  %11244 = vmatprep.subr.bf16.mxu0 %v14024_v20  ;;  %v14064_v20 = vcombine.high %v1025_v31, %v1029_v45  ;;  %v570_v29 = vld [vmem:[%s20933_s1 + $0x1058] sm:$0xff]  ;;  %v1081_v45 = vld [vmem:[%s20933_s1 + $0x2050] sm:$0xff] }
 0x47d   :  { %v14819_v2 = vadd.f32 %v10924_v61, %v1660_v51  ;;  %v10926_v4 = vpop.f32.mrb[5].mxu1  ;;  %v1041_v61 = vld [vmem:[%s20933_s1 + $0x1f10] sm:$0xff]  ;;  %v574_v31 = vld [vmem:[%s20933_s1 + $0x1078] sm:$0xff] }
 0x47e   :  { %v14820_v7 = vadd.f32 %v10926_v4, %v1664_v55  ;;  %v10928_v8 = vpop.f32.mrb[6].mxu1  ;;  %11632 = vmatpush1.bf16.msra.mxu1 %v13513_v56 }
 0x47f   :  { %v14821_v10 = vadd.f32 %v10928_v8, %v1660_v51  ;;  %11245 = vmatpush1.bf16.msra.mxu0 %v14023_v59  ;;  %v10930_v12 = vpop.f32.mrb[7].mxu1  ;;  %11633 = vmatprep.subr.bf16.mxu1 %v13522_v60  ;;  %v12053_v19 = vmax.f32 %v14819_v2, 0.0  ;;  %v1037_v51 = vld [vmem:[%s20933_s1 + $0x1ef0] sm:$0xff]  ;;  %v530_v59 = vld [vmem:[%s20933_s1 + $0xf18] sm:$0xff] }
 0x480   :  { %v14822_v15 = vadd.f32 %v10930_v12, %v1664_v55  ;;  %11246 = vmatprep.subr.bf16.mxu0 %v14032_v63  ;;  %v12054_v28 = vmax.f32 %v14820_v7, 0.0  ;;  %v13562_v55 = vcombine.high %v522_v48, %v526_v49  ;;  %v14072_v56 = vcombine.high %v1033_v50, %v1037_v51  ;;  %v534_v60 = vld [vmem:[%s20933_s1 + $0xf38] sm:$0xff]  ;;  %v1045_v63 = vld [vmem:[%s20933_s1 + $0x1f30] sm:$0xff] }
 0x481   :  { %v12061_v23 = vmax.f32 %v14821_v10, 0.0  ;;  %v14071_v1 = vcombine.low %v1033_v50, %v1037_v51  ;;  %v13570_v2 = vcombine.high %v530_v59, %v534_v60  ;;  %v14080_v4 = vcombine.high %v1041_v61, %v1045_v63  ;;  %v1049_v7 = vld [vmem:[%s20933_s1 + $0x1f50] sm:$0xff]  ;;  %v578_v49 = vld [vmem:[%s20933_s1 + $0x1098] sm:$0xff] }
 0x482   :  { %v12062_v30 = vmax.f32 %v14822_v15, 0.0  ;;  %11634 = vmatpush1.bf16.msra.mxu1 %v13521_v9  ;;  %v1053_v8 = vld [vmem:[%s20933_s1 + $0x1f70] sm:$0xff]  ;;  %v13569_v9 = vcombine.low %v530_v59, %v534_v60  ;;  %v14079_v10 = vcombine.low %v1041_v61, %v1045_v63  ;;  %v13578_v12 = vcombine.high %v538_v5, %v542_v6  ;;  %v550_v15 = vld [vmem:[%s20933_s1 + $0xfb8] sm:$0xff]  ;;  %v15314_v5 = vld [vmem:[%s20934_s0 + $0x24] ss:$100 sps:$4 sm:$0xff]  }
 0x483   :  { %v19096_v33 = vpack.c.bf16 %v12061_v23, %v12053_v19  ;;  %11247 = vmatpush1.bf16.msra.mxu0 %v14031_v13  ;;  %11635 = vmatprep.subr.bf16.mxu1 %v13530_v14  ;;  %v14088_v13 = vcombine.high %v1049_v7, %v1053_v8  ;;  %v546_v14 = vld [vmem:[%s20933_s1 + $0xf98] sm:$0xff]  ;;  %v14087_v19 = vcombine.low %v1049_v7, %v1053_v8 }
 0x484   :  { %v19098_v35 = vpack.c.bf16 %v12062_v30, %v12054_v28  ;;  %11248 = vmatprep.subr.bf16.mxu0 %v14040_v16  ;;  %v1057_v16 = vld [vmem:[%s20933_s1 + $0x1f90] sm:$0xff]  ;;  %v13586_v23 = vcombine.high %v546_v14, %v550_v15  ;;  %v558_v28 = vld [vmem:[%s20933_s1 + $0xff8] sm:$0xff] }
 0x485   :  { %v14096_v24 = vcombine.high %v1057_v16, %v1061_v17  ;;  %v1065_v30 = vld [vmem:[%s20933_s1 + $0x1fd0] sm:$0xff]  ;;  %v582_v50 = vld [vmem:[%s20933_s1 + $0x10b8] sm:$0xff] }
 0x486   :  { %11636 = vmatpush1.bf16.msra.mxu1 %v13529_v32  ;;  %v1069_v32 = vld [vmem:[%s20933_s1 + $0x1ff0] sm:$0xff]  ;;  %v15311_v51 = vld [vmem:[%s20934_s0 + $0x18] ss:$100 sps:$4 sm:$0xff]   ;;  %v13618_v60 = vcombine.high %v578_v49, %v582_v50  ;;  %v13617_v6 = vcombine.low %v578_v49, %v582_v50 }
 0x487   :  { %11249 = vmatpush1.bf16.msra.mxu0 %v14039_v22  ;;  %11637 = vmatprep.subr.bf16.mxu1 %v13538_v34  ;;  %v13585_v22 = vcombine.low %v546_v14, %v550_v15  ;;  %v14095_v34 = vcombine.low %v1057_v16, %v1061_v17  ;;  %v14104_v37 = vcombine.high %v1065_v30, %v1069_v32  ;;  %v586_v63 = vld [vmem:[%s20933_s1 + $0x10d8] sm:$0xff]  ;;  %v1109_v14 = vld [vmem:[%s20933_s1 + $0x2130] sm:$0xff] }
 0x488   :  { %11250 = vmatprep.subr.bf16.mxu0 %v14048_v36  ;;  %v13594_v36 = vcombine.high %v554_v25, %v558_v28  ;;  %v1141_v49 = vld [vmem:[%s20933_s1 + $0x2230] sm:$0xff] }
 0x48a   :  { %11638 = vmatpush1.bf16.msra.mxu1 %v13537_v26  ;;  %v1077_v26 = vld [vmem:[%s20933_s1 + $0x2030] sm:$0xff] }
 0x48b   :  { %11251 = vmatpush1.bf16.msra.mxu0 %v14047_v41  ;;  %11639 = vmatprep.subr.bf16.mxu1 %v13546_v42  ;;  %v13593_v41 = vcombine.low %v554_v25, %v558_v28  ;;  %v14103_v42 = vcombine.low %v1065_v30, %v1069_v32  ;;  %v14112_v44 = vcombine.high %v1073_v40, %v1077_v26  ;;  %v1117_v25 = vld [vmem:[%s20933_s1 + $0x2170] sm:$0xff] }
 0x48c   :  { %11252 = vmatprep.subr.bf16.mxu0 %v14056_v43  ;;  %v13602_v43 = vcombine.high %v562_v38, %v566_v39 }
 0x48e   :  { %11640 = vmatpush1.bf16.msra.mxu1 %v13545_v46  ;;  %v1085_v46 = vld [vmem:[%s20933_s1 + $0x2070] sm:$0xff] }
 0x48f   :  { %11253 = vmatpush1.bf16.msra.mxu0 %v14055_v47  ;;  %11641 = vmatprep.subr.bf16.mxu1 %v13554_v58  ;;  %v13601_v47 = vcombine.low %v562_v38, %v566_v39  ;;  %v14111_v58 = vcombine.low %v1073_v40, %v1077_v26  ;;  %v14120_v48 = vcombine.high %v1081_v45, %v1085_v46  ;;  %v1125_v38 = vld [vmem:[%s20933_s1 + $0x21b0] sm:$0xff] }
 0x490   :  { %11254 = vmatprep.subr.bf16.mxu0 %v14064_v20  ;;  %v13610_v20 = vcombine.high %v570_v29, %v574_v31  ;;  %v14119_v59 = vcombine.low %v1081_v45, %v1085_v46 }
 0x492   :  { %11642 = vmatpush1.bf16.msra.mxu1 %v13553_v52  ;;  %v1089_v52 = vld [vmem:[%s20933_s1 + $0x2090] sm:$0xff] }
 0x493   :  { %11255 = vmatpush1.bf16.msra.mxu0 %v14063_v54  ;;  %11643 = vmatprep.subr.bf16.mxu1 %v13562_v55  ;;  %v1093_v54 = vld [vmem:[%s20933_s1 + $0x20b0] sm:$0xff]  ;;  %v15312_v55 = vld [vmem:[%s20934_s0 + $0x38] ss:$100 sps:$4 sm:$0xff]  }
 0x494   :  { %11256 = vmatprep.subr.bf16.mxu0 %v14072_v56  ;;  %v13609_v56 = vcombine.low %v570_v29, %v574_v31  ;;  %v14128_v61 = vcombine.high %v1089_v52, %v1093_v54  ;;  %v14127_v7 = vcombine.low %v1089_v52, %v1093_v54  ;;  %v1133_v29 = vld [vmem:[%s20933_s1 + $0x21f0] sm:$0xff] }
 0x496   :  { %11644 = vmatpush1.bf16.msra.mxu1 %v13561_v0  ;;  %v590_v0 = vld [vmem:[%s20933_s1 + $0x10f8] sm:$0xff] }
 0x497   :  { %11257 = vmatpush1.bf16.msra.mxu0 %v14071_v1  ;;  %11645 = vmatprep.subr.bf16.mxu1 %v13570_v2  ;;  %v15313_v1 = vld [vmem:[%s20934_s0 + $0x44] ss:$100 sps:$4 sm:$0xff]   ;;  %v1097_v2 = vld [vmem:[%s20933_s1 + $0x20d0] sm:$0xff]  ;;  %v13626_v8 = vcombine.high %v586_v63, %v590_v0  ;;  %v13625_v15 = vcombine.low %v586_v63, %v590_v0 }
 0x498   :  { %11258 = vmatprep.subr.bf16.mxu0 %v14080_v4  ;;  %v1101_v4 = vld [vmem:[%s20933_s1 + $0x20f0] sm:$0xff] }
 0x499   :  { %v14135_v16 = vcombine.low %v1097_v2, %v1101_v4 }
 0x49a   :  { %11646 = vmatpush1.bf16.msra.mxu1 %v13569_v9  ;;  %v14136_v9 = vcombine.high %v1097_v2, %v1101_v4  ;;  %v642_v2 = vld [vmem:[%s20933_s1 + $0x1298] sm:$0xff] }
 0x49b   :  { %11259 = vmatpush1.bf16.msra.mxu0 %v14079_v10  ;;  %11647 = vmatprep.subr.bf16.mxu1 %v13578_v12  ;;  %v594_v10 = vld [vmem:[%s20933_s1 + $0x1118] sm:$0xff] }
 0x49c   :  { %11260 = vmatprep.subr.bf16.mxu0 %v14088_v13  ;;  %v598_v12 = vld [vmem:[%s20933_s1 + $0x1138] sm:$0xff]  ;;  %v1105_v13 = vld [vmem:[%s20933_s1 + $0x2110] sm:$0xff] }
 0x49d   :  { %v13634_v17 = vcombine.high %v594_v10, %v598_v12  ;;  %v13633_v28 = vcombine.low %v594_v10, %v598_v12  ;;  %v14143_v30 = vcombine.low %v1105_v13, %v1109_v14  ;;  %v646_v4 = vld [vmem:[%s20933_s1 + $0x12b8] sm:$0xff] }
 0x49e   :  { %11648 = vmatpush1.bf16.msra.mxu1 %v13577_v18  ;;  %v14144_v18 = vcombine.high %v1105_v13, %v1109_v14  ;;  %v650_v12 = vld [vmem:[%s20933_s1 + $0x12d8] sm:$0xff]  ;;  %v1161_v14 = vld [vmem:[%s20933_s1 + $0x22d0] sm:$0xff] }
 0x49f   :  { %11261 = vmatpush1.bf16.msra.mxu0 %v14087_v19  ;;  %11649 = vmatprep.subr.bf16.mxu1 %v13586_v23  ;;  %v602_v19 = vld [vmem:[%s20933_s1 + $0x1158] sm:$0xff] }
 0x4a0   :  { %11262 = vmatprep.subr.bf16.mxu0 %v14096_v24  ;;  %v606_v23 = vld [vmem:[%s20933_s1 + $0x1178] sm:$0xff]  ;;  %v1113_v24 = vld [vmem:[%s20933_s1 + $0x2150] sm:$0xff] }
 0x4a1   :  { %v13642_v32 = vcombine.high %v602_v19, %v606_v23  ;;  %v13641_v39 = vcombine.low %v602_v19, %v606_v23  ;;  %v14151_v40 = vcombine.low %v1113_v24, %v1117_v25  ;;  %v654_v13 = vld [vmem:[%s20933_s1 + $0x12f8] sm:$0xff] }
 0x4a2   :  { %11650 = vmatpush1.bf16.msra.mxu1 %v13585_v22  ;;  %v14152_v22 = vcombine.high %v1113_v24, %v1117_v25  ;;  %v658_v23 = vld [vmem:[%s20933_s1 + $0x1318] sm:$0xff]  ;;  %v1169_v25 = vld [vmem:[%s20933_s1 + $0x2310] sm:$0xff] }
 0x4a3   :  { %11263 = vmatpush1.bf16.msra.mxu0 %v14095_v34  ;;  %11651 = vmatprep.subr.bf16.mxu1 %v13594_v36  ;;  %v610_v34 = vld [vmem:[%s20933_s1 + $0x1198] sm:$0xff] }
 0x4a4   :  { %11264 = vmatprep.subr.bf16.mxu0 %v14104_v37  ;;  %v614_v36 = vld [vmem:[%s20933_s1 + $0x11b8] sm:$0xff]  ;;  %v1121_v37 = vld [vmem:[%s20933_s1 + $0x2190] sm:$0xff] }
 0x4a5   :  { %v13650_v26 = vcombine.high %v610_v34, %v614_v36  ;;  %v13649_v31 = vcombine.low %v610_v34, %v614_v36  ;;  %v14159_v45 = vcombine.low %v1121_v37, %v1125_v38  ;;  %v662_v24 = vld [vmem:[%s20933_s1 + $0x1338] sm:$0xff] }
 0x4a6   :  { %11652 = vmatpush1.bf16.msra.mxu1 %v13593_v41  ;;  %v14160_v41 = vcombine.high %v1121_v37, %v1125_v38  ;;  %v666_v36 = vld [vmem:[%s20933_s1 + $0x1358] sm:$0xff]  ;;  %v1177_v38 = vld [vmem:[%s20933_s1 + $0x2350] sm:$0xff] }
 0x4a7   :  { %11265 = vmatpush1.bf16.msra.mxu0 %v14103_v42  ;;  %11664 = vmatprep.subr.bf16.mxu1 %v13602_v43  ;;  %v618_v42 = vld [vmem:[%s20933_s1 + $0x11d8] sm:$0xff] }
 0x4a8   :  { %11277 = vmatprep.subr.bf16.mxu0 %v14112_v44  ;;  %v622_v43 = vld [vmem:[%s20933_s1 + $0x11f8] sm:$0xff]  ;;  %v1129_v44 = vld [vmem:[%s20933_s1 + $0x21d0] sm:$0xff] }
 0x4a9   :  { %11654 = vmatmul.mubr.bf16.vlgmr.msra.gmra.mrb[8].mxu1 %v15311_v51  ;;  %v13658_v46 = vcombine.high %v618_v42, %v622_v43  ;;  %v13657_v50 = vcombine.low %v618_v42, %v622_v43  ;;  %v14167_v51 = vcombine.low %v1129_v44, %v1133_v29  ;;  %v670_v37 = vld [vmem:[%s20933_s1 + $0x1378] sm:$0xff] }
 0x4aa   :  { %11267 = vmatmul.mubr.bf16.vlgmr.msra.gmra.mrb[4].mxu0 %v15312_v55  ;;  %11665 = vmatpush1.bf16.msra.mxu1 %v13601_v47  ;;  %v14168_v47 = vcombine.high %v1129_v44, %v1133_v29  ;;  %v634_v55 = vld [vmem:[%s20933_s1 + $0x1258] sm:$0xff]  ;;  %v1185_v29 = vld [vmem:[%s20933_s1 + $0x2390] sm:$0xff] }
 0x4ab   :  { %11278 = vmatpush1.bf16.msra.mxu0 %v14111_v58  ;;  %11666 = vmatprep.subr.bf16.mxu1 %v13610_v20  ;;  %v626_v58 = vld [vmem:[%s20933_s1 + $0x1218] sm:$0xff] }
 0x4ac   :  { %11279 = vmatprep.subr.bf16.mxu0 %v14120_v48  ;;  %11309 = vmatprep.mubr.bf16.mxu0 %v15313_v1  ;;  %v630_v20 = vld [vmem:[%s20933_s1 + $0x1238] sm:$0xff]  ;;  %v1137_v48 = vld [vmem:[%s20933_s1 + $0x2210] sm:$0xff] }
 0x4ad   :  { %11696 = vmatprep.mubr.bf16.mxu1 %v15314_v5  ;;  %v13666_v52 = vcombine.high %v626_v58, %v630_v20  ;;  %v14176_v54 = vcombine.high %v1137_v48, %v1141_v49  ;;  %v14175_v63 = vcombine.low %v1137_v48, %v1141_v49  ;;  %v1153_v5 = vld [vmem:[%s20933_s1 + $0x2290] sm:$0xff]  ;;  %v674_v43 = vld [vmem:[%s20933_s1 + $0x1398] sm:$0xff] }
 0x4ae   :  { %11667 = vmatpush1.bf16.msra.mxu1 %v13609_v56  ;;  %v638_v56 = vld [vmem:[%s20933_s1 + $0x1278] sm:$0xff]  ;;  %v1193_v49 = vld [vmem:[%s20933_s1 + $0x23d0] sm:$0xff] }
 0x4af   :  { %11280 = vmatpush1.bf16.msra.mxu0 %v14119_v59  ;;  %11668 = vmatprep.subr.bf16.mxu1 %v13618_v60  ;;  %v1145_v59 = vld [vmem:[%s20933_s1 + $0x2250] sm:$0xff]  ;;  %v13674_v0 = vcombine.high %v634_v55, %v638_v56  ;;  %v678_v44 = vld [vmem:[%s20933_s1 + $0x13b8] sm:$0xff] }
 0x4b0   :  { %11281 = vmatprep.subr.bf16.mxu0 %v14128_v61  ;;  %v1149_v60 = vld [vmem:[%s20933_s1 + $0x2270] sm:$0xff]  ;;  %v13665_v61 = vcombine.low %v626_v58, %v630_v20  ;;  %v682_v20 = vld [vmem:[%s20933_s1 + $0x13d8] sm:$0xff] }
 0x4b1   :  { %v14184_v1 = vcombine.high %v1145_v59, %v1149_v60  ;;  %v686_v48 = vld [vmem:[%s20933_s1 + $0x13f8] sm:$0xff] }
 0x4b2   :  { %11669 = vmatpush1.bf16.msra.mxu1 %v13617_v6  ;;  %v1157_v6 = vld [vmem:[%s20933_s1 + $0x22b0] sm:$0xff] }
 0x4b3   :  { %11282 = vmatpush1.bf16.msra.mxu0 %v14127_v7  ;;  %11670 = vmatprep.subr.bf16.mxu1 %v13626_v8  ;;  %v13673_v7 = vcombine.low %v634_v55, %v638_v56  ;;  %v14183_v8 = vcombine.low %v1145_v59, %v1149_v60  ;;  %v14192_v10 = vcombine.high %v1153_v5, %v1157_v6  ;;  %v690_v56 = vld [vmem:[%s20933_s1 + $0x1418] sm:$0xff]  ;;  %v1201_v60 = vld [vmem:[%s20933_s1 + $0x2410] sm:$0xff] }
 0x4b4   :  { %11283 = vmatprep.subr.bf16.mxu0 %v14136_v9  ;;  %v13682_v9 = vcombine.high %v642_v2, %v646_v4  ;;  %v694_v59 = vld [vmem:[%s20933_s1 + $0x1438] sm:$0xff] }
 0x4b6   :  { %11671 = vmatpush1.bf16.msra.mxu1 %v13625_v15  ;;  %v1165_v15 = vld [vmem:[%s20933_s1 + $0x22f0] sm:$0xff] }
 0x4b7   :  { %11284 = vmatpush1.bf16.msra.mxu0 %v14135_v16  ;;  %11672 = vmatprep.subr.bf16.mxu1 %v13634_v17  ;;  %v13681_v16 = vcombine.low %v642_v2, %v646_v4  ;;  %v14191_v17 = vcombine.low %v1153_v5, %v1157_v6  ;;  %v14200_v19 = vcombine.high %v1161_v14, %v1165_v15  ;;  %v698_v4 = vld [vmem:[%s20933_s1 + $0x1458] sm:$0xff]  ;;  %v1209_v6 = vld [vmem:[%s20933_s1 + $0x2450] sm:$0xff] }
 0x4b8   :  { %11285 = vmatprep.subr.bf16.mxu0 %v14144_v18  ;;  %v13690_v18 = vcombine.high %v650_v12, %v654_v13  ;;  %v702_v5 = vld [vmem:[%s20933_s1 + $0x1478] sm:$0xff] }
 0x4ba   :  { %11673 = vmatpush1.bf16.msra.mxu1 %v13633_v28  ;;  %v1173_v28 = vld [vmem:[%s20933_s1 + $0x2330] sm:$0xff] }
 0x4bb   :  { %11286 = vmatpush1.bf16.msra.mxu0 %v14143_v30  ;;  %11674 = vmatprep.subr.bf16.mxu1 %v13642_v32  ;;  %v13689_v30 = vcombine.low %v650_v12, %v654_v13  ;;  %v14199_v32 = vcombine.low %v1161_v14, %v1165_v15  ;;  %v14208_v34 = vcombine.high %v1169_v25, %v1173_v28  ;;  %v706_v13 = vld [vmem:[%s20933_s1 + $0x1498] sm:$0xff]  ;;  %v15315_v15 = vld [vmem:[%s20934_s0 + $0x20] ss:$100 sps:$4 sm:$0xff]  }
 0x4bc   :  { %11287 = vmatprep.subr.bf16.mxu0 %v14152_v22  ;;  %v13698_v22 = vcombine.high %v658_v23, %v662_v24  ;;  %v710_v14 = vld [vmem:[%s20933_s1 + $0x14b8] sm:$0xff] }
 0x4be   :  { %11675 = vmatpush1.bf16.msra.mxu1 %v13641_v39  ;;  %v1181_v39 = vld [vmem:[%s20933_s1 + $0x2370] sm:$0xff] }
 0x4bf   :  { %11288 = vmatpush1.bf16.msra.mxu0 %v14151_v40  ;;  %11676 = vmatprep.subr.bf16.mxu1 %v13650_v26  ;;  %v13697_v40 = vcombine.low %v658_v23, %v662_v24  ;;  %v14207_v26 = vcombine.low %v1169_v25, %v1173_v28  ;;  %v14216_v42 = vcombine.high %v1177_v38, %v1181_v39  ;;  %v714_v28 = vld [vmem:[%s20933_s1 + $0x14d8] sm:$0xff] }
 0x4c0   :  { %11289 = vmatprep.subr.bf16.mxu0 %v14160_v41  ;;  %v13706_v41 = vcombine.high %v666_v36, %v670_v37  ;;  %v13746_v24 = vcombine.high %v706_v13, %v710_v14 }
 0x4c2   :  { %11677 = vmatpush1.bf16.msra.mxu1 %v13649_v31  ;;  %v1189_v31 = vld [vmem:[%s20933_s1 + $0x23b0] sm:$0xff] }
 0x4c3   :  { %11290 = vmatpush1.bf16.msra.mxu0 %v14159_v45  ;;  %11678 = vmatprep.subr.bf16.mxu1 %v13658_v46  ;;  %v13705_v45 = vcombine.low %v666_v36, %v670_v37  ;;  %v14215_v46 = vcombine.low %v1177_v38, %v1181_v39  ;;  %v14224_v58 = vcombine.high %v1185_v29, %v1189_v31  ;;  %v15318_v36 = vld [vmem:[%s20934_s0 + $0x2c] ss:$100 sps:$4 sm:$0xff]  }
 0x4c4   :  { %11291 = vmatprep.subr.bf16.mxu0 %v14168_v47  ;;  %v13714_v47 = vcombine.high %v674_v43, %v678_v44  ;;  %v13745_v37 = vcombine.low %v706_v13, %v710_v14  ;;  %v1269_v13 = vld [vmem:[%s20933_s1 + $0x2630] sm:$0xff] }
 0x4c6   :  { %11679 = vmatpush1.bf16.msra.mxu1 %v13657_v50  ;;  %v1197_v50 = vld [vmem:[%s20933_s1 + $0x23f0] sm:$0xff] }
 0x4c7   :  { %11292 = vmatpush1.bf16.msra.mxu0 %v14167_v51  ;;  %11680 = vmatprep.subr.bf16.mxu1 %v13666_v52  ;;  %v13713_v51 = vcombine.low %v674_v43, %v678_v44  ;;  %v14223_v52 = vcombine.low %v1185_v29, %v1189_v31  ;;  %v14232_v55 = vcombine.high %v1193_v49, %v1197_v50  ;;  %v1237_v43 = vld [vmem:[%s20933_s1 + $0x2530] sm:$0xff] }
 0x4c8   :  { %11293 = vmatprep.subr.bf16.mxu0 %v14176_v54  ;;  %v13722_v54 = vcombine.high %v682_v20, %v686_v48 }
 0x4ca   :  { %11681 = vmatpush1.bf16.msra.mxu1 %v13665_v61  ;;  %v1205_v61 = vld [vmem:[%s20933_s1 + $0x2430] sm:$0xff] }
 0x4cb   :  { %11294 = vmatpush1.bf16.msra.mxu0 %v14175_v63  ;;  %11682 = vmatprep.subr.bf16.mxu1 %v13674_v0  ;;  %v13721_v63 = vcombine.low %v682_v20, %v686_v48  ;;  %v14231_v0 = vcombine.low %v1193_v49, %v1197_v50  ;;  %v14240_v2 = vcombine.high %v1201_v60, %v1205_v61  ;;  %v1245_v20 = vld [vmem:[%s20933_s1 + $0x2570] sm:$0xff] }
 0x4cc   :  { %11295 = vmatprep.subr.bf16.mxu0 %v14184_v1  ;;  %v13730_v1 = vcombine.high %v690_v56, %v694_v59 }
 0x4ce   :  { %11683 = vmatpush1.bf16.msra.mxu1 %v13673_v7  ;;  %v1213_v7 = vld [vmem:[%s20933_s1 + $0x2470] sm:$0xff] }
 0x4cf   :  { %11296 = vmatpush1.bf16.msra.mxu0 %v14183_v8  ;;  %11684 = vmatprep.subr.bf16.mxu1 %v13682_v9  ;;  %v13729_v8 = vcombine.low %v690_v56, %v694_v59  ;;  %v14239_v9 = vcombine.low %v1201_v60, %v1205_v61  ;;  %v14248_v12 = vcombine.high %v1209_v6, %v1213_v7  ;;  %v1253_v56 = vld [vmem:[%s20933_s1 + $0x25b0] sm:$0xff] }
 0x4d0   :  { %11297 = vmatprep.subr.bf16.mxu0 %v14192_v10  ;;  %v13738_v10 = vcombine.high %v698_v4, %v702_v5  ;;  %v14247_v23 = vcombine.low %v1209_v6, %v1213_v7 }
 0x4d2   :  { %11685 = vmatpush1.bf16.msra.mxu1 %v13681_v16  ;;  %v1217_v16 = vld [vmem:[%s20933_s1 + $0x2490] sm:$0xff] }
 0x4d3   :  { %11298 = vmatpush1.bf16.msra.mxu0 %v14191_v17  ;;  %11686 = vmatprep.subr.bf16.mxu1 %v13690_v18  ;;  %v1221_v17 = vld [vmem:[%s20933_s1 + $0x24b0] sm:$0xff]  ;;  %v15316_v18 = vld [vmem:[%s20934_s0 + $0x40] ss:$100 sps:$4 sm:$0xff]  }
 0x4d4   :  { %11299 = vmatprep.subr.bf16.mxu0 %v14200_v19  ;;  %v13737_v19 = vcombine.low %v698_v4, %v702_v5  ;;  %v14256_v25 = vcombine.high %v1217_v16, %v1221_v17  ;;  %v14255_v38 = vcombine.low %v1217_v16, %v1221_v17  ;;  %v1261_v4 = vld [vmem:[%s20933_s1 + $0x25f0] sm:$0xff] }
 0x4d6   :  { %11687 = vmatpush1.bf16.msra.mxu1 %v13689_v30  ;;  %v718_v30 = vld [vmem:[%s20933_s1 + $0x14f8] sm:$0xff] }
 0x4d7   :  { %11300 = vmatpush1.bf16.msra.mxu0 %v14199_v32  ;;  %11688 = vmatprep.subr.bf16.mxu1 %v13698_v22  ;;  %v15317_v32 = vld [vmem:[%s20934_s0 + $0x4c] ss:$100 sps:$4 sm:$0xff]   ;;  %v13754_v39 = vcombine.high %v714_v28, %v718_v30  ;;  %v13753_v44 = vcombine.low %v714_v28, %v718_v30 }
 0x4d8   :  { %11301 = vmatprep.subr.bf16.mxu0 %v14208_v34  ;;  %v1225_v22 = vld [vmem:[%s20933_s1 + $0x24d0] sm:$0xff] }
 0x4d9   :  { %v1229_v34 = vld [vmem:[%s20933_s1 + $0x24f0] sm:$0xff] }
 0x4da   :  { %11689 = vmatpush1.bf16.msra.mxu1 %v13697_v40  ;;  %v14264_v40 = vcombine.high %v1225_v22, %v1229_v34  ;;  %v14263_v29 = vcombine.low %v1225_v22, %v1229_v34  ;;  %v770_v22 = vld [vmem:[%s20933_s1 + $0x1698] sm:$0xff] }
 0x4db   :  { %11302 = vmatpush1.bf16.msra.mxu0 %v14207_v26  ;;  %11690 = vmatprep.subr.bf16.mxu1 %v13706_v41  ;;  %v722_v26 = vld [vmem:[%s20933_s1 + $0x1518] sm:$0xff] }
 0x4dc   :  { %11303 = vmatprep.subr.bf16.mxu0 %v14216_v42  ;;  %v726_v41 = vld [vmem:[%s20933_s1 + $0x1538] sm:$0xff]  ;;  %v1233_v42 = vld [vmem:[%s20933_s1 + $0x2510] sm:$0xff] }
 0x4dd   :  { %v13762_v31 = vcombine.high %v722_v26, %v726_v41  ;;  %v13761_v48 = vcombine.low %v722_v26, %v726_v41  ;;  %v14271_v49 = vcombine.low %v1233_v42, %v1237_v43  ;;  %v774_v34 = vld [vmem:[%s20933_s1 + $0x16b8] sm:$0xff] }
 0x4de   :  { %11691 = vmatpush1.bf16.msra.mxu1 %v13705_v45  ;;  %v14272_v45 = vcombine.high %v1233_v42, %v1237_v43  ;;  %v778_v41 = vld [vmem:[%s20933_s1 + $0x16d8] sm:$0xff]  ;;  %v1289_v43 = vld [vmem:[%s20933_s1 + $0x26d0] sm:$0xff] }
 0x4df   :  { %11304 = vmatpush1.bf16.msra.mxu0 %v14215_v46  ;;  %11692 = vmatprep.subr.bf16.mxu1 %v13714_v47  ;;  %v730_v46 = vld [vmem:[%s20933_s1 + $0x1558] sm:$0xff] }
 0x4e0   :  { %11305 = vmatprep.subr.bf16.mxu0 %v14224_v58  ;;  %v734_v47 = vld [vmem:[%s20933_s1 + $0x1578] sm:$0xff]  ;;  %v1241_v58 = vld [vmem:[%s20933_s1 + $0x2550] sm:$0xff] }
 0x4e1   :  { %v13770_v50 = vcombine.high %v730_v46, %v734_v47  ;;  %v13769_v59 = vcombine.low %v730_v46, %v734_v47  ;;  %v14279_v60 = vcombine.low %v1241_v58, %v1245_v20  ;;  %v782_v42 = vld [vmem:[%s20933_s1 + $0x16f8] sm:$0xff] }
 0x4e2   :  { %11693 = vmatpush1.bf16.msra.mxu1 %v13713_v51  ;;  %v14280_v51 = vcombine.high %v1241_v58, %v1245_v20  ;;  %v786_v47 = vld [vmem:[%s20933_s1 + $0x1718] sm:$0xff]  ;;  %v1297_v20 = vld [vmem:[%s20933_s1 + $0x2710] sm:$0xff] }
 0x4e3   :  { %11306 = vmatpush1.bf16.msra.mxu0 %v14223_v52  ;;  %11694 = vmatprep.subr.bf16.mxu1 %v13722_v54  ;;  %v738_v52 = vld [vmem:[%s20933_s1 + $0x1598] sm:$0xff] }
 0x4e4   :  { %11307 = vmatprep.subr.bf16.mxu0 %v14232_v55  ;;  %v742_v54 = vld [vmem:[%s20933_s1 + $0x15b8] sm:$0xff]  ;;  %v1249_v55 = vld [vmem:[%s20933_s1 + $0x2590] sm:$0xff] }
 0x4e5   :  { %v13778_v61 = vcombine.high %v738_v52, %v742_v54  ;;  %v13777_v5 = vcombine.low %v738_v52, %v742_v54  ;;  %v14287_v6 = vcombine.low %v1249_v55, %v1253_v56  ;;  %v790_v58 = vld [vmem:[%s20933_s1 + $0x1738] sm:$0xff] }
 0x4e6   :  { %11695 = vmatpush1.bf16.msra.mxu1 %v13721_v63  ;;  %v14288_v63 = vcombine.high %v1249_v55, %v1253_v56  ;;  %v794_v54 = vld [vmem:[%s20933_s1 + $0x1758] sm:$0xff]  ;;  %v1305_v56 = vld [vmem:[%s20933_s1 + $0x2750] sm:$0xff] }
 0x4e7   :  { %11308 = vmatpush1.bf16.msra.mxu0 %v14231_v0  ;;  %11707 = vmatprep.subr.bf16.mxu1 %v13730_v1  ;;  %v746_v0 = vld [vmem:[%s20933_s1 + $0x15d8] sm:$0xff] }
 0x4e8   :  { %11320 = vmatprep.subr.bf16.mxu0 %v14240_v2  ;;  %v750_v1 = vld [vmem:[%s20933_s1 + $0x15f8] sm:$0xff]  ;;  %v1257_v2 = vld [vmem:[%s20933_s1 + $0x25d0] sm:$0xff] }
 0x4e9   :  { %11697 = vmatmul.mubr.bf16.vlgmr.msra.gmra.mrb[8].mxu1 %v15315_v15  ;;  %v13786_v7 = vcombine.high %v746_v0, %v750_v1  ;;  %v13785_v14 = vcombine.low %v746_v0, %v750_v1  ;;  %v14295_v15 = vcombine.low %v1257_v2, %v1261_v4  ;;  %v798_v55 = vld [vmem:[%s20933_s1 + $0x1778] sm:$0xff] }
 0x4ea   :  { %11310 = vmatmul.mubr.bf16.vlgmr.msra.gmra.mrb[4].mxu0 %v15316_v18  ;;  %11708 = vmatpush1.bf16.msra.mxu1 %v13729_v8  ;;  %v14296_v8 = vcombine.high %v1257_v2, %v1261_v4  ;;  %v762_v18 = vld [vmem:[%s20933_s1 + $0x1658] sm:$0xff]  ;;  %v1313_v4 = vld [vmem:[%s20933_s1 + $0x2790] sm:$0xff] }
 0x4eb   :  { %11321 = vmatpush1.bf16.msra.mxu0 %v14239_v9  ;;  %11709 = vmatprep.subr.bf16.mxu1 %v13738_v10  ;;  %v754_v9 = vld [vmem:[%s20933_s1 + $0x1618] sm:$0xff] }
 0x4ec   :  { %11322 = vmatprep.subr.bf16.mxu0 %v14248_v12  ;;  %11352 = vmatprep.mubr.bf16.mxu0 %v15317_v32  ;;  %v758_v10 = vld [vmem:[%s20933_s1 + $0x1638] sm:$0xff]  ;;  %v1265_v12 = vld [vmem:[%s20933_s1 + $0x2610] sm:$0xff] }
 0x4ed   :  { %11739 = vmatprep.mubr.bf16.mxu1 %v15318_v36  ;;  %v13794_v16 = vcombine.high %v754_v9, %v758_v10  ;;  %v14304_v17 = vcombine.high %v1265_v12, %v1269_v13  ;;  %v14303_v28 = vcombine.low %v1265_v12, %v1269_v13  ;;  %v1281_v36 = vld [vmem:[%s20933_s1 + $0x2690] sm:$0xff]  ;;  %v802_v1 = vld [vmem:[%s20933_s1 + $0x1798] sm:$0xff] }
 0x4ee   :  { %11710 = vmatpush1.bf16.msra.mxu1 %v13737_v19  ;;  %v766_v19 = vld [vmem:[%s20933_s1 + $0x1678] sm:$0xff]  ;;  %v1321_v13 = vld [vmem:[%s20933_s1 + $0x27d0] sm:$0xff] }
 0x4ef   :  { %11323 = vmatpush1.bf16.msra.mxu0 %v14247_v23  ;;  %11711 = vmatprep.subr.bf16.mxu1 %v13746_v24  ;;  %v1273_v23 = vld [vmem:[%s20933_s1 + $0x2650] sm:$0xff]  ;;  %v13802_v30 = vcombine.high %v762_v18, %v766_v19  ;;  %v806_v2 = vld [vmem:[%s20933_s1 + $0x17b8] sm:$0xff] }
 0x4f0   :  { %11324 = vmatprep.subr.bf16.mxu0 %v14256_v25  ;;  %v1277_v24 = vld [vmem:[%s20933_s1 + $0x2670] sm:$0xff]  ;;  %v13793_v25 = vcombine.low %v754_v9, %v758_v10  ;;  %v810_v10 = vld [vmem:[%s20933_s1 + $0x17d8] sm:$0xff] }
 0x4f1   :  { %v14312_v32 = vcombine.high %v1273_v23, %v1277_v24  ;;  %v814_v12 = vld [vmem:[%s20933_s1 + $0x17f8] sm:$0xff] }
 0x4f2   :  { %11712 = vmatpush1.bf16.msra.mxu1 %v13745_v37  ;;  %v1285_v37 = vld [vmem:[%s20933_s1 + $0x26b0] sm:$0xff] }
 0x4f3   :  { %11325 = vmatpush1.bf16.msra.mxu0 %v14255_v38  ;;  %11713 = vmatprep.subr.bf16.mxu1 %v13754_v39  ;;  %v13801_v38 = vcombine.low %v762_v18, %v766_v19  ;;  %v14311_v39 = vcombine.low %v1273_v23, %v1277_v24  ;;  %v14320_v26 = vcombine.high %v1281_v36, %v1285_v37  ;;  %v818_v19 = vld [vmem:[%s20933_s1 + $0x1818] sm:$0xff]  ;;  %v1329_v24 = vld [vmem:[%s20933_s1 + $0x2810] sm:$0xff] }
 0x4f4   :  { %11326 = vmatprep.subr.bf16.mxu0 %v14264_v40  ;;  %v13810_v40 = vcombine.high %v770_v22, %v774_v34  ;;  %v822_v23 = vld [vmem:[%s20933_s1 + $0x1838] sm:$0xff] }
 0x4f6   :  { %11714 = vmatpush1.bf16.msra.mxu1 %v13753_v44  ;;  %v1293_v44 = vld [vmem:[%s20933_s1 + $0x26f0] sm:$0xff] }
 0x4f7   :  { %11327 = vmatpush1.bf16.msra.mxu0 %v14263_v29  ;;  %11715 = vmatprep.subr.bf16.mxu1 %v13762_v31  ;;  %v13809_v29 = vcombine.low %v770_v22, %v774_v34  ;;  %v14319_v31 = vcombine.low %v1281_v36, %v1285_v37  ;;  %v14328_v46 = vcombine.high %v1289_v43, %v1293_v44  ;;  %v826_v34 = vld [vmem:[%s20933_s1 + $0x1858] sm:$0xff]  ;;  %v1337_v37 = vld [vmem:[%s20933_s1 + $0x2850] sm:$0xff] }
 0x4f8   :  { %11328 = vmatprep.subr.bf16.mxu0 %v14272_v45  ;;  %v13818_v45 = vcombine.high %v778_v41, %v782_v42  ;;  %v830_v36 = vld [vmem:[%s20933_s1 + $0x1878] sm:$0xff] }
 0x4fa   :  { %11716 = vmatpush1.bf16.msra.mxu1 %v13761_v48  ;;  %v1301_v48 = vld [vmem:[%s20933_s1 + $0x2730] sm:$0xff] }
 0x4fb   :  { %11329 = vmatpush1.bf16.msra.mxu0 %v14271_v49  ;;  %11717 = vmatprep.subr.bf16.mxu1 %v13770_v50  ;;  %v13817_v49 = vcombine.low %v778_v41, %v782_v42  ;;  %v14327_v50 = vcombine.low %v1289_v43, %v1293_v44  ;;  %v14336_v52 = vcombine.high %v1297_v20, %v1301_v48  ;;  %v834_v42 = vld [vmem:[%s20933_s1 + $0x1898] sm:$0xff]  ;;  %v15319_v44 = vld [vmem:[%s20934_s0 + $0x28] ss:$100 sps:$4 sm:$0xff]  }
 0x4fc   :  { %11330 = vmatprep.subr.bf16.mxu0 %v14280_v51  ;;  %v13826_v51 = vcombine.high %v786_v47, %v790_v58  ;;  %v838_v43 = vld [vmem:[%s20933_s1 + $0x18b8] sm:$0xff] }
 0x4fe   :  { %11718 = vmatpush1.bf16.msra.mxu1 %v13769_v59  ;;  %v1309_v59 = vld [vmem:[%s20933_s1 + $0x2770] sm:$0xff] }
 0x4ff   :  { %11331 = vmatpush1.bf16.msra.mxu0 %v14279_v60  ;;  %11719 = vmatprep.subr.bf16.mxu1 %v13778_v61  ;;  %v13825_v60 = vcombine.low %v786_v47, %v790_v58  ;;  %v14335_v61 = vcombine.low %v1297_v20, %v1301_v48  ;;  %v14344_v0 = vcombine.high %v1305_v56, %v1309_v59  ;;  %v842_v48 = vld [vmem:[%s20933_s1 + $0x18d8] sm:$0xff] }
 0x500   :  { %11332 = vmatprep.subr.bf16.mxu0 %v14288_v63  ;;  %v13834_v63 = vcombine.high %v794_v54, %v798_v55  ;;  %v13874_v58 = vcombine.high %v834_v42, %v838_v43 }
 0x502   :  { %11720 = vmatpush1.bf16.msra.mxu1 %v13777_v5  ;;  %v1317_v5 = vld [vmem:[%s20933_s1 + $0x27b0] sm:$0xff] }
 0x503   :  { %11333 = vmatpush1.bf16.msra.mxu0 %v14287_v6  ;;  %11721 = vmatprep.subr.bf16.mxu1 %v13786_v7  ;;  %v13833_v6 = vcombine.low %v794_v54, %v798_v55  ;;  %v14343_v7 = vcombine.low %v1305_v56, %v1309_v59  ;;  %v14352_v9 = vcombine.high %v1313_v4, %v1317_v5  ;;  %v15322_v54 = vld [vmem:[%s20934_s0 + $0x34] ss:$100 sps:$4 sm:$0xff]  }
 0x504   :  { %11334 = vmatprep.subr.bf16.mxu0 %v14296_v8  ;;  %v13842_v8 = vcombine.high %v802_v1, %v806_v2  ;;  %v13873_v55 = vcombine.low %v834_v42, %v838_v43  ;;  %v1397_v42 = vld [vmem:[%s20933_s1 + $0x2a30] sm:$0xff] }
 0x506   :  { %11722 = vmatpush1.bf16.msra.mxu1 %v13785_v14  ;;  %v1325_v14 = vld [vmem:[%s20933_s1 + $0x27f0] sm:$0xff] }
 0x507   :  { %11335 = vmatpush1.bf16.msra.mxu0 %v14295_v15  ;;  %11723 = vmatprep.subr.bf16.mxu1 %v13794_v16  ;;  %v13841_v15 = vcombine.low %v802_v1, %v806_v2  ;;  %v14351_v16 = vcombine.low %v1313_v4, %v1317_v5  ;;  %v14360_v18 = vcombine.high %v1321_v13, %v1325_v14  ;;  %v1365_v1 = vld [vmem:[%s20933_s1 + $0x2930] sm:$0xff] }
 0x508   :  { %11336 = vmatprep.subr.bf16.mxu0 %v14304_v17  ;;  %v13850_v17 = vcombine.high %v810_v10, %v814_v12 }
 0x50a   :  { %11724 = vmatpush1.bf16.msra.mxu1 %v13793_v25  ;;  %v1333_v25 = vld [vmem:[%s20933_s1 + $0x2830] sm:$0xff] }
 0x50b   :  { %11337 = vmatpush1.bf16.msra.mxu0 %v14303_v28  ;;  %11725 = vmatprep.subr.bf16.mxu1 %v13802_v30  ;;  %v13849_v28 = vcombine.low %v810_v10, %v814_v12  ;;  %v14359_v30 = vcombine.low %v1321_v13, %v1325_v14  ;;  %v14368_v22 = vcombine.high %v1329_v24, %v1333_v25  ;;  %v1373_v10 = vld [vmem:[%s20933_s1 + $0x2970] sm:$0xff] }
 0x50c   :  { %11338 = vmatprep.subr.bf16.mxu0 %v14312_v32  ;;  %v13858_v32 = vcombine.high %v818_v19, %v822_v23 }
 0x50e   :  { %11726 = vmatpush1.bf16.msra.mxu1 %v13801_v38  ;;  %v1341_v38 = vld [vmem:[%s20933_s1 + $0x2870] sm:$0xff] }
 0x50f   :  { %11339 = vmatpush1.bf16.msra.mxu0 %v14311_v39  ;;  %11727 = vmatprep.subr.bf16.mxu1 %v13810_v40  ;;  %v13857_v39 = vcombine.low %v818_v19, %v822_v23  ;;  %v14367_v40 = vcombine.low %v1329_v24, %v1333_v25  ;;  %v14376_v41 = vcombine.high %v1337_v37, %v1341_v38  ;;  %v1381_v19 = vld [vmem:[%s20933_s1 + $0x29b0] sm:$0xff] }
 0x510   :  { %11340 = vmatprep.subr.bf16.mxu0 %v14320_v26  ;;  %v13866_v26 = vcombine.high %v826_v34, %v830_v36  ;;  %v14375_v47 = vcombine.low %v1337_v37, %v1341_v38 }
 0x512   :  { %11728 = vmatpush1.bf16.msra.mxu1 %v13809_v29  ;;  %v1345_v29 = vld [vmem:[%s20933_s1 + $0x2890] sm:$0xff] }
 0x513   :  { %11341 = vmatpush1.bf16.msra.mxu0 %v14319_v31  ;;  %11729 = vmatprep.subr.bf16.mxu1 %v13818_v45  ;;  %v1349_v31 = vld [vmem:[%s20933_s1 + $0x28b0] sm:$0xff]  ;;  %v15320_v45 = vld [vmem:[%s20934_s0 + $0x48] ss:$100 sps:$4 sm:$0xff]  }
 0x514   :  { %11342 = vmatprep.subr.bf16.mxu0 %v14328_v46  ;;  %v13865_v46 = vcombine.low %v826_v34, %v830_v36  ;;  %v14384_v20 = vcombine.high %v1345_v29, %v1349_v31  ;;  %v14383_v56 = vcombine.low %v1345_v29, %v1349_v31  ;;  %v1389_v34 = vld [vmem:[%s20933_s1 + $0x29f0] sm:$0xff] }
 0x516   :  { %11730 = vmatpush1.bf16.msra.mxu1 %v13817_v49  ;;  %v846_v49 = vld [vmem:[%s20933_s1 + $0x18f8] sm:$0xff] }
 0x517   :  { %11343 = vmatpush1.bf16.msra.mxu0 %v14327_v50  ;;  %11731 = vmatprep.subr.bf16.mxu1 %v13826_v51  ;;  %v15321_v50 = vld [vmem:[%s20934_s0 + $0x54] ss:$100 sps:$4 sm:$0xff]   ;;  %v13882_v59 = vcombine.high %v842_v48, %v846_v49  ;;  %v13881_v2 = vcombine.low %v842_v48, %v846_v49 }
 0x518   :  { %11344 = vmatprep.subr.bf16.mxu0 %v14336_v52  ;;  %v1353_v51 = vld [vmem:[%s20933_s1 + $0x28d0] sm:$0xff] }
 0x519   :  { %v1357_v52 = vld [vmem:[%s20933_s1 + $0x28f0] sm:$0xff] }
 0x51a   :  { %11732 = vmatpush1.bf16.msra.mxu1 %v13825_v60  ;;  %v14392_v60 = vcombine.high %v1353_v51, %v1357_v52  ;;  %v14391_v4 = vcombine.low %v1353_v51, %v1357_v52  ;;  %v898_v51 = vld [vmem:[%s20933_s1 + $0x1a98] sm:$0xff] }
 0x51b   :  { %11345 = vmatpush1.bf16.msra.mxu0 %v14335_v61  ;;  %11733 = vmatprep.subr.bf16.mxu1 %v13834_v63  ;;  %v850_v61 = vld [vmem:[%s20933_s1 + $0x1918] sm:$0xff] }
 0x51c   :  { %11346 = vmatprep.subr.bf16.mxu0 %v14344_v0  ;;  %v854_v63 = vld [vmem:[%s20933_s1 + $0x1938] sm:$0xff]  ;;  %v1361_v0 = vld [vmem:[%s20933_s1 + $0x2910] sm:$0xff] }
 0x51d   :  { %v13890_v5 = vcombine.high %v850_v61, %v854_v63  ;;  %v13889_v12 = vcombine.low %v850_v61, %v854_v63  ;;  %v14399_v13 = vcombine.low %v1361_v0, %v1365_v1  ;;  %v1417_v61 = vld [vmem:[%s20933_s1 + $0x2ad0] sm:$0xff] }
 0x51e   :  { %11734 = vmatpush1.bf16.msra.mxu1 %v13833_v6  ;;  %v14400_v6 = vcombine.high %v1361_v0, %v1365_v1  ;;  %v1421_v63 = vld [vmem:[%s20933_s1 + $0x2af0] sm:$0xff]  ;;  %v906_v1 = vld [vmem:[%s20933_s1 + $0x1ad8] sm:$0xff] }
 0x51f   :  { %11347 = vmatpush1.bf16.msra.mxu0 %v14343_v7  ;;  %11735 = vmatprep.subr.bf16.mxu1 %v13842_v8  ;;  %v858_v7 = vld [vmem:[%s20933_s1 + $0x1958] sm:$0xff] }
 0x520   :  { %11348 = vmatprep.subr.bf16.mxu0 %v14352_v9  ;;  %v862_v8 = vld [vmem:[%s20933_s1 + $0x1978] sm:$0xff]  ;;  %v1369_v9 = vld [vmem:[%s20933_s1 + $0x2950] sm:$0xff] }
 0x521   :  { %v13898_v14 = vcombine.high %v858_v7, %v862_v8  ;;  %v13897_v23 = vcombine.low %v858_v7, %v862_v8  ;;  %v14407_v24 = vcombine.low %v1369_v9, %v1373_v10  ;;  %v1425_v7 = vld [vmem:[%s20933_s1 + $0x2b10] sm:$0xff] }
 0x522   :  { %11736 = vmatpush1.bf16.msra.mxu1 %v13841_v15  ;;  %v14408_v15 = vcombine.high %v1369_v9, %v1373_v10  ;;  %v1429_v8 = vld [vmem:[%s20933_s1 + $0x2b30] sm:$0xff]  ;;  %v914_v9 = vld [vmem:[%s20933_s1 + $0x1b18] sm:$0xff]  ;;  %v14456_v10 = vcombine.high %v1417_v61, %v1421_v63 }
 0x523   :  { %11349 = vmatpush1.bf16.msra.mxu0 %v14351_v16  ;;  %11737 = vmatprep.subr.bf16.mxu1 %v13850_v17  ;;  %v866_v16 = vld [vmem:[%s20933_s1 + $0x1998] sm:$0xff] }
 0x524   :  { %11350 = vmatprep.subr.bf16.mxu0 %v14360_v18  ;;  %v870_v17 = vld [vmem:[%s20933_s1 + $0x19b8] sm:$0xff]  ;;  %v1377_v18 = vld [vmem:[%s20933_s1 + $0x2990] sm:$0xff] }
 0x525   :  { %v13906_v25 = vcombine.high %v866_v16, %v870_v17  ;;  %v13905_v36 = vcombine.low %v866_v16, %v870_v17  ;;  %v14415_v37 = vcombine.low %v1377_v18, %v1381_v19  ;;  %v1433_v16 = vld [vmem:[%s20933_s1 + $0x2b50] sm:$0xff] }
 0x526   :  { %11738 = vmatpush1.bf16.msra.mxu1 %v13849_v28  ;;  %v14416_v28 = vcombine.high %v1377_v18, %v1381_v19  ;;  %v1437_v17 = vld [vmem:[%s20933_s1 + $0x2b70] sm:$0xff]  ;;  %v922_v18 = vld [vmem:[%s20933_s1 + $0x1b58] sm:$0xff]  ;;  %v14464_v19 = vcombine.high %v1425_v7, %v1429_v8 }
 0x527   :  { %11351 = vmatpush1.bf16.msra.mxu0 %v14359_v30  ;;  %11750 = vmatprep.subr.bf16.mxu1 %v13858_v32  ;;  %v874_v30 = vld [vmem:[%s20933_s1 + $0x19d8] sm:$0xff] }
 0x528   :  { %11363 = vmatprep.subr.bf16.mxu0 %v14368_v22  ;;  %v878_v32 = vld [vmem:[%s20933_s1 + $0x19f8] sm:$0xff]  ;;  %v1385_v22 = vld [vmem:[%s20933_s1 + $0x29d0] sm:$0xff] }
 0x529   :  { %11740 = vmatmul.mubr.bf16.vlgmr.msra.gmra.mrb[8].mxu1 %v15319_v44  ;;  %v13914_v38 = vcombine.high %v874_v30, %v878_v32  ;;  %v13913_v43 = vcombine.low %v874_v30, %v878_v32  ;;  %v14423_v44 = vcombine.low %v1385_v22, %v1389_v34  ;;  %v1441_v30 = vld [vmem:[%s20933_s1 + $0x2b90] sm:$0xff] }
 0x52a   :  { %11353 = vmatmul.mubr.bf16.vlgmr.msra.gmra.mrb[4].mxu0 %v15320_v45  ;;  %11751 = vmatpush1.bf16.msra.mxu1 %v13857_v39  ;;  %v14424_v39 = vcombine.high %v1385_v22, %v1389_v34  ;;  %v890_v45 = vld [vmem:[%s20933_s1 + $0x1a58] sm:$0xff]  ;;  %v1445_v32 = vld [vmem:[%s20933_s1 + $0x2bb0] sm:$0xff]  ;;  %v14472_v34 = vcombine.high %v1433_v16, %v1437_v17 }
 0x52b   :  { %11364 = vmatpush1.bf16.msra.mxu0 %v14367_v40  ;;  %11752 = vmatprep.subr.bf16.mxu1 %v13866_v26  ;;  %v882_v40 = vld [vmem:[%s20933_s1 + $0x1a18] sm:$0xff] }
 0x52c   :  { %11365 = vmatprep.subr.bf16.mxu0 %v14376_v41  ;;  %11395 = vmatprep.mubr.bf16.mxu0 %v15321_v50  ;;  %v886_v26 = vld [vmem:[%s20933_s1 + $0x1a38] sm:$0xff]  ;;  %v1393_v41 = vld [vmem:[%s20933_s1 + $0x2a10] sm:$0xff] }
 0x52d   :  { %11782 = vmatprep.mubr.bf16.mxu1 %v15322_v54  ;;  %v13922_v29 = vcombine.high %v882_v40, %v886_v26  ;;  %v14432_v31 = vcombine.high %v1393_v41, %v1397_v42  ;;  %v14431_v48 = vcombine.low %v1393_v41, %v1397_v42  ;;  %v1409_v50 = vld [vmem:[%s20933_s1 + $0x2a90] sm:$0xff]  ;;  %v902_v54 = vld [vmem:[%s20933_s1 + $0x1ab8] sm:$0xff]  ;;  %v14480_v42 = vcombine.high %v1441_v30, %v1445_v32 }
 0x52e   :  { %11753 = vmatpush1.bf16.msra.mxu1 %v13865_v46  ;;  %v894_v46 = vld [vmem:[%s20933_s1 + $0x1a78] sm:$0xff] }
 0x52f   :  { %11366 = vmatpush1.bf16.msra.mxu0 %v14375_v47  ;;  %11754 = vmatprep.subr.bf16.mxu1 %v13874_v58  ;;  %v1401_v47 = vld [vmem:[%s20933_s1 + $0x2a50] sm:$0xff]  ;;  %v13930_v49 = vcombine.high %v890_v45, %v894_v46  ;;  %v930_v22 = vld [vmem:[%s20933_s1 + $0x1b98] sm:$0xff] }
 0x530   :  { %11367 = vmatprep.subr.bf16.mxu0 %v14384_v20  ;;  %v1405_v58 = vld [vmem:[%s20933_s1 + $0x2a70] sm:$0xff]  ;;  %v13921_v20 = vcombine.low %v882_v40, %v886_v26  ;;  %v938_v41 = vld [vmem:[%s20933_s1 + $0x1bd8] sm:$0xff] }
 0x531   :  { %v14440_v52 = vcombine.high %v1401_v47, %v1405_v58  ;;  %v1449_v40 = vld [vmem:[%s20933_s1 + $0x2bd0] sm:$0xff] }
 0x532   :  { %11755 = vmatpush1.bf16.msra.mxu1 %v13873_v55  ;;  %v1413_v55 = vld [vmem:[%s20933_s1 + $0x2ab0] sm:$0xff] }
 0x533   :  { %11368 = vmatpush1.bf16.msra.mxu0 %v14383_v56  ;;  %11756 = vmatprep.subr.bf16.mxu1 %v13882_v59  ;;  %v13929_v56 = vcombine.low %v890_v45, %v894_v46  ;;  %v14439_v59 = vcombine.low %v1401_v47, %v1405_v58  ;;  %v14448_v0 = vcombine.high %v1409_v50, %v1413_v55  ;;  %v1453_v26 = vld [vmem:[%s20933_s1 + $0x2bf0] sm:$0xff]  ;;  %v946_v47 = vld [vmem:[%s20933_s1 + $0x1c18] sm:$0xff] }
 0x534   :  { %11369 = vmatprep.subr.bf16.mxu0 %v14392_v60  ;;  %v13938_v60 = vcombine.high %v898_v51, %v902_v54  ;;  %v1457_v45 = vld [vmem:[%s20933_s1 + $0x2c10] sm:$0xff]  ;;  %v14488_v58 = vcombine.high %v1449_v40, %v1453_v26 }
 0x535   :  { %v1461_v46 = vld [vmem:[%s20933_s1 + $0x2c30] sm:$0xff] }
 0x536   :  { %11757 = vmatpush1.bf16.msra.mxu1 %v13881_v2  ;;  %v910_v2 = vld [vmem:[%s20933_s1 + $0x1af8] sm:$0xff] }
 0x537   :  { %11370 = vmatpush1.bf16.msra.mxu0 %v14391_v4  ;;  %11758 = vmatprep.subr.bf16.mxu1 %v13890_v5  ;;  %v13937_v4 = vcombine.low %v898_v51, %v902_v54  ;;  %v14447_v5 = vcombine.low %v1409_v50, %v1413_v55  ;;  %v1465_v51 = vld [vmem:[%s20933_s1 + $0x2c50] sm:$0xff]  ;;  %v954_v54 = vld [vmem:[%s20933_s1 + $0x1c58] sm:$0xff]  ;;  %v14496_v55 = vcombine.high %v1457_v45, %v1461_v46 }
 0x538   :  { %11371 = vmatprep.subr.bf16.mxu0 %v14400_v6  ;;  %v13946_v6 = vcombine.high %v906_v1, %v910_v2 }
 0x53a   :  { %11759 = vmatpush1.bf16.msra.mxu1 %v13889_v12  ;;  %v918_v12 = vld [vmem:[%s20933_s1 + $0x1b38] sm:$0xff] }
 0x53b   :  { %11372 = vmatpush1.bf16.msra.mxu0 %v14399_v13  ;;  %11760 = vmatprep.subr.bf16.mxu1 %v13898_v14  ;;  %v13945_v13 = vcombine.low %v906_v1, %v910_v2  ;;  %v14455_v14 = vcombine.low %v1417_v61, %v1421_v63  ;;  %v1473_v63 = vld [vmem:[%s20933_s1 + $0x2c90] sm:$0xff]  ;;  %v962_v1 = vld [vmem:[%s20933_s1 + $0x1c98] sm:$0xff] }
 0x53c   :  { %11373 = vmatprep.subr.bf16.mxu0 %v14408_v15  ;;  %v13954_v15 = vcombine.high %v914_v9, %v918_v12 }
 0x53e   :  { %11761 = vmatpush1.bf16.msra.mxu1 %v13897_v23  ;;  %v926_v23 = vld [vmem:[%s20933_s1 + $0x1b78] sm:$0xff] }
 0x53f   :  { %11374 = vmatpush1.bf16.msra.mxu0 %v14407_v24  ;;  %11762 = vmatprep.subr.bf16.mxu1 %v13906_v25  ;;  %v13953_v24 = vcombine.low %v914_v9, %v918_v12  ;;  %v14463_v25 = vcombine.low %v1425_v7, %v1429_v8  ;;  %v1485_v12 = vld [vmem:[%s20933_s1 + $0x2cf0] sm:$0xff] }
 0x540   :  { %11375 = vmatprep.subr.bf16.mxu0 %v14416_v28  ;;  %v13962_v28 = vcombine.high %v922_v18, %v926_v23 }
 0x542   :  { %11763 = vmatpush1.bf16.msra.mxu1 %v13905_v36  ;;  %v934_v36 = vld [vmem:[%s20933_s1 + $0x1bb8] sm:$0xff] }
 0x543   :  { %11376 = vmatpush1.bf16.msra.mxu0 %v14415_v37  ;;  %11764 = vmatprep.subr.bf16.mxu1 %v13914_v38  ;;  %v13961_v37 = vcombine.low %v922_v18, %v926_v23  ;;  %v14471_v38 = vcombine.low %v1433_v16, %v1437_v17  ;;  %v15325_v16 = vld [vmem:[%s20934_s0 + $0x5c] ss:$100 sps:$4 sm:$0xff]  }
 0x544   :  { %11377 = vmatprep.subr.bf16.mxu0 %v14424_v39  ;;  %v13970_v39 = vcombine.high %v930_v22, %v934_v36  ;;  %v15326_v17 = vld [vmem:[%s20934_s0 + $0x3c] ss:$100 sps:$4 sm:$0xff]  }
 0x546   :  { %11765 = vmatpush1.bf16.msra.mxu1 %v13913_v43  ;;  %v942_v43 = vld [vmem:[%s20933_s1 + $0x1bf8] sm:$0xff] }
 0x547   :  { %11378 = vmatpush1.bf16.msra.mxu0 %v14423_v44  ;;  %11766 = vmatprep.subr.bf16.mxu1 %v13922_v29  ;;  %v13969_v44 = vcombine.low %v930_v22, %v934_v36  ;;  %v14479_v29 = vcombine.low %v1441_v30, %v1445_v32  ;;  %v982_v32 = vld [vmem:[%s20933_s1 + $0x1d38] sm:$0xff] }
 0x548   :  { %11379 = vmatprep.subr.bf16.mxu0 %v14432_v31  ;;  %v13978_v31 = vcombine.high %v938_v41, %v942_v43 }
 0x54a   :  { %11767 = vmatpush1.bf16.msra.mxu1 %v13921_v20  ;;  %v950_v20 = vld [vmem:[%s20933_s1 + $0x1c38] sm:$0xff] }
 0x54b   :  { %11380 = vmatpush1.bf16.msra.mxu0 %v14431_v48  ;;  %11768 = vmatprep.subr.bf16.mxu1 %v13930_v49  ;;  %v13977_v48 = vcombine.low %v938_v41, %v942_v43  ;;  %v14487_v49 = vcombine.low %v1449_v40, %v1453_v26  ;;  %v13986_v50 = vcombine.high %v946_v47, %v950_v20  ;;  %v990_v26 = vld [vmem:[%s20933_s1 + $0x1d78] sm:$0xff] }
 0x54c   :  { %11381 = vmatprep.subr.bf16.mxu0 %v14440_v52  ;;  %v1469_v52 = vld [vmem:[%s20933_s1 + $0x2c70] sm:$0xff] }
 0x54d   :  { %v14504_v2 = vcombine.high %v1465_v51, %v1469_v52  ;;  %v14503_v8 = vcombine.low %v1465_v51, %v1469_v52  ;;  %v1006_v52 = vld [vmem:[%s20933_s1 + $0x1df8] sm:$0xff] }
 0x54e   :  { %11769 = vmatpush1.bf16.msra.mxu1 %v13929_v56  ;;  %v958_v56 = vld [vmem:[%s20933_s1 + $0x1c78] sm:$0xff] }
 0x54f   :  { %11382 = vmatpush1.bf16.msra.mxu0 %v14439_v59  ;;  %11770 = vmatprep.subr.bf16.mxu1 %v13938_v60  ;;  %v13985_v59 = vcombine.low %v946_v47, %v950_v20  ;;  %v14495_v60 = vcombine.low %v1457_v45, %v1461_v46  ;;  %v13994_v61 = vcombine.high %v954_v54, %v958_v56  ;;  %v998_v46 = vld [vmem:[%s20933_s1 + $0x1db8] sm:$0xff] }
 0x550   :  { %11383 = vmatprep.subr.bf16.mxu0 %v14448_v0  ;;  %v1477_v0 = vld [vmem:[%s20933_s1 + $0x2cb0] sm:$0xff]  ;;  %v13993_v7 = vcombine.low %v954_v54, %v958_v56 }
 0x552   :  { %11771 = vmatpush1.bf16.msra.mxu1 %v13937_v4  ;;  %v966_v4 = vld [vmem:[%s20933_s1 + $0x1cb8] sm:$0xff] }
 0x553   :  { %11384 = vmatpush1.bf16.msra.mxu0 %v14447_v5  ;;  %11772 = vmatprep.subr.bf16.mxu1 %v13946_v6  ;;  %v15323_v5 = vld [vmem:[%s20934_s0 + $0x30] ss:$100 sps:$4 sm:$0xff]   ;;  %v14002_v9 = vcombine.high %v962_v1, %v966_v4  ;;  %v14001_v18 = vcombine.low %v962_v1, %v966_v4 }
 0x554   :  { %11385 = vmatprep.subr.bf16.mxu0 %v14456_v10  ;;  %v15324_v6 = vld [vmem:[%s20934_s0 + $0x50] ss:$100 sps:$4 sm:$0xff]  }
 0x555   :  { %v1481_v10 = vld [vmem:[%s20933_s1 + $0x2cd0] sm:$0xff] }
 0x556   :  { %11773 = vmatpush1.bf16.msra.mxu1 %v13945_v13  ;;  %v970_v13 = vld [vmem:[%s20933_s1 + $0x1cd8] sm:$0xff]  ;;  %v14520_v30 = vcombine.high %v1481_v10, %v1485_v12 }
 0x557   :  { %11386 = vmatpush1.bf16.msra.mxu0 %v14455_v14  ;;  %11774 = vmatprep.subr.bf16.mxu1 %v13954_v15  ;;  %v14512_v14 = vcombine.high %v1473_v63, %v1477_v0  ;;  %v974_v15 = vld [vmem:[%s20933_s1 + $0x1cf8] sm:$0xff] }
 0x558   :  { %11387 = vmatprep.subr.bf16.mxu0 %v14464_v19  ;;  %v14511_v19 = vcombine.low %v1473_v63, %v1477_v0  ;;  %v14010_v23 = vcombine.high %v970_v13, %v974_v15  ;;  %v14009_v22 = vcombine.low %v970_v13, %v974_v15  ;;  %v1014_v0 = vld [vmem:[%s20933_s1 + $0x1e38] sm:$0xff] }
 0x559   :  { %v1026_v15 = vld [vmem:[%s20933_s1 + $0x1e98] sm:$0xff] }
 0x55a   :  { %11775 = vmatpush1.bf16.msra.mxu1 %v13953_v24  ;;  %v1489_v24 = vld [vmem:[%s20933_s1 + $0x2d10] sm:$0xff] }
 0x55b   :  { %11388 = vmatpush1.bf16.msra.mxu0 %v14463_v25  ;;  %11776 = vmatprep.subr.bf16.mxu1 %v13962_v28  ;;  %v1493_v25 = vld [vmem:[%s20933_s1 + $0x2d30] sm:$0xff]  ;;  %v978_v28 = vld [vmem:[%s20933_s1 + $0x1d18] sm:$0xff] }
 0x55c   :  { %11389 = vmatprep.subr.bf16.mxu0 %v14472_v34  ;;  %v14519_v34 = vcombine.low %v1481_v10, %v1485_v12  ;;  %v14018_v36 = vcombine.high %v978_v28, %v982_v32  ;;  %v14528_v40 = vcombine.high %v1489_v24, %v1493_v25  ;;  %v14017_v41 = vcombine.low %v978_v28, %v982_v32  ;;  %v1034_v28 = vld [vmem:[%s20933_s1 + $0x1ed8] sm:$0xff]  ;;  %v1545_v32 = vld [vmem:[%s20933_s1 + $0x2ed0] sm:$0xff] }
 0x55e   :  { %11777 = vmatpush1.bf16.msra.mxu1 %v13961_v37  ;;  %v1497_v37 = vld [vmem:[%s20933_s1 + $0x2d50] sm:$0xff] }
 0x55f   :  { %11390 = vmatpush1.bf16.msra.mxu0 %v14471_v38  ;;  %11778 = vmatprep.subr.bf16.mxu1 %v13970_v39  ;;  %v1501_v38 = vld [vmem:[%s20933_s1 + $0x2d70] sm:$0xff]  ;;  %v986_v39 = vld [vmem:[%s20933_s1 + $0x1d58] sm:$0xff] }
 0x560   :  { %11391 = vmatprep.subr.bf16.mxu0 %v14480_v42  ;;  %v14527_v42 = vcombine.low %v1489_v24, %v1493_v25  ;;  %v14026_v43 = vcombine.high %v986_v39, %v990_v26  ;;  %v14536_v45 = vcombine.high %v1497_v37, %v1501_v38  ;;  %v14025_v47 = vcombine.low %v986_v39, %v990_v26  ;;  %v1042_v39 = vld [vmem:[%s20933_s1 + $0x1f18] sm:$0xff]  ;;  %v1553_v26 = vld [vmem:[%s20933_s1 + $0x2f10] sm:$0xff] }
 0x562   :  { %11779 = vmatpush1.bf16.msra.mxu1 %v13969_v44  ;;  %v1505_v44 = vld [vmem:[%s20933_s1 + $0x2d90] sm:$0xff] }
 0x563   :  { %11392 = vmatpush1.bf16.msra.mxu0 %v14479_v29  ;;  %11780 = vmatprep.subr.bf16.mxu1 %v13978_v31  ;;  %v1509_v29 = vld [vmem:[%s20933_s1 + $0x2db0] sm:$0xff]  ;;  %v994_v31 = vld [vmem:[%s20933_s1 + $0x1d98] sm:$0xff] }
 0x564   :  { %11393 = vmatprep.subr.bf16.mxu0 %v14488_v58  ;;  %v14535_v58 = vcombine.low %v1497_v37, %v1501_v38  ;;  %v14034_v20 = vcombine.high %v994_v31, %v998_v46  ;;  %v14544_v51 = vcombine.high %v1505_v44, %v1509_v29  ;;  %v14033_v54 = vcombine.low %v994_v31, %v998_v46  ;;  %v1050_v31 = vld [vmem:[%s20933_s1 + $0x1f58] sm:$0xff]  ;;  %v1561_v46 = vld [vmem:[%s20933_s1 + $0x2f50] sm:$0xff] }
 0x566   :  { %11781 = vmatpush1.bf16.msra.mxu1 %v13977_v48  ;;  %v1513_v48 = vld [vmem:[%s20933_s1 + $0x2dd0] sm:$0xff] }
 0x567   :  { %11394 = vmatpush1.bf16.msra.mxu0 %v14487_v49  ;;  %11793 = vmatprep.subr.bf16.mxu1 %v13986_v50  ;;  %v1517_v49 = vld [vmem:[%s20933_s1 + $0x2df0] sm:$0xff]  ;;  %v1002_v50 = vld [vmem:[%s20933_s1 + $0x1dd8] sm:$0xff] }
 0x568   :  { %11406 = vmatprep.subr.bf16.mxu0 %v14496_v55  ;;  %v14543_v55 = vcombine.low %v1505_v44, %v1509_v29  ;;  %v14042_v56 = vcombine.high %v1002_v50, %v1006_v52  ;;  %v14552_v63 = vcombine.high %v1513_v48, %v1517_v49  ;;  %v14041_v1 = vcombine.low %v1002_v50, %v1006_v52  ;;  %v1058_v50 = vld [vmem:[%s20933_s1 + $0x1f98] sm:$0xff]  ;;  %v1569_v52 = vld [vmem:[%s20933_s1 + $0x2f90] sm:$0xff] }
 0x569   :  { %11783 = vmatmul.mubr.bf16.vlgmr.msra.gmra.mrb[8].mxu1 %v15323_v5  ;;  %v1529_v5 = vld [vmem:[%s20933_s1 + $0x2e50] sm:$0xff] }
 0x56a   :  { %11396 = vmatmul.mubr.bf16.vlgmr.msra.gmra.mrb[4].mxu0 %v15324_v6  ;;  %11794 = vmatpush1.bf16.msra.mxu1 %v13985_v59  ;;  %v1521_v59 = vld [vmem:[%s20933_s1 + $0x2e10] sm:$0xff] }
 0x56b   :  { %11407 = vmatpush1.bf16.msra.mxu0 %v14495_v60  ;;  %11795 = vmatprep.subr.bf16.mxu1 %v13994_v61  ;;  %v1525_v60 = vld [vmem:[%s20933_s1 + $0x2e30] sm:$0xff]  ;;  %v1010_v61 = vld [vmem:[%s20933_s1 + $0x1e18] sm:$0xff] }
 0x56c   :  { %11408 = vmatprep.subr.bf16.mxu0 %v14504_v2  ;;  %11438 = vmatprep.mubr.bf16.mxu0 %v15325_v16  ;;  %v14551_v2 = vcombine.low %v1513_v48, %v1517_v49  ;;  %v14050_v4 = vcombine.high %v1010_v61, %v1014_v0  ;;  %v1533_v6 = vld [vmem:[%s20933_s1 + $0x2e70] sm:$0xff]  ;;  %v14049_v10 = vcombine.low %v1010_v61, %v1014_v0  ;;  %v1030_v16 = vld [vmem:[%s20933_s1 + $0x1eb8] sm:$0xff] }
 0x56d   :  { %11825 = vmatprep.mubr.bf16.mxu1 %v15326_v17  ;;  %v14559_v12 = vcombine.low %v1521_v59, %v1525_v60  ;;  %v1537_v17 = vld [vmem:[%s20933_s1 + $0x2e90] sm:$0xff]  ;;  %v14066_v24 = vcombine.high %v1026_v15, %v1030_v16  ;;  %v1066_v61 = vld [vmem:[%s20933_s1 + $0x1fd8] sm:$0xff] }
 0x56e   :  { %11796 = vmatpush1.bf16.msra.mxu1 %v13993_v7  ;;  %v1018_v7 = vld [vmem:[%s20933_s1 + $0x1e58] sm:$0xff]  ;;  %v1577_v0 = vld [vmem:[%s20933_s1 + $0x2fd0] sm:$0xff] }
 0x56f   :  { %11409 = vmatpush1.bf16.msra.mxu0 %v14503_v8  ;;  %11797 = vmatprep.subr.bf16.mxu1 %v14002_v9  ;;  %v14560_v8 = vcombine.high %v1521_v59, %v1525_v60  ;;  %v1022_v9 = vld [vmem:[%s20933_s1 + $0x1e78] sm:$0xff] }
 0x570   :  { %11410 = vmatprep.subr.bf16.mxu0 %v14512_v14  ;;  %v14058_v13 = vcombine.high %v1018_v7, %v1022_v9  ;;  %v14568_v14 = vcombine.high %v1529_v5, %v1533_v6 }
 0x572   :  { %11798 = vmatpush1.bf16.msra.mxu1 %v14001_v18  ;;  %v1541_v18 = vld [vmem:[%s20933_s1 + $0x2eb0] sm:$0xff] }
 0x573   :  { %11411 = vmatpush1.bf16.msra.mxu0 %v14511_v19  ;;  %11799 = vmatprep.subr.bf16.mxu1 %v14010_v23  ;;  %v14057_v19 = vcombine.low %v1018_v7, %v1022_v9  ;;  %v14567_v23 = vcombine.low %v1529_v5, %v1533_v6  ;;  %v14576_v25 = vcombine.high %v1537_v17, %v1541_v18  ;;  %v1074_v7 = vld [vmem:[%s20933_s1 + $0x2018] sm:$0xff]  ;;  %v1585_v9 = vld [vmem:[%s20933_s1 + $0x3010] sm:$0xff] }
 0x574   :  { %11412 = vmatprep.subr.bf16.mxu0 %v14520_v30  ;;  %v1038_v30 = vld [vmem:[%s20933_s1 + $0x1ef8] sm:$0xff] }
 0x575   :  { %v14074_v37 = vcombine.high %v1034_v28, %v1038_v30 }
 0x576   :  { %11800 = vmatpush1.bf16.msra.mxu1 %v14009_v22  ;;  %v1549_v22 = vld [vmem:[%s20933_s1 + $0x2ef0] sm:$0xff] }
 0x577   :  { %11413 = vmatpush1.bf16.msra.mxu0 %v14519_v34  ;;  %11801 = vmatprep.subr.bf16.mxu1 %v14018_v36  ;;  %v14065_v34 = vcombine.low %v1026_v15, %v1030_v16  ;;  %v14575_v36 = vcombine.low %v1537_v17, %v1541_v18  ;;  %v14584_v38 = vcombine.high %v1545_v32, %v1549_v22  ;;  %v1082_v16 = vld [vmem:[%s20933_s1 + $0x2058] sm:$0xff]  ;;  %v1593_v18 = vld [vmem:[%s20933_s1 + $0x3050] sm:$0xff] }
 0x578   :  { %11414 = vmatprep.subr.bf16.mxu0 %v14528_v40  ;;  %v1046_v40 = vld [vmem:[%s20933_s1 + $0x1f38] sm:$0xff] }
 0x579   :  { %v14082_v44 = vcombine.high %v1042_v39, %v1046_v40  ;;  %v1086_v17 = vld [vmem:[%s20933_s1 + $0x2078] sm:$0xff] }
 0x57a   :  { %11802 = vmatpush1.bf16.msra.mxu1 %v14017_v41  ;;  %v1557_v41 = vld [vmem:[%s20933_s1 + $0x2f30] sm:$0xff] }
 0x57b   :  { %11415 = vmatpush1.bf16.msra.mxu0 %v14527_v42  ;;  %11803 = vmatprep.subr.bf16.mxu1 %v14026_v43  ;;  %v14073_v42 = vcombine.low %v1034_v28, %v1038_v30  ;;  %v14583_v43 = vcombine.low %v1545_v32, %v1549_v22  ;;  %v14592_v29 = vcombine.high %v1553_v26, %v1557_v41  ;;  %v1090_v30 = vld [vmem:[%s20933_s1 + $0x2098] sm:$0xff] }
 0x57c   :  { %11416 = vmatprep.subr.bf16.mxu0 %v14536_v45  ;;  %v1054_v45 = vld [vmem:[%s20933_s1 + $0x1f78] sm:$0xff] }
 0x57d   :  { %v14090_v48 = vcombine.high %v1050_v31, %v1054_v45  ;;  %v1094_v32 = vld [vmem:[%s20933_s1 + $0x20b8] sm:$0xff] }
 0x57e   :  { %11804 = vmatpush1.bf16.msra.mxu1 %v14025_v47  ;;  %v1565_v47 = vld [vmem:[%s20933_s1 + $0x2f70] sm:$0xff]  ;;  %v15327_v22 = vld [vmem:[%s20934_s0 + $0x38] ss:$100 sps:$4 sm:$0xff]  }
 0x57f   :  { %11417 = vmatpush1.bf16.msra.mxu0 %v14535_v58  ;;  %11805 = vmatprep.subr.bf16.mxu1 %v14034_v20  ;;  %v14081_v58 = vcombine.low %v1042_v39, %v1046_v40  ;;  %v14591_v20 = vcombine.low %v1553_v26, %v1557_v41  ;;  %v14600_v49 = vcombine.high %v1561_v46, %v1565_v47  ;;  %v1098_v41 = vld [vmem:[%s20933_s1 + $0x20d8] sm:$0xff] }
 0x580   :  { %11418 = vmatprep.subr.bf16.mxu0 %v14544_v51  ;;  %v1062_v51 = vld [vmem:[%s20933_s1 + $0x1fb8] sm:$0xff]  ;;  %v14130_v40 = vcombine.high %v1090_v30, %v1094_v32 }
 0x581   :  { %v14098_v59 = vcombine.high %v1058_v50, %v1062_v51 }
 0x582   :  { %11806 = vmatpush1.bf16.msra.mxu1 %v14033_v54  ;;  %v1573_v54 = vld [vmem:[%s20933_s1 + $0x2fb0] sm:$0xff] }
 0x583   :  { %11419 = vmatpush1.bf16.msra.mxu0 %v14543_v55  ;;  %11807 = vmatprep.subr.bf16.mxu1 %v14042_v56  ;;  %v14089_v55 = vcombine.low %v1050_v31, %v1054_v45  ;;  %v14599_v56 = vcombine.low %v1561_v46, %v1565_v47  ;;  %v14608_v60 = vcombine.high %v1569_v52, %v1573_v54 }
 0x584   :  { %11420 = vmatprep.subr.bf16.mxu0 %v14552_v63  ;;  %v1070_v63 = vld [vmem:[%s20933_s1 + $0x1ff8] sm:$0xff]  ;;  %v14129_v31 = vcombine.low %v1090_v30, %v1094_v32  ;;  %v15077_v32 = vld [vmem:[%s20936_s3 + $0x4] ss:$8 sps:$4 sm:$0xff]  }
 0x585   :  { %v14106_v5 = vcombine.high %v1066_v61, %v1070_v63 }
 0x586   :  { %11808 = vmatpush1.bf16.msra.mxu1 %v14041_v1  ;;  %v1581_v1 = vld [vmem:[%s20933_s1 + $0x2ff0] sm:$0xff] }
 0x587   :  { %11421 = vmatpush1.bf16.msra.mxu0 %v14551_v2  ;;  %11809 = vmatprep.subr.bf16.mxu1 %v14050_v4  ;;  %v14097_v2 = vcombine.low %v1058_v50, %v1062_v51  ;;  %v14607_v4 = vcombine.low %v1569_v52, %v1573_v54  ;;  %v14616_v6 = vcombine.high %v1577_v0, %v1581_v1 }
 0x588   :  { %11422 = vmatprep.subr.bf16.mxu0 %v14560_v8  ;;  %v1078_v8 = vld [vmem:[%s20933_s1 + $0x2038] sm:$0xff] }
 0x58a   :  { %11810 = vmatpush1.bf16.msra.mxu1 %v14049_v10  ;;  %v1589_v10 = vld [vmem:[%s20933_s1 + $0x3030] sm:$0xff] }
 0x58b   :  { %11423 = vmatpush1.bf16.msra.mxu0 %v14559_v12  ;;  %11811 = vmatprep.subr.bf16.mxu1 %v14058_v13  ;;  %v14105_v12 = vcombine.low %v1066_v61, %v1070_v63  ;;  %v14615_v13 = vcombine.low %v1577_v0, %v1581_v1  ;;  %v14624_v15 = vcombine.high %v1585_v9, %v1589_v10 }
 0x58c   :  { %11424 = vmatprep.subr.bf16.mxu0 %v14568_v14  ;;  %v14114_v14 = vcombine.high %v1074_v7, %v1078_v8 }
 0x58e   :  { %11812 = vmatpush1.bf16.msra.mxu1 %v14057_v19  ;;  %v1597_v19 = vld [vmem:[%s20933_s1 + $0x3070] sm:$0xff] }
 0x58f   :  { %11425 = vmatpush1.bf16.msra.mxu0 %v14567_v23  ;;  %11813 = vmatprep.subr.bf16.mxu1 %v14066_v24  ;;  %v14113_v23 = vcombine.low %v1074_v7, %v1078_v8  ;;  %v14623_v24 = vcombine.low %v1585_v9, %v1589_v10  ;;  %v14632_v28 = vcombine.high %v1593_v18, %v1597_v19 }
 0x590   :  { %11426 = vmatprep.subr.bf16.mxu0 %v14576_v25  ;;  %v14122_v25 = vcombine.high %v1082_v16, %v1086_v17  ;;  %v14631_v39 = vcombine.low %v1593_v18, %v1597_v19 }
 0x592   :  { %11814 = vmatpush1.bf16.msra.mxu1 %v14065_v34  ;;  %v1601_v34 = vld [vmem:[%s20933_s1 + $0x3090] sm:$0xff] }
 0x593   :  { %11427 = vmatpush1.bf16.msra.mxu0 %v14575_v36  ;;  %11815 = vmatprep.subr.bf16.mxu1 %v14074_v37  ;;  %v1605_v36 = vld [vmem:[%s20933_s1 + $0x30b0] sm:$0xff]  ;;  %v15328_v37 = vld [vmem:[%s20934_s0 + $0x58] ss:$100 sps:$4 sm:$0xff]  }
 0x594   :  { %11428 = vmatprep.subr.bf16.mxu0 %v14584_v38  ;;  %v14121_v38 = vcombine.low %v1082_v16, %v1086_v17  ;;  %v14640_v26 = vcombine.high %v1601_v34, %v1605_v36  ;;  %v14639_v45 = vcombine.low %v1601_v34, %v1605_v36  ;;  %v1150_v34 = vld [vmem:[%s20933_s1 + $0x2278] sm:$0xff] }
 0x596   :  { %11816 = vmatpush1.bf16.msra.mxu1 %v14073_v42  ;;  %v1102_v42 = vld [vmem:[%s20933_s1 + $0x20f8] sm:$0xff] }
 0x597   :  { %11429 = vmatpush1.bf16.msra.mxu0 %v14583_v43  ;;  %11817 = vmatprep.subr.bf16.mxu1 %v14082_v44  ;;  %v1609_v43 = vld [vmem:[%s20933_s1 + $0x30d0] sm:$0xff]  ;;  %v14138_v46 = vcombine.high %v1098_v41, %v1102_v42  ;;  %v14137_v50 = vcombine.low %v1098_v41, %v1102_v42  ;;  %v15330_v41 = vld [vmem:[%s20934_s0 + $0x60] ss:$100 sps:$4 sm:$0xff]  }
 0x598   :  { %11430 = vmatprep.subr.bf16.mxu0 %v14592_v29  ;;  %v1613_v44 = vld [vmem:[%s20933_s1 + $0x30f0] sm:$0xff]  ;;  %v15329_v29 = vld [vmem:[%s20934_s0 + $0x44] ss:$100 sps:$4 sm:$0xff]  }
 0x599   :  { %v14648_v47 = vcombine.high %v1609_v43, %v1613_v44  ;;  %v14647_v51 = vcombine.low %v1609_v43, %v1613_v44  ;;  %v15078_v43 = vld [vmem:[%s20936_s3 + $0x10] ss:$8 sps:$4 sm:$0xff]  }
 0x59a   :  { %11818 = vmatpush1.bf16.msra.mxu1 %v14081_v58  ;;  %v1106_v58 = vld [vmem:[%s20933_s1 + $0x2118] sm:$0xff] }
 0x59b   :  { %11431 = vmatpush1.bf16.msra.mxu0 %v14591_v20  ;;  %11819 = vmatprep.subr.bf16.mxu1 %v14090_v48  ;;  %v1110_v20 = vld [vmem:[%s20933_s1 + $0x2138] sm:$0xff]  ;;  %v1617_v48 = vld [vmem:[%s20933_s1 + $0x3110] sm:$0xff] }
 0x59c   :  { %11432 = vmatprep.subr.bf16.mxu0 %v14600_v49  ;;  %v1621_v49 = vld [vmem:[%s20933_s1 + $0x3130] sm:$0xff]  ;;  %v14146_v52 = vcombine.high %v1106_v58, %v1110_v20  ;;  %v14145_v61 = vcombine.low %v1106_v58, %v1110_v20  ;;  %v1170_v20 = vld [vmem:[%s20933_s1 + $0x2318] sm:$0xff] }
 0x59d   :  { %v14656_v54 = vcombine.high %v1617_v48, %v1621_v49  ;;  %v14655_v63 = vcombine.low %v1617_v48, %v1621_v49  ;;  %v15086_v58 = vld [vmem:[%s20936_s3 + $0x34] ss:$8 sps:$4 sm:$0xff]  }
 0x59e   :  { %11820 = vmatpush1.bf16.msra.mxu1 %v14089_v55  ;;  %v1114_v55 = vld [vmem:[%s20933_s1 + $0x2158] sm:$0xff] }
 0x59f   :  { %11433 = vmatpush1.bf16.msra.mxu0 %v14599_v56  ;;  %11821 = vmatprep.subr.bf16.mxu1 %v14098_v59  ;;  %v1118_v56 = vld [vmem:[%s20933_s1 + $0x2178] sm:$0xff]  ;;  %v1625_v59 = vld [vmem:[%s20933_s1 + $0x3150] sm:$0xff] }
 0x5a0   :  { %11434 = vmatprep.subr.bf16.mxu0 %v14608_v60  ;;  %v1629_v60 = vld [vmem:[%s20933_s1 + $0x3170] sm:$0xff]  ;;  %v14154_v0 = vcombine.high %v1114_v55, %v1118_v56  ;;  %v14153_v7 = vcombine.low %v1114_v55, %v1118_v56  ;;  %v1174_v48 = vld [vmem:[%s20933_s1 + $0x2338] sm:$0xff] }
 0x5a1   :  { %v14664_v1 = vcombine.high %v1625_v59, %v1629_v60  ;;  %v14663_v8 = vcombine.low %v1625_v59, %v1629_v60  ;;  %v1182_v55 = vld [vmem:[%s20933_s1 + $0x2378] sm:$0xff]  ;;  %v14209_v56 = vcombine.low %v1170_v20, %v1174_v48  ;;  %v15087_v59 = vld [vmem:[%s20936_s3 + $0x40] ss:$8 sps:$4 sm:$0xff]  }
 0x5a2   :  { %11822 = vmatpush1.bf16.msra.mxu1 %v14097_v2  ;;  %v1122_v2 = vld [vmem:[%s20933_s1 + $0x2198] sm:$0xff] }
 0x5a3   :  { %11435 = vmatpush1.bf16.msra.mxu0 %v14607_v4  ;;  %11823 = vmatprep.subr.bf16.mxu1 %v14106_v5  ;;  %v1126_v4 = vld [vmem:[%s20933_s1 + $0x21b8] sm:$0xff]  ;;  %v1633_v5 = vld [vmem:[%s20933_s1 + $0x3190] sm:$0xff] }
 0x5a4   :  { %11436 = vmatprep.subr.bf16.mxu0 %v14616_v6  ;;  %v1637_v6 = vld [vmem:[%s20933_s1 + $0x31b0] sm:$0xff]  ;;  %v14162_v9 = vcombine.high %v1122_v2, %v1126_v4  ;;  %v14161_v16 = vcombine.low %v1122_v2, %v1126_v4 }
 0x5a5   :  { %v14672_v10 = vcombine.high %v1633_v5, %v1637_v6  ;;  %v14671_v17 = vcombine.low %v1633_v5, %v1637_v6  ;;  %v15090_v2 = vld [vmem:[%s20936_s3 + $0x50] ss:$8 sps:$4 sm:$0xff]   ;;  %v15095_v5 = vld [vmem:[%s20936_s3 + $0x64] ss:$8 sps:$4 sm:$0xff]  }
 0x5a6   :  { %11824 = vmatpush1.bf16.msra.mxu1 %v14105_v12  ;;  %v1130_v12 = vld [vmem:[%s20933_s1 + $0x21d8] sm:$0xff] }
 0x5a7   :  { %11437 = vmatpush1.bf16.msra.mxu0 %v14615_v13  ;;  %11836 = vmatprep.subr.bf16.mxu1 %v14114_v14  ;;  %v1134_v13 = vld [vmem:[%s20933_s1 + $0x21f8] sm:$0xff]  ;;  %v1641_v14 = vld [vmem:[%s20933_s1 + $0x31d0] sm:$0xff] }
 0x5a8   :  { %11449 = vmatprep.subr.bf16.mxu0 %v14624_v15  ;;  %v1645_v15 = vld [vmem:[%s20933_s1 + $0x31f0] sm:$0xff]  ;;  %v14170_v18 = vcombine.high %v1130_v12, %v1134_v13  ;;  %v1194_v6 = vld [vmem:[%s20933_s1 + $0x23d8] sm:$0xff] }
 0x5a9   :  { %11826 = vmatmul.mubr.bf16.vlgmr.msra.gmra.mrb[8].mxu1 %v15327_v22  ;;  %v14680_v19 = vcombine.high %v1641_v14, %v1645_v15  ;;  %v1146_v22 = vld [vmem:[%s20933_s1 + $0x2258] sm:$0xff] }
 0x5aa   :  { %11439 = vmatmul.mubr.bf16.vlgmr.msra.gmra.mrb[4].mxu0 %v15328_v37  ;;  %11837 = vmatpush1.bf16.msra.mxu1 %v14113_v23  ;;  %v1138_v23 = vld [vmem:[%s20933_s1 + $0x2218] sm:$0xff]  ;;  %v15075_v37 = vld [vmem:[%s20936_s3] ss:$8 sps:$4 sm:$0xff]   ;;  %v14185_v42 = vcombine.low %v1146_v22, %v1150_v34 }
 0x5ab   :  { %11450 = vmatpush1.bf16.msra.mxu0 %v14623_v24  ;;  %11838 = vmatprep.subr.bf16.mxu1 %v14122_v25  ;;  %v1142_v24 = vld [vmem:[%s20933_s1 + $0x2238] sm:$0xff]  ;;  %v14169_v25 = vcombine.low %v1130_v12, %v1134_v13 }
 0x5ac   :  { %11451 = vmatprep.subr.bf16.mxu0 %v14632_v28  ;;  %11481 = vmatprep.mubr.bf16.mxu0 %v15340_v27  ;;  %v14679_v28 = vcombine.low %v1641_v14, %v1645_v15  ;;  %v14178_v30 = vcombine.high %v1138_v23, %v1142_v24  ;;  %v14177_v36 = vcombine.low %v1138_v23, %v1142_v24  ;;  %v15098_v12 = vld [vmem:[%s20936_s3 + $0x74] ss:$8 sps:$4 sm:$0xff]  }
 0x5ad   :  { %11868 = vmatprep.mubr.bf16.mxu1 %v15329_v29  ;;  %v15083_v29 = vld [vmem:[%s20936_s3 + $0x24] ss:$8 sps:$4 sm:$0xff]   ;;  %v1202_v13 = vld [vmem:[%s20933_s1 + $0x2418] sm:$0xff] }
 0x5ae   :  { %11839 = vmatpush1.bf16.msra.mxu1 %v14121_v38  ;;  %v14186_v38 = vcombine.high %v1146_v22, %v1150_v34  ;;  %v1206_v14 = vld [vmem:[%s20933_s1 + $0x2438] sm:$0xff]  ;;  %v15331_v34 = vld [vmem:[%s20934_s0 + $0x40] ss:$100 sps:$4 sm:$0xff]  }
 0x5af   :  { %11452 = vmatpush1.bf16.msra.mxu0 %v14631_v39  ;;  %11840 = vmatprep.subr.bf16.mxu1 %v14130_v40  ;;  %v15080_v39 = vld [vmem:[%s20936_s3 + $0x14] ss:$8 sps:$4 sm:$0xff]   ;;  %v14241_v24 = vcombine.low %v1202_v13, %v1206_v14 }
 0x5b0   :  { %11453 = vmatprep.subr.bf16.mxu0 %v14640_v26  ;;  %v1154_v40 = vld [vmem:[%s20933_s1 + $0x2298] sm:$0xff] }
 0x5b1   :  { %v1158_v26 = vld [vmem:[%s20933_s1 + $0x22b8] sm:$0xff] }
 0x5b2   :  { %11841 = vmatpush1.bf16.msra.mxu1 %v14129_v31  ;;  %v14194_v44 = vcombine.high %v1154_v40, %v1158_v26  ;;  %v1162_v31 = vld [vmem:[%s20933_s1 + $0x22d8] sm:$0xff] }
 0x5b3   :  { %11454 = vmatpush1.bf16.msra.mxu0 %v14639_v45  ;;  %11842 = vmatprep.subr.bf16.mxu1 %v14138_v46  ;;  %v1166_v45 = vld [vmem:[%s20933_s1 + $0x22f8] sm:$0xff]  ;;  %v15081_v46 = vld [vmem:[%s20936_s3 + $0x20] ss:$8 sps:$4 sm:$0xff]  }
 0x5b4   :  { %11455 = vmatprep.subr.bf16.mxu0 %v14648_v47  ;;  %v14202_v47 = vcombine.high %v1162_v31, %v1166_v45  ;;  %v14201_v49 = vcombine.low %v1162_v31, %v1166_v45  ;;  %v1214_v23 = vld [vmem:[%s20933_s1 + $0x2478] sm:$0xff] }
 0x5b5   :  { %v1222_v22 = vld [vmem:[%s20933_s1 + $0x24b8] sm:$0xff] }
 0x5b6   :  { %11843 = vmatpush1.bf16.msra.mxu1 %v14137_v50  ;;  %v15084_v50 = vld [vmem:[%s20936_s3 + $0x30] ss:$8 sps:$4 sm:$0xff]  }
 0x5b7   :  { %11456 = vmatpush1.bf16.msra.mxu0 %v14647_v51  ;;  %11844 = vmatprep.subr.bf16.mxu1 %v14146_v52  ;;  %v14210_v51 = vcombine.high %v1170_v20, %v1174_v48  ;;  %v15089_v52 = vld [vmem:[%s20936_s3 + $0x44] ss:$8 sps:$4 sm:$0xff]   ;;  %v1234_v31 = vld [vmem:[%s20933_s1 + $0x2518] sm:$0xff] }
 0x5b8   :  { %11457 = vmatprep.subr.bf16.mxu0 %v14656_v54  ;;  %v1178_v54 = vld [vmem:[%s20933_s1 + $0x2358] sm:$0xff] }
 0x5b9   :  { %v14218_v60 = vcombine.high %v1178_v54, %v1182_v55  ;;  %v1238_v45 = vld [vmem:[%s20933_s1 + $0x2538] sm:$0xff] }
 0x5ba   :  { %11845 = vmatpush1.bf16.msra.mxu1 %v14145_v61  ;;  %v15092_v61 = vld [vmem:[%s20936_s3 + $0x54] ss:$8 sps:$4 sm:$0xff]  }
 0x5bb   :  { %11458 = vmatpush1.bf16.msra.mxu0 %v14655_v63  ;;  %11846 = vmatprep.subr.bf16.mxu1 %v14154_v0  ;;  %v1186_v63 = vld [vmem:[%s20933_s1 + $0x2398] sm:$0xff] }
 0x5bc   :  { %11459 = vmatprep.subr.bf16.mxu0 %v14664_v1  ;;  %v1190_v0 = vld [vmem:[%s20933_s1 + $0x23b8] sm:$0xff]  ;;  %v14217_v1 = vcombine.low %v1178_v54, %v1182_v55 }
 0x5bd   :  { %v14226_v4 = vcombine.high %v1186_v63, %v1190_v0  ;;  %v1242_v20 = vld [vmem:[%s20933_s1 + $0x2558] sm:$0xff] }
 0x5be   :  { %11847 = vmatpush1.bf16.msra.mxu1 %v14153_v7  ;;  %v1198_v7 = vld [vmem:[%s20933_s1 + $0x23f8] sm:$0xff] }
 0x5bf   :  { %11460 = vmatpush1.bf16.msra.mxu0 %v14663_v8  ;;  %11848 = vmatprep.subr.bf16.mxu1 %v14162_v9  ;;  %v14225_v8 = vcombine.low %v1186_v63, %v1190_v0  ;;  %v15093_v9 = vld [vmem:[%s20936_s3 + $0x60] ss:$8 sps:$4 sm:$0xff]   ;;  %v14233_v15 = vcombine.low %v1194_v6, %v1198_v7  ;;  %v1246_v48 = vld [vmem:[%s20933_s1 + $0x2578] sm:$0xff] }
 0x5c0   :  { %11461 = vmatprep.subr.bf16.mxu0 %v14672_v10  ;;  %v14234_v10 = vcombine.high %v1194_v6, %v1198_v7  ;;  %v1250_v54 = vld [vmem:[%s20933_s1 + $0x2598] sm:$0xff] }
 0x5c1   :  { %v1254_v55 = vld [vmem:[%s20933_s1 + $0x25b8] sm:$0xff] }
 0x5c2   :  { %11849 = vmatpush1.bf16.msra.mxu1 %v14161_v16  ;;  %v15096_v16 = vld [vmem:[%s20936_s3 + $0x70] ss:$8 sps:$4 sm:$0xff]  }
 0x5c3   :  { %11462 = vmatpush1.bf16.msra.mxu0 %v14671_v17  ;;  %11850 = vmatprep.subr.bf16.mxu1 %v14170_v18  ;;  %v14242_v17 = vcombine.high %v1202_v13, %v1206_v14  ;;  %v15101_v18 = vld [vmem:[%s20936_s3 + $0x84] ss:$8 sps:$4 sm:$0xff]   ;;  %v1258_v63 = vld [vmem:[%s20933_s1 + $0x25d8] sm:$0xff] }
 0x5c4   :  { %11463 = vmatprep.subr.bf16.mxu0 %v14680_v19  ;;  %v1210_v19 = vld [vmem:[%s20933_s1 + $0x2458] sm:$0xff] }
 0x5c5   :  { %v1262_v0 = vld [vmem:[%s20933_s1 + $0x25f8] sm:$0xff] }
 0x5c6   :  { %11851 = vmatpush1.bf16.msra.mxu1 %v14169_v25  ;;  %v15099_v25 = vld [vmem:[%s20936_s3 + $0x80] ss:$8 sps:$4 sm:$0xff]   ;;  %v1266_v6 = vld [vmem:[%s20933_s1 + $0x2618] sm:$0xff] }
 0x5c7   :  { %11464 = vmatpush1.bf16.msra.mxu0 %v14679_v28  ;;  %11852 = vmatprep.subr.bf16.mxu1 %v14178_v30  ;;  %v14250_v28 = vcombine.high %v1210_v19, %v1214_v23  ;;  %v15104_v30 = vld [vmem:[%s20936_s3 + $0x94] ss:$8 sps:$4 sm:$0xff]  }
 0x5c8   :  { %12855 = vmatprep.subr.bf16.mxu0 %v15077_v32  ;;  %v1218_v32 = vld [vmem:[%s20933_s1 + $0x2498] sm:$0xff] }
 0x5c9   :  { %v1270_v7 = vld [vmem:[%s20933_s1 + $0x2638] sm:$0xff] }
 0x5ca   :  { %11482 = vmatmul.mubr.bf16.vlgmr.msra.gmra.mrb[4].mxu0 %v15330_v41  ;;  %11853 = vmatpush1.bf16.msra.mxu1 %v14177_v36  ;;  %v14249_v36 = vcombine.low %v1210_v19, %v1214_v23  ;;  %v1230_v41 = vld [vmem:[%s20933_s1 + $0x24f8] sm:$0xff] }
 0x5cb   :  { %12856 = vmatpush1.bf16.msra.mxu0 %v15075_v37  ;;  %12887 = vmatprep.mubr.bf16.mxu0 %v18275_v57  ;;  %v14193_v57 = vcombine.low %v1154_v40, %v1158_v26  ;;  %v15332_v37 = vld [vmem:[%s20934_s0 + $0x4c] ss:$100 sps:$4 sm:$0xff]   ;;  %v1226_v26 = vld [vmem:[%s20933_s1 + $0x24d8] sm:$0xff] }
 0x5cc   :  { %11854 = vmatprep.subr.bf16.mxu1 %v14186_v38  ;;  %12857 = vmatprep.subr.bf16.mxu0 %v15080_v39  ;;  %v15102_v38 = vld [vmem:[%s20936_s3 + $0x90] ss:$8 sps:$4 sm:$0xff]   ;;  %v14258_v39 = vcombine.high %v1218_v32, %v1222_v22  ;;  %v15107_v40 = vld [vmem:[%s20936_s3 + $0xa4] ss:$8 sps:$4 sm:$0xff]  }
 0x5cd   :  { %v1274_v13 = vld [vmem:[%s20933_s1 + $0x2658] sm:$0xff] }
 0x5ce   :  { %11855 = vmatpush1.bf16.msra.mxu1 %v14185_v42  ;;  %v14257_v42 = vcombine.low %v1218_v32, %v1222_v22  ;;  %v1278_v14 = vld [vmem:[%s20933_s1 + $0x2678] sm:$0xff]  ;;  %v15129_v22 = vld [vmem:[%s20936_s3 + $0x120] ss:$8 sps:$4 sm:$0xff]  }
 0x5cf   :  { %12858 = vmatpush1.bf16.msra.mxu0 %v15078_v43  ;;  %11856 = vmatprep.subr.bf16.mxu1 %v14194_v44  ;;  %v15105_v43 = vld [vmem:[%s20936_s3 + $0xa0] ss:$8 sps:$4 sm:$0xff]   ;;  %v14266_v44 = vcombine.high %v1226_v26, %v1230_v41  ;;  %v1282_v19 = vld [vmem:[%s20933_s1 + $0x2698] sm:$0xff] }
 0x5d0   :  { %12859 = vmatprep.subr.bf16.mxu0 %v15083_v29  ;;  %v15110_v29 = vld [vmem:[%s20936_s3 + $0xb4] ss:$8 sps:$4 sm:$0xff]  }
 0x5d1   :  { %v1286_v23 = vld [vmem:[%s20933_s1 + $0x26b8] sm:$0xff] }
 0x5d2   :  { %11857 = vmatpush1.bf16.msra.mxu1 %v14193_v57  ;;  %v14265_v57 = vcombine.low %v1226_v26, %v1230_v41  ;;  %v1294_v32 = vld [vmem:[%s20933_s1 + $0x26f8] sm:$0xff]  ;;  %v15137_v41 = vld [vmem:[%s20936_s3 + $0x144] ss:$8 sps:$4 sm:$0xff]  }
 0x5d3   :  { %12860 = vmatpush1.bf16.msra.mxu0 %v15081_v46  ;;  %11858 = vmatprep.subr.bf16.mxu1 %v14202_v47  ;;  %v15108_v46 = vld [vmem:[%s20936_s3 + $0xb0] ss:$8 sps:$4 sm:$0xff]   ;;  %v14274_v47 = vcombine.high %v1234_v31, %v1238_v45 }
 0x5d4   :  { %12861 = vmatprep.subr.bf16.mxu0 %v15086_v58  ;;  %v15113_v58 = vld [vmem:[%s20936_s3 + $0xc4] ss:$8 sps:$4 sm:$0xff]  }
 0x5d6   :  { %11859 = vmatpush1.bf16.msra.mxu1 %v14201_v49  ;;  %v14273_v49 = vcombine.low %v1234_v31, %v1238_v45  ;;  %v15140_v45 = vld [vmem:[%s20936_s3 + $0x154] ss:$8 sps:$4 sm:$0xff]  }
 0x5d7   :  { %12862 = vmatpush1.bf16.msra.mxu0 %v15084_v50  ;;  %11860 = vmatprep.subr.bf16.mxu1 %v14210_v51  ;;  %v15111_v50 = vld [vmem:[%s20936_s3 + $0xc0] ss:$8 sps:$4 sm:$0xff]   ;;  %v14282_v51 = vcombine.high %v1242_v20, %v1246_v48 }
 0x5d8   :  { %12863 = vmatprep.subr.bf16.mxu0 %v15089_v52  ;;  %v15116_v52 = vld [vmem:[%s20936_s3 + $0xd4] ss:$8 sps:$4 sm:$0xff]  }
 0x5da   :  { %11861 = vmatpush1.bf16.msra.mxu1 %v14209_v56  ;;  %v14281_v56 = vcombine.low %v1242_v20, %v1246_v48  ;;  %v15143_v48 = vld [vmem:[%s20936_s3 + $0x164] ss:$8 sps:$4 sm:$0xff]  }
 0x5db   :  { %12864 = vmatpush1.bf16.msra.mxu0 %v15087_v59  ;;  %11862 = vmatprep.subr.bf16.mxu1 %v14218_v60  ;;  %v15114_v59 = vld [vmem:[%s20936_s3 + $0xd0] ss:$8 sps:$4 sm:$0xff]   ;;  %v14290_v60 = vcombine.high %v1250_v54, %v1254_v55 }
 0x5dc   :  { %12865 = vmatprep.subr.bf16.mxu0 %v15092_v61  ;;  %v15119_v61 = vld [vmem:[%s20936_s3 + $0xe4] ss:$8 sps:$4 sm:$0xff]  }
 0x5de   :  { %11863 = vmatpush1.bf16.msra.mxu1 %v14217_v1  ;;  %v14289_v1 = vcombine.low %v1250_v54, %v1254_v55  ;;  %v15146_v55 = vld [vmem:[%s20936_s3 + $0x174] ss:$8 sps:$4 sm:$0xff]  }
 0x5df   :  { %12866 = vmatpush1.bf16.msra.mxu0 %v15090_v2  ;;  %11864 = vmatprep.subr.bf16.mxu1 %v14226_v4  ;;  %v15117_v2 = vld [vmem:[%s20936_s3 + $0xe0] ss:$8 sps:$4 sm:$0xff]   ;;  %v14298_v4 = vcombine.high %v1258_v63, %v1262_v0 }
 0x5e0   :  { %12867 = vmatprep.subr.bf16.mxu0 %v15095_v5  ;;  %v15122_v5 = vld [vmem:[%s20936_s3 + $0xf4] ss:$8 sps:$4 sm:$0xff]  }
 0x5e2   :  { %11865 = vmatpush1.bf16.msra.mxu1 %v14225_v8  ;;  %v14297_v8 = vcombine.low %v1258_v63, %v1262_v0  ;;  %v15149_v0 = vld [vmem:[%s20936_s3 + $0x184] ss:$8 sps:$4 sm:$0xff]  }
 0x5e3   :  { %12868 = vmatpush1.bf16.msra.mxu0 %v15093_v9  ;;  %11866 = vmatprep.subr.bf16.mxu1 %v14234_v10  ;;  %v15120_v9 = vld [vmem:[%s20936_s3 + $0xf0] ss:$8 sps:$4 sm:$0xff]   ;;  %v14306_v10 = vcombine.high %v1266_v6, %v1270_v7 }
 0x5e4   :  { %12869 = vmatprep.subr.bf16.mxu0 %v15098_v12  ;;  %v15125_v12 = vld [vmem:[%s20936_s3 + $0x104] ss:$8 sps:$4 sm:$0xff]  }
 0x5e6   :  { %11867 = vmatpush1.bf16.msra.mxu1 %v14233_v15  ;;  %v14305_v15 = vcombine.low %v1266_v6, %v1270_v7  ;;  %v15152_v7 = vld [vmem:[%s20936_s3 + $0x194] ss:$8 sps:$4 sm:$0xff]  }
 0x5e7   :  { %12870 = vmatpush1.bf16.msra.mxu0 %v15096_v16  ;;  %11879 = vmatprep.subr.bf16.mxu1 %v14242_v17  ;;  %v15123_v16 = vld [vmem:[%s20936_s3 + $0x100] ss:$8 sps:$4 sm:$0xff]   ;;  %v14314_v17 = vcombine.high %v1274_v13, %v1278_v14 }
 0x5e8   :  { %12871 = vmatprep.subr.bf16.mxu0 %v15101_v18  ;;  %v15128_v18 = vld [vmem:[%s20936_s3 + $0x114] ss:$8 sps:$4 sm:$0xff]  }
 0x5e9   :  { %11869 = vmatmul.mubr.bf16.vlgmr.msra.gmra.mrb[8].mxu1 %v15331_v34 }
 0x5ea   :  { %11880 = vmatpush1.bf16.msra.mxu1 %v14241_v24  ;;  %11911 = vmatprep.mubr.bf16.mxu1 %v15332_v37  ;;  %v14313_v24 = vcombine.low %v1274_v13, %v1278_v14  ;;  %v1298_v37 = vld [vmem:[%s20933_s1 + $0x2718] sm:$0xff] }
 0x5eb   :  { %12872 = vmatpush1.bf16.msra.mxu0 %v15099_v25  ;;  %11881 = vmatprep.subr.bf16.mxu1 %v14250_v28  ;;  %v15126_v25 = vld [vmem:[%s20936_s3 + $0x110] ss:$8 sps:$4 sm:$0xff]   ;;  %v14322_v28 = vcombine.high %v1282_v19, %v1286_v23 }
 0x5ec   :  { %12873 = vmatprep.subr.bf16.mxu0 %v15104_v30  ;;  %v15131_v30 = vld [vmem:[%s20936_s3 + $0x124] ss:$8 sps:$4 sm:$0xff]   ;;  %v15334_v13 = vld [vmem:[%s20934_s0 + $0x54] ss:$100 sps:$4 sm:$0xff]  }
 0x5ed   :  { %v15150_v14 = vld [vmem:[%s20936_s3 + $0x190] ss:$8 sps:$4 sm:$0xff]  }
 0x5ee   :  { %11882 = vmatpush1.bf16.msra.mxu1 %v14249_v36  ;;  %v15134_v36 = vld [vmem:[%s20936_s3 + $0x134] ss:$8 sps:$4 sm:$0xff]  }
 0x5ef   :  { %12874 = vmatpush1.bf16.msra.mxu0 %v15102_v38  ;;  %11883 = vmatprep.subr.bf16.mxu1 %v14258_v39  ;;  %v1302_v38 = vld [vmem:[%s20933_s1 + $0x2738] sm:$0xff] }
 0x5f0   :  { %12875 = vmatprep.subr.bf16.mxu0 %v15107_v40  ;;  %v15132_v40 = vld [vmem:[%s20936_s3 + $0x130] ss:$8 sps:$4 sm:$0xff]   ;;  %v14338_v26 = vcombine.high %v1298_v37, %v1302_v38 }
 0x5f2   :  { %11884 = vmatpush1.bf16.msra.mxu1 %v14257_v42  ;;  %v1306_v42 = vld [vmem:[%s20933_s1 + $0x2758] sm:$0xff] }
 0x5f3   :  { %12876 = vmatpush1.bf16.msra.mxu0 %v15105_v43  ;;  %11885 = vmatprep.subr.bf16.mxu1 %v14266_v44  ;;  %v1310_v43 = vld [vmem:[%s20933_s1 + $0x2778] sm:$0xff]  ;;  %v14337_v44 = vcombine.low %v1298_v37, %v1302_v38  ;;  %v15159_v38 = vld [vmem:[%s20936_s3 + $0x1c0] ss:$8 sps:$4 sm:$0xff]  }
 0x5f4   :  { %12877 = vmatprep.subr.bf16.mxu0 %v15110_v29  ;;  %v15135_v29 = vld [vmem:[%s20936_s3 + $0x140] ss:$8 sps:$4 sm:$0xff]   ;;  %v14346_v31 = vcombine.high %v1306_v42, %v1310_v43 }
 0x5f6   :  { %11886 = vmatpush1.bf16.msra.mxu1 %v14265_v57  ;;  %v1314_v57 = vld [vmem:[%s20933_s1 + $0x2798] sm:$0xff] }
 0x5f7   :  { %12878 = vmatpush1.bf16.msra.mxu0 %v15108_v46  ;;  %11887 = vmatprep.subr.bf16.mxu1 %v14274_v47  ;;  %v1318_v46 = vld [vmem:[%s20933_s1 + $0x27b8] sm:$0xff]  ;;  %v14345_v47 = vcombine.low %v1306_v42, %v1310_v43 }
 0x5f8   :  { %12879 = vmatprep.subr.bf16.mxu0 %v15113_v58  ;;  %v15138_v58 = vld [vmem:[%s20936_s3 + $0x150] ss:$8 sps:$4 sm:$0xff]   ;;  %v14354_v20 = vcombine.high %v1314_v57, %v1318_v46 }
 0x5f9   :  { %v15162_v43 = vld [vmem:[%s20936_s3 + $0x1d0] ss:$8 sps:$4 sm:$0xff]  }
 0x5fa   :  { %11888 = vmatpush1.bf16.msra.mxu1 %v14273_v49  ;;  %v1322_v49 = vld [vmem:[%s20933_s1 + $0x27d8] sm:$0xff] }
 0x5fb   :  { %12880 = vmatpush1.bf16.msra.mxu0 %v15111_v50  ;;  %11889 = vmatprep.subr.bf16.mxu1 %v14282_v51  ;;  %v1326_v50 = vld [vmem:[%s20933_s1 + $0x27f8] sm:$0xff]  ;;  %v14353_v51 = vcombine.low %v1314_v57, %v1318_v46  ;;  %v15165_v46 = vld [vmem:[%s20936_s3 + $0x1e0] ss:$8 sps:$4 sm:$0xff]  }
 0x5fc   :  { %12881 = vmatprep.subr.bf16.mxu0 %v15116_v52  ;;  %v15141_v52 = vld [vmem:[%s20936_s3 + $0x160] ss:$8 sps:$4 sm:$0xff]   ;;  %v14362_v54 = vcombine.high %v1322_v49, %v1326_v50 }
 0x5fe   :  { %11890 = vmatpush1.bf16.msra.mxu1 %v14281_v56  ;;  %v1330_v56 = vld [vmem:[%s20933_s1 + $0x2818] sm:$0xff] }
 0x5ff   :  { %12882 = vmatpush1.bf16.msra.mxu0 %v15114_v59  ;;  %11891 = vmatprep.subr.bf16.mxu1 %v14290_v60  ;;  %v1334_v59 = vld [vmem:[%s20933_s1 + $0x2838] sm:$0xff]  ;;  %v14361_v60 = vcombine.low %v1322_v49, %v1326_v50 }
 0x600   :  { %12883 = vmatprep.subr.bf16.mxu0 %v15119_v61  ;;  %v15144_v61 = vld [vmem:[%s20936_s3 + $0x170] ss:$8 sps:$4 sm:$0xff]   ;;  %v14370_v63 = vcombine.high %v1330_v56, %v1334_v59 }
 0x601   :  { %v15168_v50 = vld [vmem:[%s20936_s3 + $0x1f0] ss:$8 sps:$4 sm:$0xff]  }
 0x602   :  { %11892 = vmatpush1.bf16.msra.mxu1 %v14289_v1  ;;  %v1338_v1 = vld [vmem:[%s20933_s1 + $0x2858] sm:$0xff] }
 0x603   :  { %12884 = vmatpush1.bf16.msra.mxu0 %v15117_v2  ;;  %11893 = vmatprep.subr.bf16.mxu1 %v14298_v4  ;;  %v1342_v2 = vld [vmem:[%s20933_s1 + $0x2878] sm:$0xff]  ;;  %v14369_v4 = vcombine.low %v1330_v56, %v1334_v59 }
 0x604   :  { %12885 = vmatprep.subr.bf16.mxu0 %v15122_v5  ;;  %v15147_v5 = vld [vmem:[%s20936_s3 + $0x180] ss:$8 sps:$4 sm:$0xff]   ;;  %v14378_v6 = vcombine.high %v1338_v1, %v1342_v2 }
 0x606   :  { %11894 = vmatpush1.bf16.msra.mxu1 %v14297_v8  ;;  %v1346_v8 = vld [vmem:[%s20933_s1 + $0x2898] sm:$0xff] }
 0x607   :  { %12886 = vmatpush1.bf16.msra.mxu0 %v15120_v9  ;;  %11895 = vmatprep.subr.bf16.mxu1 %v14306_v10  ;;  %v1350_v9 = vld [vmem:[%s20933_s1 + $0x28b8] sm:$0xff]  ;;  %v15333_v10 = vld [vmem:[%s20934_s0 + $0x48] ss:$100 sps:$4 sm:$0xff]  }
 0x608   :  { %12898 = vmatprep.subr.bf16.mxu0 %v15125_v12  ;;  %v14377_v12 = vcombine.low %v1338_v1, %v1342_v2 }
 0x60a   :  { %12888 = vmatmul.mubr.bf16.vlgmr.msra.gmra.mrb[8].mxu0 %v18267_v21  ;;  %11896 = vmatpush1.bf16.msra.mxu1 %v14305_v15  ;;  %v1290_v21 = vld [vmem:[%s20933_s1 + $0x26d8] sm:$0xff]  ;;  %v14386_v15 = vcombine.high %v1346_v8, %v1350_v9 }
 0x60b   :  { %12899 = vmatpush1.bf16.msra.mxu0 %v15123_v16  ;;  %12930 = vmatprep.mubr.bf16.mxu0 %v19098_v35  ;;  %v14321_v35 = vcombine.low %v1282_v19, %v1286_v23  ;;  %v14330_v34 = vcombine.high %v1290_v21, %v1294_v32  ;;  %v14329_v39 = vcombine.low %v1290_v21, %v1294_v32  ;;  %v15155_v16 = vld [vmem:[%s20936_s3 + $0x1a4] ss:$8 sps:$4 sm:$0xff]   ;;  %v15153_v23 = vld [vmem:[%s20936_s3 + $0x1a0] ss:$8 sps:$4 sm:$0xff]   ;;  %v15156_v32 = vld [vmem:[%s20936_s3 + $0x1b0] ss:$8 sps:$4 sm:$0xff]  }
 0x60c   :  { %11897 = vmatprep.subr.bf16.mxu1 %v14314_v17  ;;  %12900 = vmatprep.subr.bf16.mxu0 %v15128_v18  ;;  %v1354_v17 = vld [vmem:[%s20933_s1 + $0x28d8] sm:$0xff]  ;;  %v14385_v19 = vcombine.low %v1346_v8, %v1350_v9  ;;  %v15177_v9 = vld [vmem:[%s20936_s3 + $0x220] ss:$8 sps:$4 sm:$0xff]  }
 0x60d   :  { %v1358_v18 = vld [vmem:[%s20933_s1 + $0x28f8] sm:$0xff] }
 0x60e   :  { %11898 = vmatpush1.bf16.msra.mxu1 %v14313_v24  ;;  %v14394_v24 = vcombine.high %v1354_v17, %v1358_v18  ;;  %v14393_v21 = vcombine.low %v1354_v17, %v1358_v18  ;;  %v1434_v17 = vld [vmem:[%s20933_s1 + $0x2b58] sm:$0xff] }
 0x60f   :  { %12901 = vmatpush1.bf16.msra.mxu0 %v15126_v25  ;;  %11899 = vmatprep.subr.bf16.mxu1 %v14322_v28  ;;  %v15158_v25 = vld [vmem:[%s20936_s3 + $0x1b4] ss:$8 sps:$4 sm:$0xff]  }
 0x610   :  { %12902 = vmatprep.subr.bf16.mxu0 %v15131_v30  ;;  %v1362_v28 = vld [vmem:[%s20933_s1 + $0x2918] sm:$0xff] }
 0x611   :  { %v1366_v30 = vld [vmem:[%s20933_s1 + $0x2938] sm:$0xff] }
 0x612   :  { %11900 = vmatpush1.bf16.msra.mxu1 %v14321_v35  ;;  %v14402_v35 = vcombine.high %v1362_v28, %v1366_v30  ;;  %v14401_v37 = vcombine.low %v1362_v28, %v1366_v30  ;;  %v1438_v18 = vld [vmem:[%s20933_s1 + $0x2b78] sm:$0xff] }
 0x613   :  { %12903 = vmatpush1.bf16.msra.mxu0 %v15129_v22  ;;  %11901 = vmatprep.subr.bf16.mxu1 %v14330_v34  ;;  %v15161_v22 = vld [vmem:[%s20936_s3 + $0x1c4] ss:$8 sps:$4 sm:$0xff]   ;;  %v1370_v34 = vld [vmem:[%s20933_s1 + $0x2958] sm:$0xff] }
 0x614   :  { %12904 = vmatprep.subr.bf16.mxu0 %v15134_v36  ;;  %v1374_v36 = vld [vmem:[%s20933_s1 + $0x2978] sm:$0xff] }
 0x615   :  { %v14409_v42 = vcombine.low %v1370_v34, %v1374_v36  ;;  %v1442_v28 = vld [vmem:[%s20933_s1 + $0x2b98] sm:$0xff] }
 0x616   :  { %11902 = vmatpush1.bf16.msra.mxu1 %v14329_v39  ;;  %v14410_v39 = vcombine.high %v1370_v34, %v1374_v36  ;;  %v1446_v30 = vld [vmem:[%s20933_s1 + $0x2bb8] sm:$0xff] }
 0x617   :  { %12905 = vmatpush1.bf16.msra.mxu0 %v15132_v40  ;;  %11903 = vmatprep.subr.bf16.mxu1 %v14338_v26  ;;  %v15164_v40 = vld [vmem:[%s20936_s3 + $0x1d4] ss:$8 sps:$4 sm:$0xff]  }
 0x618   :  { %12906 = vmatprep.subr.bf16.mxu0 %v15137_v41  ;;  %v1378_v26 = vld [vmem:[%s20933_s1 + $0x2998] sm:$0xff] }
 0x619   :  { %v1382_v41 = vld [vmem:[%s20933_s1 + $0x29b8] sm:$0xff] }
 0x61a   :  { %11904 = vmatpush1.bf16.msra.mxu1 %v14337_v44  ;;  %v14418_v44 = vcombine.high %v1378_v26, %v1382_v41  ;;  %v14417_v57 = vcombine.low %v1378_v26, %v1382_v41  ;;  %v1450_v34 = vld [vmem:[%s20933_s1 + $0x2bd8] sm:$0xff] }
 0x61b   :  { %12907 = vmatpush1.bf16.msra.mxu0 %v15135_v29  ;;  %11905 = vmatprep.subr.bf16.mxu1 %v14346_v31  ;;  %v15167_v29 = vld [vmem:[%s20936_s3 + $0x1e4] ss:$8 sps:$4 sm:$0xff]   ;;  %v1386_v31 = vld [vmem:[%s20933_s1 + $0x29d8] sm:$0xff] }
 0x61c   :  { %12908 = vmatprep.subr.bf16.mxu0 %v15140_v45  ;;  %v1390_v45 = vld [vmem:[%s20933_s1 + $0x29f8] sm:$0xff] }
 0x61d   :  { %v14425_v49 = vcombine.low %v1386_v31, %v1390_v45  ;;  %v1454_v36 = vld [vmem:[%s20933_s1 + $0x2bf8] sm:$0xff] }
 0x61e   :  { %11906 = vmatpush1.bf16.msra.mxu1 %v14345_v47  ;;  %v14426_v47 = vcombine.high %v1386_v31, %v1390_v45  ;;  %v1458_v26 = vld [vmem:[%s20933_s1 + $0x2c18] sm:$0xff] }
 0x61f   :  { %12909 = vmatpush1.bf16.msra.mxu0 %v15138_v58  ;;  %11907 = vmatprep.subr.bf16.mxu1 %v14354_v20  ;;  %v15170_v58 = vld [vmem:[%s20936_s3 + $0x1f4] ss:$8 sps:$4 sm:$0xff]  }
 0x620   :  { %12910 = vmatprep.subr.bf16.mxu0 %v15143_v48  ;;  %v1394_v20 = vld [vmem:[%s20933_s1 + $0x2a18] sm:$0xff] }
 0x621   :  { %v1398_v48 = vld [vmem:[%s20933_s1 + $0x2a38] sm:$0xff] }
 0x622   :  { %11908 = vmatpush1.bf16.msra.mxu1 %v14353_v51  ;;  %v14434_v51 = vcombine.high %v1394_v20, %v1398_v48  ;;  %v14433_v56 = vcombine.low %v1394_v20, %v1398_v48  ;;  %v1462_v41 = vld [vmem:[%s20933_s1 + $0x2c38] sm:$0xff] }
 0x623   :  { %12911 = vmatpush1.bf16.msra.mxu0 %v15141_v52  ;;  %11909 = vmatprep.subr.bf16.mxu1 %v14362_v54  ;;  %v1402_v52 = vld [vmem:[%s20933_s1 + $0x2a58] sm:$0xff] }
 0x624   :  { %12912 = vmatprep.subr.bf16.mxu0 %v15146_v55  ;;  %v1406_v54 = vld [vmem:[%s20933_s1 + $0x2a78] sm:$0xff]  ;;  %v15173_v55 = vld [vmem:[%s20936_s3 + $0x204] ss:$8 sps:$4 sm:$0xff]  }
 0x625   :  { %v14442_v59 = vcombine.high %v1402_v52, %v1406_v54  ;;  %v14441_v1 = vcombine.low %v1402_v52, %v1406_v54  ;;  %v1466_v31 = vld [vmem:[%s20933_s1 + $0x2c58] sm:$0xff] }
 0x626   :  { %11910 = vmatpush1.bf16.msra.mxu1 %v14361_v60  ;;  %v15171_v60 = vld [vmem:[%s20936_s3 + $0x200] ss:$8 sps:$4 sm:$0xff]   ;;  %v1470_v45 = vld [vmem:[%s20933_s1 + $0x2c78] sm:$0xff] }
 0x627   :  { %12913 = vmatpush1.bf16.msra.mxu0 %v15144_v61  ;;  %11922 = vmatprep.subr.bf16.mxu1 %v14370_v63  ;;  %v1410_v61 = vld [vmem:[%s20933_s1 + $0x2a98] sm:$0xff] }
 0x628   :  { %12914 = vmatprep.subr.bf16.mxu0 %v15149_v0  ;;  %v1414_v63 = vld [vmem:[%s20933_s1 + $0x2ab8] sm:$0xff] }
 0x629   :  { %11912 = vmatmul.mubr.bf16.vlgmr.msra.gmra.mrb[8].mxu1 %v15333_v10  ;;  %v15176_v0 = vld [vmem:[%s20936_s3 + $0x214] ss:$8 sps:$4 sm:$0xff]   ;;  %v14450_v2 = vcombine.high %v1410_v61, %v1414_v63 }
 0x62a   :  { %11923 = vmatpush1.bf16.msra.mxu1 %v14369_v4  ;;  %11954 = vmatprep.mubr.bf16.mxu1 %v15334_v13  ;;  %v15174_v4 = vld [vmem:[%s20936_s3 + $0x210] ss:$8 sps:$4 sm:$0xff]   ;;  %v15182_v13 = vld [vmem:[%s20936_s3 + $0x234] ss:$8 sps:$4 sm:$0xff]  }
 0x62b   :  { %12915 = vmatpush1.bf16.msra.mxu0 %v15147_v5  ;;  %11924 = vmatprep.subr.bf16.mxu1 %v14378_v6  ;;  %v1418_v5 = vld [vmem:[%s20933_s1 + $0x2ad8] sm:$0xff] }
 0x62c   :  { %12916 = vmatprep.subr.bf16.mxu0 %v15152_v7  ;;  %v1422_v6 = vld [vmem:[%s20933_s1 + $0x2af8] sm:$0xff]  ;;  %v14449_v7 = vcombine.low %v1410_v61, %v1414_v63 }
 0x62d   :  { %v14458_v8 = vcombine.high %v1418_v5, %v1422_v6  ;;  %v1426_v10 = vld [vmem:[%s20933_s1 + $0x2b18] sm:$0xff] }
 0x62e   :  { %11925 = vmatpush1.bf16.msra.mxu1 %v14377_v12  ;;  %v1430_v12 = vld [vmem:[%s20933_s1 + $0x2b38] sm:$0xff] }
 0x62f   :  { %12917 = vmatpush1.bf16.msra.mxu0 %v15150_v14  ;;  %11926 = vmatprep.subr.bf16.mxu1 %v14386_v15  ;;  %v14457_v14 = vcombine.low %v1418_v5, %v1422_v6  ;;  %v14466_v15 = vcombine.high %v1426_v10, %v1430_v12  ;;  %v1474_v20 = vld [vmem:[%s20933_s1 + $0x2c98] sm:$0xff] }
 0x630   :  { %12918 = vmatprep.subr.bf16.mxu0 %v15155_v16  ;;  %v15180_v16 = vld [vmem:[%s20936_s3 + $0x230] ss:$8 sps:$4 sm:$0xff]   ;;  %v15336_v52 = vld [vmem:[%s20934_s0 + $0x5c] ss:$100 sps:$4 sm:$0xff]  }
 0x631   :  { %v1478_v48 = vld [vmem:[%s20933_s1 + $0x2cb8] sm:$0xff] }
 0x632   :  { %11927 = vmatpush1.bf16.msra.mxu1 %v14385_v19  ;;  %v15185_v19 = vld [vmem:[%s20936_s3 + $0x244] ss:$8 sps:$4 sm:$0xff]   ;;  %v14514_v54 = vcombine.high %v1474_v20, %v1478_v48  ;;  %v14513_v61 = vcombine.low %v1474_v20, %v1478_v48 }
 0x633   :  { %12919 = vmatpush1.bf16.msra.mxu0 %v15153_v23  ;;  %11928 = vmatprep.subr.bf16.mxu1 %v14394_v24  ;;  %v14465_v23 = vcombine.low %v1426_v10, %v1430_v12  ;;  %v14474_v24 = vcombine.high %v1434_v17, %v1438_v18 }
 0x634   :  { %12920 = vmatprep.subr.bf16.mxu0 %v15158_v25  ;;  %v15183_v25 = vld [vmem:[%s20936_s3 + $0x240] ss:$8 sps:$4 sm:$0xff]  }
 0x636   :  { %11929 = vmatpush1.bf16.msra.mxu1 %v14393_v21  ;;  %v15188_v21 = vld [vmem:[%s20936_s3 + $0x254] ss:$8 sps:$4 sm:$0xff]  }
 0x637   :  { %12921 = vmatpush1.bf16.msra.mxu0 %v15156_v32  ;;  %11930 = vmatprep.subr.bf16.mxu1 %v14402_v35  ;;  %v14473_v32 = vcombine.low %v1434_v17, %v1438_v18  ;;  %v14482_v35 = vcombine.high %v1442_v28, %v1446_v30 }
 0x638   :  { %12922 = vmatprep.subr.bf16.mxu0 %v15161_v22  ;;  %v15186_v22 = vld [vmem:[%s20936_s3 + $0x250] ss:$8 sps:$4 sm:$0xff]  }
 0x63a   :  { %11931 = vmatpush1.bf16.msra.mxu1 %v14401_v37  ;;  %v15191_v37 = vld [vmem:[%s20936_s3 + $0x264] ss:$8 sps:$4 sm:$0xff]  }
 0x63b   :  { %12923 = vmatpush1.bf16.msra.mxu0 %v15159_v38  ;;  %11932 = vmatprep.subr.bf16.mxu1 %v14410_v39  ;;  %v14481_v38 = vcombine.low %v1442_v28, %v1446_v30  ;;  %v14490_v39 = vcombine.high %v1450_v34, %v1454_v36 }
 0x63c   :  { %12924 = vmatprep.subr.bf16.mxu0 %v15164_v40  ;;  %v15189_v40 = vld [vmem:[%s20936_s3 + $0x260] ss:$8 sps:$4 sm:$0xff]  }
 0x63e   :  { %11933 = vmatpush1.bf16.msra.mxu1 %v14409_v42  ;;  %v15194_v42 = vld [vmem:[%s20936_s3 + $0x274] ss:$8 sps:$4 sm:$0xff]  }
 0x63f   :  { %12925 = vmatpush1.bf16.msra.mxu0 %v15162_v43  ;;  %11934 = vmatprep.subr.bf16.mxu1 %v14418_v44  ;;  %v14489_v43 = vcombine.low %v1450_v34, %v1454_v36  ;;  %v14498_v44 = vcombine.high %v1458_v26, %v1462_v41 }
 0x640   :  { %12926 = vmatprep.subr.bf16.mxu0 %v15167_v29  ;;  %v15192_v29 = vld [vmem:[%s20936_s3 + $0x270] ss:$8 sps:$4 sm:$0xff]  }
 0x642   :  { %11935 = vmatpush1.bf16.msra.mxu1 %v14417_v57  ;;  %v15197_v57 = vld [vmem:[%s20936_s3 + $0x284] ss:$8 sps:$4 sm:$0xff]  }
 0x643   :  { %12927 = vmatpush1.bf16.msra.mxu0 %v15165_v46  ;;  %11936 = vmatprep.subr.bf16.mxu1 %v14426_v47  ;;  %v14497_v46 = vcombine.low %v1458_v26, %v1462_v41  ;;  %v14506_v47 = vcombine.high %v1466_v31, %v1470_v45 }
 0x644   :  { %12928 = vmatprep.subr.bf16.mxu0 %v15170_v58  ;;  %v15195_v58 = vld [vmem:[%s20936_s3 + $0x280] ss:$8 sps:$4 sm:$0xff]  }
 0x646   :  { %11937 = vmatpush1.bf16.msra.mxu1 %v14425_v49  ;;  %v15200_v49 = vld [vmem:[%s20936_s3 + $0x294] ss:$8 sps:$4 sm:$0xff]  }
 0x647   :  { %12929 = vmatpush1.bf16.msra.mxu0 %v15168_v50  ;;  %11938 = vmatprep.subr.bf16.mxu1 %v14434_v51  ;;  %v15335_v50 = vld [vmem:[%s20934_s0 + $0x50] ss:$100 sps:$4 sm:$0xff]   ;;  %v14505_v51 = vcombine.low %v1466_v31, %v1470_v45  ;;  %v1546_v31 = vld [vmem:[%s20933_s1 + $0x2ed8] sm:$0xff] }
 0x648   :  { %12941 = vmatprep.subr.bf16.mxu0 %v15173_v55  ;;  %v15198_v55 = vld [vmem:[%s20936_s3 + $0x290] ss:$8 sps:$4 sm:$0xff]  }
 0x649   :  { %v1550_v45 = vld [vmem:[%s20933_s1 + $0x2ef8] sm:$0xff] }
 0x64a   :  { %12931 = vmatmul.mubr.bf16.vlgmr.msra.gmra.mrb[8].mxu0 %v19096_v33  ;;  %11939 = vmatpush1.bf16.msra.mxu1 %v14433_v56  ;;  %v15179_v33 = vld [vmem:[%s20936_s3 + $0x224] ss:$8 sps:$4 sm:$0xff]   ;;  %v1482_v56 = vld [vmem:[%s20933_s1 + $0x2cd8] sm:$0xff]  ;;  %v14585_v20 = vcombine.low %v1546_v31, %v1550_v45 }
 0x64b   :  { %11940 = vmatprep.subr.bf16.mxu1 %v14442_v59  ;;  %12942 = vmatpush1.bf16.msra.mxu0 %v15171_v60  ;;  %v1486_v59 = vld [vmem:[%s20933_s1 + $0x2cf8] sm:$0xff]  ;;  %v15203_v60 = vld [vmem:[%s20936_s3 + $0x2a4] ss:$8 sps:$4 sm:$0xff]  }
 0x64c   :  { %12943 = vmatprep.subr.bf16.mxu0 %v15176_v0  ;;  %v14522_v63 = vcombine.high %v1482_v56, %v1486_v59  ;;  %v15201_v0 = vld [vmem:[%s20936_s3 + $0x2a0] ss:$8 sps:$4 sm:$0xff]   ;;  %v14521_v5 = vcombine.low %v1482_v56, %v1486_v59  ;;  %v1570_v56 = vld [vmem:[%s20933_s1 + $0x2f98] sm:$0xff] }
 0x64d   :  { %v1574_v59 = vld [vmem:[%s20933_s1 + $0x2fb8] sm:$0xff] }
 0x64e   :  { %11941 = vmatpush1.bf16.msra.mxu1 %v14441_v1  ;;  %v1490_v1 = vld [vmem:[%s20933_s1 + $0x2d18] sm:$0xff] }
 0x64f   :  { %11942 = vmatprep.subr.bf16.mxu1 %v14450_v2  ;;  %12944 = vmatpush1.bf16.msra.mxu0 %v15174_v4  ;;  %v1494_v2 = vld [vmem:[%s20933_s1 + $0x2d38] sm:$0xff] }
 0x650   :  { %12945 = vmatprep.subr.bf16.mxu0 %v15179_v33  ;;  %v15206_v4 = vld [vmem:[%s20936_s3 + $0x2b4] ss:$8 sps:$4 sm:$0xff]   ;;  %v14530_v6 = vcombine.high %v1490_v1, %v1494_v2  ;;  %v15204_v33 = vld [vmem:[%s20936_s3 + $0x2b0] ss:$8 sps:$4 sm:$0xff]   ;;  %v14529_v10 = vcombine.low %v1490_v1, %v1494_v2  ;;  %v14610_v1 = vcombine.high %v1570_v56, %v1574_v59 }
 0x651   :  { %v1578_v2 = vld [vmem:[%s20933_s1 + $0x2fd8] sm:$0xff] }
 0x652   :  { %11943 = vmatpush1.bf16.msra.mxu1 %v14449_v7  ;;  %v1498_v7 = vld [vmem:[%s20933_s1 + $0x2d58] sm:$0xff] }
 0x653   :  { %11944 = vmatprep.subr.bf16.mxu1 %v14458_v8  ;;  %12946 = vmatpush1.bf16.msra.mxu0 %v15177_v9  ;;  %v1502_v8 = vld [vmem:[%s20933_s1 + $0x2d78] sm:$0xff]  ;;  %v15209_v9 = vld [vmem:[%s20936_s3 + $0x2c4] ss:$8 sps:$4 sm:$0xff]  }
 0x654   :  { %12947 = vmatprep.subr.bf16.mxu0 %v15182_v13  ;;  %v14538_v12 = vcombine.high %v1498_v7, %v1502_v8  ;;  %v15207_v13 = vld [vmem:[%s20936_s3 + $0x2c0] ss:$8 sps:$4 sm:$0xff]   ;;  %v14537_v17 = vcombine.low %v1498_v7, %v1502_v8  ;;  %v14609_v7 = vcombine.low %v1570_v56, %v1574_v59  ;;  %v1634_v56 = vld [vmem:[%s20933_s1 + $0x3198] sm:$0xff] }
 0x655   :  { %v1638_v59 = vld [vmem:[%s20933_s1 + $0x31b8] sm:$0xff] }
 0x656   :  { %11945 = vmatpush1.bf16.msra.mxu1 %v14457_v14  ;;  %v1506_v14 = vld [vmem:[%s20933_s1 + $0x2d98] sm:$0xff] }
 0x657   :  { %11946 = vmatprep.subr.bf16.mxu1 %v14466_v15  ;;  %12948 = vmatpush1.bf16.msra.mxu0 %v15180_v16  ;;  %v1510_v15 = vld [vmem:[%s20933_s1 + $0x2db8] sm:$0xff] }
 0x658   :  { %12949 = vmatprep.subr.bf16.mxu0 %v15185_v19  ;;  %v15212_v16 = vld [vmem:[%s20936_s3 + $0x2d4] ss:$8 sps:$4 sm:$0xff]   ;;  %v14546_v18 = vcombine.high %v1506_v14, %v1510_v15  ;;  %v15210_v19 = vld [vmem:[%s20936_s3 + $0x2d0] ss:$8 sps:$4 sm:$0xff]   ;;  %v14545_v28 = vcombine.low %v1506_v14, %v1510_v15 }
 0x659   :  { %v1586_v14 = vld [vmem:[%s20933_s1 + $0x3018] sm:$0xff] }
 0x65a   :  { %11947 = vmatpush1.bf16.msra.mxu1 %v14465_v23  ;;  %v1514_v23 = vld [vmem:[%s20933_s1 + $0x2dd8] sm:$0xff] }
 0x65b   :  { %11948 = vmatprep.subr.bf16.mxu1 %v14474_v24  ;;  %12950 = vmatpush1.bf16.msra.mxu0 %v15183_v25  ;;  %v1518_v24 = vld [vmem:[%s20933_s1 + $0x2df8] sm:$0xff]  ;;  %v15215_v25 = vld [vmem:[%s20936_s3 + $0x2e4] ss:$8 sps:$4 sm:$0xff]  }
 0x65c   :  { %12951 = vmatprep.subr.bf16.mxu0 %v15188_v21  ;;  %v14554_v30 = vcombine.high %v1514_v23, %v1518_v24  ;;  %v15213_v21 = vld [vmem:[%s20936_s3 + $0x2e0] ss:$8 sps:$4 sm:$0xff]   ;;  %v14553_v34 = vcombine.low %v1514_v23, %v1518_v24  ;;  %v1590_v15 = vld [vmem:[%s20933_s1 + $0x3038] sm:$0xff] }
 0x65e   :  { %11949 = vmatpush1.bf16.msra.mxu1 %v14473_v32  ;;  %v1522_v32 = vld [vmem:[%s20933_s1 + $0x2e18] sm:$0xff] }
 0x65f   :  { %11950 = vmatprep.subr.bf16.mxu1 %v14482_v35  ;;  %12952 = vmatpush1.bf16.msra.mxu0 %v15186_v22  ;;  %v1526_v35 = vld [vmem:[%s20933_s1 + $0x2e38] sm:$0xff] }
 0x660   :  { %12953 = vmatprep.subr.bf16.mxu0 %v15191_v37  ;;  %v15218_v22 = vld [vmem:[%s20936_s3 + $0x2f4] ss:$8 sps:$4 sm:$0xff]   ;;  %v14562_v36 = vcombine.high %v1522_v32, %v1526_v35  ;;  %v15216_v37 = vld [vmem:[%s20936_s3 + $0x2f0] ss:$8 sps:$4 sm:$0xff]   ;;  %v14561_v26 = vcombine.low %v1522_v32, %v1526_v35  ;;  %v15219_v35 = vld [vmem:[%s20936_s3 + $0x300] ss:$8 sps:$4 sm:$0xff]  }
 0x662   :  { %11951 = vmatpush1.bf16.msra.mxu1 %v14481_v38  ;;  %v1530_v38 = vld [vmem:[%s20933_s1 + $0x2e58] sm:$0xff] }
 0x663   :  { %11952 = vmatprep.subr.bf16.mxu1 %v14490_v39  ;;  %12954 = vmatpush1.bf16.msra.mxu0 %v15189_v40  ;;  %v1534_v39 = vld [vmem:[%s20933_s1 + $0x2e78] sm:$0xff]  ;;  %v15221_v40 = vld [vmem:[%s20936_s3 + $0x304] ss:$8 sps:$4 sm:$0xff]  }
 0x664   :  { %12955 = vmatprep.subr.bf16.mxu0 %v15194_v42  ;;  %v14570_v41 = vcombine.high %v1530_v38, %v1534_v39  ;;  %v1538_v42 = vld [vmem:[%s20933_s1 + $0x2e98] sm:$0xff] }
 0x666   :  { %11953 = vmatpush1.bf16.msra.mxu1 %v14489_v43  ;;  %v1542_v43 = vld [vmem:[%s20933_s1 + $0x2eb8] sm:$0xff] }
 0x667   :  { %11965 = vmatprep.subr.bf16.mxu1 %v14498_v44  ;;  %12956 = vmatpush1.bf16.msra.mxu0 %v15192_v29  ;;  %v14569_v44 = vcombine.low %v1530_v38, %v1534_v39  ;;  %v14578_v29 = vcombine.high %v1538_v42, %v1542_v43  ;;  %v1606_v38 = vld [vmem:[%s20933_s1 + $0x30b8] sm:$0xff] }
 0x668   :  { %12957 = vmatprep.subr.bf16.mxu0 %v15197_v57  ;;  %v14577_v57 = vcombine.low %v1538_v42, %v1542_v43  ;;  %v15338_v39 = vld [vmem:[%s20934_s0 + $0x58] ss:$100 sps:$4 sm:$0xff]  }
 0x669   :  { %11955 = vmatmul.mubr.bf16.vlgmr.msra.gmra.mrb[8].mxu1 %v15335_v50  ;;  %v1566_v50 = vld [vmem:[%s20933_s1 + $0x2f78] sm:$0xff] }
 0x66a   :  { %11966 = vmatpush1.bf16.msra.mxu1 %v14497_v46  ;;  %11997 = vmatprep.mubr.bf16.mxu1 %v15336_v52  ;;  %v14586_v46 = vcombine.high %v1546_v31, %v1550_v45  ;;  %v1667_v52 = vsub.s32 4, %v18192_v53  ;;  %v1610_v43 = vld [vmem:[%s20933_s1 + $0x30d8] sm:$0xff] }
 0x66b   :  { %11967 = vmatprep.subr.bf16.mxu1 %v14506_v47  ;;  %12958 = vmatpush1.bf16.msra.mxu0 %v15195_v58  ;;  %v1554_v47 = vld [vmem:[%s20933_s1 + $0x2f18] sm:$0xff] }
 0x66c   :  { %12959 = vmatprep.subr.bf16.mxu0 %v15200_v49  ;;  %v1558_v58 = vld [vmem:[%s20933_s1 + $0x2f38] sm:$0xff] }
 0x66d   :  { %v14594_v48 = vcombine.high %v1554_v47, %v1558_v58  ;;  %v1562_v49 = vld [vmem:[%s20933_s1 + $0x2f58] sm:$0xff] }
 0x66e   :  { %11968 = vmatpush1.bf16.msra.mxu1 %v14505_v51  ;;  %v14593_v51 = vcombine.low %v1554_v47, %v1558_v58  ;;  %v15230_v31 = vld [vmem:[%s20936_s3 + $0x334] ss:$8 sps:$4 sm:$0xff]   ;;  %v15228_v47 = vld [vmem:[%s20936_s3 + $0x330] ss:$8 sps:$4 sm:$0xff]  }
 0x66f   :  { %11969 = vmatprep.subr.bf16.mxu1 %v14514_v54  ;;  %12960 = vmatpush1.bf16.msra.mxu0 %v15198_v55  ;;  %v1671_v54 = vsub.s32 5, %v18192_v53  ;;  %v14602_v55 = vcombine.high %v1562_v49, %v1566_v50 }
 0x670   :  { %12961 = vmatprep.subr.bf16.mxu0 %v15203_v60  ;;  %v20757_v60 = vld [vmem:[%s20935_s2] sm:$0xff] }
 0x672   :  { %11970 = vmatpush1.bf16.msra.mxu1 %v14513_v61  ;;  %v1668_v61 = vrot.slane %v20757_v60, %v1667_v52 }
 0x673   :  { %11971 = vmatprep.subr.bf16.mxu1 %v14522_v63  ;;  %12962 = vmatpush1.bf16.msra.mxu0 %v15201_v0  ;;  %v14601_v63 = vcombine.low %v1562_v49, %v1566_v50  ;;  %v1672_v0 = vrot.slane %v20757_v60, %v1671_v54  ;;  %v1626_v49 = vld [vmem:[%s20933_s1 + $0x3158] sm:$0xff] }
 0x674   :  { %12963 = vmatprep.subr.bf16.mxu0 %v15206_v4  ;;  %v1582_v4 = vld [vmem:[%s20933_s1 + $0x2ff8] sm:$0xff] }
 0x675   :  { %v1630_v50 = vld [vmem:[%s20933_s1 + $0x3178] sm:$0xff] }
 0x676   :  { %11972 = vmatpush1.bf16.msra.mxu1 %v14521_v5  ;;  %v15236_v54 = vld [vmem:[%s20936_s3 + $0x354] ss:$8 sps:$4 sm:$0xff]  }
 0x677   :  { %11973 = vmatprep.subr.bf16.mxu1 %v14530_v6  ;;  %12964 = vmatpush1.bf16.msra.mxu0 %v15204_v33 }
 0x678   :  { %12965 = vmatprep.subr.bf16.mxu0 %v15209_v9 }
 0x67a   :  { %11974 = vmatpush1.bf16.msra.mxu1 %v14529_v10  ;;  %v14618_v10 = vcombine.high %v1578_v2, %v1582_v4 }
 0x67b   :  { %11975 = vmatprep.subr.bf16.mxu1 %v14538_v12  ;;  %12966 = vmatpush1.bf16.msra.mxu0 %v15207_v13 }
 0x67c   :  { %12967 = vmatprep.subr.bf16.mxu0 %v15212_v16 }
 0x67e   :  { %11976 = vmatpush1.bf16.msra.mxu1 %v14537_v17 }
 0x67f   :  { %11977 = vmatprep.subr.bf16.mxu1 %v14546_v18  ;;  %12968 = vmatpush1.bf16.msra.mxu0 %v15210_v19  ;;  %v14617_v19 = vcombine.low %v1578_v2, %v1582_v4  ;;  %v1642_v2 = vld [vmem:[%s20933_s1 + $0x31d8] sm:$0xff] }
 0x680   :  { %12969 = vmatprep.subr.bf16.mxu0 %v15215_v25  ;;  %v14626_v25 = vcombine.high %v1586_v14, %v1590_v15  ;;  %v1646_v4 = vld [vmem:[%s20933_s1 + $0x31f8] sm:$0xff] }
 0x682   :  { %11978 = vmatpush1.bf16.msra.mxu1 %v14545_v28 }
 0x683   :  { %11979 = vmatprep.subr.bf16.mxu1 %v14554_v30  ;;  %12970 = vmatpush1.bf16.msra.mxu0 %v15213_v21  ;;  %v1594_v30 = vld [vmem:[%s20933_s1 + $0x3058] sm:$0xff] }
 0x684   :  { %12971 = vmatprep.subr.bf16.mxu0 %v15218_v22  ;;  %v1598_v21 = vld [vmem:[%s20933_s1 + $0x3078] sm:$0xff]  ;;  %v14625_v22 = vcombine.low %v1586_v14, %v1590_v15  ;;  %v15339_v14 = vld [vmem:[%s20934_s0 + $0x60] ss:$100 sps:$4 sm:$0xff]  }
 0x685   :  { %v15246_v15 = vld [vmem:[%s20936_s3 + $0x390] ss:$8 sps:$4 sm:$0xff]  }
 0x686   :  { %11980 = vmatpush1.bf16.msra.mxu1 %v14553_v34  ;;  %v14634_v34 = vcombine.high %v1594_v30, %v1598_v21 }
 0x687   :  { %11981 = vmatprep.subr.bf16.mxu1 %v14562_v36  ;;  %12972 = vmatpush1.bf16.msra.mxu0 %v15216_v37  ;;  %v15224_v36 = vld [vmem:[%s20936_s3 + $0x314] ss:$8 sps:$4 sm:$0xff]  }
 0x688   :  { %12984 = vmatprep.subr.bf16.mxu0 %v15221_v40  ;;  %v1602_v37 = vld [vmem:[%s20933_s1 + $0x3098] sm:$0xff] }
 0x689   :  { %v15222_v40 = vld [vmem:[%s20936_s3 + $0x310] ss:$8 sps:$4 sm:$0xff]   ;;  %v14642_v42 = vcombine.high %v1602_v37, %v1606_v38 }
 0x68a   :  { %11982 = vmatpush1.bf16.msra.mxu1 %v14561_v26  ;;  %v14633_v26 = vcombine.low %v1594_v30, %v1598_v21  ;;  %v15263_v30 = vld [vmem:[%s20936_s3 + $0x3e4] ss:$8 sps:$4 sm:$0xff]   ;;  %v15261_v21 = vld [vmem:[%s20936_s3 + $0x3e0] ss:$8 sps:$4 sm:$0xff]  }
 0x68b   :  { %11983 = vmatprep.subr.bf16.mxu1 %v14570_v41  ;;  %v15227_v41 = vld [vmem:[%s20936_s3 + $0x324] ss:$8 sps:$4 sm:$0xff]  }
 0x68e   :  { %11984 = vmatpush1.bf16.msra.mxu1 %v14569_v44  ;;  %v1614_v44 = vld [vmem:[%s20933_s1 + $0x30f8] sm:$0xff] }
 0x68f   :  { %11985 = vmatprep.subr.bf16.mxu1 %v14578_v29  ;;  %v14641_v29 = vcombine.low %v1602_v37, %v1606_v38  ;;  %v14650_v45 = vcombine.high %v1610_v43, %v1614_v44  ;;  %v14649_v58 = vcombine.low %v1610_v43, %v1614_v44 }
 0x692   :  { %11986 = vmatpush1.bf16.msra.mxu1 %v14577_v57  ;;  %v1618_v57 = vld [vmem:[%s20933_s1 + $0x3118] sm:$0xff] }
 0x693   :  { %11987 = vmatprep.subr.bf16.mxu1 %v14586_v46  ;;  %v1622_v46 = vld [vmem:[%s20933_s1 + $0x3138] sm:$0xff] }
 0x694   :  { %v14657_v52 = vcombine.low %v1618_v57, %v1622_v46 }
 0x696   :  { %11988 = vmatpush1.bf16.msra.mxu1 %v14585_v20  ;;  %v15233_v20 = vld [vmem:[%s20936_s3 + $0x344] ss:$8 sps:$4 sm:$0xff]  }
 0x697   :  { %11989 = vmatprep.subr.bf16.mxu1 %v14594_v48  ;;  %v14658_v48 = vcombine.high %v1618_v57, %v1622_v46 }
 0x69a   :  { %11990 = vmatpush1.bf16.msra.mxu1 %v14593_v51  ;;  %v15231_v51 = vld [vmem:[%s20936_s3 + $0x340] ss:$8 sps:$4 sm:$0xff]  }
 0x69b   :  { %11991 = vmatprep.subr.bf16.mxu1 %v14602_v55  ;;  %v14666_v55 = vcombine.high %v1626_v49, %v1630_v50 }
 0x69d   :  { %v11483_v5 = vpop.f32.mrb[4].mxu0 }
 0x69e   :  { %v14823_v6 = vadd.f32 %v11483_v5, %v1668_v61  ;;  %v11485_v33 = vpop.f32.mrb[5].mxu0  ;;  %11992 = vmatpush1.bf16.msra.mxu1 %v14601_v63  ;;  %v14665_v63 = vcombine.low %v1626_v49, %v1630_v50  ;;  %v15237_v5 = vld [vmem:[%s20936_s3 + $0x360] ss:$8 sps:$4 sm:$0xff]  }
 0x69f   :  { %v14824_v8 = vadd.f32 %v11485_v33, %v1672_v0  ;;  %v11487_v9 = vpop.f32.mrb[6].mxu0  ;;  %11993 = vmatprep.subr.bf16.mxu1 %v14610_v1  ;;  %v14674_v1 = vcombine.high %v1634_v56, %v1638_v59  ;;  %v15242_v33 = vld [vmem:[%s20936_s3 + $0x374] ss:$8 sps:$4 sm:$0xff]  }
 0x6a0   :  { %v14825_v12 = vadd.f32 %v11487_v9, %v1668_v61  ;;  %v11489_v13 = vpop.f32.mrb[7].mxu0  ;;  %v12055_v17 = vmax.f32 %v14823_v6, 0.0  ;;  %v15234_v61 = vld [vmem:[%s20936_s3 + $0x350] ss:$8 sps:$4 sm:$0xff]   ;;  %v14673_v6 = vcombine.low %v1634_v56, %v1638_v59  ;;  %v14681_v9 = vcombine.low %v1642_v2, %v1646_v4 }
 0x6a1   :  { %v14826_v16 = vadd.f32 %v11489_v13, %v1672_v0  ;;  %v12056_v23 = vmax.f32 %v14824_v8, 0.0  ;;  %v15239_v0 = vld [vmem:[%s20936_s3 + $0x364] ss:$8 sps:$4 sm:$0xff]   ;;  %v15240_v8 = vld [vmem:[%s20936_s3 + $0x370] ss:$8 sps:$4 sm:$0xff]  }
 0x6a2   :  { %v12063_v18 = vmax.f32 %v14825_v12, 0.0  ;;  %11994 = vmatpush1.bf16.msra.mxu1 %v14609_v7  ;;  %v14682_v7 = vcombine.high %v1642_v2, %v1646_v4  ;;  %v15243_v12 = vld [vmem:[%s20936_s3 + $0x380] ss:$8 sps:$4 sm:$0xff]   ;;  %v15248_v13 = vld [vmem:[%s20936_s3 + $0x394] ss:$8 sps:$4 sm:$0xff]  }
 0x6a3   :  { %v12064_v24 = vmax.f32 %v14826_v16, 0.0  ;;  %11995 = vmatprep.subr.bf16.mxu1 %v14618_v10  ;;  %v15245_v10 = vld [vmem:[%s20936_s3 + $0x384] ss:$8 sps:$4 sm:$0xff]  }
 0x6a4   :  { %v12071_v28 = vpack.c.bf16 %v12063_v18, %v12055_v17  ;;  %v15251_v16 = vld [vmem:[%s20936_s3 + $0x3a4] ss:$8 sps:$4 sm:$0xff]   ;;  %v15249_v17 = vld [vmem:[%s20936_s3 + $0x3a0] ss:$8 sps:$4 sm:$0xff]   ;;  %v15254_v18 = vld [vmem:[%s20936_s3 + $0x3b4] ss:$8 sps:$4 sm:$0xff]  }
 0x6a5   :  { %v12072_v32 = vpack.c.bf16 %v12064_v24, %v12056_v23  ;;  %v15257_v23 = vld [vmem:[%s20936_s3 + $0x3c4] ss:$8 sps:$4 sm:$0xff]   ;;  %v15255_v24 = vld [vmem:[%s20936_s3 + $0x3c0] ss:$8 sps:$4 sm:$0xff]  }
 0x6a6   :  { %11996 = vmatpush1.bf16.msra.mxu1 %v14617_v19  ;;  %v15252_v19 = vld [vmem:[%s20936_s3 + $0x3b0] ss:$8 sps:$4 sm:$0xff]  }
 0x6a7   :  { %12973 = vmatprep.mubr.bf16.mxu0 %v12072_v32  ;;  %12008 = vmatprep.subr.bf16.mxu1 %v14626_v25  ;;  %v15260_v25 = vld [vmem:[%s20936_s3 + $0x3d4] ss:$8 sps:$4 sm:$0xff]  }
 0x6a8   :  { %12974 = vmatmul.mubr.bf16.vlgmr.msra.gmra.mrb[8].mxu0 %v12071_v28  ;;  %v15258_v28 = vld [vmem:[%s20936_s3 + $0x3d0] ss:$8 sps:$4 sm:$0xff]   ;;  %v15266_v32 = vld [vmem:[%s20936_s3 + $0x3f4] ss:$8 sps:$4 sm:$0xff]  }
 0x6a9   :  { %11998 = vmatmul.mubr.bf16.vlgmr.msra.gmra.mrb[8].mxu1 %v15338_v39  ;;  %12985 = vmatpush1.bf16.msra.mxu0 %v15219_v35  ;;  %v15264_v35 = vld [vmem:[%s20936_s3 + $0x3f0] ss:$8 sps:$4 sm:$0xff]  }
 0x6aa   :  { %12009 = vmatpush1.bf16.msra.mxu1 %v14625_v22  ;;  %12040 = vmatprep.mubr.bf16.mxu1 %v15340_v27  ;;  %v15225_v27 = vld [vmem:[%s20936_s3 + $0x320] ss:$8 sps:$4 sm:$0xff]   ;;  %v1675_v22 = vsub.s32 6, %v18192_v53 }
 0x6ab   :  { %12010 = vmatprep.subr.bf16.mxu1 %v14634_v34  ;;  %12986 = vmatprep.subr.bf16.mxu0 %v15224_v36  ;;  %v1679_v34 = vsub.s32 7, %v18192_v53 }
 0x6ac   :  { %v1676_v36 = vrot.slane %v20757_v60, %v1675_v22 }
 0x6ad   :  { %12987 = vmatpush1.bf16.msra.mxu0 %v15222_v40  ;;  %v1680_v37 = vrot.slane %v20757_v60, %v1679_v34  ;;  %v12203_v60 = vld [vmem:[%s20937_s4] sm:$0x3] }
 0x6ae   :  { %12011 = vmatpush1.bf16.msra.mxu1 %v14633_v26  ;;  %12988 = vmatprep.subr.bf16.mxu0 %v15227_v41 }
 0x6af   :  { %12012 = vmatprep.subr.bf16.mxu1 %v14642_v42 }
 0x6b1   :  { %12989 = vmatpush1.bf16.msra.mxu0 %v15225_v27 }
 0x6b2   :  { %12013 = vmatpush1.bf16.msra.mxu1 %v14641_v29  ;;  %12990 = vmatprep.subr.bf16.mxu0 %v15230_v31 }
 0x6b3   :  { %12014 = vmatprep.subr.bf16.mxu1 %v14650_v45 }
 0x6b5   :  { %12991 = vmatpush1.bf16.msra.mxu0 %v15228_v47  ;;  %v12208_v47 = vrot.slane %v12203_v60, %v1651_v62 }
 0x6b6   :  { %12015 = vmatpush1.bf16.msra.mxu1 %v14649_v58  ;;  %12992 = vmatprep.subr.bf16.mxu0 %v15233_v20  ;;  %v13028_v58 = vand.u32 127, %v1649_v11  ;;  %v12212_v20 = vrot.slane %v12203_v60, %v1655_v3 }
 0x6b7   :  { %12016 = vmatprep.subr.bf16.mxu1 %v14658_v48 }
 0x6b8   :  { %vm13029_vm0 = vcmp.lt.s32.totalorder %v13028_v58, 6 }
 0x6b9   :  { %12993 = vmatpush1.bf16.msra.mxu0 %v15231_v51 }
 0x6ba   :  { %12017 = vmatpush1.bf16.msra.mxu1 %v14657_v52  ;;  %12994 = vmatprep.subr.bf16.mxu0 %v15236_v54 }
 0x6bb   :  { %12018 = vmatprep.subr.bf16.mxu1 %v14666_v55 }
 0x6bd   :  { %12995 = vmatpush1.bf16.msra.mxu0 %v15234_v61 }
 0x6be   :  { %12019 = vmatpush1.bf16.msra.mxu1 %v14665_v63  ;;  %12996 = vmatprep.subr.bf16.mxu0 %v15239_v0 }
 0x6bf   :  { %12020 = vmatprep.subr.bf16.mxu1 %v14674_v1 }
 0x6c1   :  { %12997 = vmatpush1.bf16.msra.mxu0 %v15237_v5 }
 0x6c2   :  { %12021 = vmatpush1.bf16.msra.mxu1 %v14673_v6  ;;  %12998 = vmatprep.subr.bf16.mxu0 %v15242_v33 }
 0x6c3   :  { %12022 = vmatprep.subr.bf16.mxu1 %v14682_v7 }
 0x6c5   :  { %12999 = vmatpush1.bf16.msra.mxu0 %v15240_v8 }
 0x6c6   :  { %12023 = vmatpush1.bf16.msra.mxu1 %v14681_v9  ;;  %13000 = vmatprep.subr.bf16.mxu0 %v15245_v10 }
 0x6c9   :  { %12041 = vmatmul.mubr.bf16.vlgmr.msra.gmra.mrb[8].mxu1 %v15339_v14  ;;  %13001 = vmatpush1.bf16.msra.mxu0 %v15243_v12 }
 0x6ca   :  { %13002 = vmatprep.subr.bf16.mxu0 %v15248_v13 }
 0x6cd   :  { %13003 = vmatpush1.bf16.msra.mxu0 %v15246_v15 }
 0x6ce   :  { %13004 = vmatprep.subr.bf16.mxu0 %v15251_v16 }
 0x6d1   :  { %13005 = vmatpush1.bf16.msra.mxu0 %v15249_v17 }
 0x6d2   :  { %13006 = vmatprep.subr.bf16.mxu0 %v15254_v18 }
 0x6d5   :  { %13007 = vmatpush1.bf16.msra.mxu0 %v15252_v19 }
 0x6d6   :  { %13008 = vmatprep.subr.bf16.mxu0 %v15257_v23 }
 0x6d9   :  { %13009 = vmatpush1.bf16.msra.mxu0 %v15255_v24 }
 0x6da   :  { %13010 = vmatprep.subr.bf16.mxu0 %v15260_v25 }
 0x6dd   :  { %13011 = vmatpush1.bf16.msra.mxu0 %v15258_v28 }
 0x6de   :  { %13012 = vmatprep.subr.bf16.mxu0 %v15263_v30 }
 0x6e1   :  { %13013 = vmatpush1.bf16.msra.mxu0 %v15261_v21 }
 0x6e2   :  { %13014 = vmatprep.subr.bf16.mxu0 %v15266_v32 }
 0x6e5   :  { %13015 = vmatpush1.bf16.msra.mxu0 %v15264_v35 }
 0x79c   :  { %v12042_v38 = vpop.f32.mrb[8].mxu1 }
 0x79d   :  { %v14827_v39 = vadd.f32 %v12042_v38, %v1676_v36  ;;  %v12044_v40 = vpop.f32.mrb[9].mxu1 }
 0x79e   :  { %v14828_v26 = vadd.f32 %v12044_v40, %v1680_v37  ;;  %v12046_v41 = vpop.f32.mrb[10].mxu1 }
 0x79f   :  { %v14829_v42 = vadd.f32 %v12046_v41, %v1676_v36  ;;  %v12048_v43 = vpop.f32.mrb[11].mxu1  ;;  %v12057_v27 = vmax.f32 %v14827_v39, 0.0 }
 0x7a0   :  { %v14830_v44 = vadd.f32 %v12048_v43, %v1680_v37  ;;  %v12058_v31 = vmax.f32 %v14828_v26, 0.0 }
 0x7a1   :  { %v12065_v29 = vmax.f32 %v14829_v42, 0.0 }
 0x7a2   :  { %v12066_v45 = vmax.f32 %v14830_v44, 0.0 }
 0x7a3   :  { %v12073_v57 = vpack.c.bf16 %v12065_v29, %v12057_v27 }
 0x7a4   :  { %v12074_v46 = vpack.c.bf16 %v12066_v45, %v12058_v31 }
 0x7a6   :  { %13016 = vmatprep.mubr.bf16.mxu0 %v12074_v46 }
 0x7a7   :  { %13017 = vmatmul.mubr.bf16.vlgmr.msra.gmra.mrb[8].mxu0 %v12073_v57 }
 0x87a   :  { %v13018_v48 = vpop.f32.mrb[8].mxu0 }
 0x87b   :  { %v14831_v49 = vadd.f32 %v13018_v48, %v12208_v47  ;;  %v13020_v50 = vpop.f32.mrb[9].mxu0 }
 0x87c   :  { %v14832_v51 = vadd.f32 %v13020_v50, %v12212_v20  ;;  %v13022_v52 = vpop.f32.mrb[10].mxu0 }
 0x87d   :  { %v13024_v54 = vpop.f32.mrb[11].mxu0  ;;  %13038 = vperm.xlu1 %15036, %v14831_v49   ;;  %v14833_v59 = vadd.f32 %v13022_v52, %v12208_v47 }
 0x87e   :  { %v14834_v55 = vadd.f32 %v13024_v54, %v12212_v20  ;;  %v13030_v56 = vsel %vm13029_vm0, %v14832_v51, 0.0 }
 0x87f   :  { %13032 = vadd.xlane.f32.xlu0 %v13030_v56 }
 0x880   :  { %v13031_v61 = vsel %vm13029_vm0, %v14834_v55, 0.0 }
 0x881   :  { %13043 = vperm.xlu1 %15036, %v14833_v59  }
 0x883   :  { %13034 = vadd.xlane.f32.xlu0 %v13031_v61 }
 0x8fc   :  { %v13039_v62 = vpop.permute.xlu1 %13038 }
 0x8fd   :  { %v13046_v63 = vadd.f32 %v14832_v51, %v13039_v62 }
 0x900   :  { %v13044_v3 = vpop.permute.xlu1 %13043 }
 0x901   :  { %v13047_v2 = vadd.f32 %v14834_v55, %v13044_v3 }
 0x90c   :  { %v13033_v11 = vpop.xlane.xlu0 %13032 }
 0x90d   :  { %v13048_v53 = vmul.f32 0.16666667, %v13033_v11 }
 0x90f   :  { %v13050_v0 = vsub.f32 %v13046_v63, %v13048_v53 }
 0x910   :  { %v13035_v1 = vpop.xlane.xlu0 %13034 }
 0x911   :  { %13052 = vst [vmem:[%s20938_s5] sm:$0xff] %v13050_v0  ;;  %v13049_v4 = vmul.f32 0.16666667, %v13035_v1 }
 0x913   :  { %v13051_v5 = vsub.f32 %v13047_v2, %v13049_v4 }
 0x915   :  { %13053 = vst [vmem:[%s20938_s5 + $0x8] sm:$0xff] %v13051_v5 }

</bundles_post_ra>
